<compile_context>
chip_gen: v7x
topology: tpu7x:2x2x1
jax: 0.10.0
libtpu: 0.0.40
codegen_flags: <defaults>
</compile_context>

<pallas_src>
import jax
import jax.numpy as jnp
from jax.experimental import pallas as pl
from jax.experimental.pallas import tpu as pltpu

# ----------------------- small shapes consistent with the module -----------------------
B = 2
C_IN = 3
H0, W0 = 24, 24                    # small stand-in for the module's implied ~(200,296) input
C1, C2, C3 = 16, 32, 64
H1, W1 = H0 // 2, W0 // 2
H2, W2 = H1 // 2, W1 // 2
H3, W3 = H2 // 2, W2 // 2
P = H3 * W3                        # pooled spatial positions feeding fc1
FC1, FC2 = 128, 8
CHUNK = 128                        # conv row chunk (keeps live vregs small)

# flattened / padded row counts per conv stage (row index r = h*(W+2) + w)
WPA, RA, LA = W0 + 2, (H0 + 2) * (W0 + 2), H0 * (W0 + 2) - 2
WPB, RB, LB = W1 + 2, (H1 + 2) * (W1 + 2), H1 * (W1 + 2) - 2
WPC, RC, LC = W2 + 2, (H2 + 2) * (W2 + 2), H2 * (W2 + 2) - 2


# ------------------------------- in-kernel helpers -------------------------------
def _conv_relu(read, w_ref, b_ref, out_ref, H, W, Cout):
    """3x3 same-pad conv + bias + ReLU on a zero-padded row-flattened input.

    read(start, n) -> (n, Cin) f32 rows of the padded (H+2, W+2) image (flattened,
    row index r = h*(W+2) + w).  Writes output rows j = a*(W+2) + b for a in [0,H);
    columns b >= W are wrap-around garbage that is never read downstream.
    """
    Wp = W + 2
    L = H * Wp - 2
    # Hoisted: tap weights / bias read from VMEM once per stage (not per chunk).
    w_all = w_ref[...]                            # (9, Cin, Cout) bf16
    taps = [w_all[t] for t in range(9)]
    bias = b_ref[...]                             # (1, Cout) f32
    for j0 in range(0, L, CHUNK):                 # fully unrolled: <=5 chunks at this size
        n = min(CHUNK, L - j0)
        # Two independent partial accumulators break the serial pop->add chain;
        # more would spill ((n, Cout) f32 partials cost up to 16 vregs each).
        acc0 = jnp.zeros((n, Cout), jnp.float32)
        acc1 = jnp.zeros((n, Cout), jnp.float32)
        for t in range(9):
            ky, kx = divmod(t, 3)
            xin = read(j0 + ky * Wp + kx, n).astype(jnp.bfloat16)    # bf16 MXU lhs
            part = jnp.dot(xin, taps[t], preferred_element_type=jnp.float32)
            if t % 2 == 0:
                acc0 = acc0 + part
            else:
                acc1 = acc1 + part
        out_ref[pl.ds(j0, n), :] = jnp.maximum(acc0 + acc1 + bias, 0.0)


def _maxpool2(out_ref, dst_ref, H, W, dst_padded):
    """2x2 stride-2 max-pool of a conv-output scratch (rows j = a*(W+2)+b).

    Kept as sublane-strided ref reads (known-good lowering); the pool phase is
    not the binding slot after the conv-stage changes above.
    dst_padded=True : write into the next stage's zero-padded flattened input.
    dst_padded=False: write a dense (H/2*W/2, C) feature buffer (HWC order).
    """
    Wp = W + 2
    Ho, Wo = H // 2, W // 2
    for hp in range(Ho):
        r0 = (2 * hp) * Wp
        r1 = (2 * hp + 1) * Wp
        e00 = out_ref[pl.ds(r0, Wo, 2), :]
        e01 = out_ref[pl.ds(r0 + 1, Wo, 2), :]
        e10 = out_ref[pl.ds(r1, Wo, 2), :]
        e11 = out_ref[pl.ds(r1 + 1, Wo, 2), :]
        pooled = jnp.maximum(jnp.maximum(e00, e01), jnp.maximum(e10, e11))
        if dst_padded:
            dst_ref[pl.ds((hp + 1) * (Wo + 2) + 1, Wo), :] = pooled
        else:
            dst_ref[pl.ds(hp * Wo, Wo), :] = pooled


def _scnn_kernel(x_ref, w1_ref, b1_ref, w2_ref, b2_ref, w3_ref, b3_ref,
                 wg_ref, bg_ref, w4_ref, b4_ref, w5_ref, b5_ref, w6_ref, b6_ref,
                 o_ref,
                 out1, in2, out2, in3, out3, feat):
    # ---- conv1 + ReLU + pool ----
    _conv_relu(lambda s, n: x_ref[pl.ds(s, n), :], w1_ref, b1_ref, out1, H0, W0, C1)
    # NOTE: the full zero-fill runs every grid step on purpose.  Guarding it with
    # pl.when(program_id==0) would be wrong under megacore sharding (each core has
    # its own scratch and only one core runs step 0); border-only zeroing saves
    # <10 masked stores per step at this size, so the simple form is kept.
    in2[...] = jnp.zeros((RB, C1), jnp.float32)
    _maxpool2(out1, in2, H0, W0, dst_padded=True)
    # ---- conv2 + ReLU + pool ----
    _conv_relu(lambda s, n: in2[pl.ds(s, n), :], w2_ref, b2_ref, out2, H1, W1, C2)
    in3[...] = jnp.zeros((RC, C2), jnp.float32)
    _maxpool2(out2, in3, H1, W1, dst_padded=True)
    # ---- conv3 + ReLU + pool ----
    _conv_relu(lambda s, n: in3[pl.ds(s, n), :], w3_ref, b3_ref, out3, H2, W2, C3)
    _maxpool2(out3, feat, H2, W2, dst_padded=False)

    # ---- SomnialUnit (eval mode: x_s == x_t) ----
    f = feat[...]                                                      # (P, C3) f32
    xs_hat = jnp.dot(f.astype(jnp.bfloat16), wg_ref[...],
                     preferred_element_type=jnp.float32) + bg_ref[...]
    qn = f / jnp.maximum(jnp.sqrt(jnp.sum(f * f, axis=1, keepdims=True)), 1e-12)
    kn = xs_hat / jnp.maximum(
        jnp.sqrt(jnp.sum(xs_hat * xs_hat, axis=1, keepdims=True)), 1e-12)
    m = jax.nn.sigmoid(jnp.sum(qn * kn, axis=1, keepdims=True))        # (P, 1)
    su = m * xs_hat + (1.0 - m) * f                                    # (P, C3) f32

    # ---- head: flatten (implicit) -> fc1+ReLU -> fc2+ReLU -> fc3+sigmoid ----
    # fc1 contracts over (spatial, channel); w4 is stored as (P, C3, FC1) so no
    # in-kernel flatten/relayout is needed.  Each w4[p] slab is read exactly once;
    # two partial accumulators break the serial accumulation chain.
    h1a = jnp.zeros((1, FC1), jnp.float32)
    h1b = jnp.zeros((1, FC1), jnp.float32)
    for s in range(P):
        part = jnp.dot(su[s:s + 1, :].astype(jnp.bfloat16), w4_ref[s],
                       preferred_element_type=jnp.float32)
        if s % 2 == 0:
            h1a = h1a + part
        else:
            h1b = h1b + part
    h1 = jnp.maximum(h1a + h1b + b4_ref[...], 0.0)                     # (1, FC1)
    h2 = jnp.maximum(jnp.dot(h1.astype(jnp.bfloat16), w5_ref[...],
                             preferred_element_type=jnp.float32) + b5_ref[...], 0.0)
    logit = jnp.sum(h2 * w6_ref[...], axis=1, keepdims=True) + b6_ref[...]   # (1, 1)
    # layout-compliant (8, 128) output block; wrapper takes [0, 0]
    o_ref[...] = jnp.broadcast_to(jax.nn.sigmoid(logit), (8, 128))


# ------------------------------- wrapper -------------------------------
def _full_spec(*shape):
    return pl.BlockSpec(shape, lambda i, _n=len(shape): (0,) * _n)


def scnn_forward(x, params):
    bsz = x.shape[0]
    # NCHW -> zero-padded, row-flattened NHWC: (B, (H0+2)*(W0+2), C_IN)
    # TODO(synk): at the real input size, pass NHWC lane-packed and pad in-kernel.
    xh = jnp.transpose(x, (0, 2, 3, 1))
    xh = jnp.pad(xh, ((0, 0), (1, 1), (1, 1), (0, 0)))
    xpf = xh.reshape(bsz, RA, C_IN)

    out = pl.pallas_call(
        _scnn_kernel,
        out_shape=jax.ShapeDtypeStruct((bsz, 8, 128), jnp.float32),
        grid=(bsz,),
        in_specs=[
            pl.BlockSpec((None, RA, C_IN), lambda i: (i, 0, 0)),
            _full_spec(9, C_IN, C1), _full_spec(1, C1),
            _full_spec(9, C1, C2), _full_spec(1, C2),
            _full_spec(9, C2, C3), _full_spec(1, C3),
            _full_spec(C3, C3), _full_spec(1, C3),
            _full_spec(P, C3, FC1), _full_spec(1, FC1),
            _full_spec(FC1, FC2), _full_spec(1, FC2),
            _full_spec(1, FC2), _full_spec(1, 1),
        ],
        out_specs=pl.BlockSpec((None, 8, 128), lambda i: (i, 0, 0)),
        scratch_shapes=[
            pltpu.VMEM((LA, C1), jnp.float32),   # conv1 output
            pltpu.VMEM((RB, C1), jnp.float32),   # padded pooled input of conv2
            pltpu.VMEM((LB, C2), jnp.float32),   # conv2 output
            pltpu.VMEM((RC, C2), jnp.float32),   # padded pooled input of conv3
            pltpu.VMEM((LC, C3), jnp.float32),   # conv3 output
            pltpu.VMEM((P, C3), jnp.float32),    # final pooled feature (HWC)
        ],
        compiler_params=pltpu.CompilerParams(dimension_semantics=("parallel",)),
    )(xpf, params["w1"], params["b1"], params["w2"], params["b2"],
      params["w3"], params["b3"], params["wg"], params["bg"],
      params["w4"], params["b4"], params["w5"], params["b5"],
      params["w6"], params["b6"])
    return out[:, 0, :1]


def init_params(key):
    ks = jax.random.split(key, 14)
    nrm = lambda k, shape, s: jax.random.normal(k, shape, jnp.float32) * s
    bf = lambda a: a.astype(jnp.bfloat16)     # matmul weights stored in MXU-ready bf16
    return dict(
        # conv weights stored as (kh*kw, Cin, Cout)  (torch (Cout,Cin,kh,kw) permuted)
        w1=bf(nrm(ks[0], (9, C_IN, C1), 0.15)), b1=nrm(ks[7], (1, C1), 0.05),
        w2=bf(nrm(ks[1], (9, C1, C2), 0.08)),   b2=nrm(ks[8], (1, C2), 0.05),
        w3=bf(nrm(ks[2], (9, C2, C3), 0.06)),   b3=nrm(ks[9], (1, C3), 0.05),
        # SomnialUnit generator (1x1 conv): (Cin, Cout)
        wg=bf(nrm(ks[3], (C3, C3), 0.10)),      bg=nrm(ks[10], (1, C3), 0.05),
        # fc1 weight as (P, C3, FC1): torch fc1.weight with its input features
        # reordered CHW -> HWC and transposed (stored pre-laid-out for the kernel).
        w4=bf(nrm(ks[4], (P, C3, FC1), 0.05)),  b4=nrm(ks[11], (1, FC1), 0.05),
        w5=bf(nrm(ks[5], (FC1, FC2), 0.10)),    b5=nrm(ks[12], (1, FC2), 0.05),
        w6=nrm(ks[6], (1, FC2), 0.30),          b6=nrm(ks[13], (1, 1), 0.05),
    )


# ---------------------- pure-JAX reference (correctness check) ----------------------
def reference_forward(x, params):
    hp = jax.lax.Precision.HIGHEST
    f32 = lambda a: a.astype(jnp.float32)
    h = jnp.transpose(x, (0, 2, 3, 1))                                  # NHWC
    for w, b in ((params["w1"], params["b1"]),
                 (params["w2"], params["b2"]),
                 (params["w3"], params["b3"])):
        k = f32(w).reshape(3, 3, w.shape[1], w.shape[2])                # HWIO
        h = jax.lax.conv_general_dilated(
            h, k, (1, 1), ((1, 1), (1, 1)),
            dimension_numbers=("NHWC", "HWIO", "NHWC"), precision=hp)
        h = jnp.maximum(h + b[0], 0.0)
        h = jax.lax.reduce_window(h, -jnp.inf, jax.lax.max,
                                  (1, 2, 2, 1), (1, 2, 2, 1), "VALID")
    xs_hat = jnp.tensordot(h, f32(params["wg"]), axes=[[3], [0]],
                           precision=hp) + params["bg"][0]
    qn = h / jnp.maximum(jnp.sqrt(jnp.sum(h * h, axis=3, keepdims=True)), 1e-12)
    kn = xs_hat / jnp.maximum(jnp.sqrt(jnp.sum(xs_hat * xs_hat, axis=3, keepdims=True)), 1e-12)
    m = jax.nn.sigmoid(jnp.sum(qn * kn, axis=3, keepdims=True))
    su = m * xs_hat + (1.0 - m) * h                                     # (B, H3, W3, C3)
    f = su.reshape(x.shape[0], P, C3)
    h1 = jnp.maximum(jnp.einsum("bpc,pcf->bf", f, f32(params["w4"]), precision=hp)
                     + params["b4"], 0.0)
    h2 = jnp.maximum(jnp.dot(h1, f32(params["w5"]), precision=hp) + params["b5"], 0.0)
    logit = jnp.sum(h2 * params["w6"], axis=1, keepdims=True) + params["b6"]
    return jax.nn.sigmoid(logit)


if __name__ == "__main__":
    key = jax.random.PRNGKey(0)
    kx, kp = jax.random.split(key)
    x = jax.random.normal(kx, (B, C_IN, H0, W0), dtype=jnp.float32)
    params = init_params(kp)

    fwd = jax.jit(scnn_forward)
    out = jax.block_until_ready(fwd(x, params))

    assert out.shape == (B, 1), out.shape
    assert bool(jnp.all(jnp.isfinite(out)))
    assert bool(jnp.all((out >= 0.0) & (out <= 1.0)))                   # sigmoid output

    ref = reference_forward(x, params)
    assert bool(jnp.allclose(out, ref, atol=1e-2, rtol=0.0)), (out, ref)

    print("KERNEL_OK")
</pallas_src>

<mosaic_0001>
module attributes {stable_mosaic.version = 11 : i64} {
  func.func @_scnn_kernel(%arg0: i32, %arg1: memref<1x676x3xf32, #tpu.memory_space<vmem>>, %arg2: memref<9x3x16xbf16, #tpu.memory_space<vmem>>, %arg3: memref<1x16xf32, #tpu.memory_space<vmem>>, %arg4: memref<9x16x32xbf16, #tpu.memory_space<vmem>>, %arg5: memref<1x32xf32, #tpu.memory_space<vmem>>, %arg6: memref<9x32x64xbf16, #tpu.memory_space<vmem>>, %arg7: memref<1x64xf32, #tpu.memory_space<vmem>>, %arg8: memref<64x64xbf16, #tpu.memory_space<vmem>>, %arg9: memref<1x64xf32, #tpu.memory_space<vmem>>, %arg10: memref<9x64x128xbf16, #tpu.memory_space<vmem>>, %arg11: memref<1x128xf32, #tpu.memory_space<vmem>>, %arg12: memref<128x8xbf16, #tpu.memory_space<vmem>>, %arg13: memref<1x8xf32, #tpu.memory_space<vmem>>, %arg14: memref<1x8xf32, #tpu.memory_space<vmem>>, %arg15: memref<1x1xf32, #tpu.memory_space<vmem>>, %arg16: memref<1x8x128xf32, #tpu.memory_space<vmem>>, %arg17: memref<622x16xf32, #tpu.memory_space<vmem>>, %arg18: memref<196x16xf32, #tpu.memory_space<vmem>>, %arg19: memref<166x32xf32, #tpu.memory_space<vmem>>, %arg20: memref<64x32xf32, #tpu.memory_space<vmem>>, %arg21: memref<46x64xf32, #tpu.memory_space<vmem>>, %arg22: memref<9x64xf32, #tpu.memory_space<vmem>>) attributes {dimension_semantics = [#tpu.dimension_semantics<parallel>], iteration_bounds = array<i64: 2>, scalar_prefetch = 0 : i64, scratch_operands = 6 : i64, tpu.core_type = #tpu.core_type<tc>, window_params = [{transform_indices = @transform_0, window_bounds = array<i64: 1, 676, 3>}, {pipeline_mode = #tpu.pipeline_mode<synchronous>, transform_indices = @transform_1, window_bounds = array<i64: 9, 3, 16>}, {pipeline_mode = #tpu.pipeline_mode<synchronous>, transform_indices = @transform_2, window_bounds = array<i64: 1, 16>}, {pipeline_mode = #tpu.pipeline_mode<synchronous>, transform_indices = @transform_3, window_bounds = array<i64: 9, 16, 32>}, {pipeline_mode = #tpu.pipeline_mode<synchronous>, transform_indices = @transform_4, window_bounds = array<i64: 1, 32>}, {pipeline_mode = #tpu.pipeline_mode<synchronous>, transform_indices = @transform_5, window_bounds = array<i64: 9, 32, 64>}, {pipeline_mode = #tpu.pipeline_mode<synchronous>, transform_indices = @transform_6, window_bounds = array<i64: 1, 64>}, {pipeline_mode = #tpu.pipeline_mode<synchronous>, transform_indices = @transform_7, window_bounds = array<i64: 64, 64>}, {pipeline_mode = #tpu.pipeline_mode<synchronous>, transform_indices = @transform_8, window_bounds = array<i64: 1, 64>}, {pipeline_mode = #tpu.pipeline_mode<synchronous>, transform_indices = @transform_9, window_bounds = array<i64: 9, 64, 128>}, {pipeline_mode = #tpu.pipeline_mode<synchronous>, transform_indices = @transform_10, window_bounds = array<i64: 1, 128>}, {pipeline_mode = #tpu.pipeline_mode<synchronous>, transform_indices = @transform_11, window_bounds = array<i64: 128, 8>}, {pipeline_mode = #tpu.pipeline_mode<synchronous>, transform_indices = @transform_12, window_bounds = array<i64: 1, 8>}, {pipeline_mode = #tpu.pipeline_mode<synchronous>, transform_indices = @transform_13, window_bounds = array<i64: 1, 8>}, {pipeline_mode = #tpu.pipeline_mode<synchronous>, transform_indices = @transform_14, window_bounds = array<i64: 1, 1>}, {transform_indices = @transform_15, window_bounds = array<i64: 1, 8, 128>}]} {
    %c0 = arith.constant 0 : index
    %c0_0 = arith.constant 0 : index
    %c0_1 = arith.constant 0 : index
    %0 = vector.load %arg2[%c0, %c0_0, %c0_1] : memref<9x3x16xbf16, #tpu.memory_space<vmem>>, vector<9x3x16xbf16>
    %1 = vector.extract_strided_slice %0 {offsets = [0, 0, 0], sizes = [1, 3, 16], strides = [1, 1, 1]} : vector<9x3x16xbf16> to vector<1x3x16xbf16>
    %2 = vector.shape_cast %1 : vector<1x3x16xbf16> to vector<3x16xbf16>
    %3 = vector.extract_strided_slice %0 {offsets = [1, 0, 0], sizes = [1, 3, 16], strides = [1, 1, 1]} : vector<9x3x16xbf16> to vector<1x3x16xbf16>
    %4 = vector.shape_cast %3 : vector<1x3x16xbf16> to vector<3x16xbf16>
    %5 = vector.extract_strided_slice %0 {offsets = [2, 0, 0], sizes = [1, 3, 16], strides = [1, 1, 1]} : vector<9x3x16xbf16> to vector<1x3x16xbf16>
    %6 = vector.shape_cast %5 : vector<1x3x16xbf16> to vector<3x16xbf16>
    %7 = vector.extract_strided_slice %0 {offsets = [3, 0, 0], sizes = [1, 3, 16], strides = [1, 1, 1]} : vector<9x3x16xbf16> to vector<1x3x16xbf16>
    %8 = vector.shape_cast %7 : vector<1x3x16xbf16> to vector<3x16xbf16>
    %9 = vector.extract_strided_slice %0 {offsets = [4, 0, 0], sizes = [1, 3, 16], strides = [1, 1, 1]} : vector<9x3x16xbf16> to vector<1x3x16xbf16>
    %10 = vector.shape_cast %9 : vector<1x3x16xbf16> to vector<3x16xbf16>
    %11 = vector.extract_strided_slice %0 {offsets = [5, 0, 0], sizes = [1, 3, 16], strides = [1, 1, 1]} : vector<9x3x16xbf16> to vector<1x3x16xbf16>
    %12 = vector.shape_cast %11 : vector<1x3x16xbf16> to vector<3x16xbf16>
    %13 = vector.extract_strided_slice %0 {offsets = [6, 0, 0], sizes = [1, 3, 16], strides = [1, 1, 1]} : vector<9x3x16xbf16> to vector<1x3x16xbf16>
    %14 = vector.shape_cast %13 : vector<1x3x16xbf16> to vector<3x16xbf16>
    %15 = vector.extract_strided_slice %0 {offsets = [7, 0, 0], sizes = [1, 3, 16], strides = [1, 1, 1]} : vector<9x3x16xbf16> to vector<1x3x16xbf16>
    %16 = vector.shape_cast %15 : vector<1x3x16xbf16> to vector<3x16xbf16>
    %17 = vector.extract_strided_slice %0 {offsets = [8, 0, 0], sizes = [1, 3, 16], strides = [1, 1, 1]} : vector<9x3x16xbf16> to vector<1x3x16xbf16>
    %18 = vector.shape_cast %17 : vector<1x3x16xbf16> to vector<3x16xbf16>
    %c0_2 = arith.constant 0 : index
    %c0_3 = arith.constant 0 : index
    %19 = vector.load %arg3[%c0_2, %c0_3] : memref<1x16xf32, #tpu.memory_space<vmem>>, vector<1x16xf32>
    %cst = arith.constant 0.000000e+00 : f32
    %20 = vector.broadcast %cst : f32 to vector<128x16xf32>
    %cst_4 = arith.constant 0.000000e+00 : f32
    %21 = vector.broadcast %cst_4 : f32 to vector<128x16xf32>
    %c0_5 = arith.constant 0 : index
    %c0_6 = arith.constant 0 : index
    %c0_7 = arith.constant 0 : index
    %22 = vector.load %arg1[%c0_5, %c0_6, %c0_7] : memref<1x676x3xf32, #tpu.memory_space<vmem>>, vector<1x128x3xf32>
    %23 = vector.shape_cast %22 : vector<1x128x3xf32> to vector<128x3xf32>
    %24 = arith.truncf %23 : vector<128x3xf32> to vector<128x3xbf16>
    %cst_8 = arith.constant dense<0.000000e+00> : vector<128x16xf32>
    %25 = tpu.matmul %24, %2, %cst_8 {dimension_numbers = #tpu.dot_dimension_numbers<[1], [0], [0], [1], [0, 0, 1, 1], [], []>} : vector<128x3xbf16>, vector<3x16xbf16>, vector<128x16xf32> -> vector<128x16xf32>
    %26 = arith.addf %20, %25 : vector<128x16xf32>
    %c0_9 = arith.constant 0 : index
    %c1 = arith.constant 1 : index
    %c0_10 = arith.constant 0 : index
    %27 = vector.load %arg1[%c0_9, %c1, %c0_10] : memref<1x676x3xf32, #tpu.memory_space<vmem>>, vector<1x128x3xf32>
    %28 = vector.shape_cast %27 : vector<1x128x3xf32> to vector<128x3xf32>
    %29 = arith.truncf %28 : vector<128x3xf32> to vector<128x3xbf16>
    %cst_11 = arith.constant dense<0.000000e+00> : vector<128x16xf32>
    %30 = tpu.matmul %29, %4, %cst_11 {dimension_numbers = #tpu.dot_dimension_numbers<[1], [0], [0], [1], [0, 0, 1, 1], [], []>} : vector<128x3xbf16>, vector<3x16xbf16>, vector<128x16xf32> -> vector<128x16xf32>
    %31 = arith.addf %21, %30 : vector<128x16xf32>
    %c0_12 = arith.constant 0 : index
    %c2 = arith.constant 2 : index
    %c0_13 = arith.constant 0 : index
    %32 = vector.load %arg1[%c0_12, %c2, %c0_13] : memref<1x676x3xf32, #tpu.memory_space<vmem>>, vector<1x128x3xf32>
    %33 = vector.shape_cast %32 : vector<1x128x3xf32> to vector<128x3xf32>
    %34 = arith.truncf %33 : vector<128x3xf32> to vector<128x3xbf16>
    %cst_14 = arith.constant dense<0.000000e+00> : vector<128x16xf32>
    %35 = tpu.matmul %34, %6, %cst_14 {dimension_numbers = #tpu.dot_dimension_numbers<[1], [0], [0], [1], [0, 0, 1, 1], [], []>} : vector<128x3xbf16>, vector<3x16xbf16>, vector<128x16xf32> -> vector<128x16xf32>
    %36 = arith.addf %26, %35 : vector<128x16xf32>
    %c0_15 = arith.constant 0 : index
    %c26 = arith.constant 26 : index
    %c0_16 = arith.constant 0 : index
    %37 = vector.load %arg1[%c0_15, %c26, %c0_16] : memref<1x676x3xf32, #tpu.memory_space<vmem>>, vector<1x128x3xf32>
    %38 = vector.shape_cast %37 : vector<1x128x3xf32> to vector<128x3xf32>
    %39 = arith.truncf %38 : vector<128x3xf32> to vector<128x3xbf16>
    %cst_17 = arith.constant dense<0.000000e+00> : vector<128x16xf32>
    %40 = tpu.matmul %39, %8, %cst_17 {dimension_numbers = #tpu.dot_dimension_numbers<[1], [0], [0], [1], [0, 0, 1, 1], [], []>} : vector<128x3xbf16>, vector<3x16xbf16>, vector<128x16xf32> -> vector<128x16xf32>
    %41 = arith.addf %31, %40 : vector<128x16xf32>
    %c0_18 = arith.constant 0 : index
    %c27 = arith.constant 27 : index
    %c0_19 = arith.constant 0 : index
    %42 = vector.load %arg1[%c0_18, %c27, %c0_19] : memref<1x676x3xf32, #tpu.memory_space<vmem>>, vector<1x128x3xf32>
    %43 = vector.shape_cast %42 : vector<1x128x3xf32> to vector<128x3xf32>
    %44 = arith.truncf %43 : vector<128x3xf32> to vector<128x3xbf16>
    %cst_20 = arith.constant dense<0.000000e+00> : vector<128x16xf32>
    %45 = tpu.matmul %44, %10, %cst_20 {dimension_numbers = #tpu.dot_dimension_numbers<[1], [0], [0], [1], [0, 0, 1, 1], [], []>} : vector<128x3xbf16>, vector<3x16xbf16>, vector<128x16xf32> -> vector<128x16xf32>
    %46 = arith.addf %36, %45 : vector<128x16xf32>
    %c0_21 = arith.constant 0 : index
    %c28 = arith.constant 28 : index
    %c0_22 = arith.constant 0 : index
    %47 = vector.load %arg1[%c0_21, %c28, %c0_22] : memref<1x676x3xf32, #tpu.memory_space<vmem>>, vector<1x128x3xf32>
    %48 = vector.shape_cast %47 : vector<1x128x3xf32> to vector<128x3xf32>
    %49 = arith.truncf %48 : vector<128x3xf32> to vector<128x3xbf16>
    %cst_23 = arith.constant dense<0.000000e+00> : vector<128x16xf32>
    %50 = tpu.matmul %49, %12, %cst_23 {dimension_numbers = #tpu.dot_dimension_numbers<[1], [0], [0], [1], [0, 0, 1, 1], [], []>} : vector<128x3xbf16>, vector<3x16xbf16>, vector<128x16xf32> -> vector<128x16xf32>
    %51 = arith.addf %41, %50 : vector<128x16xf32>
    %c0_24 = arith.constant 0 : index
    %c52 = arith.constant 52 : index
    %c0_25 = arith.constant 0 : index
    %52 = vector.load %arg1[%c0_24, %c52, %c0_25] : memref<1x676x3xf32, #tpu.memory_space<vmem>>, vector<1x128x3xf32>
    %53 = vector.shape_cast %52 : vector<1x128x3xf32> to vector<128x3xf32>
    %54 = arith.truncf %53 : vector<128x3xf32> to vector<128x3xbf16>
    %cst_26 = arith.constant dense<0.000000e+00> : vector<128x16xf32>
    %55 = tpu.matmul %54, %14, %cst_26 {dimension_numbers = #tpu.dot_dimension_numbers<[1], [0], [0], [1], [0, 0, 1, 1], [], []>} : vector<128x3xbf16>, vector<3x16xbf16>, vector<128x16xf32> -> vector<128x16xf32>
    %56 = arith.addf %46, %55 : vector<128x16xf32>
    %c0_27 = arith.constant 0 : index
    %c53 = arith.constant 53 : index
    %c0_28 = arith.constant 0 : index
    %57 = vector.load %arg1[%c0_27, %c53, %c0_28] : memref<1x676x3xf32, #tpu.memory_space<vmem>>, vector<1x128x3xf32>
    %58 = vector.shape_cast %57 : vector<1x128x3xf32> to vector<128x3xf32>
    %59 = arith.truncf %58 : vector<128x3xf32> to vector<128x3xbf16>
    %cst_29 = arith.constant dense<0.000000e+00> : vector<128x16xf32>
    %60 = tpu.matmul %59, %16, %cst_29 {dimension_numbers = #tpu.dot_dimension_numbers<[1], [0], [0], [1], [0, 0, 1, 1], [], []>} : vector<128x3xbf16>, vector<3x16xbf16>, vector<128x16xf32> -> vector<128x16xf32>
    %61 = arith.addf %51, %60 : vector<128x16xf32>
    %c0_30 = arith.constant 0 : index
    %c54 = arith.constant 54 : index
    %c0_31 = arith.constant 0 : index
    %62 = vector.load %arg1[%c0_30, %c54, %c0_31] : memref<1x676x3xf32, #tpu.memory_space<vmem>>, vector<1x128x3xf32>
    %63 = vector.shape_cast %62 : vector<1x128x3xf32> to vector<128x3xf32>
    %64 = arith.truncf %63 : vector<128x3xf32> to vector<128x3xbf16>
    %cst_32 = arith.constant dense<0.000000e+00> : vector<128x16xf32>
    %65 = tpu.matmul %64, %18, %cst_32 {dimension_numbers = #tpu.dot_dimension_numbers<[1], [0], [0], [1], [0, 0, 1, 1], [], []>} : vector<128x3xbf16>, vector<3x16xbf16>, vector<128x16xf32> -> vector<128x16xf32>
    %66 = arith.addf %56, %65 : vector<128x16xf32>
    %67 = arith.addf %66, %61 : vector<128x16xf32>
    %68 = vector.broadcast %19 : vector<1x16xf32> to vector<128x16xf32>
    %69 = arith.addf %67, %68 : vector<128x16xf32>
    %cst_33 = arith.constant 0.000000e+00 : f32
    %70 = vector.broadcast %cst_33 : f32 to vector<128x16xf32>
    %71 = arith.maximumf %69, %70 : vector<128x16xf32>
    %c0_34 = arith.constant 0 : index
    %c0_35 = arith.constant 0 : index
    %72 = vector.load %arg17[%c0_34, %c0_35] : memref<622x16xf32, #tpu.memory_space<vmem>>, vector<128x16xf32>
    tpu.vector_store %arg17[%c0_34, %c0_35], %71 {strides = array<i32>} : memref<622x16xf32, #tpu.memory_space<vmem>>, vector<128x16xf32>,
    %cst_36 = arith.constant 0.000000e+00 : f32
    %73 = vector.broadcast %cst_36 : f32 to vector<128x16xf32>
    %cst_37 = arith.constant 0.000000e+00 : f32
    %74 = vector.broadcast %cst_37 : f32 to vector<128x16xf32>
    %c0_38 = arith.constant 0 : index
    %c128 = arith.constant 128 : index
    %c0_39 = arith.constant 0 : index
    %75 = vector.load %arg1[%c0_38, %c128, %c0_39] : memref<1x676x3xf32, #tpu.memory_space<vmem>>, vector<1x128x3xf32>
    %76 = vector.shape_cast %75 : vector<1x128x3xf32> to vector<128x3xf32>
    %77 = arith.truncf %76 : vector<128x3xf32> to vector<128x3xbf16>
    %cst_40 = arith.constant dense<0.000000e+00> : vector<128x16xf32>
    %78 = tpu.matmul %77, %2, %cst_40 {dimension_numbers = #tpu.dot_dimension_numbers<[1], [0], [0], [1], [0, 0, 1, 1], [], []>} : vector<128x3xbf16>, vector<3x16xbf16>, vector<128x16xf32> -> vector<128x16xf32>
    %79 = arith.addf %73, %78 : vector<128x16xf32>
    %c0_41 = arith.constant 0 : index
    %c129 = arith.constant 129 : index
    %c0_42 = arith.constant 0 : index
    %80 = vector.load %arg1[%c0_41, %c129, %c0_42] : memref<1x676x3xf32, #tpu.memory_space<vmem>>, vector<1x128x3xf32>
    %81 = vector.shape_cast %80 : vector<1x128x3xf32> to vector<128x3xf32>
    %82 = arith.truncf %81 : vector<128x3xf32> to vector<128x3xbf16>
    %cst_43 = arith.constant dense<0.000000e+00> : vector<128x16xf32>
    %83 = tpu.matmul %82, %4, %cst_43 {dimension_numbers = #tpu.dot_dimension_numbers<[1], [0], [0], [1], [0, 0, 1, 1], [], []>} : vector<128x3xbf16>, vector<3x16xbf16>, vector<128x16xf32> -> vector<128x16xf32>
    %84 = arith.addf %74, %83 : vector<128x16xf32>
    %c0_44 = arith.constant 0 : index
    %c130 = arith.constant 130 : index
    %c0_45 = arith.constant 0 : index
    %85 = vector.load %arg1[%c0_44, %c130, %c0_45] : memref<1x676x3xf32, #tpu.memory_space<vmem>>, vector<1x128x3xf32>
    %86 = vector.shape_cast %85 : vector<1x128x3xf32> to vector<128x3xf32>
    %87 = arith.truncf %86 : vector<128x3xf32> to vector<128x3xbf16>
    %cst_46 = arith.constant dense<0.000000e+00> : vector<128x16xf32>
    %88 = tpu.matmul %87, %6, %cst_46 {dimension_numbers = #tpu.dot_dimension_numbers<[1], [0], [0], [1], [0, 0, 1, 1], [], []>} : vector<128x3xbf16>, vector<3x16xbf16>, vector<128x16xf32> -> vector<128x16xf32>
    %89 = arith.addf %79, %88 : vector<128x16xf32>
    %c0_47 = arith.constant 0 : index
    %c154 = arith.constant 154 : index
    %c0_48 = arith.constant 0 : index
    %90 = vector.load %arg1[%c0_47, %c154, %c0_48] : memref<1x676x3xf32, #tpu.memory_space<vmem>>, vector<1x128x3xf32>
    %91 = vector.shape_cast %90 : vector<1x128x3xf32> to vector<128x3xf32>
    %92 = arith.truncf %91 : vector<128x3xf32> to vector<128x3xbf16>
    %cst_49 = arith.constant dense<0.000000e+00> : vector<128x16xf32>
    %93 = tpu.matmul %92, %8, %cst_49 {dimension_numbers = #tpu.dot_dimension_numbers<[1], [0], [0], [1], [0, 0, 1, 1], [], []>} : vector<128x3xbf16>, vector<3x16xbf16>, vector<128x16xf32> -> vector<128x16xf32>
    %94 = arith.addf %84, %93 : vector<128x16xf32>
    %c0_50 = arith.constant 0 : index
    %c155 = arith.constant 155 : index
    %c0_51 = arith.constant 0 : index
    %95 = vector.load %arg1[%c0_50, %c155, %c0_51] : memref<1x676x3xf32, #tpu.memory_space<vmem>>, vector<1x128x3xf32>
    %96 = vector.shape_cast %95 : vector<1x128x3xf32> to vector<128x3xf32>
    %97 = arith.truncf %96 : vector<128x3xf32> to vector<128x3xbf16>
    %cst_52 = arith.constant dense<0.000000e+00> : vector<128x16xf32>
    %98 = tpu.matmul %97, %10, %cst_52 {dimension_numbers = #tpu.dot_dimension_numbers<[1], [0], [0], [1], [0, 0, 1, 1], [], []>} : vector<128x3xbf16>, vector<3x16xbf16>, vector<128x16xf32> -> vector<128x16xf32>
    %99 = arith.addf %89, %98 : vector<128x16xf32>
    %c0_53 = arith.constant 0 : index
    %c156 = arith.constant 156 : index
    %c0_54 = arith.constant 0 : index
    %100 = vector.load %arg1[%c0_53, %c156, %c0_54] : memref<1x676x3xf32, #tpu.memory_space<vmem>>, vector<1x128x3xf32>
    %101 = vector.shape_cast %100 : vector<1x128x3xf32> to vector<128x3xf32>
    %102 = arith.truncf %101 : vector<128x3xf32> to vector<128x3xbf16>
    %cst_55 = arith.constant dense<0.000000e+00> : vector<128x16xf32>
    %103 = tpu.matmul %102, %12, %cst_55 {dimension_numbers = #tpu.dot_dimension_numbers<[1], [0], [0], [1], [0, 0, 1, 1], [], []>} : vector<128x3xbf16>, vector<3x16xbf16>, vector<128x16xf32> -> vector<128x16xf32>
    %104 = arith.addf %94, %103 : vector<128x16xf32>
    %c0_56 = arith.constant 0 : index
    %c180 = arith.constant 180 : index
    %c0_57 = arith.constant 0 : index
    %105 = vector.load %arg1[%c0_56, %c180, %c0_57] : memref<1x676x3xf32, #tpu.memory_space<vmem>>, vector<1x128x3xf32>
    %106 = vector.shape_cast %105 : vector<1x128x3xf32> to vector<128x3xf32>
    %107 = arith.truncf %106 : vector<128x3xf32> to vector<128x3xbf16>
    %cst_58 = arith.constant dense<0.000000e+00> : vector<128x16xf32>
    %108 = tpu.matmul %107, %14, %cst_58 {dimension_numbers = #tpu.dot_dimension_numbers<[1], [0], [0], [1], [0, 0, 1, 1], [], []>} : vector<128x3xbf16>, vector<3x16xbf16>, vector<128x16xf32> -> vector<128x16xf32>
    %109 = arith.addf %99, %108 : vector<128x16xf32>
    %c0_59 = arith.constant 0 : index
    %c181 = arith.constant 181 : index
    %c0_60 = arith.constant 0 : index
    %110 = vector.load %arg1[%c0_59, %c181, %c0_60] : memref<1x676x3xf32, #tpu.memory_space<vmem>>, vector<1x128x3xf32>
    %111 = vector.shape_cast %110 : vector<1x128x3xf32> to vector<128x3xf32>
    %112 = arith.truncf %111 : vector<128x3xf32> to vector<128x3xbf16>
    %cst_61 = arith.constant dense<0.000000e+00> : vector<128x16xf32>
    %113 = tpu.matmul %112, %16, %cst_61 {dimension_numbers = #tpu.dot_dimension_numbers<[1], [0], [0], [1], [0, 0, 1, 1], [], []>} : vector<128x3xbf16>, vector<3x16xbf16>, vector<128x16xf32> -> vector<128x16xf32>
    %114 = arith.addf %104, %113 : vector<128x16xf32>
    %c0_62 = arith.constant 0 : index
    %c182 = arith.constant 182 : index
    %c0_63 = arith.constant 0 : index
    %115 = vector.load %arg1[%c0_62, %c182, %c0_63] : memref<1x676x3xf32, #tpu.memory_space<vmem>>, vector<1x128x3xf32>
    %116 = vector.shape_cast %115 : vector<1x128x3xf32> to vector<128x3xf32>
    %117 = arith.truncf %116 : vector<128x3xf32> to vector<128x3xbf16>
    %cst_64 = arith.constant dense<0.000000e+00> : vector<128x16xf32>
    %118 = tpu.matmul %117, %18, %cst_64 {dimension_numbers = #tpu.dot_dimension_numbers<[1], [0], [0], [1], [0, 0, 1, 1], [], []>} : vector<128x3xbf16>, vector<3x16xbf16>, vector<128x16xf32> -> vector<128x16xf32>
    %119 = arith.addf %109, %118 : vector<128x16xf32>
    %120 = arith.addf %119, %114 : vector<128x16xf32>
    %121 = vector.broadcast %19 : vector<1x16xf32> to vector<128x16xf32>
    %122 = arith.addf %120, %121 : vector<128x16xf32>
    %cst_65 = arith.constant 0.000000e+00 : f32
    %123 = vector.broadcast %cst_65 : f32 to vector<128x16xf32>
    %124 = arith.maximumf %122, %123 : vector<128x16xf32>
    %c128_66 = arith.constant 128 : index
    %c0_67 = arith.constant 0 : index
    %125 = vector.load %arg17[%c128_66, %c0_67] : memref<622x16xf32, #tpu.memory_space<vmem>>, vector<128x16xf32>
    tpu.vector_store %arg17[%c128_66, %c0_67], %124 {strides = array<i32>} : memref<622x16xf32, #tpu.memory_space<vmem>>, vector<128x16xf32>,
    %cst_68 = arith.constant 0.000000e+00 : f32
    %126 = vector.broadcast %cst_68 : f32 to vector<128x16xf32>
    %cst_69 = arith.constant 0.000000e+00 : f32
    %127 = vector.broadcast %cst_69 : f32 to vector<128x16xf32>
    %c0_70 = arith.constant 0 : index
    %c256 = arith.constant 256 : index
    %c0_71 = arith.constant 0 : index
    %128 = vector.load %arg1[%c0_70, %c256, %c0_71] : memref<1x676x3xf32, #tpu.memory_space<vmem>>, vector<1x128x3xf32>
    %129 = vector.shape_cast %128 : vector<1x128x3xf32> to vector<128x3xf32>
    %130 = arith.truncf %129 : vector<128x3xf32> to vector<128x3xbf16>
    %cst_72 = arith.constant dense<0.000000e+00> : vector<128x16xf32>
    %131 = tpu.matmul %130, %2, %cst_72 {dimension_numbers = #tpu.dot_dimension_numbers<[1], [0], [0], [1], [0, 0, 1, 1], [], []>} : vector<128x3xbf16>, vector<3x16xbf16>, vector<128x16xf32> -> vector<128x16xf32>
    %132 = arith.addf %126, %131 : vector<128x16xf32>
    %c0_73 = arith.constant 0 : index
    %c257 = arith.constant 257 : index
    %c0_74 = arith.constant 0 : index
    %133 = vector.load %arg1[%c0_73, %c257, %c0_74] : memref<1x676x3xf32, #tpu.memory_space<vmem>>, vector<1x128x3xf32>
    %134 = vector.shape_cast %133 : vector<1x128x3xf32> to vector<128x3xf32>
    %135 = arith.truncf %134 : vector<128x3xf32> to vector<128x3xbf16>
    %cst_75 = arith.constant dense<0.000000e+00> : vector<128x16xf32>
    %136 = tpu.matmul %135, %4, %cst_75 {dimension_numbers = #tpu.dot_dimension_numbers<[1], [0], [0], [1], [0, 0, 1, 1], [], []>} : vector<128x3xbf16>, vector<3x16xbf16>, vector<128x16xf32> -> vector<128x16xf32>
    %137 = arith.addf %127, %136 : vector<128x16xf32>
    %c0_76 = arith.constant 0 : index
    %c258 = arith.constant 258 : index
    %c0_77 = arith.constant 0 : index
    %138 = vector.load %arg1[%c0_76, %c258, %c0_77] : memref<1x676x3xf32, #tpu.memory_space<vmem>>, vector<1x128x3xf32>
    %139 = vector.shape_cast %138 : vector<1x128x3xf32> to vector<128x3xf32>
    %140 = arith.truncf %139 : vector<128x3xf32> to vector<128x3xbf16>
    %cst_78 = arith.constant dense<0.000000e+00> : vector<128x16xf32>
    %141 = tpu.matmul %140, %6, %cst_78 {dimension_numbers = #tpu.dot_dimension_numbers<[1], [0], [0], [1], [0, 0, 1, 1], [], []>} : vector<128x3xbf16>, vector<3x16xbf16>, vector<128x16xf32> -> vector<128x16xf32>
    %142 = arith.addf %132, %141 : vector<128x16xf32>
    %c0_79 = arith.constant 0 : index
    %c282 = arith.constant 282 : index
    %c0_80 = arith.constant 0 : index
    %143 = vector.load %arg1[%c0_79, %c282, %c0_80] : memref<1x676x3xf32, #tpu.memory_space<vmem>>, vector<1x128x3xf32>
    %144 = vector.shape_cast %143 : vector<1x128x3xf32> to vector<128x3xf32>
    %145 = arith.truncf %144 : vector<128x3xf32> to vector<128x3xbf16>
    %cst_81 = arith.constant dense<0.000000e+00> : vector<128x16xf32>
    %146 = tpu.matmul %145, %8, %cst_81 {dimension_numbers = #tpu.dot_dimension_numbers<[1], [0], [0], [1], [0, 0, 1, 1], [], []>} : vector<128x3xbf16>, vector<3x16xbf16>, vector<128x16xf32> -> vector<128x16xf32>
    %147 = arith.addf %137, %146 : vector<128x16xf32>
    %c0_82 = arith.constant 0 : index
    %c283 = arith.constant 283 : index
    %c0_83 = arith.constant 0 : index
    %148 = vector.load %arg1[%c0_82, %c283, %c0_83] : memref<1x676x3xf32, #tpu.memory_space<vmem>>, vector<1x128x3xf32>
    %149 = vector.shape_cast %148 : vector<1x128x3xf32> to vector<128x3xf32>
    %150 = arith.truncf %149 : vector<128x3xf32> to vector<128x3xbf16>
    %cst_84 = arith.constant dense<0.000000e+00> : vector<128x16xf32>
    %151 = tpu.matmul %150, %10, %cst_84 {dimension_numbers = #tpu.dot_dimension_numbers<[1], [0], [0], [1], [0, 0, 1, 1], [], []>} : vector<128x3xbf16>, vector<3x16xbf16>, vector<128x16xf32> -> vector<128x16xf32>
    %152 = arith.addf %142, %151 : vector<128x16xf32>
    %c0_85 = arith.constant 0 : index
    %c284 = arith.constant 284 : index
    %c0_86 = arith.constant 0 : index
    %153 = vector.load %arg1[%c0_85, %c284, %c0_86] : memref<1x676x3xf32, #tpu.memory_space<vmem>>, vector<1x128x3xf32>
    %154 = vector.shape_cast %153 : vector<1x128x3xf32> to vector<128x3xf32>
    %155 = arith.truncf %154 : vector<128x3xf32> to vector<128x3xbf16>
    %cst_87 = arith.constant dense<0.000000e+00> : vector<128x16xf32>
    %156 = tpu.matmul %155, %12, %cst_87 {dimension_numbers = #tpu.dot_dimension_numbers<[1], [0], [0], [1], [0, 0, 1, 1], [], []>} : vector<128x3xbf16>, vector<3x16xbf16>, vector<128x16xf32> -> vector<128x16xf32>
    %157 = arith.addf %147, %156 : vector<128x16xf32>
    %c0_88 = arith.constant 0 : index
    %c308 = arith.constant 308 : index
    %c0_89 = arith.constant 0 : index
    %158 = vector.load %arg1[%c0_88, %c308, %c0_89] : memref<1x676x3xf32, #tpu.memory_space<vmem>>, vector<1x128x3xf32>
    %159 = vector.shape_cast %158 : vector<1x128x3xf32> to vector<128x3xf32>
    %160 = arith.truncf %159 : vector<128x3xf32> to vector<128x3xbf16>
    %cst_90 = arith.constant dense<0.000000e+00> : vector<128x16xf32>
    %161 = tpu.matmul %160, %14, %cst_90 {dimension_numbers = #tpu.dot_dimension_numbers<[1], [0], [0], [1], [0, 0, 1, 1], [], []>} : vector<128x3xbf16>, vector<3x16xbf16>, vector<128x16xf32> -> vector<128x16xf32>
    %162 = arith.addf %152, %161 : vector<128x16xf32>
    %c0_91 = arith.constant 0 : index
    %c309 = arith.constant 309 : index
    %c0_92 = arith.constant 0 : index
    %163 = vector.load %arg1[%c0_91, %c309, %c0_92] : memref<1x676x3xf32, #tpu.memory_space<vmem>>, vector<1x128x3xf32>
    %164 = vector.shape_cast %163 : vector<1x128x3xf32> to vector<128x3xf32>
    %165 = arith.truncf %164 : vector<128x3xf32> to vector<128x3xbf16>
    %cst_93 = arith.constant dense<0.000000e+00> : vector<128x16xf32>
    %166 = tpu.matmul %165, %16, %cst_93 {dimension_numbers = #tpu.dot_dimension_numbers<[1], [0], [0], [1], [0, 0, 1, 1], [], []>} : vector<128x3xbf16>, vector<3x16xbf16>, vector<128x16xf32> -> vector<128x16xf32>
    %167 = arith.addf %157, %166 : vector<128x16xf32>
    %c0_94 = arith.constant 0 : index
    %c310 = arith.constant 310 : index
    %c0_95 = arith.constant 0 : index
    %168 = vector.load %arg1[%c0_94, %c310, %c0_95] : memref<1x676x3xf32, #tpu.memory_space<vmem>>, vector<1x128x3xf32>
    %169 = vector.shape_cast %168 : vector<1x128x3xf32> to vector<128x3xf32>
    %170 = arith.truncf %169 : vector<128x3xf32> to vector<128x3xbf16>
    %cst_96 = arith.constant dense<0.000000e+00> : vector<128x16xf32>
    %171 = tpu.matmul %170, %18, %cst_96 {dimension_numbers = #tpu.dot_dimension_numbers<[1], [0], [0], [1], [0, 0, 1, 1], [], []>} : vector<128x3xbf16>, vector<3x16xbf16>, vector<128x16xf32> -> vector<128x16xf32>
    %172 = arith.addf %162, %171 : vector<128x16xf32>
    %173 = arith.addf %172, %167 : vector<128x16xf32>
    %174 = vector.broadcast %19 : vector<1x16xf32> to vector<128x16xf32>
    %175 = arith.addf %173, %174 : vector<128x16xf32>
    %cst_97 = arith.constant 0.000000e+00 : f32
    %176 = vector.broadcast %cst_97 : f32 to vector<128x16xf32>
    %177 = arith.maximumf %175, %176 : vector<128x16xf32>
    %c256_98 = arith.constant 256 : index
    %c0_99 = arith.constant 0 : index
    %178 = vector.load %arg17[%c256_98, %c0_99] : memref<622x16xf32, #tpu.memory_space<vmem>>, vector<128x16xf32>
    tpu.vector_store %arg17[%c256_98, %c0_99], %177 {strides = array<i32>} : memref<622x16xf32, #tpu.memory_space<vmem>>, vector<128x16xf32>,
    %cst_100 = arith.constant 0.000000e+00 : f32
    %179 = vector.broadcast %cst_100 : f32 to vector<128x16xf32>
    %cst_101 = arith.constant 0.000000e+00 : f32
    %180 = vector.broadcast %cst_101 : f32 to vector<128x16xf32>
    %c0_102 = arith.constant 0 : index
    %c384 = arith.constant 384 : index
    %c0_103 = arith.constant 0 : index
    %181 = vector.load %arg1[%c0_102, %c384, %c0_103] : memref<1x676x3xf32, #tpu.memory_space<vmem>>, vector<1x128x3xf32>
    %182 = vector.shape_cast %181 : vector<1x128x3xf32> to vector<128x3xf32>
    %183 = arith.truncf %182 : vector<128x3xf32> to vector<128x3xbf16>
    %cst_104 = arith.constant dense<0.000000e+00> : vector<128x16xf32>
    %184 = tpu.matmul %183, %2, %cst_104 {dimension_numbers = #tpu.dot_dimension_numbers<[1], [0], [0], [1], [0, 0, 1, 1], [], []>} : vector<128x3xbf16>, vector<3x16xbf16>, vector<128x16xf32> -> vector<128x16xf32>
    %185 = arith.addf %179, %184 : vector<128x16xf32>
    %c0_105 = arith.constant 0 : index
    %c385 = arith.constant 385 : index
    %c0_106 = arith.constant 0 : index
    %186 = vector.load %arg1[%c0_105, %c385, %c0_106] : memref<1x676x3xf32, #tpu.memory_space<vmem>>, vector<1x128x3xf32>
    %187 = vector.shape_cast %186 : vector<1x128x3xf32> to vector<128x3xf32>
    %188 = arith.truncf %187 : vector<128x3xf32> to vector<128x3xbf16>
    %cst_107 = arith.constant dense<0.000000e+00> : vector<128x16xf32>
    %189 = tpu.matmul %188, %4, %cst_107 {dimension_numbers = #tpu.dot_dimension_numbers<[1], [0], [0], [1], [0, 0, 1, 1], [], []>} : vector<128x3xbf16>, vector<3x16xbf16>, vector<128x16xf32> -> vector<128x16xf32>
    %190 = arith.addf %180, %189 : vector<128x16xf32>
    %c0_108 = arith.constant 0 : index
    %c386 = arith.constant 386 : index
    %c0_109 = arith.constant 0 : index
    %191 = vector.load %arg1[%c0_108, %c386, %c0_109] : memref<1x676x3xf32, #tpu.memory_space<vmem>>, vector<1x128x3xf32>
    %192 = vector.shape_cast %191 : vector<1x128x3xf32> to vector<128x3xf32>
    %193 = arith.truncf %192 : vector<128x3xf32> to vector<128x3xbf16>
    %cst_110 = arith.constant dense<0.000000e+00> : vector<128x16xf32>
    %194 = tpu.matmul %193, %6, %cst_110 {dimension_numbers = #tpu.dot_dimension_numbers<[1], [0], [0], [1], [0, 0, 1, 1], [], []>} : vector<128x3xbf16>, vector<3x16xbf16>, vector<128x16xf32> -> vector<128x16xf32>
    %195 = arith.addf %185, %194 : vector<128x16xf32>
    %c0_111 = arith.constant 0 : index
    %c410 = arith.constant 410 : index
    %c0_112 = arith.constant 0 : index
    %196 = vector.load %arg1[%c0_111, %c410, %c0_112] : memref<1x676x3xf32, #tpu.memory_space<vmem>>, vector<1x128x3xf32>
    %197 = vector.shape_cast %196 : vector<1x128x3xf32> to vector<128x3xf32>
    %198 = arith.truncf %197 : vector<128x3xf32> to vector<128x3xbf16>
    %cst_113 = arith.constant dense<0.000000e+00> : vector<128x16xf32>
    %199 = tpu.matmul %198, %8, %cst_113 {dimension_numbers = #tpu.dot_dimension_numbers<[1], [0], [0], [1], [0, 0, 1, 1], [], []>} : vector<128x3xbf16>, vector<3x16xbf16>, vector<128x16xf32> -> vector<128x16xf32>
    %200 = arith.addf %190, %199 : vector<128x16xf32>
    %c0_114 = arith.constant 0 : index
    %c411 = arith.constant 411 : index
    %c0_115 = arith.constant 0 : index
    %201 = vector.load %arg1[%c0_114, %c411, %c0_115] : memref<1x676x3xf32, #tpu.memory_space<vmem>>, vector<1x128x3xf32>
    %202 = vector.shape_cast %201 : vector<1x128x3xf32> to vector<128x3xf32>
    %203 = arith.truncf %202 : vector<128x3xf32> to vector<128x3xbf16>
    %cst_116 = arith.constant dense<0.000000e+00> : vector<128x16xf32>
    %204 = tpu.matmul %203, %10, %cst_116 {dimension_numbers = #tpu.dot_dimension_numbers<[1], [0], [0], [1], [0, 0, 1, 1], [], []>} : vector<128x3xbf16>, vector<3x16xbf16>, vector<128x16xf32> -> vector<128x16xf32>
    %205 = arith.addf %195, %204 : vector<128x16xf32>
    %c0_117 = arith.constant 0 : index
    %c412 = arith.constant 412 : index
    %c0_118 = arith.constant 0 : index
    %206 = vector.load %arg1[%c0_117, %c412, %c0_118] : memref<1x676x3xf32, #tpu.memory_space<vmem>>, vector<1x128x3xf32>
    %207 = vector.shape_cast %206 : vector<1x128x3xf32> to vector<128x3xf32>
    %208 = arith.truncf %207 : vector<128x3xf32> to vector<128x3xbf16>
    %cst_119 = arith.constant dense<0.000000e+00> : vector<128x16xf32>
    %209 = tpu.matmul %208, %12, %cst_119 {dimension_numbers = #tpu.dot_dimension_numbers<[1], [0], [0], [1], [0, 0, 1, 1], [], []>} : vector<128x3xbf16>, vector<3x16xbf16>, vector<128x16xf32> -> vector<128x16xf32>
    %210 = arith.addf %200, %209 : vector<128x16xf32>
    %c0_120 = arith.constant 0 : index
    %c436 = arith.constant 436 : index
    %c0_121 = arith.constant 0 : index
    %211 = vector.load %arg1[%c0_120, %c436, %c0_121] : memref<1x676x3xf32, #tpu.memory_space<vmem>>, vector<1x128x3xf32>
    %212 = vector.shape_cast %211 : vector<1x128x3xf32> to vector<128x3xf32>
    %213 = arith.truncf %212 : vector<128x3xf32> to vector<128x3xbf16>
    %cst_122 = arith.constant dense<0.000000e+00> : vector<128x16xf32>
    %214 = tpu.matmul %213, %14, %cst_122 {dimension_numbers = #tpu.dot_dimension_numbers<[1], [0], [0], [1], [0, 0, 1, 1], [], []>} : vector<128x3xbf16>, vector<3x16xbf16>, vector<128x16xf32> -> vector<128x16xf32>
    %215 = arith.addf %205, %214 : vector<128x16xf32>
    %c0_123 = arith.constant 0 : index
    %c437 = arith.constant 437 : index
    %c0_124 = arith.constant 0 : index
    %216 = vector.load %arg1[%c0_123, %c437, %c0_124] : memref<1x676x3xf32, #tpu.memory_space<vmem>>, vector<1x128x3xf32>
    %217 = vector.shape_cast %216 : vector<1x128x3xf32> to vector<128x3xf32>
    %218 = arith.truncf %217 : vector<128x3xf32> to vector<128x3xbf16>
    %cst_125 = arith.constant dense<0.000000e+00> : vector<128x16xf32>
    %219 = tpu.matmul %218, %16, %cst_125 {dimension_numbers = #tpu.dot_dimension_numbers<[1], [0], [0], [1], [0, 0, 1, 1], [], []>} : vector<128x3xbf16>, vector<3x16xbf16>, vector<128x16xf32> -> vector<128x16xf32>
    %220 = arith.addf %210, %219 : vector<128x16xf32>
    %c0_126 = arith.constant 0 : index
    %c438 = arith.constant 438 : index
    %c0_127 = arith.constant 0 : index
    %221 = vector.load %arg1[%c0_126, %c438, %c0_127] : memref<1x676x3xf32, #tpu.memory_space<vmem>>, vector<1x128x3xf32>
    %222 = vector.shape_cast %221 : vector<1x128x3xf32> to vector<128x3xf32>
    %223 = arith.truncf %222 : vector<128x3xf32> to vector<128x3xbf16>
    %cst_128 = arith.constant dense<0.000000e+00> : vector<128x16xf32>
    %224 = tpu.matmul %223, %18, %cst_128 {dimension_numbers = #tpu.dot_dimension_numbers<[1], [0], [0], [1], [0, 0, 1, 1], [], []>} : vector<128x3xbf16>, vector<3x16xbf16>, vector<128x16xf32> -> vector<128x16xf32>
    %225 = arith.addf %215, %224 : vector<128x16xf32>
    %226 = arith.addf %225, %220 : vector<128x16xf32>
    %227 = vector.broadcast %19 : vector<1x16xf32> to vector<128x16xf32>
    %228 = arith.addf %226, %227 : vector<128x16xf32>
    %cst_129 = arith.constant 0.000000e+00 : f32
    %229 = vector.broadcast %cst_129 : f32 to vector<128x16xf32>
    %230 = arith.maximumf %228, %229 : vector<128x16xf32>
    %c384_130 = arith.constant 384 : index
    %c0_131 = arith.constant 0 : index
    %231 = vector.load %arg17[%c384_130, %c0_131] : memref<622x16xf32, #tpu.memory_space<vmem>>, vector<128x16xf32>
    tpu.vector_store %arg17[%c384_130, %c0_131], %230 {strides = array<i32>} : memref<622x16xf32, #tpu.memory_space<vmem>>, vector<128x16xf32>,
    %cst_132 = arith.constant 0.000000e+00 : f32
    %232 = vector.broadcast %cst_132 : f32 to vector<110x16xf32>
    %cst_133 = arith.constant 0.000000e+00 : f32
    %233 = vector.broadcast %cst_133 : f32 to vector<110x16xf32>
    %c0_134 = arith.constant 0 : index
    %c512 = arith.constant 512 : index
    %c0_135 = arith.constant 0 : index
    %234 = vector.load %arg1[%c0_134, %c512, %c0_135] : memref<1x676x3xf32, #tpu.memory_space<vmem>>, vector<1x110x3xf32>
    %235 = vector.shape_cast %234 : vector<1x110x3xf32> to vector<110x3xf32>
    %236 = arith.truncf %235 : vector<110x3xf32> to vector<110x3xbf16>
    %cst_136 = arith.constant dense<0.000000e+00> : vector<110x16xf32>
    %237 = tpu.matmul %236, %2, %cst_136 {dimension_numbers = #tpu.dot_dimension_numbers<[1], [0], [0], [1], [0, 0, 1, 1], [], []>} : vector<110x3xbf16>, vector<3x16xbf16>, vector<110x16xf32> -> vector<110x16xf32>
    %238 = arith.addf %232, %237 : vector<110x16xf32>
    %c0_137 = arith.constant 0 : index
    %c513 = arith.constant 513 : index
    %c0_138 = arith.constant 0 : index
    %239 = vector.load %arg1[%c0_137, %c513, %c0_138] : memref<1x676x3xf32, #tpu.memory_space<vmem>>, vector<1x110x3xf32>
    %240 = vector.shape_cast %239 : vector<1x110x3xf32> to vector<110x3xf32>
    %241 = arith.truncf %240 : vector<110x3xf32> to vector<110x3xbf16>
    %cst_139 = arith.constant dense<0.000000e+00> : vector<110x16xf32>
    %242 = tpu.matmul %241, %4, %cst_139 {dimension_numbers = #tpu.dot_dimension_numbers<[1], [0], [0], [1], [0, 0, 1, 1], [], []>} : vector<110x3xbf16>, vector<3x16xbf16>, vector<110x16xf32> -> vector<110x16xf32>
    %243 = arith.addf %233, %242 : vector<110x16xf32>
    %c0_140 = arith.constant 0 : index
    %c514 = arith.constant 514 : index
    %c0_141 = arith.constant 0 : index
    %244 = vector.load %arg1[%c0_140, %c514, %c0_141] : memref<1x676x3xf32, #tpu.memory_space<vmem>>, vector<1x110x3xf32>
    %245 = vector.shape_cast %244 : vector<1x110x3xf32> to vector<110x3xf32>
    %246 = arith.truncf %245 : vector<110x3xf32> to vector<110x3xbf16>
    %cst_142 = arith.constant dense<0.000000e+00> : vector<110x16xf32>
    %247 = tpu.matmul %246, %6, %cst_142 {dimension_numbers = #tpu.dot_dimension_numbers<[1], [0], [0], [1], [0, 0, 1, 1], [], []>} : vector<110x3xbf16>, vector<3x16xbf16>, vector<110x16xf32> -> vector<110x16xf32>
    %248 = arith.addf %238, %247 : vector<110x16xf32>
    %c0_143 = arith.constant 0 : index
    %c538 = arith.constant 538 : index
    %c0_144 = arith.constant 0 : index
    %249 = vector.load %arg1[%c0_143, %c538, %c0_144] : memref<1x676x3xf32, #tpu.memory_space<vmem>>, vector<1x110x3xf32>
    %250 = vector.shape_cast %249 : vector<1x110x3xf32> to vector<110x3xf32>
    %251 = arith.truncf %250 : vector<110x3xf32> to vector<110x3xbf16>
    %cst_145 = arith.constant dense<0.000000e+00> : vector<110x16xf32>
    %252 = tpu.matmul %251, %8, %cst_145 {dimension_numbers = #tpu.dot_dimension_numbers<[1], [0], [0], [1], [0, 0, 1, 1], [], []>} : vector<110x3xbf16>, vector<3x16xbf16>, vector<110x16xf32> -> vector<110x16xf32>
    %253 = arith.addf %243, %252 : vector<110x16xf32>
    %c0_146 = arith.constant 0 : index
    %c539 = arith.constant 539 : index
    %c0_147 = arith.constant 0 : index
    %254 = vector.load %arg1[%c0_146, %c539, %c0_147] : memref<1x676x3xf32, #tpu.memory_space<vmem>>, vector<1x110x3xf32>
    %255 = vector.shape_cast %254 : vector<1x110x3xf32> to vector<110x3xf32>
    %256 = arith.truncf %255 : vector<110x3xf32> to vector<110x3xbf16>
    %cst_148 = arith.constant dense<0.000000e+00> : vector<110x16xf32>
    %257 = tpu.matmul %256, %10, %cst_148 {dimension_numbers = #tpu.dot_dimension_numbers<[1], [0], [0], [1], [0, 0, 1, 1], [], []>} : vector<110x3xbf16>, vector<3x16xbf16>, vector<110x16xf32> -> vector<110x16xf32>
    %258 = arith.addf %248, %257 : vector<110x16xf32>
    %c0_149 = arith.constant 0 : index
    %c540 = arith.constant 540 : index
    %c0_150 = arith.constant 0 : index
    %259 = vector.load %arg1[%c0_149, %c540, %c0_150] : memref<1x676x3xf32, #tpu.memory_space<vmem>>, vector<1x110x3xf32>
    %260 = vector.shape_cast %259 : vector<1x110x3xf32> to vector<110x3xf32>
    %261 = arith.truncf %260 : vector<110x3xf32> to vector<110x3xbf16>
    %cst_151 = arith.constant dense<0.000000e+00> : vector<110x16xf32>
    %262 = tpu.matmul %261, %12, %cst_151 {dimension_numbers = #tpu.dot_dimension_numbers<[1], [0], [0], [1], [0, 0, 1, 1], [], []>} : vector<110x3xbf16>, vector<3x16xbf16>, vector<110x16xf32> -> vector<110x16xf32>
    %263 = arith.addf %253, %262 : vector<110x16xf32>
    %c0_152 = arith.constant 0 : index
    %c564 = arith.constant 564 : index
    %c0_153 = arith.constant 0 : index
    %264 = vector.load %arg1[%c0_152, %c564, %c0_153] : memref<1x676x3xf32, #tpu.memory_space<vmem>>, vector<1x110x3xf32>
    %265 = vector.shape_cast %264 : vector<1x110x3xf32> to vector<110x3xf32>
    %266 = arith.truncf %265 : vector<110x3xf32> to vector<110x3xbf16>
    %cst_154 = arith.constant dense<0.000000e+00> : vector<110x16xf32>
    %267 = tpu.matmul %266, %14, %cst_154 {dimension_numbers = #tpu.dot_dimension_numbers<[1], [0], [0], [1], [0, 0, 1, 1], [], []>} : vector<110x3xbf16>, vector<3x16xbf16>, vector<110x16xf32> -> vector<110x16xf32>
    %268 = arith.addf %258, %267 : vector<110x16xf32>
    %c0_155 = arith.constant 0 : index
    %c565 = arith.constant 565 : index
    %c0_156 = arith.constant 0 : index
    %269 = vector.load %arg1[%c0_155, %c565, %c0_156] : memref<1x676x3xf32, #tpu.memory_space<vmem>>, vector<1x110x3xf32>
    %270 = vector.shape_cast %269 : vector<1x110x3xf32> to vector<110x3xf32>
    %271 = arith.truncf %270 : vector<110x3xf32> to vector<110x3xbf16>
    %cst_157 = arith.constant dense<0.000000e+00> : vector<110x16xf32>
    %272 = tpu.matmul %271, %16, %cst_157 {dimension_numbers = #tpu.dot_dimension_numbers<[1], [0], [0], [1], [0, 0, 1, 1], [], []>} : vector<110x3xbf16>, vector<3x16xbf16>, vector<110x16xf32> -> vector<110x16xf32>
    %273 = arith.addf %263, %272 : vector<110x16xf32>
    %c0_158 = arith.constant 0 : index
    %c566 = arith.constant 566 : index
    %c0_159 = arith.constant 0 : index
    %274 = vector.load %arg1[%c0_158, %c566, %c0_159] : memref<1x676x3xf32, #tpu.memory_space<vmem>>, vector<1x110x3xf32>
    %275 = vector.shape_cast %274 : vector<1x110x3xf32> to vector<110x3xf32>
    %276 = arith.truncf %275 : vector<110x3xf32> to vector<110x3xbf16>
    %cst_160 = arith.constant dense<0.000000e+00> : vector<110x16xf32>
    %277 = tpu.matmul %276, %18, %cst_160 {dimension_numbers = #tpu.dot_dimension_numbers<[1], [0], [0], [1], [0, 0, 1, 1], [], []>} : vector<110x3xbf16>, vector<3x16xbf16>, vector<110x16xf32> -> vector<110x16xf32>
    %278 = arith.addf %268, %277 : vector<110x16xf32>
    %279 = arith.addf %278, %273 : vector<110x16xf32>
    %280 = vector.broadcast %19 : vector<1x16xf32> to vector<110x16xf32>
    %281 = arith.addf %279, %280 : vector<110x16xf32>
    %cst_161 = arith.constant 0.000000e+00 : f32
    %282 = vector.broadcast %cst_161 : f32 to vector<110x16xf32>
    %283 = arith.maximumf %281, %282 : vector<110x16xf32>
    %c512_162 = arith.constant 512 : index
    %c0_163 = arith.constant 0 : index
    %284 = vector.load %arg17[%c512_162, %c0_163] : memref<622x16xf32, #tpu.memory_space<vmem>>, vector<110x16xf32>
    tpu.vector_store %arg17[%c512_162, %c0_163], %283 {strides = array<i32>} : memref<622x16xf32, #tpu.memory_space<vmem>>, vector<110x16xf32>,
    %cst_164 = arith.constant 0.000000e+00 : f32
    %285 = vector.broadcast %cst_164 : f32 to vector<196x16xf32>
    %c0_165 = arith.constant 0 : index
    %c0_166 = arith.constant 0 : index
    %286 = vector.load %arg18[%c0_165, %c0_166] : memref<196x16xf32, #tpu.memory_space<vmem>>, vector<196x16xf32>
    tpu.vector_store %arg18[%c0_165, %c0_166], %285 {strides = array<i32>} : memref<196x16xf32, #tpu.memory_space<vmem>>, vector<196x16xf32>,
    %c0_167 = arith.constant 0 : index
    %c0_168 = arith.constant 0 : index
    %287 = tpu.strided_load %arg17[%c0_167, %c0_168] {strides = array<i32: 2, 1>} : memref<622x16xf32, #tpu.memory_space<vmem>>, vector<12x16xf32>
    %c1_169 = arith.constant 1 : index
    %c0_170 = arith.constant 0 : index
    %288 = tpu.strided_load %arg17[%c1_169, %c0_170] {strides = array<i32: 2, 1>} : memref<622x16xf32, #tpu.memory_space<vmem>>, vector<12x16xf32>
    %c26_171 = arith.constant 26 : index
    %c0_172 = arith.constant 0 : index
    %289 = tpu.strided_load %arg17[%c26_171, %c0_172] {strides = array<i32: 2, 1>} : memref<622x16xf32, #tpu.memory_space<vmem>>, vector<12x16xf32>
    %c27_173 = arith.constant 27 : index
    %c0_174 = arith.constant 0 : index
    %290 = tpu.strided_load %arg17[%c27_173, %c0_174] {strides = array<i32: 2, 1>} : memref<622x16xf32, #tpu.memory_space<vmem>>, vector<12x16xf32>
    %291 = arith.maximumf %287, %288 : vector<12x16xf32>
    %292 = arith.maximumf %289, %290 : vector<12x16xf32>
    %293 = arith.maximumf %291, %292 : vector<12x16xf32>
    %c15 = arith.constant 15 : index
    %c0_175 = arith.constant 0 : index
    %294 = vector.load %arg18[%c15, %c0_175] : memref<196x16xf32, #tpu.memory_space<vmem>>, vector<12x16xf32>
    tpu.vector_store %arg18[%c15, %c0_175], %293 {strides = array<i32>} : memref<196x16xf32, #tpu.memory_space<vmem>>, vector<12x16xf32>,
    %c52_176 = arith.constant 52 : index
    %c0_177 = arith.constant 0 : index
    %295 = tpu.strided_load %arg17[%c52_176, %c0_177] {strides = array<i32: 2, 1>} : memref<622x16xf32, #tpu.memory_space<vmem>>, vector<12x16xf32>
    %c53_178 = arith.constant 53 : index
    %c0_179 = arith.constant 0 : index
    %296 = tpu.strided_load %arg17[%c53_178, %c0_179] {strides = array<i32: 2, 1>} : memref<622x16xf32, #tpu.memory_space<vmem>>, vector<12x16xf32>
    %c78 = arith.constant 78 : index
    %c0_180 = arith.constant 0 : index
    %297 = tpu.strided_load %arg17[%c78, %c0_180] {strides = array<i32: 2, 1>} : memref<622x16xf32, #tpu.memory_space<vmem>>, vector<12x16xf32>
    %c79 = arith.constant 79 : index
    %c0_181 = arith.constant 0 : index
    %298 = tpu.strided_load %arg17[%c79, %c0_181] {strides = array<i32: 2, 1>} : memref<622x16xf32, #tpu.memory_space<vmem>>, vector<12x16xf32>
    %299 = arith.maximumf %295, %296 : vector<12x16xf32>
    %300 = arith.maximumf %297, %298 : vector<12x16xf32>
    %301 = arith.maximumf %299, %300 : vector<12x16xf32>
    %c29 = arith.constant 29 : index
    %c0_182 = arith.constant 0 : index
    %302 = vector.load %arg18[%c29, %c0_182] : memref<196x16xf32, #tpu.memory_space<vmem>>, vector<12x16xf32>
    tpu.vector_store %arg18[%c29, %c0_182], %301 {strides = array<i32>} : memref<196x16xf32, #tpu.memory_space<vmem>>, vector<12x16xf32>,
    %c104 = arith.constant 104 : index
    %c0_183 = arith.constant 0 : index
    %303 = tpu.strided_load %arg17[%c104, %c0_183] {strides = array<i32: 2, 1>} : memref<622x16xf32, #tpu.memory_space<vmem>>, vector<12x16xf32>
    %c105 = arith.constant 105 : index
    %c0_184 = arith.constant 0 : index
    %304 = tpu.strided_load %arg17[%c105, %c0_184] {strides = array<i32: 2, 1>} : memref<622x16xf32, #tpu.memory_space<vmem>>, vector<12x16xf32>
    %c130_185 = arith.constant 130 : index
    %c0_186 = arith.constant 0 : index
    %305 = tpu.strided_load %arg17[%c130_185, %c0_186] {strides = array<i32: 2, 1>} : memref<622x16xf32, #tpu.memory_space<vmem>>, vector<12x16xf32>
    %c131 = arith.constant 131 : index
    %c0_187 = arith.constant 0 : index
    %306 = tpu.strided_load %arg17[%c131, %c0_187] {strides = array<i32: 2, 1>} : memref<622x16xf32, #tpu.memory_space<vmem>>, vector<12x16xf32>
    %307 = arith.maximumf %303, %304 : vector<12x16xf32>
    %308 = arith.maximumf %305, %306 : vector<12x16xf32>
    %309 = arith.maximumf %307, %308 : vector<12x16xf32>
    %c43 = arith.constant 43 : index
    %c0_188 = arith.constant 0 : index
    %310 = vector.load %arg18[%c43, %c0_188] : memref<196x16xf32, #tpu.memory_space<vmem>>, vector<12x16xf32>
    tpu.vector_store %arg18[%c43, %c0_188], %309 {strides = array<i32>} : memref<196x16xf32, #tpu.memory_space<vmem>>, vector<12x16xf32>,
    %c156_189 = arith.constant 156 : index
    %c0_190 = arith.constant 0 : index
    %311 = tpu.strided_load %arg17[%c156_189, %c0_190] {strides = array<i32: 2, 1>} : memref<622x16xf32, #tpu.memory_space<vmem>>, vector<12x16xf32>
    %c157 = arith.constant 157 : index
    %c0_191 = arith.constant 0 : index
    %312 = tpu.strided_load %arg17[%c157, %c0_191] {strides = array<i32: 2, 1>} : memref<622x16xf32, #tpu.memory_space<vmem>>, vector<12x16xf32>
    %c182_192 = arith.constant 182 : index
    %c0_193 = arith.constant 0 : index
    %313 = tpu.strided_load %arg17[%c182_192, %c0_193] {strides = array<i32: 2, 1>} : memref<622x16xf32, #tpu.memory_space<vmem>>, vector<12x16xf32>
    %c183 = arith.constant 183 : index
    %c0_194 = arith.constant 0 : index
    %314 = tpu.strided_load %arg17[%c183, %c0_194] {strides = array<i32: 2, 1>} : memref<622x16xf32, #tpu.memory_space<vmem>>, vector<12x16xf32>
    %315 = arith.maximumf %311, %312 : vector<12x16xf32>
    %316 = arith.maximumf %313, %314 : vector<12x16xf32>
    %317 = arith.maximumf %315, %316 : vector<12x16xf32>
    %c57 = arith.constant 57 : index
    %c0_195 = arith.constant 0 : index
    %318 = vector.load %arg18[%c57, %c0_195] : memref<196x16xf32, #tpu.memory_space<vmem>>, vector<12x16xf32>
    tpu.vector_store %arg18[%c57, %c0_195], %317 {strides = array<i32>} : memref<196x16xf32, #tpu.memory_space<vmem>>, vector<12x16xf32>,
    %c208 = arith.constant 208 : index
    %c0_196 = arith.constant 0 : index
    %319 = tpu.strided_load %arg17[%c208, %c0_196] {strides = array<i32: 2, 1>} : memref<622x16xf32, #tpu.memory_space<vmem>>, vector<12x16xf32>
    %c209 = arith.constant 209 : index
    %c0_197 = arith.constant 0 : index
    %320 = tpu.strided_load %arg17[%c209, %c0_197] {strides = array<i32: 2, 1>} : memref<622x16xf32, #tpu.memory_space<vmem>>, vector<12x16xf32>
    %c234 = arith.constant 234 : index
    %c0_198 = arith.constant 0 : index
    %321 = tpu.strided_load %arg17[%c234, %c0_198] {strides = array<i32: 2, 1>} : memref<622x16xf32, #tpu.memory_space<vmem>>, vector<12x16xf32>
    %c235 = arith.constant 235 : index
    %c0_199 = arith.constant 0 : index
    %322 = tpu.strided_load %arg17[%c235, %c0_199] {strides = array<i32: 2, 1>} : memref<622x16xf32, #tpu.memory_space<vmem>>, vector<12x16xf32>
    %323 = arith.maximumf %319, %320 : vector<12x16xf32>
    %324 = arith.maximumf %321, %322 : vector<12x16xf32>
    %325 = arith.maximumf %323, %324 : vector<12x16xf32>
    %c71 = arith.constant 71 : index
    %c0_200 = arith.constant 0 : index
    %326 = vector.load %arg18[%c71, %c0_200] : memref<196x16xf32, #tpu.memory_space<vmem>>, vector<12x16xf32>
    tpu.vector_store %arg18[%c71, %c0_200], %325 {strides = array<i32>} : memref<196x16xf32, #tpu.memory_space<vmem>>, vector<12x16xf32>,
    %c260 = arith.constant 260 : index
    %c0_201 = arith.constant 0 : index
    %327 = tpu.strided_load %arg17[%c260, %c0_201] {strides = array<i32: 2, 1>} : memref<622x16xf32, #tpu.memory_space<vmem>>, vector<12x16xf32>
    %c261 = arith.constant 261 : index
    %c0_202 = arith.constant 0 : index
    %328 = tpu.strided_load %arg17[%c261, %c0_202] {strides = array<i32: 2, 1>} : memref<622x16xf32, #tpu.memory_space<vmem>>, vector<12x16xf32>
    %c286 = arith.constant 286 : index
    %c0_203 = arith.constant 0 : index
    %329 = tpu.strided_load %arg17[%c286, %c0_203] {strides = array<i32: 2, 1>} : memref<622x16xf32, #tpu.memory_space<vmem>>, vector<12x16xf32>
    %c287 = arith.constant 287 : index
    %c0_204 = arith.constant 0 : index
    %330 = tpu.strided_load %arg17[%c287, %c0_204] {strides = array<i32: 2, 1>} : memref<622x16xf32, #tpu.memory_space<vmem>>, vector<12x16xf32>
    %331 = arith.maximumf %327, %328 : vector<12x16xf32>
    %332 = arith.maximumf %329, %330 : vector<12x16xf32>
    %333 = arith.maximumf %331, %332 : vector<12x16xf32>
    %c85 = arith.constant 85 : index
    %c0_205 = arith.constant 0 : index
    %334 = vector.load %arg18[%c85, %c0_205] : memref<196x16xf32, #tpu.memory_space<vmem>>, vector<12x16xf32>
    tpu.vector_store %arg18[%c85, %c0_205], %333 {strides = array<i32>} : memref<196x16xf32, #tpu.memory_space<vmem>>, vector<12x16xf32>,
    %c312 = arith.constant 312 : index
    %c0_206 = arith.constant 0 : index
    %335 = tpu.strided_load %arg17[%c312, %c0_206] {strides = array<i32: 2, 1>} : memref<622x16xf32, #tpu.memory_space<vmem>>, vector<12x16xf32>
    %c313 = arith.constant 313 : index
    %c0_207 = arith.constant 0 : index
    %336 = tpu.strided_load %arg17[%c313, %c0_207] {strides = array<i32: 2, 1>} : memref<622x16xf32, #tpu.memory_space<vmem>>, vector<12x16xf32>
    %c338 = arith.constant 338 : index
    %c0_208 = arith.constant 0 : index
    %337 = tpu.strided_load %arg17[%c338, %c0_208] {strides = array<i32: 2, 1>} : memref<622x16xf32, #tpu.memory_space<vmem>>, vector<12x16xf32>
    %c339 = arith.constant 339 : index
    %c0_209 = arith.constant 0 : index
    %338 = tpu.strided_load %arg17[%c339, %c0_209] {strides = array<i32: 2, 1>} : memref<622x16xf32, #tpu.memory_space<vmem>>, vector<12x16xf32>
    %339 = arith.maximumf %335, %336 : vector<12x16xf32>
    %340 = arith.maximumf %337, %338 : vector<12x16xf32>
    %341 = arith.maximumf %339, %340 : vector<12x16xf32>
    %c99 = arith.constant 99 : index
    %c0_210 = arith.constant 0 : index
    %342 = vector.load %arg18[%c99, %c0_210] : memref<196x16xf32, #tpu.memory_space<vmem>>, vector<12x16xf32>
    tpu.vector_store %arg18[%c99, %c0_210], %341 {strides = array<i32>} : memref<196x16xf32, #tpu.memory_space<vmem>>, vector<12x16xf32>,
    %c364 = arith.constant 364 : index
    %c0_211 = arith.constant 0 : index
    %343 = tpu.strided_load %arg17[%c364, %c0_211] {strides = array<i32: 2, 1>} : memref<622x16xf32, #tpu.memory_space<vmem>>, vector<12x16xf32>
    %c365 = arith.constant 365 : index
    %c0_212 = arith.constant 0 : index
    %344 = tpu.strided_load %arg17[%c365, %c0_212] {strides = array<i32: 2, 1>} : memref<622x16xf32, #tpu.memory_space<vmem>>, vector<12x16xf32>
    %c390 = arith.constant 390 : index
    %c0_213 = arith.constant 0 : index
    %345 = tpu.strided_load %arg17[%c390, %c0_213] {strides = array<i32: 2, 1>} : memref<622x16xf32, #tpu.memory_space<vmem>>, vector<12x16xf32>
    %c391 = arith.constant 391 : index
    %c0_214 = arith.constant 0 : index
    %346 = tpu.strided_load %arg17[%c391, %c0_214] {strides = array<i32: 2, 1>} : memref<622x16xf32, #tpu.memory_space<vmem>>, vector<12x16xf32>
    %347 = arith.maximumf %343, %344 : vector<12x16xf32>
    %348 = arith.maximumf %345, %346 : vector<12x16xf32>
    %349 = arith.maximumf %347, %348 : vector<12x16xf32>
    %c113 = arith.constant 113 : index
    %c0_215 = arith.constant 0 : index
    %350 = vector.load %arg18[%c113, %c0_215] : memref<196x16xf32, #tpu.memory_space<vmem>>, vector<12x16xf32>
    tpu.vector_store %arg18[%c113, %c0_215], %349 {strides = array<i32>} : memref<196x16xf32, #tpu.memory_space<vmem>>, vector<12x16xf32>,
    %c416 = arith.constant 416 : index
    %c0_216 = arith.constant 0 : index
    %351 = tpu.strided_load %arg17[%c416, %c0_216] {strides = array<i32: 2, 1>} : memref<622x16xf32, #tpu.memory_space<vmem>>, vector<12x16xf32>
    %c417 = arith.constant 417 : index
    %c0_217 = arith.constant 0 : index
    %352 = tpu.strided_load %arg17[%c417, %c0_217] {strides = array<i32: 2, 1>} : memref<622x16xf32, #tpu.memory_space<vmem>>, vector<12x16xf32>
    %c442 = arith.constant 442 : index
    %c0_218 = arith.constant 0 : index
    %353 = tpu.strided_load %arg17[%c442, %c0_218] {strides = array<i32: 2, 1>} : memref<622x16xf32, #tpu.memory_space<vmem>>, vector<12x16xf32>
    %c443 = arith.constant 443 : index
    %c0_219 = arith.constant 0 : index
    %354 = tpu.strided_load %arg17[%c443, %c0_219] {strides = array<i32: 2, 1>} : memref<622x16xf32, #tpu.memory_space<vmem>>, vector<12x16xf32>
    %355 = arith.maximumf %351, %352 : vector<12x16xf32>
    %356 = arith.maximumf %353, %354 : vector<12x16xf32>
    %357 = arith.maximumf %355, %356 : vector<12x16xf32>
    %c127 = arith.constant 127 : index
    %c0_220 = arith.constant 0 : index
    %358 = vector.load %arg18[%c127, %c0_220] : memref<196x16xf32, #tpu.memory_space<vmem>>, vector<12x16xf32>
    tpu.vector_store %arg18[%c127, %c0_220], %357 {strides = array<i32>} : memref<196x16xf32, #tpu.memory_space<vmem>>, vector<12x16xf32>,
    %c468 = arith.constant 468 : index
    %c0_221 = arith.constant 0 : index
    %359 = tpu.strided_load %arg17[%c468, %c0_221] {strides = array<i32: 2, 1>} : memref<622x16xf32, #tpu.memory_space<vmem>>, vector<12x16xf32>
    %c469 = arith.constant 469 : index
    %c0_222 = arith.constant 0 : index
    %360 = tpu.strided_load %arg17[%c469, %c0_222] {strides = array<i32: 2, 1>} : memref<622x16xf32, #tpu.memory_space<vmem>>, vector<12x16xf32>
    %c494 = arith.constant 494 : index
    %c0_223 = arith.constant 0 : index
    %361 = tpu.strided_load %arg17[%c494, %c0_223] {strides = array<i32: 2, 1>} : memref<622x16xf32, #tpu.memory_space<vmem>>, vector<12x16xf32>
    %c495 = arith.constant 495 : index
    %c0_224 = arith.constant 0 : index
    %362 = tpu.strided_load %arg17[%c495, %c0_224] {strides = array<i32: 2, 1>} : memref<622x16xf32, #tpu.memory_space<vmem>>, vector<12x16xf32>
    %363 = arith.maximumf %359, %360 : vector<12x16xf32>
    %364 = arith.maximumf %361, %362 : vector<12x16xf32>
    %365 = arith.maximumf %363, %364 : vector<12x16xf32>
    %c141 = arith.constant 141 : index
    %c0_225 = arith.constant 0 : index
    %366 = vector.load %arg18[%c141, %c0_225] : memref<196x16xf32, #tpu.memory_space<vmem>>, vector<12x16xf32>
    tpu.vector_store %arg18[%c141, %c0_225], %365 {strides = array<i32>} : memref<196x16xf32, #tpu.memory_space<vmem>>, vector<12x16xf32>,
    %c520 = arith.constant 520 : index
    %c0_226 = arith.constant 0 : index
    %367 = tpu.strided_load %arg17[%c520, %c0_226] {strides = array<i32: 2, 1>} : memref<622x16xf32, #tpu.memory_space<vmem>>, vector<12x16xf32>
    %c521 = arith.constant 521 : index
    %c0_227 = arith.constant 0 : index
    %368 = tpu.strided_load %arg17[%c521, %c0_227] {strides = array<i32: 2, 1>} : memref<622x16xf32, #tpu.memory_space<vmem>>, vector<12x16xf32>
    %c546 = arith.constant 546 : index
    %c0_228 = arith.constant 0 : index
    %369 = tpu.strided_load %arg17[%c546, %c0_228] {strides = array<i32: 2, 1>} : memref<622x16xf32, #tpu.memory_space<vmem>>, vector<12x16xf32>
    %c547 = arith.constant 547 : index
    %c0_229 = arith.constant 0 : index
    %370 = tpu.strided_load %arg17[%c547, %c0_229] {strides = array<i32: 2, 1>} : memref<622x16xf32, #tpu.memory_space<vmem>>, vector<12x16xf32>
    %371 = arith.maximumf %367, %368 : vector<12x16xf32>
    %372 = arith.maximumf %369, %370 : vector<12x16xf32>
    %373 = arith.maximumf %371, %372 : vector<12x16xf32>
    %c155_230 = arith.constant 155 : index
    %c0_231 = arith.constant 0 : index
    %374 = vector.load %arg18[%c155_230, %c0_231] : memref<196x16xf32, #tpu.memory_space<vmem>>, vector<12x16xf32>
    tpu.vector_store %arg18[%c155_230, %c0_231], %373 {strides = array<i32>} : memref<196x16xf32, #tpu.memory_space<vmem>>, vector<12x16xf32>,
    %c572 = arith.constant 572 : index
    %c0_232 = arith.constant 0 : index
    %375 = tpu.strided_load %arg17[%c572, %c0_232] {strides = array<i32: 2, 1>} : memref<622x16xf32, #tpu.memory_space<vmem>>, vector<12x16xf32>
    %c573 = arith.constant 573 : index
    %c0_233 = arith.constant 0 : index
    %376 = tpu.strided_load %arg17[%c573, %c0_233] {strides = array<i32: 2, 1>} : memref<622x16xf32, #tpu.memory_space<vmem>>, vector<12x16xf32>
    %c598 = arith.constant 598 : index
    %c0_234 = arith.constant 0 : index
    %377 = tpu.strided_load %arg17[%c598, %c0_234] {strides = array<i32: 2, 1>} : memref<622x16xf32, #tpu.memory_space<vmem>>, vector<12x16xf32>
    %c599 = arith.constant 599 : index
    %c0_235 = arith.constant 0 : index
    %378 = tpu.strided_load %arg17[%c599, %c0_235] {strides = array<i32: 2, 1>} : memref<622x16xf32, #tpu.memory_space<vmem>>, vector<12x16xf32>
    %379 = arith.maximumf %375, %376 : vector<12x16xf32>
    %380 = arith.maximumf %377, %378 : vector<12x16xf32>
    %381 = arith.maximumf %379, %380 : vector<12x16xf32>
    %c169 = arith.constant 169 : index
    %c0_236 = arith.constant 0 : index
    %382 = vector.load %arg18[%c169, %c0_236] : memref<196x16xf32, #tpu.memory_space<vmem>>, vector<12x16xf32>
    tpu.vector_store %arg18[%c169, %c0_236], %381 {strides = array<i32>} : memref<196x16xf32, #tpu.memory_space<vmem>>, vector<12x16xf32>,
    %c0_237 = arith.constant 0 : index
    %c0_238 = arith.constant 0 : index
    %c0_239 = arith.constant 0 : index
    %383 = vector.load %arg4[%c0_237, %c0_238, %c0_239] : memref<9x16x32xbf16, #tpu.memory_space<vmem>>, vector<9x16x32xbf16>
    %384 = vector.extract_strided_slice %383 {offsets = [0, 0, 0], sizes = [1, 16, 32], strides = [1, 1, 1]} : vector<9x16x32xbf16> to vector<1x16x32xbf16>
    %385 = vector.shape_cast %384 : vector<1x16x32xbf16> to vector<16x32xbf16>
    %386 = vector.extract_strided_slice %383 {offsets = [1, 0, 0], sizes = [1, 16, 32], strides = [1, 1, 1]} : vector<9x16x32xbf16> to vector<1x16x32xbf16>
    %387 = vector.shape_cast %386 : vector<1x16x32xbf16> to vector<16x32xbf16>
    %388 = vector.extract_strided_slice %383 {offsets = [2, 0, 0], sizes = [1, 16, 32], strides = [1, 1, 1]} : vector<9x16x32xbf16> to vector<1x16x32xbf16>
    %389 = vector.shape_cast %388 : vector<1x16x32xbf16> to vector<16x32xbf16>
    %390 = vector.extract_strided_slice %383 {offsets = [3, 0, 0], sizes = [1, 16, 32], strides = [1, 1, 1]} : vector<9x16x32xbf16> to vector<1x16x32xbf16>
    %391 = vector.shape_cast %390 : vector<1x16x32xbf16> to vector<16x32xbf16>
    %392 = vector.extract_strided_slice %383 {offsets = [4, 0, 0], sizes = [1, 16, 32], strides = [1, 1, 1]} : vector<9x16x32xbf16> to vector<1x16x32xbf16>
    %393 = vector.shape_cast %392 : vector<1x16x32xbf16> to vector<16x32xbf16>
    %394 = vector.extract_strided_slice %383 {offsets = [5, 0, 0], sizes = [1, 16, 32], strides = [1, 1, 1]} : vector<9x16x32xbf16> to vector<1x16x32xbf16>
    %395 = vector.shape_cast %394 : vector<1x16x32xbf16> to vector<16x32xbf16>
    %396 = vector.extract_strided_slice %383 {offsets = [6, 0, 0], sizes = [1, 16, 32], strides = [1, 1, 1]} : vector<9x16x32xbf16> to vector<1x16x32xbf16>
    %397 = vector.shape_cast %396 : vector<1x16x32xbf16> to vector<16x32xbf16>
    %398 = vector.extract_strided_slice %383 {offsets = [7, 0, 0], sizes = [1, 16, 32], strides = [1, 1, 1]} : vector<9x16x32xbf16> to vector<1x16x32xbf16>
    %399 = vector.shape_cast %398 : vector<1x16x32xbf16> to vector<16x32xbf16>
    %400 = vector.extract_strided_slice %383 {offsets = [8, 0, 0], sizes = [1, 16, 32], strides = [1, 1, 1]} : vector<9x16x32xbf16> to vector<1x16x32xbf16>
    %401 = vector.shape_cast %400 : vector<1x16x32xbf16> to vector<16x32xbf16>
    %c0_240 = arith.constant 0 : index
    %c0_241 = arith.constant 0 : index
    %402 = vector.load %arg5[%c0_240, %c0_241] : memref<1x32xf32, #tpu.memory_space<vmem>>, vector<1x32xf32>
    %cst_242 = arith.constant 0.000000e+00 : f32
    %403 = vector.broadcast %cst_242 : f32 to vector<128x32xf32>
    %cst_243 = arith.constant 0.000000e+00 : f32
    %404 = vector.broadcast %cst_243 : f32 to vector<128x32xf32>
    %c0_244 = arith.constant 0 : index
    %c0_245 = arith.constant 0 : index
    %405 = vector.load %arg18[%c0_244, %c0_245] : memref<196x16xf32, #tpu.memory_space<vmem>>, vector<128x16xf32>
    %406 = arith.truncf %405 : vector<128x16xf32> to vector<128x16xbf16>
    %cst_246 = arith.constant dense<0.000000e+00> : vector<128x32xf32>
    %407 = tpu.matmul %406, %385, %cst_246 {dimension_numbers = #tpu.dot_dimension_numbers<[1], [0], [0], [1], [0, 0, 1, 1], [], []>} : vector<128x16xbf16>, vector<16x32xbf16>, vector<128x32xf32> -> vector<128x32xf32>
    %408 = arith.addf %403, %407 : vector<128x32xf32>
    %c1_247 = arith.constant 1 : index
    %c0_248 = arith.constant 0 : index
    %409 = vector.load %arg18[%c1_247, %c0_248] : memref<196x16xf32, #tpu.memory_space<vmem>>, vector<128x16xf32>
    %410 = arith.truncf %409 : vector<128x16xf32> to vector<128x16xbf16>
    %cst_249 = arith.constant dense<0.000000e+00> : vector<128x32xf32>
    %411 = tpu.matmul %410, %387, %cst_249 {dimension_numbers = #tpu.dot_dimension_numbers<[1], [0], [0], [1], [0, 0, 1, 1], [], []>} : vector<128x16xbf16>, vector<16x32xbf16>, vector<128x32xf32> -> vector<128x32xf32>
    %412 = arith.addf %404, %411 : vector<128x32xf32>
    %c2_250 = arith.constant 2 : index
    %c0_251 = arith.constant 0 : index
    %413 = vector.load %arg18[%c2_250, %c0_251] : memref<196x16xf32, #tpu.memory_space<vmem>>, vector<128x16xf32>
    %414 = arith.truncf %413 : vector<128x16xf32> to vector<128x16xbf16>
    %cst_252 = arith.constant dense<0.000000e+00> : vector<128x32xf32>
    %415 = tpu.matmul %414, %389, %cst_252 {dimension_numbers = #tpu.dot_dimension_numbers<[1], [0], [0], [1], [0, 0, 1, 1], [], []>} : vector<128x16xbf16>, vector<16x32xbf16>, vector<128x32xf32> -> vector<128x32xf32>
    %416 = arith.addf %408, %415 : vector<128x32xf32>
    %c14 = arith.constant 14 : index
    %c0_253 = arith.constant 0 : index
    %417 = vector.load %arg18[%c14, %c0_253] : memref<196x16xf32, #tpu.memory_space<vmem>>, vector<128x16xf32>
    %418 = arith.truncf %417 : vector<128x16xf32> to vector<128x16xbf16>
    %cst_254 = arith.constant dense<0.000000e+00> : vector<128x32xf32>
    %419 = tpu.matmul %418, %391, %cst_254 {dimension_numbers = #tpu.dot_dimension_numbers<[1], [0], [0], [1], [0, 0, 1, 1], [], []>} : vector<128x16xbf16>, vector<16x32xbf16>, vector<128x32xf32> -> vector<128x32xf32>
    %420 = arith.addf %412, %419 : vector<128x32xf32>
    %c15_255 = arith.constant 15 : index
    %c0_256 = arith.constant 0 : index
    %421 = vector.load %arg18[%c15_255, %c0_256] : memref<196x16xf32, #tpu.memory_space<vmem>>, vector<128x16xf32>
    %422 = arith.truncf %421 : vector<128x16xf32> to vector<128x16xbf16>
    %cst_257 = arith.constant dense<0.000000e+00> : vector<128x32xf32>
    %423 = tpu.matmul %422, %393, %cst_257 {dimension_numbers = #tpu.dot_dimension_numbers<[1], [0], [0], [1], [0, 0, 1, 1], [], []>} : vector<128x16xbf16>, vector<16x32xbf16>, vector<128x32xf32> -> vector<128x32xf32>
    %424 = arith.addf %416, %423 : vector<128x32xf32>
    %c16 = arith.constant 16 : index
    %c0_258 = arith.constant 0 : index
    %425 = vector.load %arg18[%c16, %c0_258] : memref<196x16xf32, #tpu.memory_space<vmem>>, vector<128x16xf32>
    %426 = arith.truncf %425 : vector<128x16xf32> to vector<128x16xbf16>
    %cst_259 = arith.constant dense<0.000000e+00> : vector<128x32xf32>
    %427 = tpu.matmul %426, %395, %cst_259 {dimension_numbers = #tpu.dot_dimension_numbers<[1], [0], [0], [1], [0, 0, 1, 1], [], []>} : vector<128x16xbf16>, vector<16x32xbf16>, vector<128x32xf32> -> vector<128x32xf32>
    %428 = arith.addf %420, %427 : vector<128x32xf32>
    %c28_260 = arith.constant 28 : index
    %c0_261 = arith.constant 0 : index
    %429 = vector.load %arg18[%c28_260, %c0_261] : memref<196x16xf32, #tpu.memory_space<vmem>>, vector<128x16xf32>
    %430 = arith.truncf %429 : vector<128x16xf32> to vector<128x16xbf16>
    %cst_262 = arith.constant dense<0.000000e+00> : vector<128x32xf32>
    %431 = tpu.matmul %430, %397, %cst_262 {dimension_numbers = #tpu.dot_dimension_numbers<[1], [0], [0], [1], [0, 0, 1, 1], [], []>} : vector<128x16xbf16>, vector<16x32xbf16>, vector<128x32xf32> -> vector<128x32xf32>
    %432 = arith.addf %424, %431 : vector<128x32xf32>
    %c29_263 = arith.constant 29 : index
    %c0_264 = arith.constant 0 : index
    %433 = vector.load %arg18[%c29_263, %c0_264] : memref<196x16xf32, #tpu.memory_space<vmem>>, vector<128x16xf32>
    %434 = arith.truncf %433 : vector<128x16xf32> to vector<128x16xbf16>
    %cst_265 = arith.constant dense<0.000000e+00> : vector<128x32xf32>
    %435 = tpu.matmul %434, %399, %cst_265 {dimension_numbers = #tpu.dot_dimension_numbers<[1], [0], [0], [1], [0, 0, 1, 1], [], []>} : vector<128x16xbf16>, vector<16x32xbf16>, vector<128x32xf32> -> vector<128x32xf32>
    %436 = arith.addf %428, %435 : vector<128x32xf32>
    %c30 = arith.constant 30 : index
    %c0_266 = arith.constant 0 : index
    %437 = vector.load %arg18[%c30, %c0_266] : memref<196x16xf32, #tpu.memory_space<vmem>>, vector<128x16xf32>
    %438 = arith.truncf %437 : vector<128x16xf32> to vector<128x16xbf16>
    %cst_267 = arith.constant dense<0.000000e+00> : vector<128x32xf32>
    %439 = tpu.matmul %438, %401, %cst_267 {dimension_numbers = #tpu.dot_dimension_numbers<[1], [0], [0], [1], [0, 0, 1, 1], [], []>} : vector<128x16xbf16>, vector<16x32xbf16>, vector<128x32xf32> -> vector<128x32xf32>
    %440 = arith.addf %432, %439 : vector<128x32xf32>
    %441 = arith.addf %440, %436 : vector<128x32xf32>
    %442 = vector.broadcast %402 : vector<1x32xf32> to vector<128x32xf32>
    %443 = arith.addf %441, %442 : vector<128x32xf32>
    %cst_268 = arith.constant 0.000000e+00 : f32
    %444 = vector.broadcast %cst_268 : f32 to vector<128x32xf32>
    %445 = arith.maximumf %443, %444 : vector<128x32xf32>
    %c0_269 = arith.constant 0 : index
    %c0_270 = arith.constant 0 : index
    %446 = vector.load %arg19[%c0_269, %c0_270] : memref<166x32xf32, #tpu.memory_space<vmem>>, vector<128x32xf32>
    tpu.vector_store %arg19[%c0_269, %c0_270], %445 {strides = array<i32>} : memref<166x32xf32, #tpu.memory_space<vmem>>, vector<128x32xf32>,
    %cst_271 = arith.constant 0.000000e+00 : f32
    %447 = vector.broadcast %cst_271 : f32 to vector<38x32xf32>
    %cst_272 = arith.constant 0.000000e+00 : f32
    %448 = vector.broadcast %cst_272 : f32 to vector<38x32xf32>
    %c128_273 = arith.constant 128 : index
    %c0_274 = arith.constant 0 : index
    %449 = vector.load %arg18[%c128_273, %c0_274] : memref<196x16xf32, #tpu.memory_space<vmem>>, vector<38x16xf32>
    %450 = arith.truncf %449 : vector<38x16xf32> to vector<38x16xbf16>
    %cst_275 = arith.constant dense<0.000000e+00> : vector<38x32xf32>
    %451 = tpu.matmul %450, %385, %cst_275 {dimension_numbers = #tpu.dot_dimension_numbers<[1], [0], [0], [1], [0, 0, 1, 1], [], []>} : vector<38x16xbf16>, vector<16x32xbf16>, vector<38x32xf32> -> vector<38x32xf32>
    %452 = arith.addf %447, %451 : vector<38x32xf32>
    %c129_276 = arith.constant 129 : index
    %c0_277 = arith.constant 0 : index
    %453 = vector.load %arg18[%c129_276, %c0_277] : memref<196x16xf32, #tpu.memory_space<vmem>>, vector<38x16xf32>
    %454 = arith.truncf %453 : vector<38x16xf32> to vector<38x16xbf16>
    %cst_278 = arith.constant dense<0.000000e+00> : vector<38x32xf32>
    %455 = tpu.matmul %454, %387, %cst_278 {dimension_numbers = #tpu.dot_dimension_numbers<[1], [0], [0], [1], [0, 0, 1, 1], [], []>} : vector<38x16xbf16>, vector<16x32xbf16>, vector<38x32xf32> -> vector<38x32xf32>
    %456 = arith.addf %448, %455 : vector<38x32xf32>
    %c130_279 = arith.constant 130 : index
    %c0_280 = arith.constant 0 : index
    %457 = vector.load %arg18[%c130_279, %c0_280] : memref<196x16xf32, #tpu.memory_space<vmem>>, vector<38x16xf32>
    %458 = arith.truncf %457 : vector<38x16xf32> to vector<38x16xbf16>
    %cst_281 = arith.constant dense<0.000000e+00> : vector<38x32xf32>
    %459 = tpu.matmul %458, %389, %cst_281 {dimension_numbers = #tpu.dot_dimension_numbers<[1], [0], [0], [1], [0, 0, 1, 1], [], []>} : vector<38x16xbf16>, vector<16x32xbf16>, vector<38x32xf32> -> vector<38x32xf32>
    %460 = arith.addf %452, %459 : vector<38x32xf32>
    %c142 = arith.constant 142 : index
    %c0_282 = arith.constant 0 : index
    %461 = vector.load %arg18[%c142, %c0_282] : memref<196x16xf32, #tpu.memory_space<vmem>>, vector<38x16xf32>
    %462 = arith.truncf %461 : vector<38x16xf32> to vector<38x16xbf16>
    %cst_283 = arith.constant dense<0.000000e+00> : vector<38x32xf32>
    %463 = tpu.matmul %462, %391, %cst_283 {dimension_numbers = #tpu.dot_dimension_numbers<[1], [0], [0], [1], [0, 0, 1, 1], [], []>} : vector<38x16xbf16>, vector<16x32xbf16>, vector<38x32xf32> -> vector<38x32xf32>
    %464 = arith.addf %456, %463 : vector<38x32xf32>
    %c143 = arith.constant 143 : index
    %c0_284 = arith.constant 0 : index
    %465 = vector.load %arg18[%c143, %c0_284] : memref<196x16xf32, #tpu.memory_space<vmem>>, vector<38x16xf32>
    %466 = arith.truncf %465 : vector<38x16xf32> to vector<38x16xbf16>
    %cst_285 = arith.constant dense<0.000000e+00> : vector<38x32xf32>
    %467 = tpu.matmul %466, %393, %cst_285 {dimension_numbers = #tpu.dot_dimension_numbers<[1], [0], [0], [1], [0, 0, 1, 1], [], []>} : vector<38x16xbf16>, vector<16x32xbf16>, vector<38x32xf32> -> vector<38x32xf32>
    %468 = arith.addf %460, %467 : vector<38x32xf32>
    %c144 = arith.constant 144 : index
    %c0_286 = arith.constant 0 : index
    %469 = vector.load %arg18[%c144, %c0_286] : memref<196x16xf32, #tpu.memory_space<vmem>>, vector<38x16xf32>
    %470 = arith.truncf %469 : vector<38x16xf32> to vector<38x16xbf16>
    %cst_287 = arith.constant dense<0.000000e+00> : vector<38x32xf32>
    %471 = tpu.matmul %470, %395, %cst_287 {dimension_numbers = #tpu.dot_dimension_numbers<[1], [0], [0], [1], [0, 0, 1, 1], [], []>} : vector<38x16xbf16>, vector<16x32xbf16>, vector<38x32xf32> -> vector<38x32xf32>
    %472 = arith.addf %464, %471 : vector<38x32xf32>
    %c156_288 = arith.constant 156 : index
    %c0_289 = arith.constant 0 : index
    %473 = vector.load %arg18[%c156_288, %c0_289] : memref<196x16xf32, #tpu.memory_space<vmem>>, vector<38x16xf32>
    %474 = arith.truncf %473 : vector<38x16xf32> to vector<38x16xbf16>
    %cst_290 = arith.constant dense<0.000000e+00> : vector<38x32xf32>
    %475 = tpu.matmul %474, %397, %cst_290 {dimension_numbers = #tpu.dot_dimension_numbers<[1], [0], [0], [1], [0, 0, 1, 1], [], []>} : vector<38x16xbf16>, vector<16x32xbf16>, vector<38x32xf32> -> vector<38x32xf32>
    %476 = arith.addf %468, %475 : vector<38x32xf32>
    %c157_291 = arith.constant 157 : index
    %c0_292 = arith.constant 0 : index
    %477 = vector.load %arg18[%c157_291, %c0_292] : memref<196x16xf32, #tpu.memory_space<vmem>>, vector<38x16xf32>
    %478 = arith.truncf %477 : vector<38x16xf32> to vector<38x16xbf16>
    %cst_293 = arith.constant dense<0.000000e+00> : vector<38x32xf32>
    %479 = tpu.matmul %478, %399, %cst_293 {dimension_numbers = #tpu.dot_dimension_numbers<[1], [0], [0], [1], [0, 0, 1, 1], [], []>} : vector<38x16xbf16>, vector<16x32xbf16>, vector<38x32xf32> -> vector<38x32xf32>
    %480 = arith.addf %472, %479 : vector<38x32xf32>
    %c158 = arith.constant 158 : index
    %c0_294 = arith.constant 0 : index
    %481 = vector.load %arg18[%c158, %c0_294] : memref<196x16xf32, #tpu.memory_space<vmem>>, vector<38x16xf32>
    %482 = arith.truncf %481 : vector<38x16xf32> to vector<38x16xbf16>
    %cst_295 = arith.constant dense<0.000000e+00> : vector<38x32xf32>
    %483 = tpu.matmul %482, %401, %cst_295 {dimension_numbers = #tpu.dot_dimension_numbers<[1], [0], [0], [1], [0, 0, 1, 1], [], []>} : vector<38x16xbf16>, vector<16x32xbf16>, vector<38x32xf32> -> vector<38x32xf32>
    %484 = arith.addf %476, %483 : vector<38x32xf32>
    %485 = arith.addf %484, %480 : vector<38x32xf32>
    %486 = vector.broadcast %402 : vector<1x32xf32> to vector<38x32xf32>
    %487 = arith.addf %485, %486 : vector<38x32xf32>
    %cst_296 = arith.constant 0.000000e+00 : f32
    %488 = vector.broadcast %cst_296 : f32 to vector<38x32xf32>
    %489 = arith.maximumf %487, %488 : vector<38x32xf32>
    %c128_297 = arith.constant 128 : index
    %c0_298 = arith.constant 0 : index
    %490 = vector.load %arg19[%c128_297, %c0_298] : memref<166x32xf32, #tpu.memory_space<vmem>>, vector<38x32xf32>
    tpu.vector_store %arg19[%c128_297, %c0_298], %489 {strides = array<i32>} : memref<166x32xf32, #tpu.memory_space<vmem>>, vector<38x32xf32>,
    %cst_299 = arith.constant 0.000000e+00 : f32
    %491 = vector.broadcast %cst_299 : f32 to vector<64x32xf32>
    %c0_300 = arith.constant 0 : index
    %c0_301 = arith.constant 0 : index
    %492 = vector.load %arg20[%c0_300, %c0_301] : memref<64x32xf32, #tpu.memory_space<vmem>>, vector<64x32xf32>
    tpu.vector_store %arg20[%c0_300, %c0_301], %491 {strides = array<i32>} : memref<64x32xf32, #tpu.memory_space<vmem>>, vector<64x32xf32>,
    %c0_302 = arith.constant 0 : index
    %c0_303 = arith.constant 0 : index
    %493 = tpu.strided_load %arg19[%c0_302, %c0_303] {strides = array<i32: 2, 1>} : memref<166x32xf32, #tpu.memory_space<vmem>>, vector<6x32xf32>
    %c1_304 = arith.constant 1 : index
    %c0_305 = arith.constant 0 : index
    %494 = tpu.strided_load %arg19[%c1_304, %c0_305] {strides = array<i32: 2, 1>} : memref<166x32xf32, #tpu.memory_space<vmem>>, vector<6x32xf32>
    %c14_306 = arith.constant 14 : index
    %c0_307 = arith.constant 0 : index
    %495 = tpu.strided_load %arg19[%c14_306, %c0_307] {strides = array<i32: 2, 1>} : memref<166x32xf32, #tpu.memory_space<vmem>>, vector<6x32xf32>
    %c15_308 = arith.constant 15 : index
    %c0_309 = arith.constant 0 : index
    %496 = tpu.strided_load %arg19[%c15_308, %c0_309] {strides = array<i32: 2, 1>} : memref<166x32xf32, #tpu.memory_space<vmem>>, vector<6x32xf32>
    %497 = arith.maximumf %493, %494 : vector<6x32xf32>
    %498 = arith.maximumf %495, %496 : vector<6x32xf32>
    %499 = arith.maximumf %497, %498 : vector<6x32xf32>
    %c9 = arith.constant 9 : index
    %c0_310 = arith.constant 0 : index
    %500 = vector.load %arg20[%c9, %c0_310] : memref<64x32xf32, #tpu.memory_space<vmem>>, vector<6x32xf32>
    tpu.vector_store %arg20[%c9, %c0_310], %499 {strides = array<i32>} : memref<64x32xf32, #tpu.memory_space<vmem>>, vector<6x32xf32>,
    %c28_311 = arith.constant 28 : index
    %c0_312 = arith.constant 0 : index
    %501 = tpu.strided_load %arg19[%c28_311, %c0_312] {strides = array<i32: 2, 1>} : memref<166x32xf32, #tpu.memory_space<vmem>>, vector<6x32xf32>
    %c29_313 = arith.constant 29 : index
    %c0_314 = arith.constant 0 : index
    %502 = tpu.strided_load %arg19[%c29_313, %c0_314] {strides = array<i32: 2, 1>} : memref<166x32xf32, #tpu.memory_space<vmem>>, vector<6x32xf32>
    %c42 = arith.constant 42 : index
    %c0_315 = arith.constant 0 : index
    %503 = tpu.strided_load %arg19[%c42, %c0_315] {strides = array<i32: 2, 1>} : memref<166x32xf32, #tpu.memory_space<vmem>>, vector<6x32xf32>
    %c43_316 = arith.constant 43 : index
    %c0_317 = arith.constant 0 : index
    %504 = tpu.strided_load %arg19[%c43_316, %c0_317] {strides = array<i32: 2, 1>} : memref<166x32xf32, #tpu.memory_space<vmem>>, vector<6x32xf32>
    %505 = arith.maximumf %501, %502 : vector<6x32xf32>
    %506 = arith.maximumf %503, %504 : vector<6x32xf32>
    %507 = arith.maximumf %505, %506 : vector<6x32xf32>
    %c17 = arith.constant 17 : index
    %c0_318 = arith.constant 0 : index
    %508 = vector.load %arg20[%c17, %c0_318] : memref<64x32xf32, #tpu.memory_space<vmem>>, vector<6x32xf32>
    tpu.vector_store %arg20[%c17, %c0_318], %507 {strides = array<i32>} : memref<64x32xf32, #tpu.memory_space<vmem>>, vector<6x32xf32>,
    %c56 = arith.constant 56 : index
    %c0_319 = arith.constant 0 : index
    %509 = tpu.strided_load %arg19[%c56, %c0_319] {strides = array<i32: 2, 1>} : memref<166x32xf32, #tpu.memory_space<vmem>>, vector<6x32xf32>
    %c57_320 = arith.constant 57 : index
    %c0_321 = arith.constant 0 : index
    %510 = tpu.strided_load %arg19[%c57_320, %c0_321] {strides = array<i32: 2, 1>} : memref<166x32xf32, #tpu.memory_space<vmem>>, vector<6x32xf32>
    %c70 = arith.constant 70 : index
    %c0_322 = arith.constant 0 : index
    %511 = tpu.strided_load %arg19[%c70, %c0_322] {strides = array<i32: 2, 1>} : memref<166x32xf32, #tpu.memory_space<vmem>>, vector<6x32xf32>
    %c71_323 = arith.constant 71 : index
    %c0_324 = arith.constant 0 : index
    %512 = tpu.strided_load %arg19[%c71_323, %c0_324] {strides = array<i32: 2, 1>} : memref<166x32xf32, #tpu.memory_space<vmem>>, vector<6x32xf32>
    %513 = arith.maximumf %509, %510 : vector<6x32xf32>
    %514 = arith.maximumf %511, %512 : vector<6x32xf32>
    %515 = arith.maximumf %513, %514 : vector<6x32xf32>
    %c25 = arith.constant 25 : index
    %c0_325 = arith.constant 0 : index
    %516 = vector.load %arg20[%c25, %c0_325] : memref<64x32xf32, #tpu.memory_space<vmem>>, vector<6x32xf32>
    tpu.vector_store %arg20[%c25, %c0_325], %515 {strides = array<i32>} : memref<64x32xf32, #tpu.memory_space<vmem>>, vector<6x32xf32>,
    %c84 = arith.constant 84 : index
    %c0_326 = arith.constant 0 : index
    %517 = tpu.strided_load %arg19[%c84, %c0_326] {strides = array<i32: 2, 1>} : memref<166x32xf32, #tpu.memory_space<vmem>>, vector<6x32xf32>
    %c85_327 = arith.constant 85 : index
    %c0_328 = arith.constant 0 : index
    %518 = tpu.strided_load %arg19[%c85_327, %c0_328] {strides = array<i32: 2, 1>} : memref<166x32xf32, #tpu.memory_space<vmem>>, vector<6x32xf32>
    %c98 = arith.constant 98 : index
    %c0_329 = arith.constant 0 : index
    %519 = tpu.strided_load %arg19[%c98, %c0_329] {strides = array<i32: 2, 1>} : memref<166x32xf32, #tpu.memory_space<vmem>>, vector<6x32xf32>
    %c99_330 = arith.constant 99 : index
    %c0_331 = arith.constant 0 : index
    %520 = tpu.strided_load %arg19[%c99_330, %c0_331] {strides = array<i32: 2, 1>} : memref<166x32xf32, #tpu.memory_space<vmem>>, vector<6x32xf32>
    %521 = arith.maximumf %517, %518 : vector<6x32xf32>
    %522 = arith.maximumf %519, %520 : vector<6x32xf32>
    %523 = arith.maximumf %521, %522 : vector<6x32xf32>
    %c33 = arith.constant 33 : index
    %c0_332 = arith.constant 0 : index
    %524 = vector.load %arg20[%c33, %c0_332] : memref<64x32xf32, #tpu.memory_space<vmem>>, vector<6x32xf32>
    tpu.vector_store %arg20[%c33, %c0_332], %523 {strides = array<i32>} : memref<64x32xf32, #tpu.memory_space<vmem>>, vector<6x32xf32>,
    %c112 = arith.constant 112 : index
    %c0_333 = arith.constant 0 : index
    %525 = tpu.strided_load %arg19[%c112, %c0_333] {strides = array<i32: 2, 1>} : memref<166x32xf32, #tpu.memory_space<vmem>>, vector<6x32xf32>
    %c113_334 = arith.constant 113 : index
    %c0_335 = arith.constant 0 : index
    %526 = tpu.strided_load %arg19[%c113_334, %c0_335] {strides = array<i32: 2, 1>} : memref<166x32xf32, #tpu.memory_space<vmem>>, vector<6x32xf32>
    %c126 = arith.constant 126 : index
    %c0_336 = arith.constant 0 : index
    %527 = tpu.strided_load %arg19[%c126, %c0_336] {strides = array<i32: 2, 1>} : memref<166x32xf32, #tpu.memory_space<vmem>>, vector<6x32xf32>
    %c127_337 = arith.constant 127 : index
    %c0_338 = arith.constant 0 : index
    %528 = tpu.strided_load %arg19[%c127_337, %c0_338] {strides = array<i32: 2, 1>} : memref<166x32xf32, #tpu.memory_space<vmem>>, vector<6x32xf32>
    %529 = arith.maximumf %525, %526 : vector<6x32xf32>
    %530 = arith.maximumf %527, %528 : vector<6x32xf32>
    %531 = arith.maximumf %529, %530 : vector<6x32xf32>
    %c41 = arith.constant 41 : index
    %c0_339 = arith.constant 0 : index
    %532 = vector.load %arg20[%c41, %c0_339] : memref<64x32xf32, #tpu.memory_space<vmem>>, vector<6x32xf32>
    tpu.vector_store %arg20[%c41, %c0_339], %531 {strides = array<i32>} : memref<64x32xf32, #tpu.memory_space<vmem>>, vector<6x32xf32>,
    %c140 = arith.constant 140 : index
    %c0_340 = arith.constant 0 : index
    %533 = tpu.strided_load %arg19[%c140, %c0_340] {strides = array<i32: 2, 1>} : memref<166x32xf32, #tpu.memory_space<vmem>>, vector<6x32xf32>
    %c141_341 = arith.constant 141 : index
    %c0_342 = arith.constant 0 : index
    %534 = tpu.strided_load %arg19[%c141_341, %c0_342] {strides = array<i32: 2, 1>} : memref<166x32xf32, #tpu.memory_space<vmem>>, vector<6x32xf32>
    %c154_343 = arith.constant 154 : index
    %c0_344 = arith.constant 0 : index
    %535 = tpu.strided_load %arg19[%c154_343, %c0_344] {strides = array<i32: 2, 1>} : memref<166x32xf32, #tpu.memory_space<vmem>>, vector<6x32xf32>
    %c155_345 = arith.constant 155 : index
    %c0_346 = arith.constant 0 : index
    %536 = tpu.strided_load %arg19[%c155_345, %c0_346] {strides = array<i32: 2, 1>} : memref<166x32xf32, #tpu.memory_space<vmem>>, vector<6x32xf32>
    %537 = arith.maximumf %533, %534 : vector<6x32xf32>
    %538 = arith.maximumf %535, %536 : vector<6x32xf32>
    %539 = arith.maximumf %537, %538 : vector<6x32xf32>
    %c49 = arith.constant 49 : index
    %c0_347 = arith.constant 0 : index
    %540 = vector.load %arg20[%c49, %c0_347] : memref<64x32xf32, #tpu.memory_space<vmem>>, vector<6x32xf32>
    tpu.vector_store %arg20[%c49, %c0_347], %539 {strides = array<i32>} : memref<64x32xf32, #tpu.memory_space<vmem>>, vector<6x32xf32>,
    %c0_348 = arith.constant 0 : index
    %c0_349 = arith.constant 0 : index
    %c0_350 = arith.constant 0 : index
    %541 = vector.load %arg6[%c0_348, %c0_349, %c0_350] : memref<9x32x64xbf16, #tpu.memory_space<vmem>>, vector<9x32x64xbf16>
    %542 = vector.extract_strided_slice %541 {offsets = [0, 0, 0], sizes = [1, 32, 64], strides = [1, 1, 1]} : vector<9x32x64xbf16> to vector<1x32x64xbf16>
    %543 = vector.shape_cast %542 : vector<1x32x64xbf16> to vector<32x64xbf16>
    %544 = vector.extract_strided_slice %541 {offsets = [1, 0, 0], sizes = [1, 32, 64], strides = [1, 1, 1]} : vector<9x32x64xbf16> to vector<1x32x64xbf16>
    %545 = vector.shape_cast %544 : vector<1x32x64xbf16> to vector<32x64xbf16>
    %546 = vector.extract_strided_slice %541 {offsets = [2, 0, 0], sizes = [1, 32, 64], strides = [1, 1, 1]} : vector<9x32x64xbf16> to vector<1x32x64xbf16>
    %547 = vector.shape_cast %546 : vector<1x32x64xbf16> to vector<32x64xbf16>
    %548 = vector.extract_strided_slice %541 {offsets = [3, 0, 0], sizes = [1, 32, 64], strides = [1, 1, 1]} : vector<9x32x64xbf16> to vector<1x32x64xbf16>
    %549 = vector.shape_cast %548 : vector<1x32x64xbf16> to vector<32x64xbf16>
    %550 = vector.extract_strided_slice %541 {offsets = [4, 0, 0], sizes = [1, 32, 64], strides = [1, 1, 1]} : vector<9x32x64xbf16> to vector<1x32x64xbf16>
    %551 = vector.shape_cast %550 : vector<1x32x64xbf16> to vector<32x64xbf16>
    %552 = vector.extract_strided_slice %541 {offsets = [5, 0, 0], sizes = [1, 32, 64], strides = [1, 1, 1]} : vector<9x32x64xbf16> to vector<1x32x64xbf16>
    %553 = vector.shape_cast %552 : vector<1x32x64xbf16> to vector<32x64xbf16>
    %554 = vector.extract_strided_slice %541 {offsets = [6, 0, 0], sizes = [1, 32, 64], strides = [1, 1, 1]} : vector<9x32x64xbf16> to vector<1x32x64xbf16>
    %555 = vector.shape_cast %554 : vector<1x32x64xbf16> to vector<32x64xbf16>
    %556 = vector.extract_strided_slice %541 {offsets = [7, 0, 0], sizes = [1, 32, 64], strides = [1, 1, 1]} : vector<9x32x64xbf16> to vector<1x32x64xbf16>
    %557 = vector.shape_cast %556 : vector<1x32x64xbf16> to vector<32x64xbf16>
    %558 = vector.extract_strided_slice %541 {offsets = [8, 0, 0], sizes = [1, 32, 64], strides = [1, 1, 1]} : vector<9x32x64xbf16> to vector<1x32x64xbf16>
    %559 = vector.shape_cast %558 : vector<1x32x64xbf16> to vector<32x64xbf16>
    %c0_351 = arith.constant 0 : index
    %c0_352 = arith.constant 0 : index
    %560 = vector.load %arg7[%c0_351, %c0_352] : memref<1x64xf32, #tpu.memory_space<vmem>>, vector<1x64xf32>
    %cst_353 = arith.constant 0.000000e+00 : f32
    %561 = vector.broadcast %cst_353 : f32 to vector<46x64xf32>
    %cst_354 = arith.constant 0.000000e+00 : f32
    %562 = vector.broadcast %cst_354 : f32 to vector<46x64xf32>
    %c0_355 = arith.constant 0 : index
    %c0_356 = arith.constant 0 : index
    %563 = vector.load %arg20[%c0_355, %c0_356] : memref<64x32xf32, #tpu.memory_space<vmem>>, vector<46x32xf32>
    %564 = arith.truncf %563 : vector<46x32xf32> to vector<46x32xbf16>
    %cst_357 = arith.constant dense<0.000000e+00> : vector<46x64xf32>
    %565 = tpu.matmul %564, %543, %cst_357 {dimension_numbers = #tpu.dot_dimension_numbers<[1], [0], [0], [1], [0, 0, 1, 1], [], []>} : vector<46x32xbf16>, vector<32x64xbf16>, vector<46x64xf32> -> vector<46x64xf32>
    %566 = arith.addf %561, %565 : vector<46x64xf32>
    %c1_358 = arith.constant 1 : index
    %c0_359 = arith.constant 0 : index
    %567 = vector.load %arg20[%c1_358, %c0_359] : memref<64x32xf32, #tpu.memory_space<vmem>>, vector<46x32xf32>
    %568 = arith.truncf %567 : vector<46x32xf32> to vector<46x32xbf16>
    %cst_360 = arith.constant dense<0.000000e+00> : vector<46x64xf32>
    %569 = tpu.matmul %568, %545, %cst_360 {dimension_numbers = #tpu.dot_dimension_numbers<[1], [0], [0], [1], [0, 0, 1, 1], [], []>} : vector<46x32xbf16>, vector<32x64xbf16>, vector<46x64xf32> -> vector<46x64xf32>
    %570 = arith.addf %562, %569 : vector<46x64xf32>
    %c2_361 = arith.constant 2 : index
    %c0_362 = arith.constant 0 : index
    %571 = vector.load %arg20[%c2_361, %c0_362] : memref<64x32xf32, #tpu.memory_space<vmem>>, vector<46x32xf32>
    %572 = arith.truncf %571 : vector<46x32xf32> to vector<46x32xbf16>
    %cst_363 = arith.constant dense<0.000000e+00> : vector<46x64xf32>
    %573 = tpu.matmul %572, %547, %cst_363 {dimension_numbers = #tpu.dot_dimension_numbers<[1], [0], [0], [1], [0, 0, 1, 1], [], []>} : vector<46x32xbf16>, vector<32x64xbf16>, vector<46x64xf32> -> vector<46x64xf32>
    %574 = arith.addf %566, %573 : vector<46x64xf32>
    %c8 = arith.constant 8 : index
    %c0_364 = arith.constant 0 : index
    %575 = vector.load %arg20[%c8, %c0_364] : memref<64x32xf32, #tpu.memory_space<vmem>>, vector<46x32xf32>
    %576 = arith.truncf %575 : vector<46x32xf32> to vector<46x32xbf16>
    %cst_365 = arith.constant dense<0.000000e+00> : vector<46x64xf32>
    %577 = tpu.matmul %576, %549, %cst_365 {dimension_numbers = #tpu.dot_dimension_numbers<[1], [0], [0], [1], [0, 0, 1, 1], [], []>} : vector<46x32xbf16>, vector<32x64xbf16>, vector<46x64xf32> -> vector<46x64xf32>
    %578 = arith.addf %570, %577 : vector<46x64xf32>
    %c9_366 = arith.constant 9 : index
    %c0_367 = arith.constant 0 : index
    %579 = vector.load %arg20[%c9_366, %c0_367] : memref<64x32xf32, #tpu.memory_space<vmem>>, vector<46x32xf32>
    %580 = arith.truncf %579 : vector<46x32xf32> to vector<46x32xbf16>
    %cst_368 = arith.constant dense<0.000000e+00> : vector<46x64xf32>
    %581 = tpu.matmul %580, %551, %cst_368 {dimension_numbers = #tpu.dot_dimension_numbers<[1], [0], [0], [1], [0, 0, 1, 1], [], []>} : vector<46x32xbf16>, vector<32x64xbf16>, vector<46x64xf32> -> vector<46x64xf32>
    %582 = arith.addf %574, %581 : vector<46x64xf32>
    %c10 = arith.constant 10 : index
    %c0_369 = arith.constant 0 : index
    %583 = vector.load %arg20[%c10, %c0_369] : memref<64x32xf32, #tpu.memory_space<vmem>>, vector<46x32xf32>
    %584 = arith.truncf %583 : vector<46x32xf32> to vector<46x32xbf16>
    %cst_370 = arith.constant dense<0.000000e+00> : vector<46x64xf32>
    %585 = tpu.matmul %584, %553, %cst_370 {dimension_numbers = #tpu.dot_dimension_numbers<[1], [0], [0], [1], [0, 0, 1, 1], [], []>} : vector<46x32xbf16>, vector<32x64xbf16>, vector<46x64xf32> -> vector<46x64xf32>
    %586 = arith.addf %578, %585 : vector<46x64xf32>
    %c16_371 = arith.constant 16 : index
    %c0_372 = arith.constant 0 : index
    %587 = vector.load %arg20[%c16_371, %c0_372] : memref<64x32xf32, #tpu.memory_space<vmem>>, vector<46x32xf32>
    %588 = arith.truncf %587 : vector<46x32xf32> to vector<46x32xbf16>
    %cst_373 = arith.constant dense<0.000000e+00> : vector<46x64xf32>
    %589 = tpu.matmul %588, %555, %cst_373 {dimension_numbers = #tpu.dot_dimension_numbers<[1], [0], [0], [1], [0, 0, 1, 1], [], []>} : vector<46x32xbf16>, vector<32x64xbf16>, vector<46x64xf32> -> vector<46x64xf32>
    %590 = arith.addf %582, %589 : vector<46x64xf32>
    %c17_374 = arith.constant 17 : index
    %c0_375 = arith.constant 0 : index
    %591 = vector.load %arg20[%c17_374, %c0_375] : memref<64x32xf32, #tpu.memory_space<vmem>>, vector<46x32xf32>
    %592 = arith.truncf %591 : vector<46x32xf32> to vector<46x32xbf16>
    %cst_376 = arith.constant dense<0.000000e+00> : vector<46x64xf32>
    %593 = tpu.matmul %592, %557, %cst_376 {dimension_numbers = #tpu.dot_dimension_numbers<[1], [0], [0], [1], [0, 0, 1, 1], [], []>} : vector<46x32xbf16>, vector<32x64xbf16>, vector<46x64xf32> -> vector<46x64xf32>
    %594 = arith.addf %586, %593 : vector<46x64xf32>
    %c18 = arith.constant 18 : index
    %c0_377 = arith.constant 0 : index
    %595 = vector.load %arg20[%c18, %c0_377] : memref<64x32xf32, #tpu.memory_space<vmem>>, vector<46x32xf32>
    %596 = arith.truncf %595 : vector<46x32xf32> to vector<46x32xbf16>
    %cst_378 = arith.constant dense<0.000000e+00> : vector<46x64xf32>
    %597 = tpu.matmul %596, %559, %cst_378 {dimension_numbers = #tpu.dot_dimension_numbers<[1], [0], [0], [1], [0, 0, 1, 1], [], []>} : vector<46x32xbf16>, vector<32x64xbf16>, vector<46x64xf32> -> vector<46x64xf32>
    %598 = arith.addf %590, %597 : vector<46x64xf32>
    %599 = arith.addf %598, %594 : vector<46x64xf32>
    %600 = vector.broadcast %560 : vector<1x64xf32> to vector<46x64xf32>
    %601 = arith.addf %599, %600 : vector<46x64xf32>
    %cst_379 = arith.constant 0.000000e+00 : f32
    %602 = vector.broadcast %cst_379 : f32 to vector<46x64xf32>
    %603 = arith.maximumf %601, %602 : vector<46x64xf32>
    %c0_380 = arith.constant 0 : index
    %c0_381 = arith.constant 0 : index
    %604 = vector.load %arg21[%c0_380, %c0_381] : memref<46x64xf32, #tpu.memory_space<vmem>>, vector<46x64xf32>
    tpu.vector_store %arg21[%c0_380, %c0_381], %603 {strides = array<i32>} : memref<46x64xf32, #tpu.memory_space<vmem>>, vector<46x64xf32>,
    %c0_382 = arith.constant 0 : index
    %c0_383 = arith.constant 0 : index
    %605 = tpu.strided_load %arg21[%c0_382, %c0_383] {strides = array<i32: 2, 1>} : memref<46x64xf32, #tpu.memory_space<vmem>>, vector<3x64xf32>
    %c1_384 = arith.constant 1 : index
    %c0_385 = arith.constant 0 : index
    %606 = tpu.strided_load %arg21[%c1_384, %c0_385] {strides = array<i32: 2, 1>} : memref<46x64xf32, #tpu.memory_space<vmem>>, vector<3x64xf32>
    %c8_386 = arith.constant 8 : index
    %c0_387 = arith.constant 0 : index
    %607 = tpu.strided_load %arg21[%c8_386, %c0_387] {strides = array<i32: 2, 1>} : memref<46x64xf32, #tpu.memory_space<vmem>>, vector<3x64xf32>
    %c9_388 = arith.constant 9 : index
    %c0_389 = arith.constant 0 : index
    %608 = tpu.strided_load %arg21[%c9_388, %c0_389] {strides = array<i32: 2, 1>} : memref<46x64xf32, #tpu.memory_space<vmem>>, vector<3x64xf32>
    %609 = arith.maximumf %605, %606 : vector<3x64xf32>
    %610 = arith.maximumf %607, %608 : vector<3x64xf32>
    %611 = arith.maximumf %609, %610 : vector<3x64xf32>
    %c0_390 = arith.constant 0 : index
    %c0_391 = arith.constant 0 : index
    %612 = vector.load %arg22[%c0_390, %c0_391] : memref<9x64xf32, #tpu.memory_space<vmem>>, vector<3x64xf32>
    tpu.vector_store %arg22[%c0_390, %c0_391], %611 {strides = array<i32>} : memref<9x64xf32, #tpu.memory_space<vmem>>, vector<3x64xf32>,
    %c16_392 = arith.constant 16 : index
    %c0_393 = arith.constant 0 : index
    %613 = tpu.strided_load %arg21[%c16_392, %c0_393] {strides = array<i32: 2, 1>} : memref<46x64xf32, #tpu.memory_space<vmem>>, vector<3x64xf32>
    %c17_394 = arith.constant 17 : index
    %c0_395 = arith.constant 0 : index
    %614 = tpu.strided_load %arg21[%c17_394, %c0_395] {strides = array<i32: 2, 1>} : memref<46x64xf32, #tpu.memory_space<vmem>>, vector<3x64xf32>
    %c24 = arith.constant 24 : index
    %c0_396 = arith.constant 0 : index
    %615 = tpu.strided_load %arg21[%c24, %c0_396] {strides = array<i32: 2, 1>} : memref<46x64xf32, #tpu.memory_space<vmem>>, vector<3x64xf32>
    %c25_397 = arith.constant 25 : index
    %c0_398 = arith.constant 0 : index
    %616 = tpu.strided_load %arg21[%c25_397, %c0_398] {strides = array<i32: 2, 1>} : memref<46x64xf32, #tpu.memory_space<vmem>>, vector<3x64xf32>
    %617 = arith.maximumf %613, %614 : vector<3x64xf32>
    %618 = arith.maximumf %615, %616 : vector<3x64xf32>
    %619 = arith.maximumf %617, %618 : vector<3x64xf32>
    %c3 = arith.constant 3 : index
    %c0_399 = arith.constant 0 : index
    %620 = vector.load %arg22[%c3, %c0_399] : memref<9x64xf32, #tpu.memory_space<vmem>>, vector<3x64xf32>
    tpu.vector_store %arg22[%c3, %c0_399], %619 {strides = array<i32>} : memref<9x64xf32, #tpu.memory_space<vmem>>, vector<3x64xf32>,
    %c32 = arith.constant 32 : index
    %c0_400 = arith.constant 0 : index
    %621 = tpu.strided_load %arg21[%c32, %c0_400] {strides = array<i32: 2, 1>} : memref<46x64xf32, #tpu.memory_space<vmem>>, vector<3x64xf32>
    %c33_401 = arith.constant 33 : index
    %c0_402 = arith.constant 0 : index
    %622 = tpu.strided_load %arg21[%c33_401, %c0_402] {strides = array<i32: 2, 1>} : memref<46x64xf32, #tpu.memory_space<vmem>>, vector<3x64xf32>
    %c40 = arith.constant 40 : index
    %c0_403 = arith.constant 0 : index
    %623 = tpu.strided_load %arg21[%c40, %c0_403] {strides = array<i32: 2, 1>} : memref<46x64xf32, #tpu.memory_space<vmem>>, vector<3x64xf32>
    %c41_404 = arith.constant 41 : index
    %c0_405 = arith.constant 0 : index
    %624 = tpu.strided_load %arg21[%c41_404, %c0_405] {strides = array<i32: 2, 1>} : memref<46x64xf32, #tpu.memory_space<vmem>>, vector<3x64xf32>
    %625 = arith.maximumf %621, %622 : vector<3x64xf32>
    %626 = arith.maximumf %623, %624 : vector<3x64xf32>
    %627 = arith.maximumf %625, %626 : vector<3x64xf32>
    %c6 = arith.constant 6 : index
    %c0_406 = arith.constant 0 : index
    %628 = vector.load %arg22[%c6, %c0_406] : memref<9x64xf32, #tpu.memory_space<vmem>>, vector<3x64xf32>
    tpu.vector_store %arg22[%c6, %c0_406], %627 {strides = array<i32>} : memref<9x64xf32, #tpu.memory_space<vmem>>, vector<3x64xf32>,
    %c0_407 = arith.constant 0 : index
    %c0_408 = arith.constant 0 : index
    %629 = vector.load %arg22[%c0_407, %c0_408] : memref<9x64xf32, #tpu.memory_space<vmem>>, vector<9x64xf32>
    %630 = arith.truncf %629 : vector<9x64xf32> to vector<9x64xbf16>
    %c0_409 = arith.constant 0 : index
    %c0_410 = arith.constant 0 : index
    %631 = vector.load %arg8[%c0_409, %c0_410] : memref<64x64xbf16, #tpu.memory_space<vmem>>, vector<64x64xbf16>
    %cst_411 = arith.constant dense<0.000000e+00> : vector<9x64xf32>
    %632 = tpu.matmul %630, %631, %cst_411 {dimension_numbers = #tpu.dot_dimension_numbers<[1], [0], [0], [1], [0, 0, 1, 1], [], []>} : vector<9x64xbf16>, vector<64x64xbf16>, vector<9x64xf32> -> vector<9x64xf32>
    %c0_412 = arith.constant 0 : index
    %c0_413 = arith.constant 0 : index
    %633 = vector.load %arg9[%c0_412, %c0_413] : memref<1x64xf32, #tpu.memory_space<vmem>>, vector<1x64xf32>
    %634 = vector.broadcast %633 : vector<1x64xf32> to vector<9x64xf32>
    %635 = arith.addf %632, %634 : vector<9x64xf32>
    %636 = arith.mulf %629, %629 : vector<9x64xf32>
    %cst_414 = arith.constant dense<0.000000e+00> : vector<9xf32>
    %637 = vector.multi_reduction <add>, %636, %cst_414 [1] : vector<9x64xf32> to vector<9xf32>
    %638 = vector.shape_cast %637 : vector<9xf32> to vector<9x1xf32>
    %639 = math.sqrt %638 : vector<9x1xf32>
    %cst_415 = arith.constant 9.99999996E-13 : f32
    %640 = vector.broadcast %cst_415 : f32 to vector<9x1xf32>
    %641 = arith.maximumf %639, %640 : vector<9x1xf32>
    %642 = vector.broadcast %641 : vector<9x1xf32> to vector<9x64xf32>
    %643 = arith.divf %629, %642 : vector<9x64xf32>
    %644 = arith.mulf %635, %635 : vector<9x64xf32>
    %cst_416 = arith.constant dense<0.000000e+00> : vector<9xf32>
    %645 = vector.multi_reduction <add>, %644, %cst_416 [1] : vector<9x64xf32> to vector<9xf32>
    %646 = vector.shape_cast %645 : vector<9xf32> to vector<9x1xf32>
    %647 = math.sqrt %646 : vector<9x1xf32>
    %cst_417 = arith.constant 9.99999996E-13 : f32
    %648 = vector.broadcast %cst_417 : f32 to vector<9x1xf32>
    %649 = arith.maximumf %647, %648 : vector<9x1xf32>
    %650 = vector.broadcast %649 : vector<9x1xf32> to vector<9x64xf32>
    %651 = arith.divf %635, %650 : vector<9x64xf32>
    %652 = arith.mulf %643, %651 : vector<9x64xf32>
    %cst_418 = arith.constant dense<0.000000e+00> : vector<9xf32>
    %653 = vector.multi_reduction <add>, %652, %cst_418 [1] : vector<9x64xf32> to vector<9xf32>
    %654 = vector.shape_cast %653 : vector<9xf32> to vector<9x1xf32>
    %655 = arith.negf %654 : vector<9x1xf32>
    %656 = math.exp %655 : vector<9x1xf32>
    %cst_419 = arith.constant 1.000000e+00 : f32
    %657 = vector.broadcast %cst_419 : f32 to vector<9x1xf32>
    %658 = arith.addf %657, %656 : vector<9x1xf32>
    %659 = arith.divf %657, %658 : vector<9x1xf32>
    %660 = vector.broadcast %659 : vector<9x1xf32> to vector<9x64xf32>
    %661 = arith.mulf %660, %635 : vector<9x64xf32>
    %cst_420 = arith.constant 1.000000e+00 : f32
    %662 = vector.broadcast %cst_420 : f32 to vector<9x1xf32>
    %663 = arith.subf %662, %659 : vector<9x1xf32>
    %664 = vector.broadcast %663 : vector<9x1xf32> to vector<9x64xf32>
    %665 = arith.mulf %664, %629 : vector<9x64xf32>
    %666 = arith.addf %661, %665 : vector<9x64xf32>
    %cst_421 = arith.constant 0.000000e+00 : f32
    %667 = vector.broadcast %cst_421 : f32 to vector<1x128xf32>
    %cst_422 = arith.constant 0.000000e+00 : f32
    %668 = vector.broadcast %cst_422 : f32 to vector<1x128xf32>
    %669 = vector.extract_strided_slice %666 {offsets = [0, 0], sizes = [1, 64], strides = [1, 1]} : vector<9x64xf32> to vector<1x64xf32>
    %670 = arith.truncf %669 : vector<1x64xf32> to vector<1x64xbf16>
    %c0_423 = arith.constant 0 : index
    %c0_424 = arith.constant 0 : index
    %c0_425 = arith.constant 0 : index
    %671 = vector.load %arg10[%c0_423, %c0_424, %c0_425] : memref<9x64x128xbf16, #tpu.memory_space<vmem>>, vector<1x64x128xbf16>
    %672 = vector.shape_cast %671 : vector<1x64x128xbf16> to vector<64x128xbf16>
    %cst_426 = arith.constant dense<0.000000e+00> : vector<1x128xf32>
    %673 = tpu.matmul %670, %672, %cst_426 {dimension_numbers = #tpu.dot_dimension_numbers<[1], [0], [0], [1], [0, 0, 1, 1], [], []>} : vector<1x64xbf16>, vector<64x128xbf16>, vector<1x128xf32> -> vector<1x128xf32>
    %674 = arith.addf %667, %673 : vector<1x128xf32>
    %675 = vector.extract_strided_slice %666 {offsets = [1, 0], sizes = [1, 64], strides = [1, 1]} : vector<9x64xf32> to vector<1x64xf32>
    %676 = arith.truncf %675 : vector<1x64xf32> to vector<1x64xbf16>
    %c1_427 = arith.constant 1 : index
    %c0_428 = arith.constant 0 : index
    %c0_429 = arith.constant 0 : index
    %677 = vector.load %arg10[%c1_427, %c0_428, %c0_429] : memref<9x64x128xbf16, #tpu.memory_space<vmem>>, vector<1x64x128xbf16>
    %678 = vector.shape_cast %677 : vector<1x64x128xbf16> to vector<64x128xbf16>
    %cst_430 = arith.constant dense<0.000000e+00> : vector<1x128xf32>
    %679 = tpu.matmul %676, %678, %cst_430 {dimension_numbers = #tpu.dot_dimension_numbers<[1], [0], [0], [1], [0, 0, 1, 1], [], []>} : vector<1x64xbf16>, vector<64x128xbf16>, vector<1x128xf32> -> vector<1x128xf32>
    %680 = arith.addf %668, %679 : vector<1x128xf32>
    %681 = vector.extract_strided_slice %666 {offsets = [2, 0], sizes = [1, 64], strides = [1, 1]} : vector<9x64xf32> to vector<1x64xf32>
    %682 = arith.truncf %681 : vector<1x64xf32> to vector<1x64xbf16>
    %c2_431 = arith.constant 2 : index
    %c0_432 = arith.constant 0 : index
    %c0_433 = arith.constant 0 : index
    %683 = vector.load %arg10[%c2_431, %c0_432, %c0_433] : memref<9x64x128xbf16, #tpu.memory_space<vmem>>, vector<1x64x128xbf16>
    %684 = vector.shape_cast %683 : vector<1x64x128xbf16> to vector<64x128xbf16>
    %cst_434 = arith.constant dense<0.000000e+00> : vector<1x128xf32>
    %685 = tpu.matmul %682, %684, %cst_434 {dimension_numbers = #tpu.dot_dimension_numbers<[1], [0], [0], [1], [0, 0, 1, 1], [], []>} : vector<1x64xbf16>, vector<64x128xbf16>, vector<1x128xf32> -> vector<1x128xf32>
    %686 = arith.addf %674, %685 : vector<1x128xf32>
    %687 = vector.extract_strided_slice %666 {offsets = [3, 0], sizes = [1, 64], strides = [1, 1]} : vector<9x64xf32> to vector<1x64xf32>
    %688 = arith.truncf %687 : vector<1x64xf32> to vector<1x64xbf16>
    %c3_435 = arith.constant 3 : index
    %c0_436 = arith.constant 0 : index
    %c0_437 = arith.constant 0 : index
    %689 = vector.load %arg10[%c3_435, %c0_436, %c0_437] : memref<9x64x128xbf16, #tpu.memory_space<vmem>>, vector<1x64x128xbf16>
    %690 = vector.shape_cast %689 : vector<1x64x128xbf16> to vector<64x128xbf16>
    %cst_438 = arith.constant dense<0.000000e+00> : vector<1x128xf32>
    %691 = tpu.matmul %688, %690, %cst_438 {dimension_numbers = #tpu.dot_dimension_numbers<[1], [0], [0], [1], [0, 0, 1, 1], [], []>} : vector<1x64xbf16>, vector<64x128xbf16>, vector<1x128xf32> -> vector<1x128xf32>
    %692 = arith.addf %680, %691 : vector<1x128xf32>
    %693 = vector.extract_strided_slice %666 {offsets = [4, 0], sizes = [1, 64], strides = [1, 1]} : vector<9x64xf32> to vector<1x64xf32>
    %694 = arith.truncf %693 : vector<1x64xf32> to vector<1x64xbf16>
    %c4 = arith.constant 4 : index
    %c0_439 = arith.constant 0 : index
    %c0_440 = arith.constant 0 : index
    %695 = vector.load %arg10[%c4, %c0_439, %c0_440] : memref<9x64x128xbf16, #tpu.memory_space<vmem>>, vector<1x64x128xbf16>
    %696 = vector.shape_cast %695 : vector<1x64x128xbf16> to vector<64x128xbf16>
    %cst_441 = arith.constant dense<0.000000e+00> : vector<1x128xf32>
    %697 = tpu.matmul %694, %696, %cst_441 {dimension_numbers = #tpu.dot_dimension_numbers<[1], [0], [0], [1], [0, 0, 1, 1], [], []>} : vector<1x64xbf16>, vector<64x128xbf16>, vector<1x128xf32> -> vector<1x128xf32>
    %698 = arith.addf %686, %697 : vector<1x128xf32>
    %699 = vector.extract_strided_slice %666 {offsets = [5, 0], sizes = [1, 64], strides = [1, 1]} : vector<9x64xf32> to vector<1x64xf32>
    %700 = arith.truncf %699 : vector<1x64xf32> to vector<1x64xbf16>
    %c5 = arith.constant 5 : index
    %c0_442 = arith.constant 0 : index
    %c0_443 = arith.constant 0 : index
    %701 = vector.load %arg10[%c5, %c0_442, %c0_443] : memref<9x64x128xbf16, #tpu.memory_space<vmem>>, vector<1x64x128xbf16>
    %702 = vector.shape_cast %701 : vector<1x64x128xbf16> to vector<64x128xbf16>
    %cst_444 = arith.constant dense<0.000000e+00> : vector<1x128xf32>
    %703 = tpu.matmul %700, %702, %cst_444 {dimension_numbers = #tpu.dot_dimension_numbers<[1], [0], [0], [1], [0, 0, 1, 1], [], []>} : vector<1x64xbf16>, vector<64x128xbf16>, vector<1x128xf32> -> vector<1x128xf32>
    %704 = arith.addf %692, %703 : vector<1x128xf32>
    %705 = vector.extract_strided_slice %666 {offsets = [6, 0], sizes = [1, 64], strides = [1, 1]} : vector<9x64xf32> to vector<1x64xf32>
    %706 = arith.truncf %705 : vector<1x64xf32> to vector<1x64xbf16>
    %c6_445 = arith.constant 6 : index
    %c0_446 = arith.constant 0 : index
    %c0_447 = arith.constant 0 : index
    %707 = vector.load %arg10[%c6_445, %c0_446, %c0_447] : memref<9x64x128xbf16, #tpu.memory_space<vmem>>, vector<1x64x128xbf16>
    %708 = vector.shape_cast %707 : vector<1x64x128xbf16> to vector<64x128xbf16>
    %cst_448 = arith.constant dense<0.000000e+00> : vector<1x128xf32>
    %709 = tpu.matmul %706, %708, %cst_448 {dimension_numbers = #tpu.dot_dimension_numbers<[1], [0], [0], [1], [0, 0, 1, 1], [], []>} : vector<1x64xbf16>, vector<64x128xbf16>, vector<1x128xf32> -> vector<1x128xf32>
    %710 = arith.addf %698, %709 : vector<1x128xf32>
    %711 = vector.extract_strided_slice %666 {offsets = [7, 0], sizes = [1, 64], strides = [1, 1]} : vector<9x64xf32> to vector<1x64xf32>
    %712 = arith.truncf %711 : vector<1x64xf32> to vector<1x64xbf16>
    %c7 = arith.constant 7 : index
    %c0_449 = arith.constant 0 : index
    %c0_450 = arith.constant 0 : index
    %713 = vector.load %arg10[%c7, %c0_449, %c0_450] : memref<9x64x128xbf16, #tpu.memory_space<vmem>>, vector<1x64x128xbf16>
    %714 = vector.shape_cast %713 : vector<1x64x128xbf16> to vector<64x128xbf16>
    %cst_451 = arith.constant dense<0.000000e+00> : vector<1x128xf32>
    %715 = tpu.matmul %712, %714, %cst_451 {dimension_numbers = #tpu.dot_dimension_numbers<[1], [0], [0], [1], [0, 0, 1, 1], [], []>} : vector<1x64xbf16>, vector<64x128xbf16>, vector<1x128xf32> -> vector<1x128xf32>
    %716 = arith.addf %704, %715 : vector<1x128xf32>
    %717 = vector.extract_strided_slice %666 {offsets = [8, 0], sizes = [1, 64], strides = [1, 1]} : vector<9x64xf32> to vector<1x64xf32>
    %718 = arith.truncf %717 : vector<1x64xf32> to vector<1x64xbf16>
    %c8_452 = arith.constant 8 : index
    %c0_453 = arith.constant 0 : index
    %c0_454 = arith.constant 0 : index
    %719 = vector.load %arg10[%c8_452, %c0_453, %c0_454] : memref<9x64x128xbf16, #tpu.memory_space<vmem>>, vector<1x64x128xbf16>
    %720 = vector.shape_cast %719 : vector<1x64x128xbf16> to vector<64x128xbf16>
    %cst_455 = arith.constant dense<0.000000e+00> : vector<1x128xf32>
    %721 = tpu.matmul %718, %720, %cst_455 {dimension_numbers = #tpu.dot_dimension_numbers<[1], [0], [0], [1], [0, 0, 1, 1], [], []>} : vector<1x64xbf16>, vector<64x128xbf16>, vector<1x128xf32> -> vector<1x128xf32>
    %722 = arith.addf %710, %721 : vector<1x128xf32>
    %723 = arith.addf %722, %716 : vector<1x128xf32>
    %c0_456 = arith.constant 0 : index
    %c0_457 = arith.constant 0 : index
    %724 = vector.load %arg11[%c0_456, %c0_457] : memref<1x128xf32, #tpu.memory_space<vmem>>, vector<1x128xf32>
    %725 = arith.addf %723, %724 : vector<1x128xf32>
    %cst_458 = arith.constant 0.000000e+00 : f32
    %726 = vector.broadcast %cst_458 : f32 to vector<1x128xf32>
    %727 = arith.maximumf %725, %726 : vector<1x128xf32>
    %728 = arith.truncf %727 : vector<1x128xf32> to vector<1x128xbf16>
    %c0_459 = arith.constant 0 : index
    %c0_460 = arith.constant 0 : index
    %729 = vector.load %arg12[%c0_459, %c0_460] : memref<128x8xbf16, #tpu.memory_space<vmem>>, vector<128x8xbf16>
    %cst_461 = arith.constant dense<0.000000e+00> : vector<1x8xf32>
    %730 = tpu.matmul %728, %729, %cst_461 {dimension_numbers = #tpu.dot_dimension_numbers<[1], [0], [0], [1], [0, 0, 1, 1], [], []>} : vector<1x128xbf16>, vector<128x8xbf16>, vector<1x8xf32> -> vector<1x8xf32>
    %c0_462 = arith.constant 0 : index
    %c0_463 = arith.constant 0 : index
    %731 = vector.load %arg13[%c0_462, %c0_463] : memref<1x8xf32, #tpu.memory_space<vmem>>, vector<1x8xf32>
    %732 = arith.addf %730, %731 : vector<1x8xf32>
    %cst_464 = arith.constant 0.000000e+00 : f32
    %733 = vector.broadcast %cst_464 : f32 to vector<1x8xf32>
    %734 = arith.maximumf %732, %733 : vector<1x8xf32>
    %c0_465 = arith.constant 0 : index
    %c0_466 = arith.constant 0 : index
    %735 = vector.load %arg14[%c0_465, %c0_466] : memref<1x8xf32, #tpu.memory_space<vmem>>, vector<1x8xf32>
    %736 = arith.mulf %734, %735 : vector<1x8xf32>
    %cst_467 = arith.constant dense<0.000000e+00> : vector<1xf32>
    %737 = vector.multi_reduction <add>, %736, %cst_467 [1] : vector<1x8xf32> to vector<1xf32>
    %738 = vector.shape_cast %737 : vector<1xf32> to vector<1x1xf32>
    %c0_468 = arith.constant 0 : index
    %c0_469 = arith.constant 0 : index
    %739 = vector.load %arg15[%c0_468, %c0_469] : memref<1x1xf32, #tpu.memory_space<vmem>>, vector<1x1xf32>
    %740 = arith.addf %738, %739 : vector<1x1xf32>
    %741 = arith.negf %740 : vector<1x1xf32>
    %742 = math.exp %741 : vector<1x1xf32>
    %cst_470 = arith.constant 1.000000e+00 : f32
    %743 = vector.broadcast %cst_470 : f32 to vector<1x1xf32>
    %744 = arith.addf %743, %742 : vector<1x1xf32>
    %745 = arith.divf %743, %744 : vector<1x1xf32>
    %746 = vector.shape_cast %745 : vector<1x1xf32> to vector<1x1xf32>
    %747 = vector.broadcast %746 : vector<1x1xf32> to vector<8x128xf32>
    %c0_471 = arith.constant 0 : index
    %c0_472 = arith.constant 0 : index
    %c0_473 = arith.constant 0 : index
    %748 = vector.load %arg16[%c0_471, %c0_472, %c0_473] : memref<1x8x128xf32, #tpu.memory_space<vmem>>, vector<1x8x128xf32>
    %749 = vector.shape_cast %748 : vector<1x8x128xf32> to vector<8x128xf32>
    %750 = vector.shape_cast %747 : vector<8x128xf32> to vector<1x8x128xf32>
    tpu.vector_store %arg16[%c0_471, %c0_472, %c0_473], %750 {strides = array<i32>} : memref<1x8x128xf32, #tpu.memory_space<vmem>>, vector<1x8x128xf32>,
    return
  }
  func.func @transform_0(%arg0: i32) -> (i32, i32, i32) {
    %c0_i32 = arith.constant 0 : i32
    %c0_i32_0 = arith.constant 0 : i32
    %c0_i32_1 = arith.constant 0 : i32
    return %arg0, %c0_i32, %c0_i32_0 : i32, i32, i32
  }
  func.func @transform_1(%arg0: i32) -> (i32, i32, i32) {
    %c0_i32 = arith.constant 0 : i32
    %c0_i32_0 = arith.constant 0 : i32
    %c0_i32_1 = arith.constant 0 : i32
    %c0_i32_2 = arith.constant 0 : i32
    return %c0_i32, %c0_i32_0, %c0_i32_1 : i32, i32, i32
  }
  func.func @transform_2(%arg0: i32) -> (i32, i32) {
    %c0_i32 = arith.constant 0 : i32
    %c0_i32_0 = arith.constant 0 : i32
    %c0_i32_1 = arith.constant 0 : i32
    return %c0_i32, %c0_i32_0 : i32, i32
  }
  func.func @transform_3(%arg0: i32) -> (i32, i32, i32) {
    %c0_i32 = arith.constant 0 : i32
    %c0_i32_0 = arith.constant 0 : i32
    %c0_i32_1 = arith.constant 0 : i32
    %c0_i32_2 = arith.constant 0 : i32
    return %c0_i32, %c0_i32_0, %c0_i32_1 : i32, i32, i32
  }
  func.func @transform_4(%arg0: i32) -> (i32, i32) {
    %c0_i32 = arith.constant 0 : i32
    %c0_i32_0 = arith.constant 0 : i32
    %c0_i32_1 = arith.constant 0 : i32
    return %c0_i32, %c0_i32_0 : i32, i32
  }
  func.func @transform_5(%arg0: i32) -> (i32, i32, i32) {
    %c0_i32 = arith.constant 0 : i32
    %c0_i32_0 = arith.constant 0 : i32
    %c0_i32_1 = arith.constant 0 : i32
    %c0_i32_2 = arith.constant 0 : i32
    return %c0_i32, %c0_i32_0, %c0_i32_1 : i32, i32, i32
  }
  func.func @transform_6(%arg0: i32) -> (i32, i32) {
    %c0_i32 = arith.constant 0 : i32
    %c0_i32_0 = arith.constant 0 : i32
    %c0_i32_1 = arith.constant 0 : i32
    return %c0_i32, %c0_i32_0 : i32, i32
  }
  func.func @transform_7(%arg0: i32) -> (i32, i32) {
    %c0_i32 = arith.constant 0 : i32
    %c0_i32_0 = arith.constant 0 : i32
    %c0_i32_1 = arith.constant 0 : i32
    return %c0_i32, %c0_i32_0 : i32, i32
  }
  func.func @transform_8(%arg0: i32) -> (i32, i32) {
    %c0_i32 = arith.constant 0 : i32
    %c0_i32_0 = arith.constant 0 : i32
    %c0_i32_1 = arith.constant 0 : i32
    return %c0_i32, %c0_i32_0 : i32, i32
  }
  func.func @transform_9(%arg0: i32) -> (i32, i32, i32) {
    %c0_i32 = arith.constant 0 : i32
    %c0_i32_0 = arith.constant 0 : i32
    %c0_i32_1 = arith.constant 0 : i32
    %c0_i32_2 = arith.constant 0 : i32
    return %c0_i32, %c0_i32_0, %c0_i32_1 : i32, i32, i32
  }
  func.func @transform_10(%arg0: i32) -> (i32, i32) {
    %c0_i32 = arith.constant 0 : i32
    %c0_i32_0 = arith.constant 0 : i32
    %c0_i32_1 = arith.constant 0 : i32
    return %c0_i32, %c0_i32_0 : i32, i32
  }
  func.func @transform_11(%arg0: i32) -> (i32, i32) {
    %c0_i32 = arith.constant 0 : i32
    %c0_i32_0 = arith.constant 0 : i32
    %c0_i32_1 = arith.constant 0 : i32
    return %c0_i32, %c0_i32_0 : i32, i32
  }
  func.func @transform_12(%arg0: i32) -> (i32, i32) {
    %c0_i32 = arith.constant 0 : i32
    %c0_i32_0 = arith.constant 0 : i32
    %c0_i32_1 = arith.constant 0 : i32
    return %c0_i32, %c0_i32_0 : i32, i32
  }
  func.func @transform_13(%arg0: i32) -> (i32, i32) {
    %c0_i32 = arith.constant 0 : i32
    %c0_i32_0 = arith.constant 0 : i32
    %c0_i32_1 = arith.constant 0 : i32
    return %c0_i32, %c0_i32_0 : i32, i32
  }
  func.func @transform_14(%arg0: i32) -> (i32, i32) {
    %c0_i32 = arith.constant 0 : i32
    %c0_i32_0 = arith.constant 0 : i32
    %c0_i32_1 = arith.constant 0 : i32
    return %c0_i32, %c0_i32_0 : i32, i32
  }
  func.func @transform_15(%arg0: i32) -> (i32, i32, i32) {
    %c0_i32 = arith.constant 0 : i32
    %c0_i32_0 = arith.constant 0 : i32
    %c0_i32_1 = arith.constant 0 : i32
    return %arg0, %c0_i32, %c0_i32_0 : i32, i32, i32
  }
}

</mosaic_0001>

<bundles_post_ra>
// kernel: scnn_forward.1
= control target key start
LH: loop header
LB: loop body
LE: loop exit
PB: predicated region body
PF: predicated region fallthrough
CT: control target
= control target key end

     0   :  { %s15853_s20 = smov 0   ;;  %s18948_s0 = inlined_call_operand.vmem [shape: f32[2,676,3], index: 0, kind: input, shape index: {}]   ;;  %s18949_s1 = inlined_call_operand.vmem [shape: bf16[9,3,16], index: 1, kind: input, shape index: {}]   ;;  %s18950_s2 = inlined_call_operand.vmem [shape: f32[1,16], index: 2, kind: input, shape index: {}]   ;;  %s18951_s3 = inlined_call_operand.vmem [shape: bf16[9,16,32], index: 3, kind: input, shape index: {}]   ;;  %s18952_s4 = inlined_call_operand.vmem [shape: f32[1,32], index: 4, kind: input, shape index: {}]   ;;  %s18953_s5 = inlined_call_operand.vmem [shape: bf16[9,32,64], index: 5, kind: input, shape index: {}]   ;;  %s18954_s6 = inlined_call_operand.vmem [shape: f32[1,64], index: 6, kind: input, shape index: {}]   ;;  %s18955_s7 = inlined_call_operand.vmem [shape: bf16[64,64], index: 7, kind: input, shape index: {}]   ;;  %s18956_s8 = inlined_call_operand.vmem [shape: f32[1,64], index: 8, kind: input, shape index: {}]   ;;  %s18957_s9 = inlined_call_operand.vmem [shape: bf16[9,64,128], index: 9, kind: input, shape index: {}]   ;;  %s18958_s10 = inlined_call_operand.vmem [shape: f32[1,128], index: 10, kind: input, shape index: {}]   ;;  %s18959_s11 = inlined_call_operand.vmem [shape: bf16[128,8], index: 11, kind: input, shape index: {}]   ;;  %s18960_s12 = inlined_call_operand.vmem [shape: f32[1,8], index: 12, kind: input, shape index: {}]   ;;  %s18961_s13 = inlined_call_operand.vmem [shape: f32[1,8], index: 13, kind: input, shape index: {}]   ;;  %s18962_s14 = inlined_call_operand.<no memory space> [shape: f32[1,1], index: 14, kind: input, shape index: {}]   ;;  %s18963_s15 = inlined_call_operand.vmem [shape: f32[2,8,128], index: 15, kind: output, shape index: {}]  }
   0x1   :  { %v20_v0 = vstv %s18962_s14 }
   0x2   :  { %21 = vst [vmem:[#allocation8] sm:$0x1] %v20_v0 }
   0x3 LB: > { %s12242_s21 = sadd.s32 4294967295, %s15765_s20   ;;  %p12246_p0 = scmp.ge.s32.totalorder %s15765_s20, 1  ;;  %s15765_s20 = sphi %s15853_s20, %s27_s20  }
   0x4   : > { %p439_p1 = scmp.lt.s32.totalorder %s15765_s20, 3 }
   0x6   : > { %p440_p2 = pnand %p12246_p0, %p439_p1 }
   0x7   : > { %v498_v1 = vld [vmem:[%s18949_s1 + $0x4] sm:$0x3] (!%p440_p2)  ;;  %vm603_vm0 = vcmask (!%p440_p2), 1040384   ;;  %vm604_vm1 = vcmask (!%p440_p2), 1041408   ;;  %p486_p3 = scmp.lt.s32.totalorder (!%p440_p2), %s12242_s21, 1  ;;  %v15767_v2 = vmov (!%p440_p2), 65535  }
   0x8   : > { %443 = sbr.rel (%p440_p2) target bundleno = 3165 (0xc5d), region = 80  ;;  %v605_v3 = vsel (!%p440_p2), %vm603_vm0, 4294967295, %v15767_v2  ;;  %v496_v4 = vld [vmem:[%s18949_s1] sm:$0x3] (!%p440_p2)  ;;  %v499_v8 = vld [vmem:[%s18949_s1 + $0x6] sm:$0x3] (!%p440_p2) }
   0x9   : > { %v15867_v5 = vsel (!%p440_p2), %vm604_vm1, %v605_v3, 0  ;;  %vm578_vm2 = vcmask (!%p440_p2), 23552   ;;  %v497_v61 = vld [vmem:[%s18949_s1 + $0x2] sm:$0x3] (!%p440_p2)  ;;  %vm1977_vm3 = vcmask (!%p440_p2), 130048   ;;  %vm7671_vm4 = vcmask (!%p440_p2), 125952  }
   0xa   : > { %v15872_v6 = vand.u32 (!%p440_p2), %v15867_v5, %v498_v1  ;;  %v15875_v7 = vand.u32 (!%p440_p2), %v15867_v5, %v496_v4  ;;  %v15935_v27 = vand.u32 (!%p440_p2), %v15867_v5, %v499_v8  ;;  %v16028_v1 = vand.u32 (!%p440_p2), %v15867_v5, %v497_v61 }
   0xb   : > { %vm15769_vm5 = vmmov (!%p440_p2), 0   ;;  %vm7645_vm6 = vcmask (!%p440_p2), 128000   ;;  %vm9472_vm7 = vcmask (!%p440_p2), 261120   ;;  %vm10190_vm8 = vcmask (!%p440_p2), 259072  }
   0xc   : > { %13501 = vmatprep.subr.bf16.mxu0 (!%p440_p2), %v15872_v6  ;;  %14991 = vmatprep.subr.bf16.mxu1 (!%p440_p2), %v15872_v6  ;;  %vm11145_vm9 = vcmask (!%p440_p2), 523264   ;;  %vm11163_vm10 = vcmask (!%p440_p2), 518144   ;;  %vm11151_vm11 = vcmask (!%p440_p2), 521216   ;;  %vm11280_vm12 = vcmask (!%p440_p2), 516096  }
   0xd   : > { %13502 = vmatpush3.bf16.msra.mxu0 (!%p440_p2), %v15872_v6  ;;  %14992 = vmatpush3.bf16.msra.mxu1 (!%p440_p2), %v15872_v6 }
   0xe   : > { %13519 = vmatprep.subr.bf16.mxu0 (!%p440_p2), %v15875_v7  ;;  %13681 = vmatprep.subr.bf16.mxu1 (!%p440_p2), %v15875_v7 }
   0xf   : > { %s18965_s21 = smov (!%p486_p3, %s12242_s21), 1 }
  0x10   : > { %s15633_s25 = smul.u32 680, %s18965_s21  ;;  %s12248_s24 = sshll.u32 %s18965_s21, 3 }
  0x11   : > { %s494_s27 = scalar_lea.vmem %s18963_s15, %s12248_s24 }
  0x12   : > { %s15885_s28 = scalar_lea.vmem %s18948_s0, %s15633_s25 }
  0x13   : > { %v554_v9 = vld [vmem:[%s15885_s28 + $0x2] sm:$0xff]  ;;  %v555_v10 = vld [vmem:[%s15885_s28 + $0xa] sm:$0xff]  ;;  %v556_v14 = vld [vmem:[%s15885_s28 + $0x12] sm:$0xff] }
  0x14   : > { %v15894_v11 = vld [vmem:[%s15885_s28 + $0xa2] sm:$0xff]  ;;  %v570_v12 = vpack.c.bf16 %v555_v10, %v554_v9  ;;  %v15898_v13 = vld [vmem:[%s15885_s28 + $0xaa] sm:$0xff]  ;;  %v15902_v15 = vld [vmem:[%s15885_s28 + $0x1a] sm:$0xff] }
  0x15   : > { %v2060_v16 = vpack.c.bf16 %v15898_v13, %v15894_v11  ;;  %v571_v17 = vpack.c.bf16 %v15902_v15, %v556_v14  ;;  %v15908_v18 = vld [vmem:[%s15885_s28 + $0xb2] sm:$0xff]  ;;  %v15911_v19 = vld [vmem:[%s15885_s28 + $0xba] sm:$0xff]  ;;  %v15914_v20 = vld [vmem:[%s15885_s28 + $0x22] sm:$0xff] }
  0x16   : > { %13503 = vmatprep.mubr.msk.bf16.mxu0 %vm578_vm2, %v570_v12  ;;  %v2061_v21 = vpack.c.bf16 %v15911_v19, %v15908_v18  ;;  %v15920_v22 = vld [vmem:[%s15885_s28 + $0x2a] sm:$0xff]  ;;  %v15923_v23 = vld [vmem:[%s15885_s28 + $0xc2] sm:$0xff]  ;;  %v15940_v28 = vld [vmem:[%s15885_s28 + $0x32] sm:$0xff] }
  0x17   : > { %v15926_v24 = vld [vmem:[%s15885_s28 + $0xca] sm:$0xff]  ;;  %13669 = vmatprep.mubr.msk.bf16.mxu1 %vm578_vm2, %v2060_v16  ;;  %13504 = vmatmul.mubr.msk.bf16.vlgmr.msra.gmra.mrb[0].mxu0 %vm578_vm2, %v571_v17  ;;  %v572_v25 = vpack.c.bf16 %v15920_v22, %v15914_v20  ;;  %v15943_v29 = vld [vmem:[%s15885_s28 + $0x3a] sm:$0xff]  ;;  %v15946_v30 = vld [vmem:[%s15885_s28 + $0xd2] sm:$0xff] }
  0x18   : > { %v2062_v26 = vpack.c.bf16 %v15926_v24, %v15923_v23  ;;  %13520 = vmatpush3.bf16.msra.mxu0 %v15875_v7  ;;  %13670 = vmatmul.mubr.msk.bf16.vlgmr.msra.gmra.mrb[0].mxu1 %vm578_vm2, %v2061_v21  ;;  %v15951_v31 = vld [vmem:[%s15885_s28 + $0xda] sm:$0xff]  ;;  %v15954_v32 = vld [vmem:[%s15885_s28 + $0x42] sm:$0xff]  ;;  %v15957_v33 = vld [vmem:[%s15885_s28 + $0x4a] sm:$0xff]  ;;  %v573_v36 = vpack.c.bf16 %v15943_v29, %v15940_v28 }
  0x19   : > { %13507 = vmatprep.mubr.msk.bf16.mxu0 %vm578_vm2, %v572_v25  ;;  %v15960_v34 = vld [vmem:[%s15885_s28 + $0xe2] sm:$0xff]  ;;  %v15963_v35 = vld [vmem:[%s15885_s28 + $0xea] sm:$0xff]  ;;  %13682 = vmatpush3.bf16.msra.mxu1 %v15875_v7  ;;  %v2063_v37 = vpack.c.bf16 %v15951_v31, %v15946_v30  ;;  %v574_v38 = vpack.c.bf16 %v15957_v33, %v15954_v32  ;;  %v15980_v40 = vld [vmem:[%s15885_s28 + $0x52] sm:$0xff] }
  0x1a   : > { %13673 = vmatprep.mubr.msk.bf16.mxu1 %vm578_vm2, %v2062_v26  ;;  %13537 = vmatprep.subr.bf16.mxu0 %v15935_v27  ;;  %v2064_v39 = vpack.c.bf16 %v15963_v35, %v15960_v34  ;;  %v15983_v41 = vld [vmem:[%s15885_s28 + $0x5a] sm:$0xff]  ;;  %v15986_v42 = vld [vmem:[%s15885_s28 + $0xf2] sm:$0xff]  ;;  %v15993_v44 = vld [vmem:[%s15885_s28 + $0x62] sm:$0xff] }
  0x1b   : > { %13699 = vmatprep.subr.bf16.mxu1 %v15935_v27  ;;  %v15990_v43 = vld [vmem:[%s15885_s28 + $0xfa] sm:$0xff]  ;;  %v15996_v45 = vld [vmem:[%s15885_s28 + $0x6a] sm:$0xff]  ;;  %v575_v48 = vpack.c.bf16 %v15983_v41, %v15980_v40  ;;  %v16010_v52 = vld [vmem:[%s15885_s28 + $0x72] sm:$0xff] }
  0x1c   : > { %v1994_v46 = vld [vmem:[%s15885_s28 + $0x80] sm:$0xff]  ;;  %v1995_v47 = vld [vmem:[%s15885_s28 + $0x88] sm:$0xff]  ;;  %v2065_v49 = vpack.c.bf16 %v15990_v43, %v15986_v42  ;;  %v576_v50 = vpack.c.bf16 %v15996_v45, %v15993_v44  ;;  %v1996_v54 = vld [vmem:[%s15885_s28 + $0x90] sm:$0xff] }
  0x1d   : > { %v2010_v51 = vpack.c.bf16 %v1995_v47, %v1994_v46  ;;  %v16013_v53 = vld [vmem:[%s15885_s28 + $0x7a] sm:$0xff]  ;;  %v507_v57 = vld [vmem:[%s15885_s28 + $0x8] sm:$0xff]  ;;  %v508_v2 = vld [vmem:[%s15885_s28 + $0x10] sm:$0xff] }
  0x1e   : > { %v1997_v55 = vld [vmem:[%s15885_s28 + $0x98] sm:$0xff]  ;;  %v506_v56 = vld [vmem:[%s15885_s28] sm:$0xff]  ;;  %v1999_v59 = vld [vmem:[%s15885_s28 + $0xa8] sm:$0xff]  ;;  %v577_v60 = vpack.c.bf16 %v16013_v53, %v16010_v52 }
  0x1f   : > { %13508 = vmatmul.mubr.msk.bf16.gmra.mrb[4].mxu0 %vm578_vm2, %v573_v36  ;;  %v1998_v58 = vld [vmem:[%s15885_s28 + $0xa0] sm:$0xff]  ;;  %v2011_v62 = vpack.c.bf16 %v1997_v55, %v1996_v54  ;;  %v522_v63 = vpack.c.bf16 %v507_v57, %v506_v56  ;;  %v509_v3 = vld [vmem:[%s15885_s28 + $0x18] sm:$0xff]  ;;  %v2000_v4 = vld [vmem:[%s15885_s28 + $0xb0] sm:$0xff] }
  0x20   : > { %13674 = vmatmul.mubr.msk.bf16.gmra.mrb[4].mxu1 %vm578_vm2, %v2063_v37  ;;  %13511 = vmatprep.mubr.msk.bf16.mxu0 %vm578_vm2, %v574_v38  ;;  %v2012_v0 = vpack.c.bf16 %v1999_v59, %v1998_v58  ;;  %v2001_v8 = vld [vmem:[%s15885_s28 + $0xb8] sm:$0xff]  ;;  %v510_v9 = vld [vmem:[%s15885_s28 + $0x20] sm:$0xff]  ;;  %v511_v10 = vld [vmem:[%s15885_s28 + $0x28] sm:$0xff]  ;;  %v523_v16 = vpack.c.bf16 %v509_v3, %v508_v2 }
  0x21   : > { %13677 = vmatprep.mubr.msk.bf16.mxu1 %vm578_vm2, %v2064_v39  ;;  %v2002_v12 = vld [vmem:[%s15885_s28 + $0xc0] sm:$0xff]  ;;  %v2003_v14 = vld [vmem:[%s15885_s28 + $0xc8] sm:$0xff]  ;;  %v2013_v17 = vpack.c.bf16 %v2001_v8, %v2000_v4  ;;  %v524_v21 = vpack.c.bf16 %v511_v10, %v510_v9  ;;  %v512_v26 = vld [vmem:[%s15885_s28 + $0x30] sm:$0xff]  ;;  %v2325_v10 = vpack.c.bf16 %v15908_v18, %v15898_v13  ;;  %v848_v13 = vpack.c.bf16 %v15940_v28, %v15920_v22 }
  0x22   : > { %v2014_v25 = vpack.c.bf16 %v2003_v14, %v2002_v12  ;;  %v513_v36 = vld [vmem:[%s15885_s28 + $0x38] sm:$0xff]  ;;  %v2004_v37 = vld [vmem:[%s15885_s28 + $0xd0] sm:$0xff]  ;;  %v514_v39 = vld [vmem:[%s15885_s28 + $0x40] sm:$0xff]  ;;  %v2326_v12 = vpack.c.bf16 %v15923_v23, %v15911_v19  ;;  %v849_v18 = vpack.c.bf16 %v15954_v32, %v15943_v29  ;;  %v2328_v19 = vpack.c.bf16 %v15960_v34, %v15951_v31 }
  0x23   : > { %v2005_v38 = vld [vmem:[%s15885_s28 + $0xd8] sm:$0xff]  ;;  %v515_v46 = vld [vmem:[%s15885_s28 + $0x48] sm:$0xff]  ;;  %v2006_v47 = vld [vmem:[%s15885_s28 + $0xe0] sm:$0xff]  ;;  %v850_v22 = vpack.c.bf16 %v15980_v40, %v15957_v33  ;;  %v2329_v23 = vpack.c.bf16 %v15986_v42, %v15963_v35  ;;  %v852_v34 = vpack.c.bf16 %v16010_v52, %v15996_v45 }
  0x24   : > { %v516_v55 = vld [vmem:[%s15885_s28 + $0x50] sm:$0xff]  ;;  %v517_v56 = vld [vmem:[%s15885_s28 + $0x58] sm:$0xff]  ;;  %v518_v59 = vld [vmem:[%s15885_s28 + $0x60] sm:$0xff] }
  0x25   : > { %v2008_v57 = vld [vmem:[%s15885_s28 + $0xf0] sm:$0xff]  ;;  %v2009_v58 = vld [vmem:[%s15885_s28 + $0xf8] sm:$0xff]  ;;  %v500_v8 = vld [vmem:[%s18949_s1 + $0x8] sm:$0x3] }
  0x26   : > { %v2308_v61 = vld [vmem:[%s15885_s28 + $0x9a] sm:$0xff]  ;;  %v520_v3 = vld [vmem:[%s15885_s28 + $0x70] sm:$0xff]  ;;  %v16086_v14 = vand.u32 %v15867_v5, %v500_v8  ;;  %v16122_v31 = vld [vmem:[%s15885_s28 + $0x82] sm:$0xff] }
  0x27   : > { %13512 = vmatmul.mubr.msk.bf16.gmra.mrb[8].mxu0 %vm578_vm2, %v575_v48  ;;  %v2007_v48 = vld [vmem:[%s15885_s28 + $0xe8] sm:$0xff]  ;;  %v2324_v2 = vpack.c.bf16 %v15894_v11, %v2308_v61  ;;  %v521_v4 = vld [vmem:[%s15885_s28 + $0x78] sm:$0xff]  ;;  %v847_v11 = vpack.c.bf16 %v15914_v20, %v15902_v15  ;;  %v2327_v15 = vpack.c.bf16 %v15946_v30, %v15926_v24  ;;  %v851_v24 = vpack.c.bf16 %v15993_v44, %v15983_v41 }
  0x28   : > { %13678 = vmatmul.mubr.msk.bf16.gmra.mrb[8].mxu1 %vm578_vm2, %v2065_v49  ;;  %13515 = vmatprep.mubr.msk.bf16.mxu0 %vm578_vm2, %v576_v50  ;;  %v525_v49 = vpack.c.bf16 %v513_v36, %v512_v26  ;;  %v2015_v50 = vpack.c.bf16 %v2005_v38, %v2004_v37  ;;  %v2016_v54 = vpack.c.bf16 %v2007_v48, %v2006_v47  ;;  %v2321_v20 = vld [vmem:[%s15885_s28 + $0x102] sm:$0xff]  ;;  %v16118_v29 = vld [vmem:[%s15885_s28 + $0x10a] sm:$0xff]  ;;  %v2323_v30 = vld [vmem:[%s15885_s28 + $0x112] sm:$0xff] }
  0x29   : > { %13683 = vmatprep.mubr.msk.bf16.mxu1 %vm578_vm2, %v2010_v51  ;;  %v526_v51 = vpack.c.bf16 %v515_v46, %v514_v39  ;;  %v529_v9 = vpack.c.bf16 %v521_v4, %v520_v3  ;;  %v2330_v28 = vpack.c.bf16 %v2321_v20, %v15990_v43  ;;  %v2018_v32 = vld [vmem:[%s15885_s28 + $0x81] sm:$0xff]  ;;  %v2019_v33 = vld [vmem:[%s15885_s28 + $0x89] sm:$0xff]  ;;  %v2331_v35 = vpack.c.bf16 %v2323_v30, %v16118_v29  ;;  %v16138_v43 = vld [vmem:[%s15885_s28 + $0x92] sm:$0xff] }
  0x2a   : > { %v853_v40 = vpack.c.bf16 %v16122_v31, %v16013_v53  ;;  %v2034_v41 = vpack.c.bf16 %v2019_v33, %v2018_v32  ;;  %v16135_v42 = vld [vmem:[%s15885_s28 + $0x8a] sm:$0xff]  ;;  %v2022_v45 = vld [vmem:[%s15885_s28 + $0xa1] sm:$0xff]  ;;  %v533_v46 = vld [vmem:[%s15885_s28 + $0x19] sm:$0xff] }
  0x2b   : > { %v2020_v44 = vld [vmem:[%s15885_s28 + $0x91] sm:$0xff]  ;;  %v2023_v52 = vld [vmem:[%s15885_s28 + $0xa9] sm:$0xff]  ;;  %v2025_v48 = vld [vmem:[%s15885_s28 + $0xb9] sm:$0xff] }
  0x2c   : > { %v501_v53 = vld [vmem:[%s18949_s1 + $0xa] sm:$0x3]  ;;  %v2036_v37 = vpack.c.bf16 %v2023_v52, %v2022_v45  ;;  %v532_v38 = vld [vmem:[%s15885_s28 + $0x11] sm:$0xff]  ;;  %v2574_v20 = vld [vmem:[%s15885_s28 + $0x9b] sm:$0xff] }
  0x2d   : > { %v16157_v39 = vand.u32 %v15867_v5, %v501_v53  ;;  %v2024_v47 = vld [vmem:[%s15885_s28 + $0xb1] sm:$0xff]  ;;  %v2031_v3 = vld [vmem:[%s15885_s28 + $0xe9] sm:$0xff]  ;;  %v545_v33 = vld [vmem:[%s15885_s28 + $0x79] sm:$0xff] }
  0x2e   : > { %v2028_v61 = vld [vmem:[%s15885_s28 + $0xd1] sm:$0xff] }
  0x2f   : > { %13516 = vmatmul.mubr.msk.bf16.gmra.mrb[12].mxu0 %vm578_vm2, %v577_v60  ;;  %v519_v60 = vld [vmem:[%s15885_s28 + $0x68] sm:$0xff]  ;;  %v544_v32 = vld [vmem:[%s15885_s28 + $0x71] sm:$0xff] }
  0x30   : > { %13684 = vmatmul.mubr.msk.bf16.vlgmr.msra.gmra.mrb[12].mxu1 %vm578_vm2, %v2011_v62  ;;  %13521 = vmatprep.mubr.msk.bf16.mxu0 %vm578_vm2, %v522_v63  ;;  %v527_v62 = vpack.c.bf16 %v517_v56, %v516_v55  ;;  %v2017_v63 = vpack.c.bf16 %v2009_v58, %v2008_v57  ;;  %v547_v55 = vpack.c.bf16 %v533_v46, %v532_v38  ;;  %v2581_v38 = vld [vmem:[%s15885_s28 + $0xd3] sm:$0xff]  ;;  %v1107_v46 = vld [vmem:[%s15885_s28 + $0x3b] sm:$0xff] }
  0x31   : > { %13687 = vmatprep.mubr.msk.bf16.mxu1 %vm578_vm2, %v2012_v0  ;;  %13700 = vmatpush3.bf16.msra.mxu1 %v15935_v27  ;;  %v528_v0 = vpack.c.bf16 %v519_v60, %v518_v59  ;;  %v2037_v56 = vpack.c.bf16 %v2025_v48, %v2024_v47  ;;  %v536_v59 = vld [vmem:[%s15885_s28 + $0x31] sm:$0xff]  ;;  %v537_v60 = vld [vmem:[%s15885_s28 + $0x39] sm:$0xff]  ;;  %v1108_v47 = vld [vmem:[%s15885_s28 + $0x43] sm:$0xff] }
  0x32   : > { %13717 = vmatprep.subr.bf16.mxu1 %v16028_v1  ;;  %v549_v4 = vpack.c.bf16 %v537_v60, %v536_v59  ;;  %v2582_v48 = vld [vmem:[%s15885_s28 + $0xdb] sm:$0xff]  ;;  %v2585_v59 = vld [vmem:[%s15885_s28 + $0xf3] sm:$0xff] }
  0x33   : > { %v1111_v60 = vld [vmem:[%s15885_s28 + $0x5b] sm:$0xff] }
  0x37   : > { %13522 = vmatmul.mubr.msk.bf16.vlgmr.msra.gmra.mrb[0].mxu0 %vm578_vm2, %v523_v16  ;;  %v2021_v16 = vld [vmem:[%s15885_s28 + $0x99] sm:$0xff] }
  0x38   : > { %13538 = vmatpush3.bf16.msra.mxu0 %v15935_v27  ;;  %13688 = vmatmul.mubr.msk.bf16.gmra.mrb[0].mxu1 %vm578_vm2, %v2013_v17  ;;  %v530_v17 = vld [vmem:[%s15885_s28 + $0x1] sm:$0xff]  ;;  %v2035_v26 = vpack.c.bf16 %v2021_v16, %v2020_v44 }
  0x39   : > { %13525 = vmatprep.mubr.msk.bf16.mxu0 %vm578_vm2, %v524_v21  ;;  %13691 = vmatprep.mubr.msk.bf16.mxu1 %vm578_vm2, %v2014_v25  ;;  %v531_v21 = vld [vmem:[%s15885_s28 + $0x9] sm:$0xff]  ;;  %v854_v25 = vpack.c.bf16 %v16138_v43, %v16135_v42  ;;  %v2578_v44 = vld [vmem:[%s15885_s28 + $0xbb] sm:$0xff] }
  0x3a   : > { %13555 = vmatprep.subr.bf16.mxu0 %v16028_v1  ;;  %v546_v36 = vpack.c.bf16 %v531_v21, %v530_v17  ;;  %v2579_v16 = vld [vmem:[%s15885_s28 + $0xc3] sm:$0xff]  ;;  %v553_v17 = vpack.c.bf16 %v545_v33, %v544_v32  ;;  %v502_v21 = vld [vmem:[%s18949_s1 + $0xc] sm:$0x3]  ;;  %v16272_v32 = vld [vmem:[%s15885_s28 + $0xb4] sm:$0xff] }
  0x3b   : > { %v2592_v53 = vpack.c.bf16 %v2579_v16, %v2578_v44  ;;  %v1267_v33 = vld [vmem:[%s15885_s28 + $0x1c] sm:$0xff]  ;;  %v503_v44 = vld [vmem:[%s18949_s1 + $0xe] sm:$0x3] }
  0x3f   : > { %13526 = vmatmul.mubr.msk.bf16.gmra.mrb[4].mxu0 %vm578_vm2, %v525_v49  ;;  %v534_v49 = vld [vmem:[%s15885_s28 + $0x21] sm:$0xff] }
  0x40   : > { %13692 = vmatmul.mubr.msk.bf16.gmra.mrb[4].mxu1 %vm578_vm2, %v2015_v50  ;;  %13529 = vmatprep.mubr.msk.bf16.mxu0 %vm578_vm2, %v526_v51  ;;  %v535_v50 = vld [vmem:[%s15885_s28 + $0x29] sm:$0xff]  ;;  %v2026_v51 = vld [vmem:[%s15885_s28 + $0xc1] sm:$0xff] }
  0x41   : > { %13695 = vmatprep.mubr.msk.bf16.mxu1 %vm578_vm2, %v2016_v54  ;;  %v2027_v54 = vld [vmem:[%s15885_s28 + $0xc9] sm:$0xff]  ;;  %v548_v57 = vpack.c.bf16 %v535_v50, %v534_v49 }
  0x42   : > { %v2038_v58 = vpack.c.bf16 %v2027_v54, %v2026_v51  ;;  %v2583_v49 = vld [vmem:[%s15885_s28 + $0xe3] sm:$0xff]  ;;  %v1121_v54 = vpack.c.bf16 %v1108_v47, %v1107_v46 }
  0x43   : > { %v2743_v46 = vld [vmem:[%s15885_s28 + $0xdc] sm:$0xff]  ;;  %v16307_v47 = vld [vmem:[%s15885_s28 + $0xe4] sm:$0xff] }
  0x47   : > { %13530 = vmatmul.mubr.msk.bf16.gmra.mrb[8].mxu0 %vm578_vm2, %v527_v62  ;;  %v2029_v62 = vld [vmem:[%s15885_s28 + $0xd9] sm:$0xff] }
  0x48   : > { %13696 = vmatmul.mubr.msk.bf16.gmra.mrb[8].mxu1 %vm578_vm2, %v2017_v63  ;;  %13533 = vmatprep.mubr.msk.bf16.mxu0 %vm578_vm2, %v528_v0  ;;  %v538_v63 = vld [vmem:[%s15885_s28 + $0x41] sm:$0xff]  ;;  %v539_v0 = vld [vmem:[%s15885_s28 + $0x49] sm:$0xff]  ;;  %v2039_v8 = vpack.c.bf16 %v2029_v62, %v2028_v61 }
  0x49   : > { %13701 = vmatprep.mubr.msk.bf16.mxu1 %vm578_vm2, %v2324_v2  ;;  %v2030_v2 = vld [vmem:[%s15885_s28 + $0xe1] sm:$0xff] }
  0x4a   : > { %v1112_v61 = vld [vmem:[%s15885_s28 + $0x63] sm:$0xff]  ;;  %v2586_v62 = vld [vmem:[%s15885_s28 + $0xfb] sm:$0xff] }
  0x4f   : > { %13534 = vmatmul.mubr.msk.bf16.gmra.mrb[12].mxu0 %vm578_vm2, %v529_v9  ;;  %v550_v9 = vpack.c.bf16 %v539_v0, %v538_v63  ;;  %v2587_v63 = vld [vmem:[%s15885_s28 + $0x103] sm:$0xff] }
  0x50   : > { %13702 = vmatmul.mubr.msk.bf16.vlgmr.msra.gmra.mrb[12].mxu1 %vm578_vm2, %v2325_v10  ;;  %13539 = vmatprep.mubr.msk.bf16.mxu0 %vm578_vm2, %v847_v11  ;;  %v2040_v10 = vpack.c.bf16 %v2031_v3, %v2030_v2  ;;  %v540_v11 = vld [vmem:[%s15885_s28 + $0x51] sm:$0xff]  ;;  %v1123_v3 = vpack.c.bf16 %v1112_v61, %v1111_v60  ;;  %v2747_v60 = vld [vmem:[%s15885_s28 + $0xfc] sm:$0xff]  ;;  %v2748_v61 = vld [vmem:[%s15885_s28 + $0x104] sm:$0xff] }
  0x51   : > { %13705 = vmatprep.mubr.msk.bf16.mxu1 %vm578_vm2, %v2326_v12  ;;  %13718 = vmatpush3.bf16.msra.mxu1 %v16028_v1  ;;  %v541_v12 = vld [vmem:[%s15885_s28 + $0x59] sm:$0xff] }
  0x52   : > { %13735 = vmatprep.subr.bf16.mxu1 %v16086_v14 }
  0x57   : > { %13540 = vmatmul.mubr.msk.bf16.vlgmr.msra.gmra.mrb[0].mxu0 %vm578_vm2, %v848_v13  ;;  %v2032_v13 = vld [vmem:[%s15885_s28 + $0xf1] sm:$0xff] }
  0x58   : > { %13556 = vmatpush3.bf16.msra.mxu0 %v16028_v1  ;;  %13706 = vmatmul.mubr.msk.bf16.gmra.mrb[0].mxu1 %vm578_vm2, %v2327_v15  ;;  %v2033_v15 = vld [vmem:[%s15885_s28 + $0xf9] sm:$0xff] }
  0x59   : > { %13543 = vmatprep.mubr.msk.bf16.mxu0 %vm578_vm2, %v849_v18  ;;  %13709 = vmatprep.mubr.msk.bf16.mxu1 %vm578_vm2, %v2328_v19  ;;  %v542_v18 = vld [vmem:[%s15885_s28 + $0x61] sm:$0xff]  ;;  %v543_v19 = vld [vmem:[%s15885_s28 + $0x69] sm:$0xff] }
  0x5a   : > { %13573 = vmatprep.subr.bf16.mxu0 %v16086_v14 }
  0x5f   : > { %13544 = vmatmul.mubr.msk.bf16.gmra.mrb[4].mxu0 %vm578_vm2, %v850_v22  ;;  %v2575_v22 = vld [vmem:[%s15885_s28 + $0xa3] sm:$0xff] }
  0x60   : > { %13710 = vmatmul.mubr.msk.bf16.gmra.mrb[4].mxu1 %vm578_vm2, %v2329_v23  ;;  %13547 = vmatprep.mubr.msk.bf16.mxu0 %vm578_vm2, %v851_v24  ;;  %v551_v23 = vpack.c.bf16 %v541_v12, %v540_v11  ;;  %v2041_v24 = vpack.c.bf16 %v2033_v15, %v2032_v13  ;;  %v2590_v30 = vpack.c.bf16 %v2575_v22, %v2574_v20  ;;  %v2589_v11 = vld [vmem:[%s15885_s28 + $0x113] sm:$0xff]  ;;  %v1115_v12 = vld [vmem:[%s15885_s28 + $0x7b] sm:$0xff]  ;;  %v1116_v13 = vld [vmem:[%s15885_s28 + $0x83] sm:$0xff] }
  0x61   : > { %13713 = vmatprep.mubr.msk.bf16.mxu1 %vm578_vm2, %v2330_v28  ;;  %v552_v28 = vpack.c.bf16 %v543_v19, %v542_v18  ;;  %v16255_v15 = vld [vmem:[%s15885_s28 + $0x9c] sm:$0xff]  ;;  %v16258_v18 = vld [vmem:[%s15885_s28 + $0xa4] sm:$0xff]  ;;  %v1125_v22 = vpack.c.bf16 %v1116_v13, %v1115_v12 }
  0x67   : > { %13548 = vmatmul.mubr.msk.bf16.gmra.mrb[8].mxu0 %vm578_vm2, %v852_v34  ;;  %v2576_v34 = vld [vmem:[%s15885_s28 + $0xab] sm:$0xff] }
  0x68   : > { %13714 = vmatmul.mubr.msk.bf16.gmra.mrb[8].mxu1 %vm578_vm2, %v2331_v35  ;;  %13551 = vmatprep.mubr.msk.bf16.mxu0 %vm578_vm2, %v853_v40  ;;  %v2577_v35 = vld [vmem:[%s15885_s28 + $0xb3] sm:$0xff]  ;;  %v1103_v40 = vld [vmem:[%s15885_s28 + $0x1b] sm:$0xff] }
  0x69   : > { %13719 = vmatprep.mubr.msk.bf16.mxu1 %vm578_vm2, %v2034_v41  ;;  %v1104_v41 = vld [vmem:[%s15885_s28 + $0x23] sm:$0xff]  ;;  %v2591_v45 = vpack.c.bf16 %v2577_v35, %v2576_v34 }
  0x6a   : > { %v1119_v52 = vpack.c.bf16 %v1104_v41, %v1103_v40  ;;  %v1268_v34 = vld [vmem:[%s15885_s28 + $0x24] sm:$0xff]  ;;  %v16277_v35 = vld [vmem:[%s15885_s28 + $0xbc] sm:$0xff] }
  0x6b   : > { %v16280_v40 = vld [vmem:[%s15885_s28 + $0xc4] sm:$0xff] }
  0x6f   : > { %13552 = vmatmul.mubr.msk.bf16.gmra.mrb[12].mxu0 %vm578_vm2, %v854_v25  ;;  %v16214_v25 = vand.u32 %v15867_v5, %v502_v21  ;;  %v2753_v21 = vpack.c.bf16 %v16280_v40, %v16277_v35 }
  0x70   : > { %13720 = vmatmul.mubr.msk.bf16.vlgmr.msra.gmra.mrb[12].mxu1 %vm578_vm2, %v2035_v26  ;;  %13557 = vmatprep.mubr.msk.bf16.mxu0 %vm578_vm2, %v546_v36  ;;  %v1105_v26 = vld [vmem:[%s15885_s28 + $0x2b] sm:$0xff]  ;;  %v1106_v36 = vld [vmem:[%s15885_s28 + $0x33] sm:$0xff] }
  0x71   : > { %13723 = vmatprep.mubr.msk.bf16.mxu1 %vm578_vm2, %v2036_v37  ;;  %13736 = vmatpush3.bf16.msra.mxu1 %v16086_v14  ;;  %v2580_v37 = vld [vmem:[%s15885_s28 + $0xcb] sm:$0xff]  ;;  %v1120_v50 = vpack.c.bf16 %v1106_v36, %v1105_v26  ;;  %v2742_v36 = vld [vmem:[%s15885_s28 + $0xd4] sm:$0xff] }
  0x72   : > { %13753 = vmatprep.subr.bf16.mxu1 %v16157_v39  ;;  %v2593_v51 = vpack.c.bf16 %v2581_v38, %v2580_v37  ;;  %v2741_v26 = vld [vmem:[%s15885_s28 + $0xcc] sm:$0xff]  ;;  %v1271_v37 = vld [vmem:[%s15885_s28 + $0x3c] sm:$0xff]  ;;  %v16303_v38 = vld [vmem:[%s15885_s28 + $0x44] sm:$0xff] }
  0x77   : > { %13558 = vmatmul.mubr.msk.bf16.vlgmr.msra.gmra.mrb[0].mxu0 %vm578_vm2, %v547_v55  ;;  %v2594_v55 = vpack.c.bf16 %v2583_v49, %v2582_v48  ;;  %v2754_v49 = vpack.c.bf16 %v2742_v36, %v2741_v26 }
  0x78   : > { %13574 = vmatpush3.bf16.msra.mxu0 %v16086_v14  ;;  %13724 = vmatmul.mubr.msk.bf16.gmra.mrb[0].mxu1 %vm578_vm2, %v2037_v56  ;;  %v1109_v56 = vld [vmem:[%s15885_s28 + $0x4b] sm:$0xff] }
  0x79   : > { %13561 = vmatprep.mubr.msk.bf16.mxu0 %vm578_vm2, %v548_v57  ;;  %13727 = vmatprep.mubr.msk.bf16.mxu1 %vm578_vm2, %v2038_v58  ;;  %v1110_v57 = vld [vmem:[%s15885_s28 + $0x53] sm:$0xff]  ;;  %v2584_v58 = vld [vmem:[%s15885_s28 + $0xeb] sm:$0xff] }
  0x7a   : > { %13591 = vmatprep.subr.bf16.mxu0 %v16157_v39  ;;  %v1122_v0 = vpack.c.bf16 %v1110_v57, %v1109_v56  ;;  %v2595_v2 = vpack.c.bf16 %v2585_v59, %v2584_v58  ;;  %v2745_v56 = vld [vmem:[%s15885_s28 + $0xec] sm:$0xff]  ;;  %v2746_v57 = vld [vmem:[%s15885_s28 + $0xf4] sm:$0xff]  ;;  %v1275_v58 = vld [vmem:[%s15885_s28 + $0x5c] sm:$0xff] }
  0x7b   : > { %v1276_v59 = vld [vmem:[%s15885_s28 + $0x64] sm:$0xff] }
  0x7f   : > { %13562 = vmatmul.mubr.msk.bf16.gmra.mrb[4].mxu0 %vm578_vm2, %v549_v4  ;;  %v2596_v4 = vpack.c.bf16 %v2587_v63, %v2586_v62  ;;  %v2756_v63 = vpack.c.bf16 %v2746_v57, %v2745_v56 }
  0x80   : > { %13728 = vmatmul.mubr.msk.bf16.gmra.mrb[4].mxu1 %vm578_vm2, %v2039_v8  ;;  %13565 = vmatprep.mubr.msk.bf16.mxu0 %vm578_vm2, %v550_v9  ;;  %v1113_v8 = vld [vmem:[%s15885_s28 + $0x6b] sm:$0xff]  ;;  %v1114_v9 = vld [vmem:[%s15885_s28 + $0x73] sm:$0xff] }
  0x81   : > { %13731 = vmatprep.mubr.msk.bf16.mxu1 %vm578_vm2, %v2040_v10  ;;  %v2588_v10 = vld [vmem:[%s15885_s28 + $0x10b] sm:$0xff]  ;;  %v1124_v19 = vpack.c.bf16 %v1114_v9, %v1113_v8  ;;  %v2750_v9 = vld [vmem:[%s15885_s28 + $0x114] sm:$0xff] }
  0x82   : > { %v2597_v20 = vpack.c.bf16 %v2589_v11, %v2588_v10  ;;  %v2749_v8 = vld [vmem:[%s15885_s28 + $0x10c] sm:$0xff]  ;;  %v1279_v10 = vld [vmem:[%s15885_s28 + $0x7c] sm:$0xff]  ;;  %v1280_v11 = vld [vmem:[%s15885_s28 + $0x84] sm:$0xff] }
  0x83   : > { %v2758_v13 = vpack.c.bf16 %v2750_v9, %v2749_v8 }
  0x87   : > { %13566 = vmatmul.mubr.msk.bf16.gmra.mrb[8].mxu0 %vm578_vm2, %v551_v23  ;;  %v2751_v23 = vpack.c.bf16 %v16258_v18, %v16255_v15 }
  0x88   : > { %13732 = vmatmul.mubr.msk.bf16.gmra.mrb[8].mxu1 %vm578_vm2, %v2041_v24  ;;  %13569 = vmatprep.mubr.msk.bf16.mxu0 %vm578_vm2, %v552_v28  ;;  %v1117_v24 = vld [vmem:[%s15885_s28 + $0x8b] sm:$0xff]  ;;  %v1118_v28 = vld [vmem:[%s15885_s28 + $0x93] sm:$0xff] }
  0x89   : > { %13737 = vmatprep.mubr.msk.bf16.mxu1 %vm578_vm2, %v2590_v30  ;;  %v16268_v30 = vld [vmem:[%s15885_s28 + $0xac] sm:$0xff]  ;;  %v1126_v41 = vpack.c.bf16 %v1118_v28, %v1117_v24 }
  0x8a   : > { %v2752_v16 = vpack.c.bf16 %v16272_v32, %v16268_v30  ;;  %v504_v28 = vld [vmem:[%s18949_s1 + $0x10] sm:$0x3] }
  0x8f   : > { %13570 = vmatmul.mubr.msk.bf16.gmra.mrb[12].mxu0 %vm578_vm2, %v553_v17  ;;  %v1283_v17 = vpack.c.bf16 %v1268_v34, %v1267_v33  ;;  %v2913_v33 = vpack.c.bf16 %v2741_v26, %v16280_v40  ;;  %v2915_v40 = vpack.c.bf16 %v2745_v56, %v16307_v47  ;;  %v2910_v26 = vld [vmem:[%s15885_s28 + $0x124] sm:$0xff]  ;;  %v3061_v56 = vld [vmem:[%s15885_s28 + $0xd5] sm:$0xff] }
  0x90   : > { %13738 = vmatmul.mubr.msk.bf16.vlgmr.msra.gmra.mrb[12].mxu1 %vm578_vm2, %v2591_v45  ;;  %13575 = vmatprep.mubr.msk.bf16.mxu0 %vm578_vm2, %v1119_v52  ;;  %v16290_v45 = vand.u32 %v15867_v5, %v503_v44  ;;  %v1269_v52 = vld [vmem:[%s15885_s28 + $0x2c] sm:$0xff] }
  0x91   : > { %13741 = vmatprep.mubr.msk.bf16.mxu1 %vm578_vm2, %v2592_v53  ;;  %13754 = vmatpush3.bf16.msra.mxu1 %v16157_v39  ;;  %v1270_v53 = vld [vmem:[%s15885_s28 + $0x34] sm:$0xff] }
  0x92   : > { %13771 = vmatprep.subr.bf16.mxu1 %v16214_v25  ;;  %v1284_v48 = vpack.c.bf16 %v1270_v53, %v1269_v52  ;;  %v1447_v34 = vpack.c.bf16 %v1271_v37, %v1270_v53 }
  0x97   : > { %13576 = vmatmul.mubr.msk.bf16.vlgmr.msra.gmra.mrb[0].mxu0 %vm578_vm2, %v1120_v50  ;;  %v1285_v50 = vpack.c.bf16 %v16303_v38, %v1271_v37  ;;  %v3057_v37 = vld [vmem:[%s15885_s28 + $0xb5] sm:$0xff] }
  0x98   : > { %13592 = vmatpush3.bf16.msra.mxu0 %v16157_v39  ;;  %13742 = vmatmul.mubr.msk.bf16.gmra.mrb[0].mxu1 %vm578_vm2, %v2593_v51  ;;  %v2755_v51 = vpack.c.bf16 %v16307_v47, %v2743_v46 }
  0x99   : > { %13579 = vmatprep.mubr.msk.bf16.mxu0 %vm578_vm2, %v1121_v54  ;;  %13745 = vmatprep.mubr.msk.bf16.mxu1 %vm578_vm2, %v2594_v55  ;;  %v1273_v54 = vld [vmem:[%s15885_s28 + $0x4c] sm:$0xff]  ;;  %v1274_v55 = vld [vmem:[%s15885_s28 + $0x54] sm:$0xff] }
  0x9a   : > { %13609 = vmatprep.subr.bf16.mxu0 %v16214_v25  ;;  %v1286_v62 = vpack.c.bf16 %v1274_v55, %v1273_v54  ;;  %v1449_v44 = vpack.c.bf16 %v1275_v58, %v1274_v55  ;;  %v1596_v55 = vld [vmem:[%s15885_s28 + $0x3d] sm:$0xff] }
  0x9f   : > { %13580 = vmatmul.mubr.msk.bf16.gmra.mrb[4].mxu0 %vm578_vm2, %v1122_v0  ;;  %v1287_v0 = vpack.c.bf16 %v1276_v59, %v1275_v58 }
  0xa0   : > { %13746 = vmatmul.mubr.msk.bf16.gmra.mrb[4].mxu1 %vm578_vm2, %v2595_v2  ;;  %13583 = vmatprep.mubr.msk.bf16.mxu0 %vm578_vm2, %v1123_v3  ;;  %v2757_v2 = vpack.c.bf16 %v2748_v61, %v2747_v60  ;;  %v1277_v3 = vld [vmem:[%s15885_s28 + $0x6c] sm:$0xff] }
  0xa1   : > { %13749 = vmatprep.mubr.msk.bf16.mxu1 %vm578_vm2, %v2596_v4  ;;  %v1278_v4 = vld [vmem:[%s15885_s28 + $0x74] sm:$0xff] }
  0xa2   : > { %v1288_v12 = vpack.c.bf16 %v1278_v4, %v1277_v3  ;;  %v1451_v52 = vpack.c.bf16 %v1279_v10, %v1278_v4 }
  0xa7   : > { %13584 = vmatmul.mubr.msk.bf16.gmra.mrb[8].mxu0 %vm578_vm2, %v1124_v19  ;;  %v1289_v19 = vpack.c.bf16 %v1280_v11, %v1279_v10 }
  0xa8   : > { %13750 = vmatmul.mubr.msk.bf16.gmra.mrb[8].mxu1 %vm578_vm2, %v2597_v20  ;;  %13587 = vmatprep.mubr.msk.bf16.mxu0 %vm578_vm2, %v1125_v22  ;;  %v2912_v20 = vpack.c.bf16 %v16277_v35, %v16272_v32  ;;  %v1281_v22 = vld [vmem:[%s15885_s28 + $0x8c] sm:$0xff]  ;;  %v16349_v32 = vand.u32 %v15867_v5, %v504_v28  ;;  %v1448_v35 = vpack.c.bf16 %v1273_v54, %v16303_v38  ;;  %v3058_v38 = vld [vmem:[%s15885_s28 + $0xbd] sm:$0xff]  ;;  %v1595_v54 = vld [vmem:[%s15885_s28 + $0x35] sm:$0xff] }
  0xa9   : > { %13755 = vmatprep.mubr.msk.bf16.mxu1 %vm578_vm2, %v2751_v23  ;;  %v1282_v23 = vld [vmem:[%s15885_s28 + $0x94] sm:$0xff]  ;;  %v2916_v5 = vpack.c.bf16 %v2747_v60, %v2746_v57  ;;  %v1454_v57 = vpack.c.bf16 %v16268_v30, %v16258_v18  ;;  %v1600_v30 = vld [vmem:[%s15885_s28 + $0x5d] sm:$0xff] }
  0xaa   : > { %v1290_v24 = vpack.c.bf16 %v1282_v23, %v1281_v22  ;;  %v1599_v18 = vld [vmem:[%s15885_s28 + $0x55] sm:$0xff] }
  0xaf   : > { %13588 = vmatmul.mubr.msk.bf16.gmra.mrb[12].mxu0 %vm578_vm2, %v1126_v41  ;;  %v2914_v41 = vpack.c.bf16 %v2743_v46, %v2742_v36  ;;  %v2911_v36 = vld [vmem:[%s15885_s28 + $0x12c] sm:$0xff]  ;;  %v1452_v46 = vpack.c.bf16 %v1281_v22, %v1280_v11  ;;  %v1604_v22 = vld [vmem:[%s15885_s28 + $0x7d] sm:$0xff] }
  0xb0   : > { %13756 = vmatmul.mubr.msk.bf16.vlgmr.msra.gmra.mrb[12].mxu1 %vm578_vm2, %v2752_v16  ;;  %13593 = vmatprep.mubr.msk.bf16.mxu0 %vm578_vm2, %v1283_v17  ;;  %v2909_v16 = vld [vmem:[%s15885_s28 + $0x11c] sm:$0xff]  ;;  %v1450_v17 = vpack.c.bf16 %v1277_v3, %v1276_v59  ;;  %v2919_v47 = vpack.c.bf16 %v2911_v36, %v2910_v26  ;;  %v1611_v59 = vpack.c.bf16 %v1596_v55, %v1595_v54  ;;  %v1601_v11 = vld [vmem:[%s15885_s28 + $0x65] sm:$0xff] }
  0xb1   : > { %13759 = vmatprep.mubr.msk.bf16.mxu1 %vm578_vm2, %v2753_v21  ;;  %13772 = vmatpush3.bf16.msra.mxu1 %v16214_v25  ;;  %v2917_v21 = vpack.c.bf16 %v2749_v8, %v2748_v61  ;;  %v2918_v53 = vpack.c.bf16 %v2909_v16, %v2750_v9  ;;  %v1597_v61 = vld [vmem:[%s15885_s28 + $0x45] sm:$0xff]  ;;  %v3066_v3 = vld [vmem:[%s15885_s28 + $0xfd] sm:$0xff]  ;;  %v1613_v9 = vpack.c.bf16 %v1600_v30, %v1599_v18  ;;  %v1607_v16 = vld [vmem:[%s15885_s28 + $0x95] sm:$0xff] }
  0xb2   : > { %13789 = vmatprep.subr.bf16.mxu1 %v16290_v45  ;;  %v3223_v54 = vld [vmem:[%s15885_s28 + $0xde] sm:$0xff] }
  0xb3   : > { %v3227_v18 = vld [vmem:[%s15885_s28 + $0xfe] sm:$0xff] }
  0xb7   : > { %13594 = vmatmul.mubr.msk.bf16.vlgmr.msra.gmra.mrb[0].mxu0 %vm578_vm2, %v1284_v48  ;;  %v1453_v48 = vpack.c.bf16 %v16255_v15, %v1282_v23  ;;  %v3062_v15 = vld [vmem:[%s15885_s28 + $0xdd] sm:$0xff]  ;;  %v3069_v23 = vld [vmem:[%s15885_s28 + $0x115] sm:$0xff] }
  0xb8   : > { %13610 = vmatpush3.bf16.msra.mxu0 %v16214_v25  ;;  %13760 = vmatmul.mubr.msk.bf16.gmra.mrb[0].mxu1 %vm578_vm2, %v2754_v49  ;;  %v3073_v49 = vpack.c.bf16 %v3058_v38, %v3057_v37  ;;  %v3075_v60 = vpack.c.bf16 %v3062_v15, %v3061_v56  ;;  %v1609_v38 = vld [vmem:[%s15885_s28 + $0xa5] sm:$0xff] }
  0xb9   : > { %13597 = vmatprep.mubr.msk.bf16.mxu0 %vm578_vm2, %v1285_v50  ;;  %13763 = vmatprep.mubr.msk.bf16.mxu1 %vm578_vm2, %v2755_v51  ;;  %v3059_v50 = vld [vmem:[%s15885_s28 + $0xc5] sm:$0xff]  ;;  %v3060_v51 = vld [vmem:[%s15885_s28 + $0xcd] sm:$0xff] }
  0xba   : > { %13627 = vmatprep.subr.bf16.mxu0 %v16290_v45  ;;  %v3074_v58 = vpack.c.bf16 %v3060_v51, %v3059_v50  ;;  %v1760_v50 = vld [vmem:[%s15885_s28 + $0x3e] sm:$0xff]  ;;  %v3222_v51 = vld [vmem:[%s15885_s28 + $0xd6] sm:$0xff] }
  0xbf   : > { %13598 = vmatmul.mubr.msk.bf16.gmra.mrb[4].mxu0 %vm578_vm2, %v1286_v62  ;;  %v1598_v62 = vld [vmem:[%s15885_s28 + $0x4d] sm:$0xff] }
  0xc0   : > { %13764 = vmatmul.mubr.msk.bf16.gmra.mrb[4].mxu1 %vm578_vm2, %v2756_v63  ;;  %13601 = vmatprep.mubr.msk.bf16.mxu0 %vm578_vm2, %v1287_v0  ;;  %v3063_v63 = vld [vmem:[%s15885_s28 + $0xe5] sm:$0xff]  ;;  %v3064_v0 = vld [vmem:[%s15885_s28 + $0xed] sm:$0xff]  ;;  %v1612_v4 = vpack.c.bf16 %v1598_v62, %v1597_v61  ;;  %v1763_v62 = vld [vmem:[%s15885_s28 + $0x56] sm:$0xff] }
  0xc1   : > { %13767 = vmatprep.mubr.msk.bf16.mxu1 %vm578_vm2, %v2757_v2  ;;  %v3065_v2 = vld [vmem:[%s15885_s28 + $0xf5] sm:$0xff]  ;;  %v3076_v8 = vpack.c.bf16 %v3064_v0, %v3063_v63  ;;  %v1764_v63 = vld [vmem:[%s15885_s28 + $0x5e] sm:$0xff] }
  0xc2   : > { %v3077_v10 = vpack.c.bf16 %v3066_v3, %v3065_v2  ;;  %v3225_v61 = vld [vmem:[%s15885_s28 + $0xee] sm:$0xff]  ;;  %v3226_v0 = vld [vmem:[%s15885_s28 + $0xf6] sm:$0xff]  ;;  %v1777_v3 = vpack.c.bf16 %v1764_v63, %v1763_v62  ;;  %v16550_v62 = vld [vmem:[%s15885_s28 + $0x122] sm:$0xff] }
  0xc3   : > { %v16554_v63 = vld [vmem:[%s15885_s28 + $0x12a] sm:$0xff] }
  0xc7   : > { %13602 = vmatmul.mubr.msk.bf16.gmra.mrb[8].mxu0 %vm578_vm2, %v1288_v12  ;;  %v1602_v12 = vld [vmem:[%s15885_s28 + $0x6d] sm:$0xff] }
  0xc8   : > { %13768 = vmatmul.mubr.msk.bf16.gmra.mrb[8].mxu1 %vm578_vm2, %v2758_v13  ;;  %13605 = vmatprep.mubr.msk.bf16.mxu0 %vm578_vm2, %v1289_v19  ;;  %v3067_v13 = vld [vmem:[%s15885_s28 + $0x105] sm:$0xff]  ;;  %v3068_v19 = vld [vmem:[%s15885_s28 + $0x10d] sm:$0xff]  ;;  %v1614_v28 = vpack.c.bf16 %v1602_v12, %v1601_v11  ;;  %v1767_v12 = vld [vmem:[%s15885_s28 + $0x76] sm:$0xff] }
  0xc9   : > { %13773 = vmatprep.mubr.msk.bf16.mxu1 %vm578_vm2, %v2912_v20  ;;  %v1603_v20 = vld [vmem:[%s15885_s28 + $0x75] sm:$0xff] }
  0xca   : > { %v3229_v11 = vld [vmem:[%s15885_s28 + $0x10e] sm:$0xff] }
  0xcf   : > { %13606 = vmatmul.mubr.msk.bf16.gmra.mrb[12].mxu0 %vm578_vm2, %v1290_v24  ;;  %v3070_v24 = vld [vmem:[%s15885_s28 + $0x11d] sm:$0xff] }
  0xd0   : > { %13774 = vmatmul.mubr.msk.bf16.vlgmr.msra.gmra.mrb[12].mxu1 %vm578_vm2, %v2913_v33  ;;  %13611 = vmatprep.mubr.msk.bf16.mxu0 %vm578_vm2, %v1447_v34  ;;  %v3078_v33 = vpack.c.bf16 %v3068_v19, %v3067_v13  ;;  %v1615_v34 = vpack.c.bf16 %v1604_v22, %v1603_v20  ;;  %v1768_v13 = vld [vmem:[%s15885_s28 + $0x7e] sm:$0xff]  ;;  %v3230_v19 = vld [vmem:[%s15885_s28 + $0x116] sm:$0xff] }
  0xd1   : > { %13777 = vmatprep.mubr.msk.bf16.mxu1 %vm578_vm2, %v2914_v41  ;;  %13790 = vmatpush3.bf16.msra.mxu1 %v16290_v45  ;;  %v3079_v41 = vpack.c.bf16 %v3070_v24, %v3069_v23  ;;  %v3231_v20 = vld [vmem:[%s15885_s28 + $0x11e] sm:$0xff]  ;;  %v1779_v24 = vpack.c.bf16 %v1768_v13, %v1767_v12 }
  0xd2   : > { %13807 = vmatprep.subr.bf16.mxu1 %v16349_v32  ;;  %v16585_v12 = vld [vmem:[%s15885_s28 + $0x1fa] sm:$0xff]  ;;  %v16588_v13 = vld [vmem:[%s15885_s28 + $0x142] sm:$0xff] }
  0xd7   : > { %13612 = vmatmul.mubr.msk.bf16.vlgmr.msra.gmra.mrb[0].mxu0 %vm578_vm2, %v1448_v35  ;;  %v1605_v35 = vld [vmem:[%s15885_s28 + $0x85] sm:$0xff] }
  0xd8   : > { %13628 = vmatpush3.bf16.msra.mxu0 %v16290_v45  ;;  %13778 = vmatmul.mubr.msk.bf16.gmra.mrb[0].mxu1 %vm578_vm2, %v2915_v40  ;;  %v1606_v40 = vld [vmem:[%s15885_s28 + $0x8d] sm:$0xff] }
  0xd9   : > { %13615 = vmatprep.mubr.msk.bf16.mxu0 %vm578_vm2, %v1449_v44  ;;  %13781 = vmatprep.mubr.msk.bf16.mxu1 %vm578_vm2, %v2916_v5  ;;  %v3071_v44 = vld [vmem:[%s15885_s28 + $0x125] sm:$0xff]  ;;  %v3072_v5 = vld [vmem:[%s15885_s28 + $0x12d] sm:$0xff] }
  0xda   : > { %13645 = vmatprep.subr.bf16.mxu0 %v16349_v32  ;;  %v3080_v26 = vpack.c.bf16 %v3072_v5, %v3071_v44  ;;  %v1772_v44 = vld [vmem:[%s15885_s28 + $0x9e] sm:$0xff] }
  0xdb   : > { %v16478_v5 = vld [vmem:[%s15885_s28 + $0x182] sm:$0xff] }
  0xdf   : > { %13616 = vmatmul.mubr.msk.bf16.gmra.mrb[4].mxu0 %vm578_vm2, %v1450_v17  ;;  %v1608_v17 = vld [vmem:[%s15885_s28 + $0x9d] sm:$0xff] }
  0xe0   : > { %13782 = vmatmul.mubr.msk.bf16.gmra.mrb[4].mxu1 %vm578_vm2, %v2917_v21  ;;  %13619 = vmatprep.mubr.msk.bf16.mxu0 %vm578_vm2, %v1451_v52  ;;  %v3218_v21 = vld [vmem:[%s15885_s28 + $0xb6] sm:$0xff]  ;;  %v3219_v52 = vld [vmem:[%s15885_s28 + $0xbe] sm:$0xff]  ;;  %v1617_v36 = vpack.c.bf16 %v1608_v17, %v1607_v16  ;;  %v16481_v16 = vld [vmem:[%s15885_s28 + $0x18a] sm:$0xff] }
  0xe1   : > { %13785 = vmatprep.mubr.msk.bf16.mxu1 %vm578_vm2, %v2918_v53  ;;  %v1616_v53 = vpack.c.bf16 %v1606_v40, %v1605_v35  ;;  %v3234_v37 = vpack.c.bf16 %v3219_v52, %v3218_v21  ;;  %v3233_v35 = vld [vmem:[%s15885_s28 + $0x12e] sm:$0xff]  ;;  %v1771_v40 = vld [vmem:[%s15885_s28 + $0x96] sm:$0xff] }
  0xe2   : > { %v1781_v52 = vpack.c.bf16 %v1772_v44, %v1771_v40  ;;  %v4895_v40 = vld [vmem:[%s15885_s28 + $0x198] sm:$0xff]  ;;  %v16615_v44 = vld [vmem:[%s15885_s28 + $0x162] sm:$0xff] }
  0xe7   : > { %13620 = vmatmul.mubr.msk.bf16.gmra.mrb[8].mxu0 %vm578_vm2, %v1452_v46  ;;  %v1610_v46 = vld [vmem:[%s15885_s28 + $0xad] sm:$0xff] }
  0xe8   : > { %13786 = vmatmul.mubr.msk.bf16.gmra.mrb[8].mxu1 %vm578_vm2, %v2919_v47  ;;  %13623 = vmatprep.mubr.msk.bf16.mxu0 %vm578_vm2, %v1453_v48  ;;  %v3220_v47 = vld [vmem:[%s15885_s28 + $0xc6] sm:$0xff]  ;;  %v3221_v48 = vld [vmem:[%s15885_s28 + $0xce] sm:$0xff]  ;;  %v1618_v55 = vpack.c.bf16 %v1610_v46, %v1609_v38  ;;  %v16495_v38 = vld [vmem:[%s15885_s28 + $0x19a] sm:$0xff] }
  0xe9   : > { %13791 = vmatprep.mubr.msk.bf16.mxu1 %vm578_vm2, %v3073_v49  ;;  %v1759_v49 = vld [vmem:[%s15885_s28 + $0x36] sm:$0xff]  ;;  %v3235_v56 = vpack.c.bf16 %v3221_v48, %v3220_v47  ;;  %v16498_v46 = vld [vmem:[%s15885_s28 + $0x1a2] sm:$0xff]  ;;  %v16501_v47 = vld [vmem:[%s15885_s28 + $0x1aa] sm:$0xff] }
  0xea   : > { %v1775_v15 = vpack.c.bf16 %v1760_v50, %v1759_v49  ;;  %v2058_v50 = vpack.c.bf16 %v16135_v42, %v16122_v31  ;;  %v15750_v31 = vld [vmem:[%s15885_s28 + $0x9a] sm:$0xff] }
  0xeb   : > { %v2059_v42 = vpack.c.bf16 %v15750_v31, %v16138_v43  ;;  %v16539_v43 = vld [vmem:[%s15885_s28 + $0x11a] sm:$0xff] }
  0xec   : > { %v4899_v31 = vld [vmem:[%s15885_s28 + $0x1b8] sm:$0xff] }
  0xef   : > { %13624 = vmatmul.mubr.msk.bf16.gmra.mrb[12].mxu0 %vm578_vm2, %v1454_v57  ;;  %v3236_v57 = vpack.c.bf16 %v3223_v54, %v3222_v51  ;;  %v4958_v51 = vpack.c.bf16 %v16501_v47, %v16498_v46  ;;  %v16514_v54 = vld [vmem:[%s15885_s28 + $0x1b2] sm:$0xff] }
  0xf0   : > { %13792 = vmatmul.mubr.msk.bf16.vlgmr.msra.gmra.mrb[12].mxu1 %vm578_vm2, %v3074_v58  ;;  %13629 = vmatprep.mubr.msk.bf16.mxu0 %vm578_vm2, %v1611_v59  ;;  %v1761_v58 = vld [vmem:[%s15885_s28 + $0x46] sm:$0xff]  ;;  %v1762_v59 = vld [vmem:[%s15885_s28 + $0x4e] sm:$0xff] }
  0xf1   : > { %13795 = vmatprep.mubr.msk.bf16.mxu1 %vm578_vm2, %v3075_v60  ;;  %13808 = vmatpush3.bf16.msra.mxu1 %v16349_v32  ;;  %v3224_v60 = vld [vmem:[%s15885_s28 + $0xe6] sm:$0xff]  ;;  %v1776_v30 = vpack.c.bf16 %v1762_v59, %v1761_v58 }
  0xf2   : > { %13987 = vmatprep.subr.bf16.mxu1 %v15872_v6  ;;  %v3237_v2 = vpack.c.bf16 %v3225_v61, %v3224_v60  ;;  %v15751_v58 = vld [vmem:[%s15885_s28 + $0x102] sm:$0xff]  ;;  %v16544_v61 = vld [vmem:[%s15885_s28 + $0x1d2] sm:$0xff] }
  0xf3   : > { %v3507_v59 = vpack.c.bf16 %v16118_v29, %v15751_v58  ;;  %v16547_v29 = vld [vmem:[%s15885_s28 + $0x1da] sm:$0xff] }
  0xf4   : > { %v4900_v58 = vld [vmem:[%s15885_s28 + $0x1c0] sm:$0xff] }
  0xf7   : > { %13630 = vmatmul.mubr.msk.bf16.vlgmr.msra.gmra.mrb[0].mxu0 %vm578_vm2, %v1612_v4  ;;  %v3238_v4 = vpack.c.bf16 %v3227_v18, %v3226_v0  ;;  %v16557_v0 = vld [vmem:[%s15885_s28 + $0x1e2] sm:$0xff]  ;;  %v16560_v18 = vld [vmem:[%s15885_s28 + $0x1ea] sm:$0xff] }
  0xf8   : > { %13646 = vmatpush3.bf16.msra.mxu0 %v16349_v32  ;;  %13796 = vmatmul.mubr.msk.bf16.gmra.mrb[0].mxu1 %vm578_vm2, %v3076_v8  ;;  %v1765_v8 = vld [vmem:[%s15885_s28 + $0x66] sm:$0xff] }
  0xf9   : > { %13633 = vmatprep.mubr.msk.bf16.mxu0 %vm578_vm2, %v1613_v9  ;;  %13799 = vmatprep.mubr.msk.bf16.mxu1 %vm578_vm2, %v3077_v10  ;;  %v1766_v9 = vld [vmem:[%s15885_s28 + $0x6e] sm:$0xff]  ;;  %v3228_v10 = vld [vmem:[%s15885_s28 + $0x106] sm:$0xff] }
  0xfa   : > { %13663 = vmatprep.subr.bf16.mxu0 %v15872_v6  ;;  %v1778_v22 = vpack.c.bf16 %v1766_v9, %v1765_v8  ;;  %v3239_v23 = vpack.c.bf16 %v3229_v11, %v3228_v10  ;;  %v4962_v8 = vpack.c.bf16 %v16560_v18, %v16557_v0  ;;  %v16574_v9 = vld [vmem:[%s15885_s28 + $0x132] sm:$0xff]  ;;  %v16577_v10 = vld [vmem:[%s15885_s28 + $0x13a] sm:$0xff] }
  0xfb   : > { %v16580_v11 = vld [vmem:[%s15885_s28 + $0x1f2] sm:$0xff] }
  0xff   : > { %13634 = vmatmul.mubr.msk.bf16.gmra.mrb[4].mxu0 %vm578_vm2, %v1614_v28  ;;  %v3240_v28 = vpack.c.bf16 %v3231_v20, %v3230_v19  ;;  %v16591_v19 = vld [vmem:[%s15885_s28 + $0x14a] sm:$0xff]  ;;  %v4892_v20 = vld [vmem:[%s15885_s28 + $0x180] sm:$0xff] }
 0x100   : > { %13800 = vmatmul.mubr.msk.bf16.gmra.mrb[4].mxu1 %vm578_vm2, %v3078_v33  ;;  %13637 = vmatprep.mubr.msk.bf16.mxu0 %vm578_vm2, %v1615_v34  ;;  %v1769_v33 = vld [vmem:[%s15885_s28 + $0x86] sm:$0xff]  ;;  %v1770_v34 = vld [vmem:[%s15885_s28 + $0x8e] sm:$0xff] }
 0x101   : > { %13803 = vmatprep.mubr.msk.bf16.mxu1 %vm578_vm2, %v3079_v41  ;;  %v3232_v41 = vld [vmem:[%s15885_s28 + $0x126] sm:$0xff]  ;;  %v1780_v17 = vpack.c.bf16 %v1770_v34, %v1769_v33  ;;  %v16606_v34 = vld [vmem:[%s15885_s28 + $0x152] sm:$0xff] }
 0x102   : > { %v3241_v21 = vpack.c.bf16 %v3233_v35, %v3232_v41  ;;  %v16609_v41 = vld [vmem:[%s15885_s28 + $0x15a] sm:$0xff]  ;;  %v4894_v35 = vld [vmem:[%s15885_s28 + $0x190] sm:$0xff] }
 0x107   : > { %13638 = vmatmul.mubr.msk.bf16.gmra.mrb[8].mxu0 %vm578_vm2, %v1616_v53  ;;  %v4956_v53 = vpack.c.bf16 %v16481_v16, %v16478_v5 }
 0x108   : > { %13804 = vmatmul.mubr.msk.bf16.gmra.mrb[8].mxu1 %vm578_vm2, %v3080_v26  ;;  %13641 = vmatprep.mubr.msk.bf16.mxu0 %vm578_vm2, %v1617_v36  ;;  %v1773_v26 = vld [vmem:[%s15885_s28 + $0xa6] sm:$0xff]  ;;  %v1774_v36 = vld [vmem:[%s15885_s28 + $0xae] sm:$0xff] }
 0x109   : > { %13809 = vmatprep.mubr.msk.bf16.mxu1 %vm578_vm2, %v3234_v37  ;;  %v16492_v37 = vld [vmem:[%s15885_s28 + $0x192] sm:$0xff]  ;;  %v1782_v48 = vpack.c.bf16 %v1774_v36, %v1773_v26  ;;  %v4909_v26 = vpack.c.bf16 %v4895_v40, %v4894_v35 }
 0x10a   : > { %v4957_v49 = vpack.c.bf16 %v16495_v38, %v16492_v37 }
 0x10f   : > { %13642 = vmatmul.mubr.msk.bf16.gmra.mrb[12].mxu0 %vm578_vm2, %v1618_v55  ;;  %v16517_v55 = vld [vmem:[%s15885_s28 + $0x1ba] sm:$0xff] }
 0x110   : > { %13810 = vmatmul.mubr.msk.bf16.vlgmr.msra.gmra.mrb[12].mxu1 %vm578_vm2, %v3235_v56  ;;  %13647 = vmatprep.mubr.msk.bf16.mxu0 %vm578_vm2, %v1775_v15  ;;  %v16524_v56 = vld [vmem:[%s15885_s28 + $0x1c2] sm:$0xff]  ;;  %v16527_v15 = vld [vmem:[%s15885_s28 + $0x1ca] sm:$0xff] }
 0x111   : > { %13813 = vmatprep.mubr.msk.bf16.mxu1 %vm578_vm2, %v3236_v57  ;;  %13988 = vmatpush3.bf16.msra.mxu1 %v15872_v6  ;;  %v4959_v57 = vpack.c.bf16 %v16517_v55, %v16514_v54  ;;  %v4960_v60 = vpack.c.bf16 %v16527_v15, %v16524_v56 }
 0x112   : > { %14005 = vmatprep.subr.bf16.mxu1 %v15875_v7 }
 0x117   : > { %13648 = vmatmul.mubr.msk.bf16.vlgmr.msra.gmra.mrb[0].mxu0 %vm578_vm2, %v1776_v30  ;;  %v15752_v30 = vld [vmem:[%s15885_s28 + $0x112] sm:$0xff] }
 0x118   : > { %13664 = vmatpush3.bf16.msra.mxu0 %v15872_v6  ;;  %13814 = vmatmul.mubr.msk.bf16.gmra.mrb[0].mxu1 %vm578_vm2, %v3237_v2  ;;  %v3508_v2 = vpack.c.bf16 %v16539_v43, %v15752_v30 }
 0x119   : > { %13651 = vmatprep.mubr.msk.bf16.mxu0 %vm578_vm2, %v1777_v3  ;;  %13817 = vmatprep.mubr.msk.bf16.mxu1 %vm578_vm2, %v3238_v4  ;;  %v4961_v3 = vpack.c.bf16 %v16547_v29, %v16544_v61  ;;  %v3509_v4 = vpack.c.bf16 %v16554_v63, %v16550_v62 }
 0x11a   : > { %13825 = vmatprep.subr.bf16.mxu0 %v15872_v6 }
 0x11f   : > { %13652 = vmatmul.mubr.msk.bf16.gmra.mrb[4].mxu0 %vm578_vm2, %v1778_v22  ;;  %v4893_v22 = vld [vmem:[%s15885_s28 + $0x188] sm:$0xff] }
 0x120   : > { %13818 = vmatmul.mubr.msk.bf16.gmra.mrb[4].mxu1 %vm578_vm2, %v3239_v23  ;;  %13655 = vmatprep.mubr.msk.bf16.mxu0 %vm578_vm2, %v1779_v24  ;;  %v3510_v23 = vpack.c.bf16 %v16577_v10, %v16574_v9  ;;  %v4963_v24 = vpack.c.bf16 %v16585_v12, %v16580_v11  ;;  %v4908_v33 = vpack.c.bf16 %v4893_v22, %v4892_v20  ;;  %v4902_v20 = vld [vmem:[%s15885_s28 + $0x1d0] sm:$0xff]  ;;  %v4903_v22 = vld [vmem:[%s15885_s28 + $0x1d8] sm:$0xff] }
 0x121   : > { %13821 = vmatprep.mubr.msk.bf16.mxu1 %vm578_vm2, %v3240_v28  ;;  %v3511_v28 = vpack.c.bf16 %v16591_v19, %v16588_v13  ;;  %v4913_v40 = vpack.c.bf16 %v4903_v22, %v4902_v20  ;;  %v3458_v22 = vld [vmem:[%s15885_s28 + $0x178] sm:$0xff] }
 0x127   : > { %13656 = vmatmul.mubr.msk.bf16.gmra.mrb[8].mxu0 %vm578_vm2, %v1780_v17  ;;  %v16618_v17 = vld [vmem:[%s15885_s28 + $0x16a] sm:$0xff] }
 0x128   : > { %13822 = vmatmul.mubr.msk.bf16.gmra.mrb[8].mxu1 %vm578_vm2, %v3241_v21  ;;  %13659 = vmatprep.mubr.msk.bf16.mxu0 %vm578_vm2, %v1781_v52  ;;  %v4896_v21 = vld [vmem:[%s15885_s28 + $0x1a0] sm:$0xff]  ;;  %v4897_v52 = vld [vmem:[%s15885_s28 + $0x1a8] sm:$0xff]  ;;  %v3513_v36 = vpack.c.bf16 %v16618_v17, %v16615_v44 }
 0x129   : > { %13989 = vmatprep.mubr.msk.bf16.mxu1 %vm578_vm2, %v4956_v53  ;;  %v3512_v53 = vpack.c.bf16 %v16609_v41, %v16606_v34 }
 0x12f   : > { %13660 = vmatmul.mubr.msk.bf16.gmra.mrb[12].mxu0 %vm578_vm2, %v1782_v48  ;;  %v4910_v48 = vpack.c.bf16 %v4897_v52, %v4896_v21 }
 0x130   : > { %13990 = vmatmul.mubr.msk.bf16.vlgmr.msra.gmra.mrb[16].mxu1 %vm578_vm2, %v4957_v49  ;;  %13665 = vmatprep.mubr.msk.bf16.mxu0 %vm578_vm2, %v2058_v50  ;;  %v16630_v49 = vld [vmem:[%s15885_s28 + $0x172] sm:$0xff]  ;;  %v16633_v50 = vld [vmem:[%s15885_s28 + $0x17a] sm:$0xff] }
 0x131   : > { %13993 = vmatprep.mubr.msk.bf16.mxu1 %vm578_vm2, %v4958_v51  ;;  %14006 = vmatpush3.bf16.msra.mxu1 %v15875_v7  ;;  %v4898_v51 = vld [vmem:[%s15885_s28 + $0x1b0] sm:$0xff] }
 0x132   : > { %14023 = vmatprep.subr.bf16.mxu1 %v15935_v27  ;;  %v4911_v30 = vpack.c.bf16 %v4899_v31, %v4898_v51  ;;  %v3451_v51 = vld [vmem:[%s15885_s28 + $0x140] sm:$0xff]  ;;  %v3452_v31 = vld [vmem:[%s15885_s28 + $0x148] sm:$0xff] }
 0x137   : > { %13666 = vmatmul.mubr.msk.bf16.vlgmr.msra.gmra.mrb[16].mxu0 %vm578_vm2, %v2059_v42  ;;  %v3443_v42 = vld [vmem:[%s15885_s28 + $0x100] sm:$0xff] }
 0x138   : > { %13826 = vmatpush3.bf16.msra.mxu0 %v15872_v6  ;;  %13994 = vmatmul.mubr.msk.bf16.gmra.mrb[20].mxu1 %vm578_vm2, %v4959_v57  ;;  %v3444_v57 = vld [vmem:[%s15885_s28 + $0x108] sm:$0xff] }
 0x139   : > { %13827 = vmatprep.mubr.msk.bf16.mxu0 %vm578_vm2, %v3507_v59  ;;  %13843 = vmatprep.subr.bf16.mxu0 %v15875_v7  ;;  %v4901_v59 = vld [vmem:[%s15885_s28 + $0x1c8] sm:$0xff] }
 0x13a   : > { %13997 = vmatprep.mubr.msk.bf16.mxu1 %vm578_vm2, %v4960_v60  ;;  %v3514_v60 = vpack.c.bf16 %v16633_v50, %v16630_v49 }
 0x13f   : > { %13828 = vmatmul.mubr.msk.bf16.vlgmr.msra.gmra.mrb[20].mxu0 %vm578_vm2, %v3508_v2  ;;  %v3459_v2 = vpack.c.bf16 %v3444_v57, %v3443_v42 }
 0x140   : > { %13844 = vmatpush3.bf16.msra.mxu0 %v15875_v7  ;;  %13998 = vmatmul.mubr.msk.bf16.gmra.mrb[24].mxu1 %vm578_vm2, %v4961_v3  ;;  %v4912_v3 = vpack.c.bf16 %v4901_v59, %v4900_v58  ;;  %v3463_v58 = vpack.c.bf16 %v3452_v31, %v3451_v51  ;;  %v5222_v59 = vpack.c.bf16 %v16498_v46, %v16495_v38  ;;  %v3457_v46 = vld [vmem:[%s15885_s28 + $0x170] sm:$0xff]  ;;  %v3470_v51 = vld [vmem:[%s15885_s28 + $0x119] sm:$0xff] }
 0x141   : > { %13831 = vmatprep.mubr.msk.bf16.mxu0 %vm578_vm2, %v3509_v4  ;;  %14001 = vmatprep.mubr.msk.bf16.mxu1 %vm578_vm2, %v4962_v8  ;;  %v3445_v4 = vld [vmem:[%s15885_s28 + $0x110] sm:$0xff]  ;;  %v3446_v8 = vld [vmem:[%s15885_s28 + $0x118] sm:$0xff]  ;;  %v5224_v38 = vpack.c.bf16 %v16524_v56, %v16517_v55  ;;  %v3773_v55 = vpack.c.bf16 %v16550_v62, %v16539_v43  ;;  %v5226_v56 = vpack.c.bf16 %v16557_v0, %v16547_v29  ;;  %v4916_v0 = vld [vmem:[%s15885_s28 + $0x181] sm:$0xff] }
 0x142   : > { %13861 = vmatprep.subr.bf16.mxu0 %v15935_v27  ;;  %v3460_v35 = vpack.c.bf16 %v3446_v8, %v3445_v4  ;;  %v5223_v8 = vpack.c.bf16 %v16514_v54, %v16501_v47  ;;  %v3466_v47 = vpack.c.bf16 %v3458_v22, %v3457_v46  ;;  %v5225_v54 = vpack.c.bf16 %v16544_v61, %v16527_v15  ;;  %v5220_v62 = vld [vmem:[%s15885_s28 + $0x20a] sm:$0xff]  ;;  %v5472_v22 = vld [vmem:[%s15885_s28 + $0x19b] sm:$0xff] }
 0x143   : > { %v3774_v15 = vpack.c.bf16 %v16574_v9, %v16554_v63  ;;  %v5227_v43 = vpack.c.bf16 %v16580_v11, %v16560_v18  ;;  %v3775_v61 = vpack.c.bf16 %v16588_v13, %v16577_v10  ;;  %v5221_v63 = vld [vmem:[%s15885_s28 + $0x212] sm:$0xff]  ;;  %v4917_v9 = vld [vmem:[%s15885_s28 + $0x189] sm:$0xff]  ;;  %v3776_v18 = vpack.c.bf16 %v16606_v34, %v16591_v19 }
 0x144   : > { %v5229_v10 = vpack.c.bf16 %v5221_v63, %v5220_v62  ;;  %v3777_v11 = vpack.c.bf16 %v16615_v44, %v16609_v41  ;;  %v15768_v13 = vmov 0.0   ;;  %v4918_v19 = vld [vmem:[%s15885_s28 + $0x191] sm:$0xff]  ;;  %v4919_v34 = vld [vmem:[%s15885_s28 + $0x199] sm:$0xff]  ;;  %v4920_v41 = vld [vmem:[%s15885_s28 + $0x1a1] sm:$0xff] }
 0x145   : > { %7650 = vst.msk [vmem:[#allocation3 + $0x18] sm:$0xff] %vm1977_vm3, %v15768_v13  ;;  %7651 = vst.msk [vmem:[#allocation3 + $0x20] sm:$0xff] %vm1977_vm3, %v15768_v13  ;;  %v4921_v44 = vld [vmem:[%s15885_s28 + $0x1a9] sm:$0xff]  ;;  %v4926_v31 = vld [vmem:[%s15885_s28 + $0x1d1] sm:$0xff] }
 0x146   : > { %7647 = vst.msk [vmem:[#allocation3] sm:$0xff] %vm1977_vm3, %v15768_v13  ;;  %7648 = vst.msk [vmem:[#allocation3 + $0x8] sm:$0xff] %vm1977_vm3, %v15768_v13  ;;  %v3476_v46 = vld [vmem:[%s15885_s28 + $0x149] sm:$0xff]  ;;  %v3479_v62 = vld [vmem:[%s15885_s28 + $0x161] sm:$0xff] }
 0x147   : > { %13832 = vmatmul.mubr.msk.bf16.gmra.mrb[24].mxu0 %vm578_vm2, %v3510_v23  ;;  %v3447_v23 = vld [vmem:[%s15885_s28 + $0x120] sm:$0xff]  ;;  %7649 = vst.msk [vmem:[#allocation3 + $0x10] sm:$0xff] %vm1977_vm3, %v15768_v13  ;;  %7652 = vst.msk [vmem:[#allocation3 + $0x28] sm:$0xff] %vm1977_vm3, %v15768_v13  ;;  %v3480_v63 = vld [vmem:[%s15885_s28 + $0x169] sm:$0xff] }
 0x148   : > { %14002 = vmatmul.mubr.msk.bf16.gmra.mrb[28].mxu1 %vm578_vm2, %v4963_v24  ;;  %13835 = vmatprep.mubr.msk.bf16.mxu0 %vm578_vm2, %v3511_v28  ;;  %v3448_v24 = vld [vmem:[%s15885_s28 + $0x128] sm:$0xff]  ;;  %v4904_v28 = vld [vmem:[%s15885_s28 + $0x1e0] sm:$0xff]  ;;  %7653 = vst.msk [vmem:[#allocation3 + $0x30] sm:$0xff] %vm1977_vm3, %v15768_v13  ;;  %7654 = vst.msk [vmem:[#allocation3 + $0x38] sm:$0xff] %vm1977_vm3, %v15768_v13 }
 0x149   : > { %14007 = vmatprep.mubr.msk.bf16.mxu1 %vm578_vm2, %v4908_v33  ;;  %v4905_v33 = vld [vmem:[%s15885_s28 + $0x1e8] sm:$0xff]  ;;  %v3461_v21 = vpack.c.bf16 %v3448_v24, %v3447_v23  ;;  %7655 = vst.msk [vmem:[#allocation3 + $0x40] sm:$0xff] %vm1977_vm3, %v15768_v13  ;;  %7656 = vst.msk [vmem:[#allocation3 + $0x48] sm:$0xff] %vm1977_vm3, %v15768_v13  ;;  %v3778_v24 = vpack.c.bf16 %v16630_v49, %v16618_v17  ;;  %v4923_v17 = vld [vmem:[%s15885_s28 + $0x1b9] sm:$0xff] }
 0x14a   : > { %v4914_v52 = vpack.c.bf16 %v4905_v33, %v4904_v28  ;;  %v5219_v23 = vld [vmem:[%s15885_s28 + $0x202] sm:$0xff]  ;;  %7657 = vst.msk [vmem:[#allocation3 + $0x50] sm:$0xff] %vm1977_vm3, %v15768_v13  ;;  %7658 = vst.msk [vmem:[#allocation3 + $0x58] sm:$0xff] %vm1977_vm3, %v15768_v13  ;;  %v4933_v28 = vpack.c.bf16 %v4919_v34, %v4918_v19  ;;  %v3779_v33 = vpack.c.bf16 %v16478_v5, %v16633_v50  ;;  %v3481_v19 = vld [vmem:[%s15885_s28 + $0x171] sm:$0xff] }
 0x14b   : > { %v5228_v29 = vpack.c.bf16 %v5219_v23, %v16585_v12  ;;  %v4932_v12 = vpack.c.bf16 %v4917_v9, %v4916_v0  ;;  %7659 = vst.msk [vmem:[#allocation3 + $0x60] sm:$0xff] %vm1977_vm3, %v15768_v13  ;;  %7660 = vst.msk [vmem:[#allocation3 + $0x68] sm:$0xff] %vm1977_vm3, %v15768_v13  ;;  %v3467_v49 = vld [vmem:[%s15885_s28 + $0x101] sm:$0xff]  ;;  %v4925_v50 = vld [vmem:[%s15885_s28 + $0x1c9] sm:$0xff] }
 0x14c   : > { %7661 = vst.msk [vmem:[#allocation3 + $0x70] sm:$0xff] %vm1977_vm3, %v15768_v13  ;;  %7662 = vst.msk [vmem:[#allocation3 + $0x78] sm:$0xff] %vm1977_vm3, %v15768_v13  ;;  %v4924_v5 = vld [vmem:[%s15885_s28 + $0x1c1] sm:$0xff]  ;;  %v3482_v34 = vld [vmem:[%s15885_s28 + $0x179] sm:$0xff] }
 0x14d   : > { %7663 = vst.msk [vmem:[#allocation3 + $0x80] sm:$0xff] %vm1977_vm3, %v15768_v13  ;;  %7664 = vst.msk [vmem:[#allocation3 + $0x88] sm:$0xff] %vm1977_vm3, %v15768_v13  ;;  %v5476_v0 = vld [vmem:[%s15885_s28 + $0x1bb] sm:$0xff]  ;;  %v5477_v9 = vld [vmem:[%s15885_s28 + $0x1c3] sm:$0xff] }
 0x14e   : > { %7665 = vst.msk [vmem:[#allocation3 + $0x90] sm:$0xff] %vm1977_vm3, %v15768_v13  ;;  %7666 = vst.msk [vmem:[#allocation3 + $0x98] sm:$0xff] %vm1977_vm3, %v15768_v13 }
 0x14f   : > { %13836 = vmatmul.mubr.msk.bf16.gmra.mrb[28].mxu0 %vm578_vm2, %v3512_v53  ;;  %v3449_v53 = vld [vmem:[%s15885_s28 + $0x130] sm:$0xff]  ;;  %7667 = vst.msk [vmem:[#allocation3 + $0xa0] sm:$0xff] %vm1977_vm3, %v15768_v13  ;;  %7668 = vst.msk [vmem:[#allocation3 + $0xa8] sm:$0xff] %vm1977_vm3, %v15768_v13 }
 0x150   : > { %14008 = vmatmul.mubr.msk.bf16.vlgmr.msra.gmra.mrb[16].mxu1 %vm578_vm2, %v4909_v26  ;;  %13839 = vmatprep.mubr.msk.bf16.mxu0 %vm578_vm2, %v3513_v36  ;;  %v3450_v26 = vld [vmem:[%s15885_s28 + $0x138] sm:$0xff]  ;;  %v4906_v36 = vld [vmem:[%s15885_s28 + $0x1f0] sm:$0xff]  ;;  %7669 = vst.msk [vmem:[#allocation3 + $0xb0] sm:$0xff] %vm1977_vm3, %v15768_v13  ;;  %7670 = vst.msk [vmem:[#allocation3 + $0xb8] sm:$0xff] %vm1977_vm3, %v15768_v13 }
 0x151   : > { %14011 = vmatprep.mubr.msk.bf16.mxu1 %vm578_vm2, %v4910_v48  ;;  %14024 = vmatpush3.bf16.msra.mxu1 %v15935_v27  ;;  %v4907_v48 = vld [vmem:[%s15885_s28 + $0x1f8] sm:$0xff]  ;;  %v3462_v42 = vpack.c.bf16 %v3450_v26, %v3449_v53  ;;  %7672 = vst.msk [vmem:[#allocation3 + $0xc0] sm:$0xf] %vm7671_vm4, %v15768_v13 }
 0x152   : > { %14041 = vmatprep.subr.bf16.mxu1 %v16028_v1  ;;  %v4915_v57 = vpack.c.bf16 %v4907_v48, %v4906_v36  ;;  %v4936_v36 = vpack.c.bf16 %v4925_v50, %v4924_v5  ;;  %v3469_v48 = vld [vmem:[%s15885_s28 + $0x111] sm:$0xff]  ;;  %10192 = vst.msk [vmem:[#allocation5] sm:$0xff] %vm9472_vm7, %v15768_v13  ;;  %10193 = vst.msk [vmem:[#allocation5 + $0x8] sm:$0xff] %vm9472_vm7, %v15768_v13 }
 0x153   : > { %v4025_v5 = vld [vmem:[%s15885_s28 + $0x12b] sm:$0xff]  ;;  %v4026_v50 = vld [vmem:[%s15885_s28 + $0x133] sm:$0xff]  ;;  %10194 = vst.msk [vmem:[#allocation5 + $0x10] sm:$0xff] %vm9472_vm7, %v15768_v13  ;;  %10195 = vst.msk [vmem:[#allocation5 + $0x18] sm:$0xff] %vm9472_vm7, %v15768_v13 }
 0x154   : > { %10196 = vst.msk [vmem:[#allocation5 + $0x20] sm:$0xff] %vm9472_vm7, %v15768_v13  ;;  %10197 = vst.msk [vmem:[#allocation5 + $0x28] sm:$0xff] %vm9472_vm7, %v15768_v13 }
 0x155   : > { %10198 = vst.msk [vmem:[#allocation5 + $0x30] sm:$0xff] %vm9472_vm7, %v15768_v13  ;;  %10199 = vst.msk [vmem:[#allocation5 + $0x38] sm:$0xff] %vm9472_vm7, %v15768_v13 }
 0x157   : > { %13840 = vmatmul.mubr.msk.bf16.gmra.mrb[32].mxu0 %vm578_vm2, %v3514_v60  ;;  %v3453_v60 = vld [vmem:[%s15885_s28 + $0x150] sm:$0xff] }
 0x158   : > { %14012 = vmatmul.mubr.msk.bf16.gmra.mrb[20].mxu1 %vm578_vm2, %v4911_v30  ;;  %13845 = vmatprep.mubr.msk.bf16.mxu0 %vm578_vm2, %v3459_v2  ;;  %v3454_v30 = vld [vmem:[%s15885_s28 + $0x158] sm:$0xff]  ;;  %v3455_v2 = vld [vmem:[%s15885_s28 + $0x160] sm:$0xff] }
 0x159   : > { %14015 = vmatprep.mubr.msk.bf16.mxu1 %vm578_vm2, %v4912_v3  ;;  %v3456_v3 = vld [vmem:[%s15885_s28 + $0x168] sm:$0xff]  ;;  %v3464_v4 = vpack.c.bf16 %v3454_v30, %v3453_v60 }
 0x15a   : > { %v3465_v20 = vpack.c.bf16 %v3456_v3, %v3455_v2  ;;  %v3473_v3 = vld [vmem:[%s15885_s28 + $0x131] sm:$0xff] }
 0x15f   : > { %13846 = vmatmul.mubr.msk.bf16.vlgmr.msra.gmra.mrb[20].mxu0 %vm578_vm2, %v3460_v35  ;;  %v4934_v35 = vpack.c.bf16 %v4921_v44, %v4920_v41  ;;  %v5478_v41 = vld [vmem:[%s15885_s28 + $0x1cb] sm:$0xff]  ;;  %v5479_v44 = vld [vmem:[%s15885_s28 + $0x1d3] sm:$0xff] }
 0x160   : > { %13862 = vmatpush3.bf16.msra.mxu0 %v15935_v27  ;;  %14016 = vmatmul.mubr.msk.bf16.gmra.mrb[24].mxu1 %vm578_vm2, %v4913_v40  ;;  %v4922_v40 = vld [vmem:[%s15885_s28 + $0x1b1] sm:$0xff] }
 0x161   : > { %13849 = vmatprep.mubr.msk.bf16.mxu0 %vm578_vm2, %v3461_v21  ;;  %14019 = vmatprep.mubr.msk.bf16.mxu1 %vm578_vm2, %v4914_v52  ;;  %v3468_v21 = vld [vmem:[%s15885_s28 + $0x109] sm:$0xff]  ;;  %v3780_v52 = vpack.c.bf16 %v16492_v37, %v16481_v16  ;;  %v4935_v53 = vpack.c.bf16 %v4923_v17, %v4922_v40  ;;  %v4928_v37 = vld [vmem:[%s15885_s28 + $0x1e1] sm:$0xff]  ;;  %v3490_v40 = vpack.c.bf16 %v3482_v34, %v3481_v19 }
 0x162   : > { %13879 = vmatprep.subr.bf16.mxu0 %v16028_v1  ;;  %v3483_v26 = vpack.c.bf16 %v3468_v21, %v3467_v49  ;;  %v3472_v16 = vld [vmem:[%s15885_s28 + $0x129] sm:$0xff]  ;;  %v5491_v17 = vpack.c.bf16 %v5479_v44, %v5478_v41  ;;  %v16924_v19 = vld [vmem:[%s15885_s28 + $0x1dc] sm:$0xff] }
 0x163   : > { %v16927_v34 = vld [vmem:[%s15885_s28 + $0x1e4] sm:$0xff] }
 0x167   : > { %13850 = vmatmul.mubr.msk.bf16.gmra.mrb[24].mxu0 %vm578_vm2, %v3462_v42  ;;  %v4927_v42 = vld [vmem:[%s15885_s28 + $0x1d9] sm:$0xff] }
 0x168   : > { %14020 = vmatmul.mubr.msk.bf16.gmra.mrb[28].mxu1 %vm578_vm2, %v4915_v57  ;;  %13853 = vmatprep.mubr.msk.bf16.mxu0 %vm578_vm2, %v3463_v58  ;;  %v3471_v57 = vld [vmem:[%s15885_s28 + $0x121] sm:$0xff]  ;;  %v4929_v58 = vld [vmem:[%s15885_s28 + $0x1e9] sm:$0xff]  ;;  %v4937_v60 = vpack.c.bf16 %v4927_v42, %v4926_v31  ;;  %v4040_v31 = vpack.c.bf16 %v4026_v50, %v4025_v5 }
 0x169   : > { %14025 = vmatprep.mubr.msk.bf16.mxu1 %vm578_vm2, %v5222_v59  ;;  %v3484_v59 = vpack.c.bf16 %v3470_v51, %v3469_v48  ;;  %v3485_v30 = vpack.c.bf16 %v3472_v16, %v3471_v57  ;;  %v4938_v2 = vpack.c.bf16 %v4929_v58, %v4928_v37  ;;  %v5484_v48 = vld [vmem:[%s15885_s28 + $0x1fb] sm:$0xff]  ;;  %v5485_v51 = vld [vmem:[%s15885_s28 + $0x203] sm:$0xff]  ;;  %v4029_v37 = vld [vmem:[%s15885_s28 + $0x14b] sm:$0xff] }
 0x16a   : > { %v5494_v16 = vpack.c.bf16 %v5485_v51, %v5484_v48  ;;  %v4030_v58 = vld [vmem:[%s15885_s28 + $0x153] sm:$0xff]  ;;  %v16955_v5 = vld [vmem:[%s15885_s28 + $0x1fc] sm:$0xff]  ;;  %v16958_v50 = vld [vmem:[%s15885_s28 + $0x204] sm:$0xff] }
 0x16b   : > { %v16971_v48 = vld [vmem:[%s15885_s28 + $0x14c] sm:$0xff]  ;;  %v16974_v51 = vld [vmem:[%s15885_s28 + $0x154] sm:$0xff] }
 0x16f   : > { %13854 = vmatmul.mubr.msk.bf16.gmra.mrb[28].mxu0 %vm578_vm2, %v3464_v4  ;;  %v3474_v4 = vld [vmem:[%s15885_s28 + $0x139] sm:$0xff] }
 0x170   : > { %14026 = vmatmul.mubr.msk.bf16.vlgmr.msra.gmra.mrb[16].mxu1 %vm578_vm2, %v5223_v8  ;;  %13857 = vmatprep.mubr.msk.bf16.mxu0 %vm578_vm2, %v3465_v20  ;;  %v4930_v8 = vld [vmem:[%s15885_s28 + $0x1f1] sm:$0xff]  ;;  %v4931_v20 = vld [vmem:[%s15885_s28 + $0x1f9] sm:$0xff] }
 0x171   : > { %14029 = vmatprep.mubr.msk.bf16.mxu1 %vm578_vm2, %v5224_v38  ;;  %14042 = vmatpush3.bf16.msra.mxu1 %v16028_v1  ;;  %v3475_v38 = vld [vmem:[%s15885_s28 + $0x141] sm:$0xff] }
 0x172   : > { %14059 = vmatprep.subr.bf16.mxu1 %v16086_v14 }
 0x177   : > { %13858 = vmatmul.mubr.msk.bf16.gmra.mrb[32].mxu0 %vm578_vm2, %v3466_v47  ;;  %v5473_v47 = vld [vmem:[%s15885_s28 + $0x1a3] sm:$0xff] }
 0x178   : > { %14030 = vmatmul.mubr.msk.bf16.gmra.mrb[20].mxu1 %vm578_vm2, %v5225_v54  ;;  %13863 = vmatprep.mubr.msk.bf16.mxu0 %vm578_vm2, %v3773_v55  ;;  %v3486_v54 = vpack.c.bf16 %v3474_v4, %v3473_v3  ;;  %v4939_v55 = vpack.c.bf16 %v4931_v20, %v4930_v8  ;;  %v5488_v23 = vpack.c.bf16 %v5473_v47, %v5472_v22  ;;  %v16876_v3 = vld [vmem:[%s15885_s28 + $0x19c] sm:$0xff]  ;;  %v16879_v4 = vld [vmem:[%s15885_s28 + $0x1a4] sm:$0xff]  ;;  %v4034_v47 = vld [vmem:[%s15885_s28 + $0x173] sm:$0xff] }
 0x179   : > { %14033 = vmatprep.mubr.msk.bf16.mxu1 %vm578_vm2, %v5226_v56  ;;  %v3487_v56 = vpack.c.bf16 %v3476_v46, %v3475_v38  ;;  %v4042_v8 = vpack.c.bf16 %v4030_v58, %v4029_v37  ;;  %v5649_v46 = vpack.c.bf16 %v16879_v4, %v16876_v3  ;;  %v4033_v22 = vld [vmem:[%s15885_s28 + $0x16b] sm:$0xff]  ;;  %v4203_v58 = vpack.c.bf16 %v16974_v51, %v16971_v48 }
 0x17f   : > { %13864 = vmatmul.mubr.msk.bf16.vlgmr.msra.gmra.mrb[20].mxu0 %vm578_vm2, %v3774_v15  ;;  %v3477_v15 = vld [vmem:[%s15885_s28 + $0x151] sm:$0xff] }
 0x180   : > { %13880 = vmatpush3.bf16.msra.mxu0 %v16028_v1  ;;  %14034 = vmatmul.mubr.msk.bf16.gmra.mrb[24].mxu1 %vm578_vm2, %v5227_v43  ;;  %v3478_v43 = vld [vmem:[%s15885_s28 + $0x159] sm:$0xff] }
 0x181   : > { %13867 = vmatprep.mubr.msk.bf16.mxu0 %vm578_vm2, %v3775_v61  ;;  %14037 = vmatprep.mubr.msk.bf16.mxu1 %vm578_vm2, %v5228_v29  ;;  %v5474_v61 = vld [vmem:[%s15885_s28 + $0x1ab] sm:$0xff]  ;;  %v5475_v29 = vld [vmem:[%s15885_s28 + $0x1b3] sm:$0xff] }
 0x182   : > { %13897 = vmatprep.subr.bf16.mxu0 %v16086_v14 }
 0x187   : > { %13868 = vmatmul.mubr.msk.bf16.gmra.mrb[24].mxu0 %vm578_vm2, %v3776_v18  ;;  %v3488_v18 = vpack.c.bf16 %v3478_v43, %v3477_v15  ;;  %v16899_v15 = vld [vmem:[%s15885_s28 + $0x1bc] sm:$0xff]  ;;  %v16902_v43 = vld [vmem:[%s15885_s28 + $0x1c4] sm:$0xff] }
 0x188   : > { %14038 = vmatmul.mubr.msk.bf16.gmra.mrb[28].mxu1 %vm578_vm2, %v5229_v10  ;;  %13871 = vmatprep.mubr.msk.bf16.mxu0 %vm578_vm2, %v3777_v11  ;;  %v5489_v10 = vpack.c.bf16 %v5475_v29, %v5474_v61  ;;  %v3489_v11 = vpack.c.bf16 %v3480_v63, %v3479_v62  ;;  %v4044_v61 = vpack.c.bf16 %v4034_v47, %v4033_v22  ;;  %v17019_v22 = vld [vmem:[%s15885_s28 + $0x174] sm:$0xff]  ;;  %v17023_v47 = vld [vmem:[%s15885_s28 + $0x17c] sm:$0xff] }
 0x189   : > { %14043 = vmatprep.mubr.msk.bf16.mxu1 %vm578_vm2, %v4932_v12  ;;  %v5490_v12 = vpack.c.bf16 %v5477_v9, %v5476_v0  ;;  %v5651_v63 = vpack.c.bf16 %v16902_v43, %v16899_v15  ;;  %v4037_v0 = vld [vmem:[%s15885_s28 + $0x18b] sm:$0xff]  ;;  %v4038_v9 = vld [vmem:[%s15885_s28 + $0x193] sm:$0xff] }
 0x18a   : > { %v4046_v41 = vpack.c.bf16 %v4038_v9, %v4037_v0 }
 0x18f   : > { %13872 = vmatmul.mubr.msk.bf16.gmra.mrb[28].mxu0 %vm578_vm2, %v3778_v24  ;;  %v4023_v24 = vld [vmem:[%s15885_s28 + $0x11b] sm:$0xff] }
 0x190   : > { %14044 = vmatmul.mubr.msk.bf16.vlgmr.msra.gmra.mrb[16].mxu1 %vm578_vm2, %v4933_v28  ;;  %13875 = vmatprep.mubr.msk.bf16.mxu0 %vm578_vm2, %v3779_v33  ;;  %v4024_v28 = vld [vmem:[%s15885_s28 + $0x123] sm:$0xff]  ;;  %v5480_v33 = vld [vmem:[%s15885_s28 + $0x1db] sm:$0xff] }
 0x191   : > { %14047 = vmatprep.mubr.msk.bf16.mxu1 %vm578_vm2, %v4934_v35  ;;  %14060 = vmatpush3.bf16.msra.mxu1 %v16086_v14  ;;  %v5481_v35 = vld [vmem:[%s15885_s28 + $0x1e3] sm:$0xff]  ;;  %v4039_v49 = vpack.c.bf16 %v4024_v28, %v4023_v24  ;;  %v5653_v28 = vpack.c.bf16 %v16927_v34, %v16924_v19 }
 0x192   : > { %14077 = vmatprep.subr.bf16.mxu1 %v16157_v39  ;;  %v5492_v21 = vpack.c.bf16 %v5481_v35, %v5480_v33  ;;  %v4186_v33 = vld [vmem:[%s15885_s28 + $0x12c] sm:$0xff]  ;;  %v16939_v35 = vld [vmem:[%s15885_s28 + $0x134] sm:$0xff] }
 0x197   : > { %13876 = vmatmul.mubr.msk.bf16.gmra.mrb[32].mxu0 %vm578_vm2, %v3780_v52  ;;  %v5482_v52 = vld [vmem:[%s15885_s28 + $0x1eb] sm:$0xff] }
 0x198   : > { %14048 = vmatmul.mubr.msk.bf16.gmra.mrb[20].mxu1 %vm578_vm2, %v4935_v53  ;;  %13881 = vmatprep.mubr.msk.bf16.mxu0 %vm578_vm2, %v3483_v26  ;;  %v5483_v53 = vld [vmem:[%s15885_s28 + $0x1f3] sm:$0xff]  ;;  %v4027_v26 = vld [vmem:[%s15885_s28 + $0x13b] sm:$0xff] }
 0x199   : > { %14051 = vmatprep.mubr.msk.bf16.mxu1 %vm578_vm2, %v4936_v36  ;;  %v4028_v36 = vld [vmem:[%s15885_s28 + $0x143] sm:$0xff]  ;;  %v5493_v42 = vpack.c.bf16 %v5483_v53, %v5482_v52  ;;  %v4201_v52 = vpack.c.bf16 %v16939_v35, %v4186_v33 }
 0x19a   : > { %v4041_v57 = vpack.c.bf16 %v4028_v36, %v4027_v26  ;;  %v5655_v36 = vpack.c.bf16 %v16958_v50, %v16955_v5 }
 0x19f   : > { %13882 = vmatmul.mubr.msk.bf16.vlgmr.msra.gmra.mrb[20].mxu0 %vm578_vm2, %v3484_v59  ;;  %v5486_v59 = vld [vmem:[%s15885_s28 + $0x20b] sm:$0xff] }
 0x1a0   : > { %13898 = vmatpush3.bf16.msra.mxu0 %v16086_v14  ;;  %14052 = vmatmul.mubr.msk.bf16.gmra.mrb[24].mxu1 %vm578_vm2, %v4937_v60  ;;  %v5487_v60 = vld [vmem:[%s15885_s28 + $0x213] sm:$0xff] }
 0x1a1   : > { %13885 = vmatprep.mubr.msk.bf16.mxu0 %vm578_vm2, %v3485_v30  ;;  %14055 = vmatprep.mubr.msk.bf16.mxu1 %vm578_vm2, %v4938_v2  ;;  %v4031_v30 = vld [vmem:[%s15885_s28 + $0x15b] sm:$0xff]  ;;  %v4032_v2 = vld [vmem:[%s15885_s28 + $0x163] sm:$0xff]  ;;  %v5495_v20 = vpack.c.bf16 %v5487_v60, %v5486_v59 }
 0x1a2   : > { %13915 = vmatprep.subr.bf16.mxu0 %v16157_v39  ;;  %v4043_v38 = vpack.c.bf16 %v4032_v2, %v4031_v30 }
 0x1a7   : > { %13886 = vmatmul.mubr.msk.bf16.gmra.mrb[24].mxu0 %vm578_vm2, %v3486_v54  ;;  %v16890_v54 = vld [vmem:[%s15885_s28 + $0x1ac] sm:$0xff] }
 0x1a8   : > { %14056 = vmatmul.mubr.msk.bf16.gmra.mrb[28].mxu1 %vm578_vm2, %v4939_v55  ;;  %13889 = vmatprep.mubr.msk.bf16.mxu0 %vm578_vm2, %v3487_v56  ;;  %v16894_v55 = vld [vmem:[%s15885_s28 + $0x1b4] sm:$0xff] }
 0x1a9   : > { %14061 = vmatprep.mubr.msk.bf16.mxu1 %vm578_vm2, %v5488_v23  ;;  %v4035_v56 = vld [vmem:[%s15885_s28 + $0x17b] sm:$0xff]  ;;  %v4036_v23 = vld [vmem:[%s15885_s28 + $0x183] sm:$0xff]  ;;  %v5650_v29 = vpack.c.bf16 %v16894_v55, %v16890_v54 }
 0x1aa   : > { %v4045_v62 = vpack.c.bf16 %v4036_v23, %v4035_v56 }
 0x1af   : > { %13890 = vmatmul.mubr.msk.bf16.gmra.mrb[28].mxu0 %vm578_vm2, %v3488_v18  ;;  %v16914_v18 = vld [vmem:[%s15885_s28 + $0x1cc] sm:$0xff] }
 0x1b0   : > { %14062 = vmatmul.mubr.msk.bf16.vlgmr.msra.gmra.mrb[16].mxu1 %vm578_vm2, %v5489_v10  ;;  %13893 = vmatprep.mubr.msk.bf16.mxu0 %vm578_vm2, %v3489_v11  ;;  %v16918_v10 = vld [vmem:[%s15885_s28 + $0x1d4] sm:$0xff]  ;;  %v4184_v11 = vld [vmem:[%s15885_s28 + $0x11c] sm:$0xff] }
 0x1b1   : > { %14065 = vmatprep.mubr.msk.bf16.mxu1 %vm578_vm2, %v5490_v12  ;;  %14078 = vmatpush3.bf16.msra.mxu1 %v16157_v39  ;;  %v4185_v12 = vld [vmem:[%s15885_s28 + $0x124] sm:$0xff]  ;;  %v5652_v44 = vpack.c.bf16 %v16918_v10, %v16914_v18 }
 0x1b2   : > { %14095 = vmatprep.subr.bf16.mxu1 %v16214_v25  ;;  %v4200_v24 = vpack.c.bf16 %v4185_v12, %v4184_v11  ;;  %v5811_v11 = vpack.c.bf16 %v16914_v18, %v16902_v43 }
 0x1b7   : > { %13894 = vmatmul.mubr.msk.bf16.gmra.mrb[32].mxu0 %vm578_vm2, %v3490_v40  ;;  %v16943_v40 = vld [vmem:[%s15885_s28 + $0x1ec] sm:$0xff] }
 0x1b8   : > { %14066 = vmatmul.mubr.msk.bf16.gmra.mrb[20].mxu1 %vm578_vm2, %v5491_v17  ;;  %13899 = vmatprep.mubr.msk.bf16.mxu0 %vm578_vm2, %v4039_v49  ;;  %v16946_v17 = vld [vmem:[%s15885_s28 + $0x1f4] sm:$0xff]  ;;  %v16949_v49 = vld [vmem:[%s15885_s28 + $0x13c] sm:$0xff] }
 0x1b9   : > { %14069 = vmatprep.mubr.msk.bf16.mxu1 %vm578_vm2, %v5492_v21  ;;  %v16952_v21 = vld [vmem:[%s15885_s28 + $0x144] sm:$0xff]  ;;  %v5654_v53 = vpack.c.bf16 %v16946_v17, %v16943_v40 }
 0x1ba   : > { %v4202_v26 = vpack.c.bf16 %v16952_v21, %v16949_v49 }
 0x1bf   : > { %13900 = vmatmul.mubr.msk.bf16.vlgmr.msra.gmra.mrb[20].mxu0 %vm578_vm2, %v4040_v31  ;;  %v16977_v31 = vld [vmem:[%s15885_s28 + $0x20c] sm:$0xff] }
 0x1c0   : > { %13916 = vmatpush3.bf16.msra.mxu0 %v16157_v39  ;;  %14070 = vmatmul.mubr.msk.bf16.gmra.mrb[24].mxu1 %vm578_vm2, %v5493_v42  ;;  %v16982_v42 = vld [vmem:[%s15885_s28 + $0x214] sm:$0xff] }
 0x1c1   : > { %13903 = vmatprep.mubr.msk.bf16.mxu0 %vm578_vm2, %v4041_v57  ;;  %14073 = vmatprep.mubr.msk.bf16.mxu1 %vm578_vm2, %v5494_v16  ;;  %v16985_v57 = vld [vmem:[%s15885_s28 + $0x15c] sm:$0xff]  ;;  %v16988_v16 = vld [vmem:[%s15885_s28 + $0x164] sm:$0xff]  ;;  %v5656_v60 = vpack.c.bf16 %v16982_v42, %v16977_v31 }
 0x1c2   : > { %13933 = vmatprep.subr.bf16.mxu0 %v16214_v25  ;;  %v4204_v30 = vpack.c.bf16 %v16988_v16, %v16985_v57 }
 0x1c7   : > { %13904 = vmatmul.mubr.msk.bf16.gmra.mrb[24].mxu0 %vm578_vm2, %v4042_v8  ;;  %v5810_v8 = vpack.c.bf16 %v16899_v15, %v16894_v55  ;;  %v17026_v55 = vld [vmem:[%s15885_s28 + $0x184] sm:$0xff] }
 0x1c8   : > { %14074 = vmatmul.mubr.msk.bf16.gmra.mrb[28].mxu1 %vm578_vm2, %v5495_v20  ;;  %13907 = vmatprep.mubr.msk.bf16.mxu0 %vm578_vm2, %v4043_v38  ;;  %v17012_v38 = vld [vmem:[%s18950_s2] ss:$0 sm:$0xff]  ;;  %v4206_v12 = vpack.c.bf16 %v17026_v55, %v17023_v47 }
 0x1c9   : > { %14079 = vmatprep.mubr.msk.bf16.mxu1 %vm578_vm2, %v5649_v46  ;;  %v17016_v46 = vld [vmem:[%s15885_s28 + $0x16c] sm:$0xff] }
 0x1cf   : > { %13908 = vmatmul.mubr.msk.bf16.gmra.mrb[28].mxu0 %vm578_vm2, %v4044_v61 }
 0x1d0   : > { %14080 = vmatmul.mubr.msk.bf16.vlgmr.msra.gmra.mrb[16].mxu1 %vm578_vm2, %v5650_v29  ;;  %13911 = vmatprep.mubr.msk.bf16.mxu0 %vm578_vm2, %v4045_v62  ;;  %v4205_v29 = vpack.c.bf16 %v17019_v22, %v17016_v46 }
 0x1d1   : > { %14083 = vmatprep.mubr.msk.bf16.mxu1 %vm578_vm2, %v5651_v63  ;;  %14096 = vmatpush3.bf16.msra.mxu1 %v16214_v25 }
 0x1d2   : > { %14113 = vmatprep.subr.bf16.mxu1 %v16290_v45 }
 0x1d7   : > { %13912 = vmatmul.mubr.msk.bf16.gmra.mrb[32].mxu0 %vm578_vm2, %v4046_v41 }
 0x1d8   : > { %14084 = vmatmul.mubr.msk.bf16.gmra.mrb[20].mxu1 %vm578_vm2, %v5652_v44  ;;  %13917 = vmatprep.mubr.msk.bf16.mxu0 %vm578_vm2, %v4200_v24 }
 0x1d9   : > { %14087 = vmatprep.mubr.msk.bf16.mxu1 %vm578_vm2, %v5653_v28 }
 0x1df   : > { %13918 = vmatmul.mubr.msk.bf16.vlgmr.msra.gmra.mrb[20].mxu0 %vm578_vm2, %v4201_v52  ;;  %v5812_v52 = vpack.c.bf16 %v16924_v19, %v16918_v10 }
 0x1e0   : > { %13934 = vmatpush3.bf16.msra.mxu0 %v16214_v25  ;;  %14088 = vmatmul.mubr.msk.bf16.gmra.mrb[24].mxu1 %vm578_vm2, %v5654_v53 }
 0x1e1   : > { %13921 = vmatprep.mubr.msk.bf16.mxu0 %vm578_vm2, %v4202_v26  ;;  %14091 = vmatprep.mubr.msk.bf16.mxu1 %vm578_vm2, %v5655_v36 }
 0x1e2   : > { %13951 = vmatprep.subr.bf16.mxu0 %v16290_v45 }
 0x1e3   : > { %v16991_v37 = vpop.f32.mrb[12].mxu1 }
 0x1e4   : > { %v16995_v59 = vpop.f32.mrb[13].mxu1 }
 0x1e5   : > { %v17001_v2 = vpop.f32.mrb[14].mxu1 }
 0x1e6   : > { %v17005_v20 = vpop.f32.mrb[15].mxu1 }
 0x1e7   : > { %13922 = vmatmul.mubr.msk.bf16.gmra.mrb[24].mxu0 %vm578_vm2, %v4203_v58 }
 0x1e8   : > { %14092 = vmatmul.mubr.msk.bf16.gmra.mrb[28].mxu1 %vm578_vm2, %v5656_v60  ;;  %13925 = vmatprep.mubr.msk.bf16.mxu0 %vm578_vm2, %v4204_v30 }
 0x1e9   : > { %14097 = vmatprep.mubr.msk.bf16.mxu1 %vm578_vm2, %v5810_v8  ;;  %v17051_v8 = vld [vmem:[%s15885_s28 + $0x18c] sm:$0xff] }
 0x1ea   : > { %v13649_v56 = vpop.f32.mrb[0].mxu0 }
 0x1eb   : > { %v1947_v23 = vadd.f32 %v13649_v56, %v17012_v38  ;;  %v13815_v15 = vpop.f32.mrb[0].mxu1  ;;  %v1844_v61 = vpop.f32.mrb[1].mxu0  ;;  %v17054_v56 = vld [vmem:[%s15885_s28 + $0x194] sm:$0xff] }
 0x1ec   : > { %v3401_v62 = vadd.f32 %v13815_v15, %v17012_v38  ;;  %v1945_v63 = vadd.f32 %v17012_v38, %v1844_v61  ;;  %v3316_v0 = vpop.f32.mrb[1].mxu1  ;;  %v13650_v9 = vpop.f32.mrb[2].mxu0 }
 0x1ed   : > { %v1963_v41 = vmax.f32 %v1947_v23, 0.0  ;;  %v3399_v44 = vadd.f32 %v17012_v38, %v3316_v0  ;;  %v1948_v24 = vadd.f32 %v13650_v9, %v17012_v38  ;;  %v13816_v28 = vpop.f32.mrb[2].mxu1  ;;  %v1847_v33 = vpop.f32.mrb[3].mxu0 }
 0x1ee   : > { %v3417_v53 = vmax.f32 %v3401_v62, 0.0  ;;  %v1961_v26 = vmax.f32 %v1945_v63, 0.0  ;;  %v3402_v36 = vadd.f32 %v13816_v28, %v17012_v38  ;;  %v1946_v43 = vadd.f32 %v17012_v38, %v1847_v33  ;;  %v3319_v18 = vpop.f32.mrb[3].mxu1 }
 0x1ef   : > { %1980 = vst.msk [vmem:[#allocation2 + $0x10] sm:$0xff] %vm1977_vm3, %v1963_v41  ;;  %v3415_v58 = vmax.f32 %v3399_v44, 0.0  ;;  %v1964_v60 = vmax.f32 %v1948_v24, 0.0  ;;  %v3400_v30 = vadd.f32 %v17012_v38, %v3319_v18  ;;  %13926 = vmatmul.mubr.msk.bf16.gmra.mrb[28].mxu0 %vm578_vm2, %v4205_v29  ;;  %v4207_v63 = vpack.c.bf16 %v17054_v56, %v17051_v8 }
 0x1f0   : > { %3433 = vst.msk [vmem:[#allocation2 + $0xb0] sm:$0xff] %vm1977_vm3, %v3417_v53  ;;  %1978 = vst.msk [vmem:[#allocation2] sm:$0xff] %vm1977_vm3, %v1961_v26  ;;  %v3418_v10 = vmax.f32 %v3402_v36, 0.0  ;;  %v1962_v19 = vmax.f32 %v1946_v43, 0.0  ;;  %14098 = vmatmul.mubr.msk.bf16.vlgmr.msra.gmra.mrb[16].mxu1 %vm578_vm2, %v5811_v11  ;;  %13929 = vmatprep.mubr.msk.bf16.mxu0 %vm578_vm2, %v4206_v12  ;;  %v5813_v41 = vpack.c.bf16 %v16943_v40, %v16927_v34 }
 0x1f1   : > { %3431 = vst.msk [vmem:[#allocation2 + $0xa0] sm:$0xff] %vm1977_vm3, %v3415_v58  ;;  %1981 = vst.msk [vmem:[#allocation2 + $0x18] sm:$0xff] %vm1977_vm3, %v1964_v60  ;;  %v3416_v23 = vmax.f32 %v3400_v30, 0.0  ;;  %14101 = vmatprep.mubr.msk.bf16.mxu1 %vm578_vm2, %v5812_v52  ;;  %14114 = vmatpush3.bf16.msra.mxu1 %v16290_v45  ;;  %v4361_v44 = vpack.c.bf16 %v16949_v49, %v16939_v35  ;;  %v5814_v26 = vpack.c.bf16 %v16955_v5, %v16946_v17  ;;  %v17092_v17 = vld [vmem:[%s15885_s28 + $0x21c] sm:$0xff] }
 0x1f2   : > { %3434 = vst.msk [vmem:[#allocation2 + $0xb8] sm:$0xff] %vm1977_vm3, %v3418_v10  ;;  %1979 = vst.msk [vmem:[#allocation2 + $0x8] sm:$0xff] %vm1977_vm3, %v1962_v19  ;;  %v13653_v15 = vpop.f32.mrb[4].mxu0  ;;  %14131 = vmatprep.subr.bf16.mxu1 %v16349_v32 }
 0x1f3   : > { %3432 = vst.msk [vmem:[#allocation2 + $0xa8] sm:$0xff] %vm1977_vm3, %v3416_v23  ;;  %v1951_v61 = vadd.f32 %v13653_v15, %v17012_v38  ;;  %v13819_v29 = vpop.f32.mrb[4].mxu1  ;;  %v1860_v62 = vpop.f32.mrb[5].mxu0  ;;  %v4362_v23 = vpack.c.bf16 %v16971_v48, %v16952_v21  ;;  %v4363_v21 = vpack.c.bf16 %v16985_v57, %v16974_v51  ;;  %v5816_v48 = vpack.c.bf16 %v17092_v17, %v16982_v42 }
 0x1f4   : > { %v3405_v0 = vadd.f32 %v13819_v29, %v17012_v38  ;;  %v1949_v9 = vadd.f32 %v17012_v38, %v1860_v62  ;;  %v3332_v11 = vpop.f32.mrb[5].mxu1  ;;  %v13654_v12 = vpop.f32.mrb[6].mxu0 }
 0x1f5   : > { %v1967_v24 = vmax.f32 %v1951_v61, 0.0  ;;  %v3403_v28 = vadd.f32 %v17012_v38, %v3332_v11  ;;  %v1952_v33 = vadd.f32 %v13654_v12, %v17012_v38  ;;  %v13820_v52 = vpop.f32.mrb[6].mxu1  ;;  %v1863_v53 = vpop.f32.mrb[7].mxu0 }
 0x1f6   : > { %v3406_v36 = vadd.f32 %v13820_v52, %v17012_v38  ;;  %v1950_v43 = vadd.f32 %v17012_v38, %v1863_v53  ;;  %v3421_v34 = vmax.f32 %v3405_v0, 0.0  ;;  %v1965_v40 = vmax.f32 %v1949_v9, 0.0  ;;  %v3335_v35 = vpop.f32.mrb[7].mxu1  ;;  %v17113_v52 = vld [vmem:[%s15885_s28 + $0x22c] sm:$0xff] }
 0x1f7   : > { %1984 = vst.msk [vmem:[#allocation2 + $0x30] sm:$0xff] %vm1977_vm3, %v1967_v24  ;;  %v3419_v18 = vmax.f32 %v3403_v28, 0.0  ;;  %13930 = vmatmul.mubr.msk.bf16.gmra.mrb[32].mxu0 %vm578_vm2, %v4207_v63  ;;  %v1968_v49 = vmax.f32 %v1952_v33, 0.0  ;;  %v3404_v30 = vadd.f32 %v17012_v38, %v3335_v35  ;;  %v5815_v63 = vpack.c.bf16 %v16977_v31, %v16958_v50  ;;  %v17110_v33 = vld [vmem:[%s15885_s28 + $0x224] sm:$0xff] }
 0x1f8   : > { %v3422_v58 = vmax.f32 %v3406_v36, 0.0  ;;  %v1966_v60 = vmax.f32 %v1950_v43, 0.0  ;;  %14102 = vmatmul.mubr.msk.bf16.gmra.mrb[20].mxu1 %vm578_vm2, %v5813_v41  ;;  %13935 = vmatprep.mubr.msk.bf16.mxu0 %vm578_vm2, %v4361_v44  ;;  %3437 = vst.msk [vmem:[#allocation2 + $0xd0] sm:$0xff] %vm1977_vm3, %v3421_v34  ;;  %1982 = vst.msk [vmem:[#allocation2 + $0x20] sm:$0xff] %vm1977_vm3, %v1965_v40 }
 0x1f9   : > { %3435 = vst.msk [vmem:[#allocation2 + $0xc0] sm:$0xff] %vm1977_vm3, %v3419_v18  ;;  %14105 = vmatprep.mubr.msk.bf16.mxu1 %vm578_vm2, %v5814_v26  ;;  %1985 = vst.msk [vmem:[#allocation2 + $0x38] sm:$0xff] %vm1977_vm3, %v1968_v49  ;;  %v3420_v5 = vmax.f32 %v3404_v30, 0.0  ;;  %v7675_v53 = vld [vmem:[#allocation2 + $0x10] ss:$2 sm:$0xf] }
 0x1fa   : > { %3438 = vst.msk [vmem:[#allocation2 + $0xd8] sm:$0xff] %vm1977_vm3, %v3422_v58  ;;  %1983 = vst.msk [vmem:[#allocation2 + $0x28] sm:$0xff] %vm1977_vm3, %v1966_v60  ;;  %v13657_v10 = vpop.f32.mrb[8].mxu0  ;;  %v7679_v26 = vld [vmem:[#allocation2 + $0x11] ss:$2 sm:$0xf] }
 0x1fb   : > { %v13823_v19 = vpop.f32.mrb[8].mxu1  ;;  %v1955_v15 = vadd.f32 %v13657_v10, %v17012_v38  ;;  %v1876_v29 = vpop.f32.mrb[9].mxu0  ;;  %3436 = vst.msk [vmem:[#allocation2 + $0xc8] sm:$0xff] %vm1977_vm3, %v3420_v5  ;;  %v7673_v36 = vld [vmem:[#allocation2] ss:$2 sm:$0xff]  ;;  %v5955_v49 = vld [vmem:[%s15885_s28 + $0x1b5] sm:$0xff] }
 0x1fc   : > { %v3409_v61 = vadd.f32 %v13823_v19, %v17012_v38  ;;  %v3348_v62 = vpop.f32.mrb[9].mxu1  ;;  %v1953_v0 = vadd.f32 %v17012_v38, %v1876_v29  ;;  %v13658_v11 = vpop.f32.mrb[10].mxu0  ;;  %v7677_v51 = vld [vmem:[#allocation2 + $0x1] ss:$2 sm:$0xff] }
 0x1fd   : > { %v3407_v9 = vadd.f32 %v17012_v38, %v3348_v62  ;;  %v13824_v12 = vpop.f32.mrb[10].mxu1  ;;  %v1971_v41 = vmax.f32 %v1955_v15, 0.0  ;;  %v1956_v24 = vadd.f32 %v13658_v11, %v17012_v38  ;;  %v1879_v31 = vpop.f32.mrb[11].mxu0  ;;  %v7747_v40 = vld [vmem:[#allocation2 + $0xac] ss:$2 sm:$0xf]  ;;  %v7688_v15 = vmax.f32 %v7673_v36, %v7677_v51 }
 0x1fe   : > { %v3425_v44 = vmax.f32 %v3409_v61, 0.0  ;;  %v3410_v50 = vadd.f32 %v13824_v12, %v17012_v38  ;;  %v3351_v28 = vpop.f32.mrb[11].mxu1  ;;  %v1969_v57 = vmax.f32 %v1953_v0, 0.0  ;;  %v1954_v42 = vadd.f32 %v17012_v38, %v1879_v31  ;;  %v7751_v58 = vld [vmem:[#allocation2 + $0xad] ss:$2 sm:$0xf] }
 0x1ff   : > { %v3423_v43 = vmax.f32 %v3407_v9, 0.0  ;;  %v3408_v34 = vadd.f32 %v17012_v38, %v3351_v28  ;;  %13936 = vmatmul.mubr.msk.bf16.vlgmr.msra.gmra.mrb[20].mxu0 %vm578_vm2, %v4362_v23  ;;  %1988 = vst.msk [vmem:[#allocation2 + $0x50] sm:$0xff] %vm1977_vm3, %v1971_v41  ;;  %v1972_v18 = vmax.f32 %v1956_v24, 0.0  ;;  %v5956_v30 = vld [vmem:[%s15885_s28 + $0x1bd] sm:$0xff]  ;;  %v4364_v23 = vpack.c.bf16 %v17016_v46, %v16988_v16 }
 0x200   : > { %3441 = vst.msk [vmem:[#allocation2 + $0xf0] sm:$0xff] %vm1977_vm3, %v3425_v44  ;;  %v3426_v35 = vmax.f32 %v3410_v50, 0.0  ;;  %13952 = vmatpush3.bf16.msra.mxu0 %v16290_v45  ;;  %14106 = vmatmul.mubr.msk.bf16.gmra.mrb[24].mxu1 %vm578_vm2, %v5815_v63  ;;  %1986 = vst.msk [vmem:[#allocation2 + $0x40] sm:$0xff] %vm1977_vm3, %v1969_v57  ;;  %v1970_v19 = vmax.f32 %v1954_v42, 0.0  ;;  %v5817_v0 = vpack.c.bf16 %v17113_v52, %v17110_v33 }
 0x201   : > { %v7681_v60 = vld [vmem:[#allocation2 + $0x1a] ss:$2 sm:$0xff]  ;;  %3439 = vst.msk [vmem:[#allocation2 + $0xe0] sm:$0xff] %vm1977_vm3, %v3423_v43  ;;  %13939 = vmatprep.mubr.msk.bf16.mxu0 %vm578_vm2, %v4363_v21  ;;  %14109 = vmatprep.mubr.msk.bf16.mxu1 %vm578_vm2, %v5816_v48  ;;  %v7683_v5 = vld [vmem:[#allocation2 + $0x2a] ss:$2 sm:$0xf]  ;;  %v7689_v9 = vmax.f32 %v7675_v53, %v7679_v26  ;;  %v4365_v16 = vpack.c.bf16 %v17023_v47, %v17019_v22 }
 0x202   : > { %v7685_v10 = vld [vmem:[#allocation2 + $0x1b] ss:$2 sm:$0xff]  ;;  %1989 = vst.msk [vmem:[#allocation2 + $0x58] sm:$0xff] %vm1977_vm3, %v1972_v18  ;;  %3442 = vst.msk [vmem:[#allocation2 + $0xf8] sm:$0xff] %vm1977_vm3, %v3426_v35  ;;  %13969 = vmatprep.subr.bf16.mxu0 %v16349_v32  ;;  %v3424_v62 = vmax.f32 %v3408_v34, 0.0  ;;  %v13661_v63 = vpop.f32.mrb[12].mxu0  ;;  %v7761_v46 = vmax.f32 %v7747_v40, %v7751_v58  ;;  %v5971_v50 = vpack.c.bf16 %v5956_v30, %v5955_v49 }
 0x203   : > { %v7687_v61 = vld [vmem:[#allocation2 + $0x2b] ss:$2 sm:$0xf]  ;;  %v7690_v29 = vmax.f32 %v7681_v60, %v7685_v10  ;;  %v7755_v12 = vld [vmem:[#allocation2 + $0xc6] ss:$2 sm:$0xf]  ;;  %v1959_v48 = vadd.f32 %v13661_v63, %v17012_v38 }
 0x204   : > { %v7691_v11 = vmax.f32 %v7683_v5, %v7687_v61  ;;  %v7759_v21 = vld [vmem:[#allocation2 + $0xc7] ss:$2 sm:$0xf]  ;;  %1987 = vst.msk [vmem:[#allocation2 + $0x48] sm:$0xff] %vm1977_vm3, %v1970_v19  ;;  %3440 = vst.msk [vmem:[#allocation2 + $0xe8] sm:$0xff] %vm1977_vm3, %v3424_v62  ;;  %v1892_v24 = vpop.f32.mrb[13].mxu0  ;;  %v4366_v19 = vpack.c.bf16 %v17051_v8, %v17026_v55  ;;  %v4367_v62 = vpack.c.bf16 %v16876_v3, %v17054_v56 }
 0x205   : > { %v7692_v41 = vmax.f32 %v7688_v15, %v7690_v29  ;;  %v7763_v44 = vmax.f32 %v7755_v12, %v7759_v21  ;;  %v1975_v28 = vmax.f32 %v1959_v48, 0.0  ;;  %v1957_v53 = vadd.f32 %v17012_v38, %v1892_v24  ;;  %v13662_v26 = vpop.f32.mrb[14].mxu0  ;;  %v5957_v43 = vld [vmem:[%s15885_s28 + $0x1c5] sm:$0xff]  ;;  %v5958_v34 = vld [vmem:[%s15885_s28 + $0x1cd] sm:$0xff]  ;;  %v5959_v40 = vld [vmem:[%s15885_s28 + $0x1d5] sm:$0xff] }
 0x206   : > { %v7693_v31 = vmax.f32 %v7689_v9, %v7691_v11  ;;  %v1960_v22 = vadd.f32 %v13662_v26, %v17012_v38  ;;  %v1895_v47 = vpop.f32.mrb[15].mxu0  ;;  %v5960_v60 = vld [vmem:[%s15885_s28 + $0x1dd] sm:$0xff]  ;;  %v5972_v29 = vpack.c.bf16 %v5958_v34, %v5957_v43  ;;  %v5961_v24 = vld [vmem:[%s15885_s28 + $0x1e5] sm:$0xff]  ;;  %v5963_v43 = vld [vmem:[%s15885_s28 + $0x1f5] sm:$0xff]  ;;  %v4368_v34 = vpack.c.bf16 %v16890_v54, %v16879_v4 }
 0x207   : > { %v7765_v36 = vmax.f32 %v7761_v46, %v7763_v44  ;;  %7694 = vst.msk [vmem:[#allocation3 + $0xf] sm:$0xff] %vm1977_vm3, %v7692_v41  ;;  %13940 = vmatmul.mubr.msk.bf16.gmra.mrb[24].mxu0 %vm578_vm2, %v4364_v23  ;;  %1992 = vst.msk [vmem:[#allocation2 + $0x70] sm:$0xff] %vm1977_vm3, %v1975_v28  ;;  %v1973_v51 = vmax.f32 %v1957_v53, 0.0  ;;  %v1958_v57 = vadd.f32 %v17012_v38, %v1895_v47  ;;  %v7697_v42 = vld [vmem:[#allocation2 + $0x34] ss:$2 sm:$0xff]  ;;  %v4508_v4 = vld [vmem:[%s15885_s28 + $0x145] sm:$0xff] }
 0x208   : > { %14110 = vmatmul.mubr.msk.bf16.gmra.mrb[28].mxu1 %vm578_vm2, %v5817_v0  ;;  %13943 = vmatprep.mubr.msk.bf16.mxu0 %vm578_vm2, %v4365_v16  ;;  %7695 = vst.msk [vmem:[#allocation3 + $0x17] sm:$0xf] %vm7671_vm4, %v7693_v31  ;;  %v7701_v18 = vld [vmem:[#allocation2 + $0x35] ss:$2 sm:$0xff]  ;;  %v1976_v35 = vmax.f32 %v1960_v22, 0.0  ;;  %v5973_v12 = vpack.c.bf16 %v5960_v60, %v5959_v40  ;;  %v4509_v54 = vld [vmem:[%s15885_s28 + $0x14d] sm:$0xff] }
 0x209   : > { %14115 = vmatprep.mubr.msk.bf16.mxu1 %vm578_vm2, %v5971_v50  ;;  %7767 = vst.msk [vmem:[#allocation3 + $0x41] sm:$0xf] %vm7671_vm4, %v7765_v36  ;;  %v1974_v49 = vmax.f32 %v1958_v57, 0.0  ;;  %v7769_v30 = vld [vmem:[#allocation2 + $0xd0] ss:$2 sm:$0xff]  ;;  %v7712_v63 = vmax.f32 %v7697_v42, %v7701_v18  ;;  %v5965_v60 = vld [vmem:[%s15885_s28 + $0x205] sm:$0xff] }
 0x20a   : > { %1990 = vst.msk [vmem:[#allocation2 + $0x60] sm:$0xff] %vm1977_vm3, %v1973_v51  ;;  %v13667_v58 = vpop.f32.mrb[16].mxu0  ;;  %v7773_v5 = vld [vmem:[#allocation2 + $0xd1] ss:$2 sm:$0xff]  ;;  %1993 = vst.msk [vmem:[#allocation2 + $0x78] sm:$0xff] %vm1977_vm3, %v1976_v35 }
 0x20b   : > { %v14993_v10 = vadd.f32 %v16991_v37, %v13667_v58  ;;  %v7705_v23 = vld [vmem:[#allocation2 + $0x4e] ss:$2 sm:$0xff]  ;;  %v7709_v15 = vld [vmem:[#allocation2 + $0x4f] ss:$2 sm:$0xff]  ;;  %1991 = vst.msk [vmem:[#allocation2 + $0x68] sm:$0xff] %vm1977_vm3, %v1974_v49  ;;  %v2124_v11 = vpop.f32.mrb[17].mxu0  ;;  %v7784_v55 = vmax.f32 %v7769_v30, %v7773_v5 }
 0x20c   : > { %v7777_v61 = vld [vmem:[#allocation2 + $0xea] ss:$2 sm:$0xff]  ;;  %v7714_v0 = vmax.f32 %v7705_v23, %v7709_v15  ;;  %v7781_v9 = vld [vmem:[#allocation2 + $0xeb] ss:$2 sm:$0xff]  ;;  %v14994_v48 = vadd.f32 %v16995_v59, %v2124_v11  ;;  %v13668_v16 = vpop.f32.mrb[18].mxu0  ;;  %v4507_v26 = vld [vmem:[%s15885_s28 + $0x13d] sm:$0xff] }
 0x20d   : > { %v3397_v37 = vadd.f32 %v14993_v10, %v17012_v38  ;;  %v7699_v8 = vld [vmem:[#allocation2 + $0x44] ss:$2 sm:$0xf]  ;;  %v7786_v21 = vmax.f32 %v7777_v61, %v7781_v9  ;;  %v7703_v46 = vld [vmem:[#allocation2 + $0x45] ss:$2 sm:$0xf]  ;;  %v14995_v56 = vadd.f32 %v17001_v2, %v13668_v16 }
 0x20e   : > { %v7716_v41 = vmax.f32 %v7712_v63, %v7714_v0  ;;  %v2127_v44 = vpop.f32.mrb[19].mxu0  ;;  %v3395_v31 = vadd.f32 %v14994_v48, %v17012_v38  ;;  %v5962_v59 = vld [vmem:[%s15885_s28 + $0x1ed] sm:$0xff]  ;;  %v4506_v53 = vld [vmem:[%s15885_s28 + $0x135] sm:$0xff]  ;;  %v5964_v42 = vld [vmem:[%s15885_s28 + $0x1fd] sm:$0xff] }
 0x20f   : > { %v3413_v3 = vmax.f32 %v3397_v37, 0.0  ;;  %13944 = vmatmul.mubr.msk.bf16.gmra.mrb[28].mxu0 %vm578_vm2, %v4366_v19  ;;  %v7788_v50 = vmax.f32 %v7784_v55, %v7786_v21  ;;  %v14996_v28 = vadd.f32 %v17005_v20, %v2127_v44  ;;  %v3398_v22 = vadd.f32 %v14995_v56, %v17012_v38  ;;  %v5966_v30 = vld [vmem:[%s15885_s28 + $0x20d] sm:$0xff]  ;;  %v4510_v5 = vld [vmem:[%s15885_s28 + $0x155] sm:$0xff]  ;;  %v4511_v10 = vld [vmem:[%s15885_s28 + $0x15d] sm:$0xff] }
 0x210   : > { %14116 = vmatmul.mubr.msk.bf16.vlgmr.msra.gmra.mrb[16].mxu1 %vm578_vm2, %v5972_v29  ;;  %13947 = vmatprep.mubr.msk.bf16.mxu0 %vm578_vm2, %v4367_v62  ;;  %7718 = vst.msk [vmem:[#allocation3 + $0x1d] sm:$0xff] %vm1977_vm3, %v7716_v41  ;;  %v7713_v20 = vmax.f32 %v7699_v8, %v7703_v46  ;;  %v3411_v51 = vmax.f32 %v3395_v31, 0.0  ;;  %v5974_v40 = vpack.c.bf16 %v5962_v59, %v5961_v24  ;;  %v7753_v19 = vld [vmem:[#allocation2 + $0xb6] ss:$2 sm:$0xff]  ;;  %v7757_v63 = vld [vmem:[#allocation2 + $0xb7] ss:$2 sm:$0xff] }
 0x211   : > { %v7707_v2 = vld [vmem:[#allocation2 + $0x5e] ss:$2 sm:$0xf]  ;;  %v7711_v36 = vld [vmem:[#allocation2 + $0x5f] ss:$2 sm:$0xf]  ;;  %14119 = vmatprep.mubr.msk.bf16.mxu1 %vm578_vm2, %v5973_v12  ;;  %14132 = vmatpush3.bf16.msra.mxu1 %v16349_v32  ;;  %v3396_v57 = vadd.f32 %v14996_v28, %v17012_v38  ;;  %v4522_v38 = vpack.c.bf16 %v4507_v26, %v4506_v53  ;;  %v5975_v58 = vpack.c.bf16 %v5964_v42, %v5963_v43 }
 0x212   : > { %3429 = vst.msk [vmem:[#allocation2 + $0x90] sm:$0xff] %vm1977_vm3, %v3413_v3  ;;  %7790 = vst.msk [vmem:[#allocation3 + $0x47] sm:$0xff] %vm1977_vm3, %v7788_v50  ;;  %v7715_v47 = vmax.f32 %v7707_v2, %v7711_v36  ;;  %14179 = vmatprep.subr.bf16.mxu1 %v15768_v13  ;;  %v3414_v35 = vmax.f32 %v3398_v22, 0.0  ;;  %v5967_v23 = vld [vmem:[%s15885_s28 + $0x215] sm:$0xff]  ;;  %v5968_v15 = vld [vmem:[%s15885_s28 + $0x21d] sm:$0xff]  ;;  %v4523_v62 = vpack.c.bf16 %v4509_v54, %v4508_v4 }
 0x213   : > { %3427 = vst.msk [vmem:[#allocation2 + $0x80] sm:$0xff] %vm1977_vm3, %v3411_v51  ;;  %v3412_v49 = vmax.f32 %v3396_v57, 0.0  ;;  %v7723_v61 = vld [vmem:[#allocation2 + $0x78] ss:$2 sm:$0xf]  ;;  %v5976_v37 = vpack.c.bf16 %v5966_v30, %v5965_v60  ;;  %v4524_v55 = vpack.c.bf16 %v4511_v10, %v4510_v5  ;;  %v5977_v8 = vpack.c.bf16 %v5968_v15, %v5967_v23  ;;  %v4512_v28 = vld [vmem:[%s15885_s28 + $0x165] sm:$0xff] }
 0x214   : > { %v7717_v18 = vmax.f32 %v7713_v20, %v7715_v47  ;;  %3430 = vst.msk [vmem:[#allocation2 + $0x98] sm:$0xff] %vm1977_vm3, %v3414_v35  ;;  %v7727_v29 = vld [vmem:[#allocation2 + $0x79] ss:$2 sm:$0xf]  ;;  %v7721_v0 = vld [vmem:[#allocation2 + $0x68] ss:$2 sm:$0xff]  ;;  %v7762_v3 = vmax.f32 %v7753_v19, %v7757_v63 }
 0x215   : > { %3428 = vst.msk [vmem:[#allocation2 + $0x88] sm:$0xff] %vm1977_vm3, %v3412_v49  ;;  %v7725_v9 = vld [vmem:[#allocation2 + $0x69] ss:$2 sm:$0xff]  ;;  %v7737_v21 = vmax.f32 %v7723_v61, %v7727_v29  ;;  %v4515_v22 = vld [vmem:[%s15885_s28 + $0x17d] sm:$0xff] }
 0x216   : > { %7719 = vst.msk [vmem:[#allocation3 + $0x25] sm:$0xf] %vm7671_vm4, %v7717_v18  ;;  %v7736_v24 = vmax.f32 %v7721_v0, %v7725_v9  ;;  %v4513_v59 = vld [vmem:[%s15885_s28 + $0x16d] sm:$0xff]  ;;  %v5969_v53 = vld [vmem:[%s15885_s28 + $0x225] sm:$0xff]  ;;  %v4514_v36 = vld [vmem:[%s15885_s28 + $0x175] sm:$0xff] }
 0x217   : > { %13948 = vmatmul.mubr.msk.bf16.gmra.mrb[32].mxu0 %vm578_vm2, %v4368_v34  ;;  %v5970_v2 = vld [vmem:[%s15885_s28 + $0x22d] sm:$0xff]  ;;  %v6116_v47 = vld [vmem:[%s15885_s28 + $0x1b6] sm:$0xff]  ;;  %v6117_v51 = vld [vmem:[%s15885_s28 + $0x1be] sm:$0xff]  ;;  %v4525_v57 = vpack.c.bf16 %v4513_v59, %v4512_v28  ;;  %v4526_v42 = vpack.c.bf16 %v4515_v22, %v4514_v36 }
 0x218   : > { %14120 = vmatmul.mubr.msk.bf16.gmra.mrb[20].mxu1 %vm578_vm2, %v5974_v40  ;;  %13953 = vmatprep.mubr.msk.bf16.mxu0 %vm578_vm2, %v4522_v38  ;;  %v5978_v43 = vpack.c.bf16 %v5970_v2, %v5969_v53  ;;  %v6132_v34 = vpack.c.bf16 %v6117_v51, %v6116_v47  ;;  %v4516_v40 = vld [vmem:[%s15885_s28 + $0x185] sm:$0xff]  ;;  %v4517_v18 = vld [vmem:[%s15885_s28 + $0x18d] sm:$0xff]  ;;  %v4518_v38 = vld [vmem:[%s15885_s28 + $0x195] sm:$0xff] }
 0x219   : > { %14123 = vmatprep.mubr.msk.bf16.mxu1 %vm578_vm2, %v5975_v58  ;;  %v6118_v35 = vld [vmem:[%s15885_s28 + $0x1c6] sm:$0xff]  ;;  %v6119_v49 = vld [vmem:[%s15885_s28 + $0x1ce] sm:$0xff]  ;;  %v4519_v58 = vld [vmem:[%s15885_s28 + $0x19d] sm:$0xff]  ;;  %v4527_v60 = vpack.c.bf16 %v4517_v18, %v4516_v40 }
 0x21a   : > { %v6120_v4 = vld [vmem:[%s15885_s28 + $0x1d6] sm:$0xff]  ;;  %v6121_v54 = vld [vmem:[%s15885_s28 + $0x1de] sm:$0xff]  ;;  %v6133_v30 = vpack.c.bf16 %v6119_v49, %v6118_v35  ;;  %v4528_v5 = vpack.c.bf16 %v4519_v58, %v4518_v38  ;;  %v4521_v23 = vld [vmem:[%s15885_s28 + $0x1ad] sm:$0xff] }
 0x21b   : > { %v7731_v11 = vld [vmem:[#allocation2 + $0x92] ss:$2 sm:$0xf]  ;;  %v7735_v12 = vld [vmem:[#allocation2 + $0x93] ss:$2 sm:$0xf]  ;;  %v6134_v10 = vpack.c.bf16 %v6121_v54, %v6120_v4 }
 0x21c   : > { %v7739_v48 = vmax.f32 %v7731_v11, %v7735_v12  ;;  %v7745_v16 = vld [vmem:[#allocation2 + $0x9c] ss:$2 sm:$0xff]  ;;  %v7749_v46 = vld [vmem:[#allocation2 + $0x9d] ss:$2 sm:$0xff]  ;;  %v6123_v61 = vld [vmem:[%s15885_s28 + $0x1ee] sm:$0xff] }
 0x21d   : > { %v7729_v41 = vld [vmem:[#allocation2 + $0x82] ss:$2 sm:$0xff]  ;;  %v7760_v56 = vmax.f32 %v7745_v16, %v7749_v46  ;;  %v7733_v44 = vld [vmem:[#allocation2 + $0x83] ss:$2 sm:$0xff]  ;;  %v4667_v29 = vld [vmem:[%s15885_s28 + $0x136] sm:$0xff] }
 0x21e   : > { %v7741_v50 = vmax.f32 %v7737_v21, %v7739_v48  ;;  %v7738_v31 = vmax.f32 %v7729_v41, %v7733_v44  ;;  %v4520_v19 = vld [vmem:[%s15885_s28 + $0x1a5] sm:$0xff]  ;;  %v6124_v63 = vld [vmem:[%s15885_s28 + $0x1f6] sm:$0xff]  ;;  %v6127_v21 = vld [vmem:[%s15885_s28 + $0x20e] sm:$0xff] }
 0x21f   : > { %13954 = vmatmul.mubr.msk.bf16.vlgmr.msra.gmra.mrb[20].mxu0 %vm578_vm2, %v4523_v62  ;;  %v7764_v26 = vmax.f32 %v7760_v56, %v7762_v3  ;;  %v6122_v15 = vld [vmem:[%s15885_s28 + $0x1e6] sm:$0xff]  ;;  %v4668_v62 = vld [vmem:[%s15885_s28 + $0x13e] sm:$0xff]  ;;  %v4529_v9 = vpack.c.bf16 %v4521_v23, %v4520_v19  ;;  %v4671_v48 = vld [vmem:[%s15885_s28 + $0x156] sm:$0xff] }
 0x220   : > { %13970 = vmatpush3.bf16.msra.mxu0 %v16349_v32  ;;  %14124 = vmatmul.mubr.msk.bf16.gmra.mrb[24].mxu1 %vm578_vm2, %v5976_v37  ;;  %v7740_v20 = vmax.f32 %v7736_v24, %v7738_v31  ;;  %7743 = vst.msk [vmem:[#allocation3 + $0x33] sm:$0xf] %vm7671_vm4, %v7741_v50  ;;  %v6125_v0 = vld [vmem:[%s15885_s28 + $0x1fe] sm:$0xff]  ;;  %v6135_v37 = vpack.c.bf16 %v6123_v61, %v6122_v15  ;;  %v6128_v46 = vld [vmem:[%s15885_s28 + $0x216] sm:$0xff]  ;;  %v4673_v50 = vld [vmem:[%s15885_s28 + $0x166] sm:$0xff] }
 0x221   : > { %13957 = vmatprep.mubr.msk.bf16.mxu0 %vm578_vm2, %v4524_v55  ;;  %14127 = vmatprep.mubr.msk.bf16.mxu1 %vm578_vm2, %v5977_v8  ;;  %7766 = vst.msk [vmem:[#allocation3 + $0x39] sm:$0xff] %vm1977_vm3, %v7764_v26  ;;  %v4683_v11 = vpack.c.bf16 %v4668_v62, %v4667_v29  ;;  %v6136_v12 = vpack.c.bf16 %v6125_v0, %v6124_v63  ;;  %v4669_v55 = vld [vmem:[%s15885_s28 + $0x146] sm:$0xff]  ;;  %v4672_v16 = vld [vmem:[%s15885_s28 + $0x15e] sm:$0xff]  ;;  %v4674_v31 = vld [vmem:[%s15885_s28 + $0x16e] sm:$0xff] }
 0x222   : > { %14149 = vmatprep.subr.bf16.mxu0 %v15768_v13  ;;  %7742 = vst.msk [vmem:[#allocation3 + $0x2b] sm:$0xff] %vm1977_vm3, %v7740_v20  ;;  %v6126_v8 = vld [vmem:[%s15885_s28 + $0x206] sm:$0xff]  ;;  %v6129_v41 = vld [vmem:[%s15885_s28 + $0x21e] sm:$0xff]  ;;  %v4685_v44 = vpack.c.bf16 %v4672_v16, %v4671_v48  ;;  %v6131_v59 = vld [vmem:[%s15885_s28 + $0x22e] sm:$0xff]  ;;  %v4686_v2 = vpack.c.bf16 %v4674_v31, %v4673_v50 }
 0x223   : > { %v6137_v56 = vpack.c.bf16 %v6127_v21, %v6126_v8  ;;  %v6138_v24 = vpack.c.bf16 %v6129_v41, %v6128_v46  ;;  %v6130_v28 = vld [vmem:[%s15885_s28 + $0x226] sm:$0xff]  ;;  %v4675_v53 = vld [vmem:[%s15885_s28 + $0x176] sm:$0xff]  ;;  %v4676_v26 = vld [vmem:[%s15885_s28 + $0x17e] sm:$0xff] }
 0x224   : > { %v4687_v36 = vpack.c.bf16 %v4676_v26, %v4675_v53  ;;  %v4677_v22 = vld [vmem:[%s15885_s28 + $0x186] sm:$0xff]  ;;  %v4678_v20 = vld [vmem:[%s15885_s28 + $0x18e] sm:$0xff]  ;;  %v6344_v38 = vld [vmem:[%s15885_s28 + $0x218] sm:$0xff] }
 0x225   : > { %v6341_v47 = vld [vmem:[%s15885_s28 + $0x200] sm:$0xff]  ;;  %v6342_v51 = vld [vmem:[%s15885_s28 + $0x208] sm:$0xff]  ;;  %v6343_v49 = vld [vmem:[%s15885_s28 + $0x210] sm:$0xff] }
 0x226   : > { %v4681_v18 = vld [vmem:[%s15885_s28 + $0x1a6] sm:$0xff]  ;;  %v4682_v35 = vld [vmem:[%s15885_s28 + $0x1ae] sm:$0xff]  ;;  %v6356_v4 = vpack.c.bf16 %v6344_v38, %v6343_v49  ;;  %v17307_v23 = vld [vmem:[%s15885_s28 + $0x21a] sm:$0xff] }
 0x227   : > { %13958 = vmatmul.mubr.msk.bf16.gmra.mrb[24].mxu0 %vm578_vm2, %v4525_v57  ;;  %v4679_v57 = vld [vmem:[%s15885_s28 + $0x196] sm:$0xff]  ;;  %v4690_v58 = vpack.c.bf16 %v4682_v35, %v4681_v18  ;;  %v6383_v54 = vld [vmem:[%s15885_s28 + $0x202] sm:$0xff]  ;;  %v17323_v63 = vld [vmem:[%s15885_s28 + $0x22a] sm:$0xff] }
 0x228   : > { %14128 = vmatmul.mubr.msk.bf16.gmra.mrb[28].mxu1 %vm578_vm2, %v5978_v43  ;;  %13961 = vmatprep.mubr.msk.bf16.mxu0 %vm578_vm2, %v4526_v42  ;;  %v4680_v43 = vld [vmem:[%s15885_s28 + $0x19e] sm:$0xff]  ;;  %v4688_v42 = vpack.c.bf16 %v4678_v20, %v4677_v22  ;;  %v6385_v19 = vld [vmem:[%s15885_s28 + $0x212] sm:$0xff]  ;;  %v17349_v46 = vld [vmem:[%s15885_s28 + $0x24a] sm:$0xff] }
 0x229   : > { %14133 = vmatprep.mubr.msk.bf16.mxu1 %vm578_vm2, %v6132_v34  ;;  %v6355_v34 = vpack.c.bf16 %v6342_v51, %v6341_v47  ;;  %v4689_v40 = vpack.c.bf16 %v4680_v43, %v4679_v57  ;;  %v6347_v15 = vld [vmem:[%s15885_s28 + $0x230] sm:$0xff]  ;;  %v6348_v61 = vld [vmem:[%s15885_s28 + $0x238] sm:$0xff]  ;;  %v6398_v29 = vpack.c.bf16 %v17307_v23, %v6385_v19  ;;  %v6387_v62 = vld [vmem:[%s15885_s28 + $0x222] sm:$0xff] }
 0x22a   : > { %v6349_v0 = vld [vmem:[%s15885_s28 + $0x240] sm:$0xff]  ;;  %v6352_v8 = vld [vmem:[%s15885_s28 + $0x258] sm:$0xff]  ;;  %v6367_v51 = vld [vmem:[%s15885_s28 + $0x229] sm:$0xff] }
 0x22b   : > { %v6391_v16 = vld [vmem:[%s15885_s28 + $0x242] sm:$0xff]  ;;  %v6394_v50 = vld [vmem:[%s15885_s28 + $0x25a] sm:$0xff]  ;;  %v6368_v43 = vld [vmem:[%s15885_s28 + $0x231] sm:$0xff] }
 0x22c   : > { %v6353_v41 = vld [vmem:[%s15885_s28 + $0x260] sm:$0xff]  ;;  %v6371_v18 = vld [vmem:[%s15885_s28 + $0x249] sm:$0xff]  ;;  %v6372_v38 = vld [vmem:[%s15885_s28 + $0x251] sm:$0xff] }
 0x22d   : > { %v6362_v31 = vld [vmem:[%s15885_s28 + $0x201] sm:$0xff]  ;;  %v6635_v19 = vld [vmem:[%s15885_s28 + $0x272] sm:$0xff] }
 0x22e   : > { %v6395_v26 = vld [vmem:[%s15885_s28 + $0x262] sm:$0xff] }
 0x22f   : > { %13962 = vmatmul.mubr.msk.bf16.gmra.mrb[28].mxu0 %vm578_vm2, %v4527_v60  ;;  %v6384_v60 = vld [vmem:[%s15885_s28 + $0x20a] sm:$0xff]  ;;  %v6366_v47 = vld [vmem:[%s15885_s28 + $0x221] sm:$0xff] }
 0x230   : > { %14134 = vmatmul.mubr.msk.bf16.vlgmr.msra.gmra.mrb[16].mxu1 %vm578_vm2, %v6133_v30  ;;  %13965 = vmatprep.mubr.msk.bf16.mxu0 %vm578_vm2, %v4528_v5  ;;  %v6346_v30 = vld [vmem:[%s15885_s28 + $0x228] sm:$0xff]  ;;  %v6397_v5 = vpack.c.bf16 %v6384_v60, %v6383_v54  ;;  %v6378_v57 = vpack.c.bf16 %v6367_v51, %v6366_v47  ;;  %v7300_v47 = vld [vmem:[%s15885_s28 + $0x235] sm:$0xff]  ;;  %v7301_v51 = vld [vmem:[%s15885_s28 + $0x23d] sm:$0xff] }
 0x231   : > { %14137 = vmatprep.mubr.msk.bf16.mxu1 %vm578_vm2, %v6134_v10  ;;  %14180 = vmatpush3.bf16.msra.mxu1 %v15875_v7  ;;  %v4670_v7 = vld [vmem:[%s15885_s28 + $0x14e] sm:$0xff]  ;;  %v6374_v60 = vld [vmem:[%s15885_s28 + $0x261] sm:$0xff] }
 0x232   : > { %14239 = vmatprep.subr.bf16.mxu1 %v15768_v13  ;;  %v4684_v3 = vpack.c.bf16 %v4670_v7, %v4669_v55  ;;  %v17336_v55 = vld [vmem:[%s15885_s28 + $0x23a] sm:$0xff]  ;;  %v6351_v7 = vld [vmem:[%s15885_s28 + $0x250] sm:$0xff] }
 0x233   : > { %v6360_v48 = vpack.c.bf16 %v6352_v8, %v6351_v7  ;;  %v6640_v35 = vpack.c.bf16 %v6391_v16, %v17336_v55  ;;  %v17483_v7 = vld [vmem:[%s15885_s28 + $0x254] sm:$0xff] }
 0x237   : > { %13966 = vmatmul.mubr.msk.bf16.gmra.mrb[32].mxu0 %vm578_vm2, %v4529_v9  ;;  %v6350_v9 = vld [vmem:[%s15885_s28 + $0x248] sm:$0xff] }
 0x238   : > { %14138 = vmatmul.mubr.msk.bf16.gmra.mrb[20].mxu1 %vm578_vm2, %v6135_v37  ;;  %13971 = vmatprep.mubr.msk.bf16.mxu0 %vm578_vm2, %v4683_v11  ;;  %v6399_v37 = vpack.c.bf16 %v17323_v63, %v6387_v62  ;;  %v6359_v11 = vpack.c.bf16 %v6350_v9, %v6349_v0  ;;  %v6866_v0 = vld [vmem:[%s15885_s28 + $0x223] sm:$0xff] }
 0x239   : > { %14141 = vmatprep.mubr.msk.bf16.mxu1 %vm578_vm2, %v6136_v12  ;;  %v6389_v12 = vld [vmem:[%s15885_s28 + $0x232] sm:$0xff]  ;;  %v17466_v9 = vld [vmem:[%s15885_s28 + $0x244] sm:$0xff] }
 0x23a   : > { %v6400_v21 = vpack.c.bf16 %v17336_v55, %v6389_v12  ;;  %v17480_v55 = vld [vmem:[%s15885_s28 + $0x24c] sm:$0xff] }
 0x23f   : > { %13972 = vmatmul.mubr.msk.bf16.vlgmr.msra.gmra.mrb[20].mxu0 %vm578_vm2, %v4684_v3  ;;  %v6354_v3 = vld [vmem:[%s15885_s28 + $0x268] sm:$0x3f] }
 0x240   : > { %14142 = vmatmul.mubr.msk.bf16.gmra.mrb[24].mxu1 %vm578_vm2, %v6137_v56  ;;  %14150 = vmatpush3.bf16.msra.mxu0 %v15872_v6  ;;  %v6139_v6 = vpack.c.bf16 %v6131_v59, %v6130_v28  ;;  %v6401_v56 = vpack.c.bf16 %v17349_v46, %v6391_v16  ;;  %v6363_v28 = vld [vmem:[%s15885_s28 + $0x209] sm:$0xff]  ;;  %v17497_v16 = vld [vmem:[%s15885_s28 + $0x25c] sm:$0xff] }
 0x241   : > { %13975 = vmatprep.mubr.msk.bf16.mxu0 %vm578_vm2, %v4685_v44  ;;  %14145 = vmatprep.mubr.msk.bf16.mxu1 %vm578_vm2, %v6138_v24  ;;  %v6361_v44 = vpack.c.bf16 %v6354_v3, %v6353_v41  ;;  %v6393_v24 = vld [vmem:[%s15885_s28 + $0x252] sm:$0xff]  ;;  %v6376_v53 = vpack.c.bf16 %v6363_v28, %v6362_v31 }
 0x242   : > { %14209 = vmatprep.subr.bf16.mxu0 %v15768_v13  ;;  %v6402_v59 = vpack.c.bf16 %v6394_v50, %v6393_v24 }
 0x247   : > { %13976 = vmatmul.mubr.msk.bf16.gmra.mrb[24].mxu0 %vm578_vm2, %v4686_v2  ;;  %v6396_v2 = vld [vmem:[%s15885_s28 + $0x26a] sm:$0x3f] }
 0x248   : > { %14146 = vmatmul.mubr.msk.bf16.gmra.mrb[28].mxu1 %vm578_vm2, %v6139_v6  ;;  %13979 = vmatprep.mubr.msk.bf16.mxu0 %vm578_vm2, %v4687_v36  ;;  %v6364_v6 = vld [vmem:[%s15885_s28 + $0x211] sm:$0xff]  ;;  %v6365_v36 = vld [vmem:[%s15885_s28 + $0x219] sm:$0xff]  ;;  %v6403_v22 = vpack.c.bf16 %v6396_v2, %v6395_v26  ;;  %v7023_v2 = vld [vmem:[%s15885_s28 + $0x284] sm:$0x3f] }
 0x249   : > { %14181 = vmatprep.mubr.msk.bf16.mxu1 %vm15769_vm5, %v15768_v13  ;;  %v6377_v20 = vpack.c.bf16 %v6365_v36, %v6364_v6 }
 0x24f   : > { %13980 = vmatmul.mubr.msk.bf16.gmra.mrb[28].mxu0 %vm578_vm2, %v4688_v42  ;;  %v6369_v42 = vld [vmem:[%s15885_s28 + $0x239] sm:$0xff] }
 0x250   : > { %14182 = vmatmul.mubr.msk.bf16.vlgmr.msra.gmra.mrb[32].mxu1 %vm578_vm2, %v6355_v34  ;;  %13983 = vmatprep.mubr.msk.bf16.mxu0 %vm578_vm2, %v4689_v40  ;;  %v6639_v34 = vpack.c.bf16 %v6389_v12, %v17323_v63  ;;  %v6379_v40 = vpack.c.bf16 %v6369_v42, %v6368_v43  ;;  %v6865_v63 = vld [vmem:[%s15885_s28 + $0x21b] sm:$0xff]  ;;  %v6868_v12 = vld [vmem:[%s15885_s28 + $0x233] sm:$0xff] }
 0x251   : > { %14185 = vmatprep.mubr.msk.bf16.mxu1 %vm15769_vm5, %v15768_v13  ;;  %14240 = vmatpush3.bf16.msra.mxu1 %v16028_v1  ;;  %v6345_v1 = vld [vmem:[%s15885_s28 + $0x220] sm:$0xff] }
 0x252   : > { %14299 = vmatprep.subr.bf16.mxu1 %v15768_v13  ;;  %v6357_v10 = vpack.c.bf16 %v6346_v30, %v6345_v1  ;;  %v6375_v1 = vld [vmem:[%s15885_s28 + $0x269] sm:$0x3f]  ;;  %v6642_v30 = vpack.c.bf16 %v6395_v26, %v6394_v50  ;;  %v17516_v50 = vld [vmem:[%s15885_s28 + $0x274] sm:$0xff]  ;;  %v17529_v26 = vld [vmem:[%s15885_s28 + $0x27c] sm:$0xff] }
 0x253   : > { %v7030_v36 = vpack.c.bf16 %v7023_v2, %v17529_v26  ;;  %v17546_v43 = vld [vmem:[%s18951_s3] sm:$0xff]  }
 0x254   : > { %v6877_v42 = vld [vmem:[%s15885_s28 + $0x27b] sm:$0xff] }
 0x257   : > { %13984 = vmatmul.mubr.msk.bf16.gmra.mrb[32].mxu0 %vm578_vm2, %v4690_v58  ;;  %v6373_v58 = vld [vmem:[%s15885_s28 + $0x259] sm:$0xff] }
 0x258   : > { %14186 = vmatmul.mubr.msk.bf16.gmra.mrb[36].mxu1 %vm578_vm2, %v6356_v4  ;;  %14151 = vmatprep.mubr.msk.bf16.mxu0 %vm15769_vm5, %v15768_v13  ;;  %v6641_v4 = vpack.c.bf16 %v6393_v24, %v17349_v46  ;;  %v6381_v54 = vpack.c.bf16 %v6373_v58, %v6372_v38  ;;  %v17500_v46 = vld [vmem:[%s15885_s28 + $0x264] sm:$0xff]  ;;  %v17513_v24 = vld [vmem:[%s15885_s28 + $0x26c] sm:$0xff] }
 0x259   : > { %14189 = vmatprep.mubr.msk.bf16.mxu1 %vm15769_vm5, %v15768_v13  ;;  %v7028_v3 = vpack.c.bf16 %v17500_v46, %v17497_v16  ;;  %v7029_v28 = vpack.c.bf16 %v17516_v50, %v17513_v24  ;;  %v7305_v38 = vld [vmem:[%s15885_s28 + $0x25d] sm:$0xff] }
 0x25f   : > { %14152 = vmatmul.mubr.msk.bf16.vlgmr.msra.gmra.mrb[36].mxu0 %vm578_vm2, %v6397_v5  ;;  %v6382_v5 = vpack.c.bf16 %v6375_v1, %v6374_v60 }
 0x260   : > { %14190 = vmatmul.mubr.msk.bf16.gmra.mrb[40].mxu1 %vm578_vm2, %v6357_v10  ;;  %14210 = vmatpush3.bf16.msra.mxu0 %v15935_v27  ;;  %v6358_v27 = vpack.c.bf16 %v6348_v61, %v6347_v15  ;;  %v6634_v10 = vld [vmem:[%s15885_s28 + $0x26a] sm:$0xff]  ;;  %v7024_v15 = vpack.c.bf16 %v17110_v33, %v17092_v17  ;;  %v17448_v17 = vld [vmem:[%s15885_s28 + $0x234] sm:$0xff] }
 0x261   : > { %14155 = vmatprep.mubr.msk.bf16.mxu0 %vm15769_vm5, %v15768_v13  ;;  %14193 = vmatprep.mubr.msk.bf16.mxu1 %vm15769_vm5, %v15768_v13  ;;  %v17437_v61 = vld [vmem:[%s18951_s3 + $0x10] sm:$0xff]  }
 0x262   : > { %14269 = vmatprep.subr.bf16.mxu0 %v15768_v13 }
 0x267   : > { %14156 = vmatmul.mubr.msk.bf16.gmra.mrb[40].mxu0 %vm578_vm2, %v6398_v29  ;;  %v6636_v29 = vld [vmem:[%s15885_s28 + $0x27a] sm:$0xff] }
 0x268   : > { %14194 = vmatmul.mubr.msk.bf16.gmra.mrb[44].mxu1 %vm578_vm2, %v6358_v27  ;;  %14159 = vmatprep.mubr.msk.bf16.mxu0 %vm15769_vm5, %v15768_v13  ;;  %v6637_v27 = vld [vmem:[%s15885_s28 + $0x282] sm:$0x3f] }
 0x269   : > { %14197 = vmatprep.mubr.msk.bf16.mxu1 %vm15769_vm5, %v15768_v13  ;;  %v6644_v33 = vpack.c.bf16 %v6637_v27, %v6636_v29 }
 0x26f   : > { %14160 = vmatmul.mubr.msk.bf16.gmra.mrb[44].mxu0 %vm578_vm2, %v6399_v37  ;;  %v6879_v37 = vpack.c.bf16 %v6866_v0, %v6865_v63  ;;  %v7307_v63 = vld [vmem:[%s15885_s28 + $0x26d] sm:$0xff] }
 0x270   : > { %14198 = vmatmul.mubr.msk.bf16.gmra.mrb[48].mxu1 %vm578_vm2, %v6359_v11  ;;  %14163 = vmatprep.mubr.msk.bf16.mxu0 %vm15769_vm5, %v15768_v13  ;;  %v6867_v11 = vld [vmem:[%s15885_s28 + $0x22b] sm:$0xff] }
 0x271   : > { %14201 = vmatprep.mubr.msk.bf16.mxu1 %vm15769_vm5, %v15768_v13  ;;  %v6880_v8 = vpack.c.bf16 %v6868_v12, %v6867_v11 }
 0x277   : > { %14164 = vmatmul.mubr.msk.bf16.gmra.mrb[48].mxu0 %vm578_vm2, %v6400_v21  ;;  %v6869_v21 = vld [vmem:[%s15885_s28 + $0x23b] sm:$0xff] }
 0x278   : > { %14202 = vmatmul.mubr.msk.bf16.gmra.mrb[52].mxu1 %vm578_vm2, %v6360_v48  ;;  %14167 = vmatprep.mubr.msk.bf16.mxu0 %vm15769_vm5, %v15768_v13  ;;  %v6870_v48 = vld [vmem:[%s15885_s28 + $0x243] sm:$0xff] }
 0x279   : > { %14205 = vmatprep.mubr.msk.bf16.mxu1 %vm15769_vm5, %v15768_v13  ;;  %v6881_v41 = vpack.c.bf16 %v6870_v48, %v6869_v21 }
 0x27f   : > { %14168 = vmatmul.mubr.msk.bf16.gmra.mrb[52].mxu0 %vm578_vm2, %v6401_v56  ;;  %v6871_v56 = vld [vmem:[%s15885_s28 + $0x24b] sm:$0xff] }
 0x280   : > { %14206 = vmatmul.mubr.msk.bf16.gmra.mrb[56].mxu1 %vm578_vm2, %v6361_v44  ;;  %14171 = vmatprep.mubr.msk.bf16.mxu0 %vm15769_vm5, %v15768_v13  ;;  %v6872_v44 = vld [vmem:[%s15885_s28 + $0x253] sm:$0xff] }
 0x281   : > { %14241 = vmatprep.mubr.msk.bf16.mxu1 %vm15769_vm5, %v15768_v13  ;;  %v6882_v31 = vpack.c.bf16 %v6872_v44, %v6871_v56 }
 0x287   : > { %14172 = vmatmul.mubr.msk.bf16.gmra.mrb[56].mxu0 %vm578_vm2, %v6402_v59  ;;  %v6873_v59 = vld [vmem:[%s15885_s28 + $0x25b] sm:$0xff] }
 0x288   : > { %14242 = vmatmul.mubr.msk.bf16.vlgmr.msra.gmra.mrb[60].mxu1 %vm578_vm2, %v6376_v53  ;;  %14175 = vmatprep.mubr.msk.bf16.mxu0 %vm15769_vm5, %v15768_v13  ;;  %v6874_v53 = vld [vmem:[%s15885_s28 + $0x263] sm:$0xff] }
 0x289   : > { %14245 = vmatprep.mubr.msk.bf16.mxu1 %vm15769_vm5, %v15768_v13  ;;  %14300 = vmatpush3.bf16.msra.mxu1 %v16157_v39  ;;  %v6638_v39 = vpack.c.bf16 %v6387_v62, %v17307_v23  ;;  %v6643_v23 = vpack.c.bf16 %v6635_v19, %v6634_v10  ;;  %v7025_v62 = vpack.c.bf16 %v17448_v17, %v17113_v52 }
 0x28a   : > { %14359 = vmatprep.subr.bf16.mxu1 %v15768_v13  ;;  %v6883_v6 = vpack.c.bf16 %v6874_v53, %v6873_v59  ;;  %v7171_v53 = vpack.c.bf16 %v17497_v16, %v17483_v7 }
 0x28f   : > { %14176 = vmatmul.mubr.msk.bf16.gmra.mrb[60].mxu0 %vm578_vm2, %v6403_v22  ;;  %v6875_v22 = vld [vmem:[%s15885_s28 + $0x26b] sm:$0xff] }
 0x290   : > { %14246 = vmatmul.mubr.msk.bf16.gmra.mrb[64].mxu1 %vm578_vm2, %v6377_v20  ;;  %14211 = vmatprep.mubr.msk.bf16.mxu0 %vm15769_vm5, %v15768_v13  ;;  %v6876_v20 = vld [vmem:[%s15885_s28 + $0x273] sm:$0xff] }
 0x291   : > { %14249 = vmatprep.mubr.msk.bf16.mxu1 %vm15769_vm5, %v15768_v13 }
 0x297   : > { %14212 = vmatmul.mubr.msk.bf16.vlgmr.msra.gmra.mrb[64].mxu0 %vm578_vm2, %v6638_v39  ;;  %v6884_v39 = vpack.c.bf16 %v6876_v20, %v6875_v22 }
 0x298   : > { %14250 = vmatmul.mubr.msk.bf16.gmra.mrb[68].mxu1 %vm578_vm2, %v6378_v57  ;;  %14270 = vmatpush3.bf16.msra.mxu0 %v16086_v14  ;;  %v6370_v14 = vld [vmem:[%s15885_s28 + $0x241] sm:$0xff]  ;;  %v7314_v57 = vpack.c.bf16 %v7301_v51, %v7300_v47 }
 0x299   : > { %14215 = vmatprep.mubr.msk.bf16.mxu0 %vm15769_vm5, %v15768_v13  ;;  %14253 = vmatprep.mubr.msk.bf16.mxu1 %vm15769_vm5, %v15768_v13  ;;  %v6380_v49 = vpack.c.bf16 %v6371_v18, %v6370_v14  ;;  %v7303_v14 = vld [vmem:[%s15885_s28 + $0x24d] sm:$0xff] }
 0x29a   : > { %14329 = vmatprep.subr.bf16.mxu0 %v15768_v13 }
 0x29f   : > { %14216 = vmatmul.mubr.msk.bf16.gmra.mrb[68].mxu0 %vm578_vm2, %v6639_v34  ;;  %v6878_v34 = vld [vmem:[%s15885_s28 + $0x283] sm:$0x3f] }
 0x2a0   : > { %14254 = vmatmul.mubr.msk.bf16.gmra.mrb[72].mxu1 %vm578_vm2, %v6379_v40  ;;  %14219 = vmatprep.mubr.msk.bf16.mxu0 %vm15769_vm5, %v15768_v13  ;;  %v7302_v40 = vld [vmem:[%s15885_s28 + $0x245] sm:$0xff]  ;;  %v6885_v18 = vpack.c.bf16 %v6878_v34, %v6877_v42 }
 0x2a1   : > { %14257 = vmatprep.mubr.msk.bf16.mxu1 %vm15769_vm5, %v15768_v13 }
 0x2a7   : > { %14220 = vmatmul.mubr.msk.bf16.gmra.mrb[72].mxu0 %vm578_vm2, %v6640_v35  ;;  %v7315_v35 = vpack.c.bf16 %v7303_v14, %v7302_v40 }
 0x2a8   : > { %14258 = vmatmul.mubr.msk.bf16.gmra.mrb[76].mxu1 %vm578_vm2, %v6380_v49  ;;  %14223 = vmatprep.mubr.msk.bf16.mxu0 %vm15769_vm5, %v15768_v13  ;;  %v7304_v49 = vld [vmem:[%s15885_s28 + $0x255] sm:$0xff] }
 0x2a9   : > { %14261 = vmatprep.mubr.msk.bf16.mxu1 %vm15769_vm5, %v15768_v13 }
 0x2af   : > { %14224 = vmatmul.mubr.msk.bf16.gmra.mrb[76].mxu0 %vm578_vm2, %v6641_v4 }
 0x2b0   : > { %14262 = vmatmul.mubr.msk.bf16.gmra.mrb[80].mxu1 %vm578_vm2, %v6381_v54  ;;  %14227 = vmatprep.mubr.msk.bf16.mxu0 %vm15769_vm5, %v15768_v13  ;;  %v17573_v54 = vld [vmem:[%s18950_s2] ss:$0 sm:$0xff] }
 0x2b1   : > { %14265 = vmatprep.mubr.msk.bf16.mxu1 %vm15769_vm5, %v15768_v13 }
 0x2b7   : > { %14228 = vmatmul.mubr.msk.bf16.gmra.mrb[80].mxu0 %vm578_vm2, %v6642_v30  ;;  %v7316_v30 = vpack.c.bf16 %v7305_v38, %v7304_v49 }
 0x2b8   : > { %14266 = vmatmul.mubr.msk.bf16.gmra.mrb[84].mxu1 %vm578_vm2, %v6382_v5  ;;  %14231 = vmatprep.mubr.msk.bf16.mxu0 %vm15769_vm5, %v15768_v13 }
 0x2b9   : > { %14301 = vmatprep.mubr.msk.bf16.mxu1 %vm15769_vm5, %v15768_v13 }
 0x2bf   : > { %14232 = vmatmul.mubr.msk.bf16.gmra.mrb[84].mxu0 %vm578_vm2, %v6643_v23 }
 0x2c0   : > { %14302 = vmatmul.mubr.msk.bf16.vlgmr.msra.gmra.mrb[88].mxu1 %vm578_vm2, %v7024_v15  ;;  %14235 = vmatprep.mubr.msk.bf16.mxu0 %vm15769_vm5, %v15768_v13 }
 0x2c1   : > { %14305 = vmatprep.mubr.msk.bf16.mxu1 %vm15769_vm5, %v15768_v13  ;;  %14360 = vmatpush3.bf16.msra.mxu1 %v16290_v45  ;;  %v17463_v45 = vld [vmem:[%s15885_s28 + $0x23c] sm:$0xff] }
 0x2c2   : > { %14419 = vmatprep.subr.bf16.mxu1 %v17437_v61  ;;  %v7026_v52 = vpack.c.bf16 %v17466_v9, %v17463_v45  ;;  %v7169_v4 = vpack.c.bf16 %v17463_v45, %v17448_v17 }
 0x2c7   : > { %14236 = vmatmul.mubr.msk.bf16.gmra.mrb[88].mxu0 %vm578_vm2, %v6644_v33 }
 0x2c8   : > { %14306 = vmatmul.mubr.msk.bf16.gmra.mrb[92].mxu1 %vm578_vm2, %v7025_v62  ;;  %14271 = vmatprep.mubr.msk.bf16.mxu0 %vm15769_vm5, %v15768_v13  ;;  %v7306_v62 = vld [vmem:[%s15885_s28 + $0x265] sm:$0xff] }
 0x2c9   : > { %14309 = vmatprep.mubr.msk.bf16.mxu1 %vm15769_vm5, %v15768_v13 }
 0x2cf   : > { %14272 = vmatmul.mubr.msk.bf16.vlgmr.msra.gmra.mrb[92].mxu0 %vm578_vm2, %v6879_v37 }
 0x2d0   : > { %14310 = vmatmul.mubr.msk.bf16.gmra.mrb[96].mxu1 %vm578_vm2, %v7026_v52  ;;  %14330 = vmatpush3.bf16.msra.mxu0 %v16214_v25  ;;  %v7027_v25 = vpack.c.bf16 %v17483_v7, %v17480_v55  ;;  %v7317_v52 = vpack.c.bf16 %v7307_v63, %v7306_v62 }
 0x2d1   : > { %14275 = vmatprep.mubr.msk.bf16.mxu0 %vm15769_vm5, %v15768_v13  ;;  %14313 = vmatprep.mubr.msk.bf16.mxu1 %vm15769_vm5, %v15768_v13 }
 0x2d2   : > { %14389 = vmatprep.subr.bf16.mxu0 %v15768_v13 }
 0x2d7   : > { %14276 = vmatmul.mubr.msk.bf16.gmra.mrb[96].mxu0 %vm578_vm2, %v6880_v8 }
 0x2d8   : > { %14314 = vmatmul.mubr.msk.bf16.gmra.mrb[100].mxu1 %vm578_vm2, %v7027_v25  ;;  %14279 = vmatprep.mubr.msk.bf16.mxu0 %vm15769_vm5, %v15768_v13 }
 0x2d9   : > { %14317 = vmatprep.mubr.msk.bf16.mxu1 %vm15769_vm5, %v15768_v13 }
 0x2df   : > { %14280 = vmatmul.mubr.msk.bf16.gmra.mrb[100].mxu0 %vm578_vm2, %v6881_v41 }
 0x2e0   : > { %14318 = vmatmul.mubr.msk.bf16.gmra.mrb[104].mxu1 %vm578_vm2, %v7028_v3  ;;  %14283 = vmatprep.mubr.msk.bf16.mxu0 %vm15769_vm5, %v15768_v13  ;;  %v7309_v3 = vld [vmem:[%s15885_s28 + $0x27d] sm:$0xff] }
 0x2e1   : > { %14321 = vmatprep.mubr.msk.bf16.mxu1 %vm15769_vm5, %v15768_v13 }
 0x2e7   : > { %14284 = vmatmul.mubr.msk.bf16.gmra.mrb[104].mxu0 %vm578_vm2, %v6882_v31 }
 0x2e8   : > { %14322 = vmatmul.mubr.msk.bf16.gmra.mrb[108].mxu1 %vm578_vm2, %v7029_v28  ;;  %14287 = vmatprep.mubr.msk.bf16.mxu0 %vm15769_vm5, %v15768_v13 }
 0x2e9   : > { %14325 = vmatprep.mubr.msk.bf16.mxu1 %vm15769_vm5, %v15768_v13 }
 0x2ef   : > { %14288 = vmatmul.mubr.msk.bf16.gmra.mrb[108].mxu0 %vm578_vm2, %v6883_v6 }
 0x2f0   : > { %14326 = vmatmul.mubr.msk.bf16.gmra.mrb[112].mxu1 %vm578_vm2, %v7030_v36  ;;  %14291 = vmatprep.mubr.msk.bf16.mxu0 %vm15769_vm5, %v15768_v13 }
 0x2f1   : > { %14361 = vmatprep.mubr.msk.bf16.mxu1 %vm15769_vm5, %v15768_v13 }
 0x2f7   : > { %14292 = vmatmul.mubr.msk.bf16.gmra.mrb[112].mxu0 %vm578_vm2, %v6884_v39 }
 0x2f8   : > { %14362 = vmatmul.mubr.msk.bf16.vlgmr.msra.gmra.mrb[116].mxu1 %vm578_vm2, %v7314_v57  ;;  %14295 = vmatprep.mubr.msk.bf16.mxu0 %vm15769_vm5, %v15768_v13 }
 0x2f9   : > { %14365 = vmatprep.mubr.msk.bf16.mxu1 %vm15769_vm5, %v15768_v13  ;;  %14420 = vmatpush3.bf16.msra.mxu1 %v17437_v61 }
 0x2fa   : > { %14437 = vmatprep.subr.bf16.mxu1 %v17546_v43 }
 0x2ff   : > { %14296 = vmatmul.mubr.msk.bf16.gmra.mrb[116].mxu0 %vm578_vm2, %v6885_v18 }
 0x300   : > { %14366 = vmatmul.mubr.msk.bf16.gmra.mrb[120].mxu1 %vm578_vm2, %v7315_v35  ;;  %14331 = vmatprep.mubr.msk.bf16.mxu0 %vm15769_vm5, %v15768_v13 }
 0x301   : > { %14369 = vmatprep.mubr.msk.bf16.mxu1 %vm15769_vm5, %v15768_v13 }
 0x303   : > { %v14135_v58 = vpop.f32.mrb[16].mxu1 }
 0x304   : > { %v6295_v60 = vadd.f32 %v17573_v54, %v14135_v58  ;;  %v6198_v1 = vpop.f32.mrb[17].mxu1 }
 0x305   : > { %v6293_v5 = vadd.f32 %v17573_v54, %v6198_v1  ;;  %v14136_v10 = vpop.f32.mrb[18].mxu1  ;;  %v7311_v1 = vld [vmem:[%s15885_s28 + $0x28d] sm:$0xff] }
 0x306   : > { %v6311_v19 = vmax.f32 %v6295_v60, 0.0  ;;  %v6296_v23 = vadd.f32 %v17573_v54, %v14136_v10  ;;  %v6201_v15 = vpop.f32.mrb[19].mxu1  ;;  %v7310_v60 = vld [vmem:[%s15885_s28 + $0x285] sm:$0xff] }
 0x307   : > { %v6309_v29 = vmax.f32 %v6293_v5, 0.0  ;;  %v6294_v27 = vadd.f32 %v17573_v54, %v6201_v15  ;;  %14332 = vmatmul.mubr.msk.bf16.vlgmr.msra.gmra.mrb[120].mxu0 %vm578_vm2, %v7169_v4  ;;  %v7771_v5 = vld [vmem:[#allocation2 + $0xe0] ss:$2 sm:$0xf]  ;;  %v7172_v15 = vpack.c.bf16 %v17513_v24, %v17500_v46  ;;  %v7319_v63 = vpack.c.bf16 %v7311_v1, %v7310_v60 }
 0x308   : > { %6327 = vst.msk [vmem:[#allocation2 + $0x190] sm:$0xff] %vm1977_vm3, %v6311_v19  ;;  %v6312_v17 = vmax.f32 %v6296_v23, 0.0  ;;  %14370 = vmatmul.mubr.msk.bf16.gmra.mrb[124].mxu1 %vm578_vm2, %v7316_v30  ;;  %14390 = vmatpush3.bf16.msra.mxu0 %v16349_v32  ;;  %v7170_v32 = vpack.c.bf16 %v17480_v55, %v17466_v9  ;;  %v7308_v55 = vld [vmem:[%s15885_s28 + $0x275] sm:$0xff] }
 0x309   : > { %6325 = vst.msk [vmem:[#allocation2 + $0x180] sm:$0xff] %vm1977_vm3, %v6309_v29  ;;  %v6310_v33 = vmax.f32 %v6294_v27, 0.0  ;;  %14335 = vmatprep.mubr.msk.bf16.mxu0 %vm15769_vm5, %v15768_v13  ;;  %14373 = vmatprep.mubr.msk.bf16.mxu1 %vm15769_vm5, %v15768_v13  ;;  %v7318_v20 = vpack.c.bf16 %v7309_v3, %v7308_v55  ;;  %v7775_v29 = vld [vmem:[#allocation2 + $0xe1] ss:$2 sm:$0xf] }
 0x30a   : > { %6328 = vst.msk [vmem:[#allocation2 + $0x198] sm:$0xff] %vm1977_vm3, %v6312_v17  ;;  %14581 = vmatprep.subr.bf16.mxu0 %v15768_v13 }
 0x30b   : > { %6326 = vst.msk [vmem:[#allocation2 + $0x188] sm:$0xff] %vm1977_vm3, %v6310_v33  ;;  %v14139_v0 = vpop.f32.mrb[20].mxu1 }
 0x30c   : > { %v6299_v45 = vadd.f32 %v17573_v54, %v14139_v0  ;;  %v6214_v37 = vpop.f32.mrb[21].mxu1 }
 0x30d   : > { %v6297_v11 = vadd.f32 %v17573_v54, %v6214_v37  ;;  %v14140_v12 = vpop.f32.mrb[22].mxu1 }
 0x30e   : > { %v6315_v8 = vmax.f32 %v6299_v45, 0.0  ;;  %v6300_v25 = vadd.f32 %v17573_v54, %v14140_v12  ;;  %v6217_v21 = vpop.f32.mrb[23].mxu1 }
 0x30f   : > { %v6313_v48 = vmax.f32 %v6297_v11, 0.0  ;;  %v6298_v41 = vadd.f32 %v17573_v54, %v6217_v21  ;;  %14336 = vmatmul.mubr.msk.bf16.gmra.mrb[124].mxu0 %vm578_vm2, %v7170_v32 }
 0x310   : > { %6331 = vst.msk [vmem:[#allocation2 + $0x1b0] sm:$0xff] %vm1977_vm3, %v6315_v8  ;;  %v6316_v9 = vmax.f32 %v6300_v25, 0.0  ;;  %14374 = vmatmul.mubr.msk.bf16.gmra.mrb[128].mxu1 %vm578_vm2, %v7317_v52  ;;  %14339 = vmatprep.mubr.msk.bf16.mxu0 %vm15769_vm5, %v15768_v13  ;;  %v7785_v8 = vmax.f32 %v7771_v5, %v7775_v29 }
 0x311   : > { %6329 = vst.msk [vmem:[#allocation2 + $0x1a0] sm:$0xff] %vm1977_vm3, %v6313_v48  ;;  %14377 = vmatprep.mubr.msk.bf16.mxu1 %vm15769_vm5, %v15768_v13  ;;  %v6314_v56 = vmax.f32 %v6298_v41, 0.0 }
 0x312   : > { %6332 = vst.msk [vmem:[#allocation2 + $0x1b8] sm:$0xff] %vm1977_vm3, %v6316_v9  ;;  %v13973_v44 = vpop.f32.mrb[20].mxu0  ;;  %v7312_v9 = vld [vmem:[%s15885_s28 + $0x295] sm:$0xff] }
 0x313   : > { %v4846_v31 = vadd.f32 %v17573_v54, %v13973_v44  ;;  %v14143_v28 = vpop.f32.mrb[24].mxu1  ;;  %v4749_v59 = vpop.f32.mrb[21].mxu0  ;;  %6330 = vst.msk [vmem:[#allocation2 + $0x1a8] sm:$0xff] %vm1977_vm3, %v6314_v56 }
 0x314   : > { %v6303_v2 = vadd.f32 %v17573_v54, %v14143_v28  ;;  %v4844_v6 = vadd.f32 %v17573_v54, %v4749_v59  ;;  %v6230_v36 = vpop.f32.mrb[25].mxu1  ;;  %v13974_v22 = vpop.f32.mrb[22].mxu0 }
 0x315   : > { %v4862_v47 = vmax.f32 %v4846_v31, 0.0  ;;  %v6301_v51 = vadd.f32 %v17573_v54, %v6230_v36  ;;  %v4847_v39 = vadd.f32 %v17573_v54, %v13974_v22  ;;  %v14144_v57 = vpop.f32.mrb[26].mxu1  ;;  %v4752_v42 = vpop.f32.mrb[23].mxu0  ;;  %v8027_v22 = vld [vmem:[#allocation3 + $0x2] sm:$0xff] }
 0x316   : > { %v6319_v34 = vmax.f32 %v6303_v2, 0.0  ;;  %v4860_v40 = vmax.f32 %v4844_v6, 0.0  ;;  %v6304_v7 = vadd.f32 %v17573_v54, %v14144_v57  ;;  %v4845_v16 = vadd.f32 %v17573_v54, %v4752_v42  ;;  %v6233_v14 = vpop.f32.mrb[27].mxu1 }
 0x317   : > { %4878 = vst.msk [vmem:[#allocation2 + $0x110] sm:$0xff] %vm1977_vm3, %v4862_v47  ;;  %v6302_v18 = vadd.f32 %v17573_v54, %v6233_v14  ;;  %14340 = vmatmul.mubr.msk.bf16.gmra.mrb[128].mxu0 %vm578_vm2, %v7171_v53  ;;  %v6317_v35 = vmax.f32 %v6301_v51, 0.0  ;;  %v4863_v49 = vmax.f32 %v4847_v39, 0.0  ;;  %v7867_v55 = vld [vmem:[#allocation2 + $0x1b0] ss:$2 sm:$0xf]  ;;  %v7173_v57 = vpack.c.bf16 %v17529_v26, %v17516_v50 }
 0x318   : > { %6335 = vst.msk [vmem:[#allocation2 + $0x1d0] sm:$0xff] %vm1977_vm3, %v6319_v34  ;;  %4876 = vst.msk [vmem:[#allocation2 + $0x100] sm:$0xff] %vm1977_vm3, %v4860_v40  ;;  %v6320_v38 = vmax.f32 %v6304_v7, 0.0  ;;  %14378 = vmatmul.mubr.msk.bf16.gmra.mrb[132].mxu1 %vm578_vm2, %v7318_v20  ;;  %14343 = vmatprep.mubr.msk.bf16.mxu0 %vm15769_vm5, %v15768_v13  ;;  %v4861_v58 = vmax.f32 %v4845_v16, 0.0  ;;  %v7313_v53 = vld [vmem:[%s15885_s28 + $0x29d] sm:$0x3f] }
 0x319   : > { %v6318_v4 = vmax.f32 %v6302_v18, 0.0  ;;  %14381 = vmatprep.mubr.msk.bf16.mxu1 %vm15769_vm5, %v15768_v13  ;;  %6333 = vst.msk [vmem:[#allocation2 + $0x1c0] sm:$0xff] %vm1977_vm3, %v6317_v35  ;;  %4879 = vst.msk [vmem:[#allocation2 + $0x118] sm:$0xff] %vm1977_vm3, %v4863_v49  ;;  %v7871_v2 = vld [vmem:[#allocation2 + $0x1b1] ss:$2 sm:$0xf]  ;;  %v7320_v14 = vpack.c.bf16 %v7313_v53, %v7312_v9 }
 0x31a   : > { %6336 = vst.msk [vmem:[#allocation2 + $0x1d8] sm:$0xff] %vm1977_vm3, %v6320_v38  ;;  %v13977_v30 = vpop.f32.mrb[24].mxu0  ;;  %4877 = vst.msk [vmem:[#allocation2 + $0x108] sm:$0xff] %vm1977_vm3, %v4861_v58  ;;  %v7865_v28 = vld [vmem:[#allocation2 + $0x1a0] ss:$2 sm:$0xff]  ;;  %v7881_v35 = vmax.f32 %v7867_v55, %v7871_v2 }
 0x31b   : > { %6334 = vst.msk [vmem:[#allocation2 + $0x1c8] sm:$0xff] %vm1977_vm3, %v6318_v4  ;;  %v4850_v10 = vadd.f32 %v17573_v54, %v13977_v30  ;;  %v14147_v19 = vpop.f32.mrb[28].mxu1  ;;  %v4765_v23 = vpop.f32.mrb[25].mxu0  ;;  %v7869_v59 = vld [vmem:[#allocation2 + $0x1a1] ss:$2 sm:$0xff] }
 0x31c   : > { %v6307_v27 = vadd.f32 %v17573_v54, %v14147_v19  ;;  %v4848_v17 = vadd.f32 %v17573_v54, %v4765_v23  ;;  %v6246_v33 = vpop.f32.mrb[29].mxu1  ;;  %v13978_v62 = vpop.f32.mrb[26].mxu0  ;;  %v8028_v20 = vld [vmem:[#allocation3 + $0xa] sm:$0xff]  ;;  %v7880_v42 = vmax.f32 %v7865_v28, %v7869_v59 }
 0x31d   : > { %v4866_v0 = vmax.f32 %v4850_v10, 0.0  ;;  %v6305_v32 = vadd.f32 %v17573_v54, %v6246_v33  ;;  %v4851_v45 = vadd.f32 %v17573_v54, %v13978_v62  ;;  %v14148_v37 = vpop.f32.mrb[30].mxu1  ;;  %v4768_v52 = vpop.f32.mrb[27].mxu0  ;;  %v8043_v23 = vpack.c.bf16 %v8028_v20, %v8027_v22  ;;  %v7166_v33 = vld [vmem:[%s15885_s28 + $0x28c] sm:$0xff] }
 0x31e   : > { %v6323_v11 = vmax.f32 %v6307_v27, 0.0  ;;  %v4864_v12 = vmax.f32 %v4848_v17, 0.0  ;;  %v6308_v46 = vadd.f32 %v17573_v54, %v14148_v37  ;;  %v6249_v24 = vpop.f32.mrb[31].mxu1  ;;  %v4849_v48 = vadd.f32 %v17573_v54, %v4768_v52  ;;  %v7165_v17 = vld [vmem:[%s15885_s28 + $0x284] sm:$0xff]  ;;  %v8031_v20 = vld [vmem:[#allocation3 + $0x22] sm:$0xff] }
 0x31f   : > { %v7779_v25 = vld [vmem:[#allocation2 + $0xfa] ss:$2 sm:$0xf]  ;;  %v7783_v21 = vld [vmem:[#allocation2 + $0xfb] ss:$2 sm:$0xf]  ;;  %v6306_v41 = vadd.f32 %v17573_v54, %v6249_v24  ;;  %14344 = vmatmul.mubr.msk.bf16.gmra.mrb[132].mxu0 %vm578_vm2, %v7172_v15 }
 0x320   : > { %4882 = vst.msk [vmem:[#allocation2 + $0x130] sm:$0xff] %vm1977_vm3, %v4866_v0  ;;  %v7787_v3 = vmax.f32 %v7779_v25, %v7783_v21  ;;  %6339 = vst.msk [vmem:[#allocation2 + $0x1f0] sm:$0xff] %vm1977_vm3, %v6323_v11  ;;  %v6321_v56 = vmax.f32 %v6305_v32, 0.0  ;;  %v4867_v44 = vmax.f32 %v4851_v45, 0.0  ;;  %v6324_v31 = vmax.f32 %v6308_v46, 0.0  ;;  %14382 = vmatmul.mubr.msk.bf16.gmra.mrb[136].mxu1 %vm578_vm2, %v7319_v63  ;;  %14347 = vmatprep.mubr.msk.bf16.mxu0 %vm15769_vm5, %v15768_v13  ;;  %v8030_v32 = vld [vmem:[#allocation3 + $0x1a] sm:$0xff] }
 0x321   : > { %4880 = vst.msk [vmem:[#allocation2 + $0x120] sm:$0xff] %vm1977_vm3, %v4864_v12  ;;  %14385 = vmatprep.mubr.msk.bf16.mxu1 %vm15769_vm5, %v15768_v13  ;;  %v4865_v39 = vmax.f32 %v4849_v48, 0.0  ;;  %v6322_v7 = vmax.f32 %v6306_v41, 0.0  ;;  %v7795_v62 = vld [vmem:[#allocation2 + $0x114] ss:$2 sm:$0xf]  ;;  %v7174_v48 = vpack.c.bf16 %v7166_v33, %v7165_v17 }
 0x322   : > { %v7789_v6 = vmax.f32 %v7785_v8, %v7787_v3  ;;  %v7873_v36 = vld [vmem:[#allocation2 + $0x1ba] ss:$2 sm:$0xff]  ;;  %6337 = vst.msk [vmem:[#allocation2 + $0x1e0] sm:$0xff] %vm1977_vm3, %v6321_v56  ;;  %4883 = vst.msk [vmem:[#allocation2 + $0x138] sm:$0xff] %vm1977_vm3, %v4867_v44  ;;  %v7877_v51 = vld [vmem:[#allocation2 + $0x1bb] ss:$2 sm:$0xff] }
 0x323   : > { %6340 = vst.msk [vmem:[#allocation2 + $0x1f8] sm:$0xff] %vm1977_vm3, %v6324_v31  ;;  %v7875_v47 = vld [vmem:[#allocation2 + $0x1ca] ss:$2 sm:$0xf]  ;;  %v7882_v40 = vmax.f32 %v7873_v36, %v7877_v51  ;;  %v13981_v16 = vpop.f32.mrb[28].mxu0  ;;  %v17664_v18 = vpop.f32.mrb[32].mxu1 }
 0x324   : > { %v7879_v34 = vld [vmem:[#allocation2 + $0x1cb] ss:$2 sm:$0xf]  ;;  %7791 = vst.msk [vmem:[#allocation3 + $0x4f] sm:$0xf] %vm7671_vm4, %v7789_v6  ;;  %v4854_v38 = vadd.f32 %v17573_v54, %v13981_v16  ;;  %v4781_v58 = vpop.f32.mrb[29].mxu0 }
 0x325   : > { %v7883_v49 = vmax.f32 %v7875_v47, %v7879_v34  ;;  %4881 = vst.msk [vmem:[#allocation2 + $0x128] sm:$0xff] %vm1977_vm3, %v4865_v39  ;;  %v14183_v4 = vpop.f32.mrb[33].mxu1  ;;  %v7884_v60 = vmax.f32 %v7880_v42, %v7882_v40  ;;  %6338 = vst.msk [vmem:[#allocation2 + $0x1e8] sm:$0xff] %vm1977_vm3, %v6322_v7  ;;  %v4852_v50 = vadd.f32 %v17573_v54, %v4781_v58  ;;  %v13982_v26 = vpop.f32.mrb[30].mxu0  ;;  %v7793_v45 = vld [vmem:[#allocation2 + $0x104] ss:$2 sm:$0xff] }
 0x326   : > { %v17670_v1 = vpop.f32.mrb[34].mxu1  ;;  %v4870_v5 = vmax.f32 %v4854_v38, 0.0  ;;  %v4855_v10 = vadd.f32 %v17573_v54, %v13982_v26  ;;  %v4784_v19 = vpop.f32.mrb[31].mxu0  ;;  %v7799_v63 = vld [vmem:[#allocation2 + $0x115] ss:$2 sm:$0xf] }
 0x327   : > { %v7885_v30 = vmax.f32 %v7881_v35, %v7883_v49  ;;  %14348 = vmatmul.mubr.msk.bf16.gmra.mrb[136].mxu0 %vm578_vm2, %v7173_v57  ;;  %v14184_v15 = vpop.f32.mrb[35].mxu1  ;;  %7886 = vst.msk [vmem:[#allocation3 + $0x7f] sm:$0xff] %vm1977_vm3, %v7884_v60  ;;  %v4868_v29 = vmax.f32 %v4852_v50, 0.0  ;;  %v4853_v27 = vadd.f32 %v17573_v54, %v4784_v19  ;;  %v7797_v37 = vld [vmem:[#allocation2 + $0x105] ss:$2 sm:$0xff]  ;;  %v8032_v46 = vld [vmem:[#allocation3 + $0x2a] sm:$0xff]  ;;  %v7809_v2 = vmax.f32 %v7795_v62, %v7799_v63 }
 0x328   : > { %14386 = vmatmul.mubr.msk.bf16.gmra.mrb[140].mxu1 %vm578_vm2, %v7320_v14  ;;  %14351 = vmatprep.mubr.msk.bf16.mxu0 %vm15769_vm5, %v15768_v13  ;;  %4886 = vst.msk [vmem:[#allocation2 + $0x150] sm:$0xff] %vm1977_vm3, %v4870_v5  ;;  %v4871_v0 = vmax.f32 %v4855_v10, 0.0  ;;  %v8029_v12 = vld [vmem:[#allocation3 + $0x12] sm:$0xff]  ;;  %v7808_v6 = vmax.f32 %v7793_v45, %v7797_v37  ;;  %v17695_v47 = vld [vmem:[%s18951_s3 + $0x18] sm:$0xff]   ;;  %v8045_v40 = vpack.c.bf16 %v8032_v46, %v8031_v20  ;;  %v8034_v19 = vld [vmem:[#allocation3 + $0x3a] sm:$0xff] }
 0x329   : > { %14421 = vmatprep.mubr.msk.bf16.mxu1 %vm1977_vm3, %v8043_v23  ;;  %7887 = vst.msk [vmem:[#allocation3 + $0x87] sm:$0xf] %vm7671_vm4, %v7885_v30  ;;  %v4869_v52 = vmax.f32 %v4853_v27, 0.0  ;;  %v7889_v24 = vld [vmem:[#allocation2 + $0x1d4] ss:$2 sm:$0xff]  ;;  %v8044_v53 = vpack.c.bf16 %v8030_v32, %v8029_v12 }
 0x32a   : > { %4884 = vst.msk [vmem:[#allocation2 + $0x140] sm:$0xff] %vm1977_vm3, %v4868_v29  ;;  %v13985_v11 = vpop.f32.mrb[32].mxu0  ;;  %v7893_v8 = vld [vmem:[#allocation2 + $0x1d5] ss:$2 sm:$0xff]  ;;  %4887 = vst.msk [vmem:[#allocation2 + $0x158] sm:$0xff] %vm1977_vm3, %v4871_v0 }
 0x32b   : > { %v4858_v25 = vadd.f32 %v17573_v54, %v13985_v11  ;;  %v4797_v21 = vpop.f32.mrb[33].mxu0  ;;  %v17687_v41 = vpop.f32.mrb[36].mxu1  ;;  %4885 = vst.msk [vmem:[#allocation2 + $0x148] sm:$0xff] %vm1977_vm3, %v4869_v52  ;;  %v7904_v51 = vmax.f32 %v7889_v24, %v7893_v8  ;;  %v7167_v49 = vld [vmem:[%s15885_s28 + $0x294] sm:$0xff]  ;;  %v7168_v38 = vld [vmem:[%s15885_s28 + $0x29c] sm:$0x3f] }
 0x32c   : > { %v7801_v9 = vld [vmem:[#allocation2 + $0x11e] ss:$2 sm:$0xff]  ;;  %v7803_v55 = vld [vmem:[#allocation2 + $0x12e] ss:$2 sm:$0xf]  ;;  %v4856_v3 = vadd.f32 %v17573_v54, %v4797_v21  ;;  %v13986_v56 = vpop.f32.mrb[34].mxu0  ;;  %v7175_v10 = vpack.c.bf16 %v7168_v38, %v7167_v49 }
 0x32d   : > { %v7805_v44 = vld [vmem:[#allocation2 + $0x11f] ss:$2 sm:$0xff]  ;;  %v7807_v31 = vld [vmem:[#allocation2 + $0x12f] ss:$2 sm:$0xf]  ;;  %v4874_v28 = vmax.f32 %v4858_v25, 0.0  ;;  %v4859_v59 = vadd.f32 %v17573_v54, %v13986_v56 }
 0x32e   : > { %v7810_v36 = vmax.f32 %v7801_v9, %v7805_v44  ;;  %v7811_v22 = vmax.f32 %v7803_v55, %v7807_v31  ;;  %v7897_v39 = vld [vmem:[#allocation2 + $0x1ee] ss:$2 sm:$0xff]  ;;  %v7901_v57 = vld [vmem:[#allocation2 + $0x1ef] ss:$2 sm:$0xff]  ;;  %v4872_v42 = vmax.f32 %v4856_v3, 0.0  ;;  %v4800_v35 = vpop.f32.mrb[35].mxu0 }
 0x32f   : > { %4890 = vst.msk [vmem:[#allocation2 + $0x170] sm:$0xff] %vm1977_vm3, %v4874_v28  ;;  %v4875_v34 = vmax.f32 %v4859_v59, 0.0  ;;  %14352 = vmatmul.mubr.msk.bf16.gmra.mrb[140].mxu0 %vm578_vm2, %v7174_v48  ;;  %v7906_v14 = vmax.f32 %v7897_v39, %v7901_v57  ;;  %v14187_v58 = vpop.f32.mrb[37].mxu1  ;;  %v4857_v4 = vadd.f32 %v17573_v54, %v4800_v35  ;;  %v8033_v54 = vld [vmem:[#allocation3 + $0x32] sm:$0xff]  ;;  %v8036_v29 = vld [vmem:[#allocation3 + $0x4a] sm:$0xff]  ;;  %v8035_v62 = vld [vmem:[#allocation3 + $0x42] sm:$0xff] }
 0x330   : > { %v7812_v7 = vmax.f32 %v7808_v6, %v7810_v36  ;;  %v7813_v16 = vmax.f32 %v7809_v2, %v7811_v22  ;;  %14422 = vmatmul.mubr.msk.bf16.vlgmr.msra.gmra.mrb[144].mxu1 %vm1977_vm3, %v8044_v53  ;;  %14355 = vmatprep.mubr.msk.bf16.mxu0 %vm15769_vm5, %v15768_v13  ;;  %4888 = vst.msk [vmem:[#allocation2 + $0x160] sm:$0xff] %vm1977_vm3, %v4872_v42  ;;  %v17708_v60 = vpop.f32.mrb[38].mxu1  ;;  %v7851_v17 = vld [vmem:[#allocation2 + $0x196] ss:$2 sm:$0xf]  ;;  %v7446_v21 = vld [vmem:[%s15885_s28 + $0x23e] sm:$0xff] }
 0x331   : > { %4891 = vst.msk [vmem:[#allocation2 + $0x178] sm:$0xff] %vm1977_vm3, %v4875_v34  ;;  %14425 = vmatprep.mubr.msk.bf16.mxu1 %vm1977_vm3, %v8045_v40  ;;  %14438 = vmatpush3.bf16.msra.mxu1 %v17546_v43  ;;  %v7908_v50 = vmax.f32 %v7904_v51, %v7906_v14  ;;  %v14188_v30 = vpop.f32.mrb[39].mxu1  ;;  %v4873_v23 = vmax.f32 %v4857_v4, 0.0  ;;  %v7817_v0 = vld [vmem:[#allocation2 + $0x138] ss:$2 sm:$0xff]  ;;  %v8046_v37 = vpack.c.bf16 %v8034_v19, %v8033_v54  ;;  %v7448_v54 = vld [vmem:[%s15885_s28 + $0x24e] sm:$0xff] }
 0x332   : > { %7814 = vst.msk [vmem:[#allocation3 + $0x55] sm:$0xff] %vm1977_vm3, %v7812_v7  ;;  %v6459_v26 = vpop.f32.mrb[36].mxu0  ;;  %14455 = vmatprep.subr.bf16.mxu1 %v17695_v47  ;;  %v7821_v32 = vld [vmem:[#allocation2 + $0x139] ss:$2 sm:$0xff]  ;;  %v8047_v12 = vpack.c.bf16 %v8036_v29, %v8035_v62  ;;  %v7849_v51 = vld [vmem:[#allocation2 + $0x186] ss:$2 sm:$0xff] }
 0x333   : > { %7815 = vst.msk [vmem:[#allocation3 + $0x5d] sm:$0xf] %vm7671_vm4, %v7813_v16  ;;  %v17715_v5 = vadd.f32 %v17664_v18, %v6459_v26  ;;  %v14153_v15 = vpop.f32.mrb[37].mxu0  ;;  %v17718_v27 = vpop.f32.mrb[40].mxu1  ;;  %v7445_v46 = vld [vmem:[%s15885_s28 + $0x236] sm:$0xff] }
 0x334   : > { %7910 = vst.msk [vmem:[#allocation3 + $0x8d] sm:$0xff] %vm1977_vm3, %v7908_v50  ;;  %v6462_v33 = vpop.f32.mrb[38].mxu0  ;;  %v14191_v63 = vpop.f32.mrb[41].mxu1  ;;  %4889 = vst.msk [vmem:[#allocation2 + $0x168] sm:$0xff] %vm1977_vm3, %v4873_v23  ;;  %v7459_v6 = vpack.c.bf16 %v7446_v21, %v7445_v46  ;;  %v7853_v39 = vld [vmem:[#allocation2 + $0x187] ss:$2 sm:$0xff] }
 0x335   : > { %v17722_v18 = vadd.f32 %v17670_v1, %v6462_v33  ;;  %v14154_v45 = vpop.f32.mrb[39].mxu0  ;;  %v17724_v52 = vpop.f32.mrb[42].mxu1  ;;  %v7855_v11 = vld [vmem:[#allocation2 + $0x197] ss:$2 sm:$0xf]  ;;  %v7832_v1 = vmax.f32 %v7817_v0, %v7821_v32  ;;  %v7858_v50 = vmax.f32 %v7849_v51, %v7853_v39 }
 0x336   : > { %v14192_v24 = vpop.f32.mrb[43].mxu1  ;;  %v7819_v48 = vld [vmem:[#allocation2 + $0x148] ss:$2 sm:$0xf]  ;;  %v7859_v56 = vmax.f32 %v7851_v17, %v7855_v11  ;;  %v7449_v11 = vld [vmem:[%s15885_s28 + $0x256] sm:$0xff] }
 0x337   : > { %14356 = vmatmul.mubr.msk.bf16.gmra.mrb[144].mxu0 %vm578_vm2, %v7175_v10  ;;  %v7825_v8 = vld [vmem:[#allocation2 + $0x152] ss:$2 sm:$0xff]  ;;  %v7829_v25 = vld [vmem:[#allocation2 + $0x153] ss:$2 sm:$0xff] }
 0x338   : > { %14426 = vmatmul.mubr.msk.bf16.gmra.mrb[148].mxu1 %vm1977_vm3, %v8046_v37  ;;  %14391 = vmatprep.mubr.msk.bf16.mxu0 %vm15769_vm5, %v15768_v13  ;;  %v7834_v9 = vmax.f32 %v7825_v8, %v7829_v25  ;;  %v7843_v55 = vld [vmem:[#allocation2 + $0x17c] ss:$2 sm:$0xf]  ;;  %v7847_v3 = vld [vmem:[#allocation2 + $0x17d] ss:$2 sm:$0xf] }
 0x339   : > { %14429 = vmatprep.mubr.msk.bf16.mxu1 %vm1977_vm3, %v8047_v12  ;;  %v7823_v44 = vld [vmem:[#allocation2 + $0x149] ss:$2 sm:$0xf]  ;;  %v7857_v31 = vmax.f32 %v7843_v55, %v7847_v3  ;;  %v7979_v12 = vld [vmem:[#allocation3] sm:$0xff]  ;;  %v7980_v46 = vld [vmem:[#allocation3 + $0x8] sm:$0xff] }
 0x33a   : > { %v6467_v28 = vpop.f32.mrb[40].mxu0  ;;  %v7836_v59 = vmax.f32 %v7832_v1, %v7834_v9  ;;  %v8037_v36 = vld [vmem:[#allocation3 + $0x52] sm:$0xff]  ;;  %v8038_v22 = vld [vmem:[#allocation3 + $0x5a] sm:$0xff]  ;;  %v7984_v39 = vld [vmem:[#allocation3 + $0x28] sm:$0xff] }
 0x33b   : > { %v17734_v53 = vadd.f32 %v17687_v41, %v6467_v28  ;;  %v14157_v2 = vpop.f32.mrb[41].mxu0  ;;  %v6593_v20 = vpop.f32.mrb[44].mxu1  ;;  %v7861_v57 = vmax.f32 %v7857_v31, %v7859_v56  ;;  %v7827_v40 = vld [vmem:[#allocation2 + $0x162] ss:$2 sm:$0xf]  ;;  %v7833_v41 = vmax.f32 %v7819_v48, %v7823_v44  ;;  %v8048_v58 = vpack.c.bf16 %v8038_v22, %v8037_v36  ;;  %v7452_v22 = vld [vmem:[%s15885_s28 + $0x26e] sm:$0xff] }
 0x33c   : > { %v6470_v42 = vpop.f32.mrb[42].mxu0  ;;  %v14195_v34 = vpop.f32.mrb[45].mxu1  ;;  %7838 = vst.msk [vmem:[#allocation3 + $0x63] sm:$0xff] %vm1977_vm3, %v7836_v59  ;;  %v7831_v7 = vld [vmem:[#allocation2 + $0x163] ss:$2 sm:$0xf]  ;;  %v7995_v31 = vpack.c.bf16 %v7980_v46, %v7979_v12 }
 0x33d   : > { %v17738_v16 = vadd.f32 %v17708_v60, %v6470_v42  ;;  %7863 = vst.msk [vmem:[#allocation3 + $0x79] sm:$0xf] %vm7671_vm4, %v7861_v57  ;;  %v7835_v14 = vmax.f32 %v7827_v40, %v7831_v7  ;;  %v7841_v35 = vld [vmem:[#allocation2 + $0x16c] ss:$2 sm:$0xff]  ;;  %v7845_v49 = vld [vmem:[#allocation2 + $0x16d] ss:$2 sm:$0xff] }
 0x33e   : > { %v14158_v38 = vpop.f32.mrb[43].mxu0  ;;  %v6596_v4 = vpop.f32.mrb[46].mxu1  ;;  %v7856_v26 = vmax.f32 %v7841_v35, %v7845_v49  ;;  %v7447_v60 = vld [vmem:[%s15885_s28 + $0x246] sm:$0xff] }
 0x33f   : > { %14392 = vmatmul.mubr.msk.bf16.vlgmr.msra.gmra.mrb[148].mxu0 %vm578_vm2, %v7459_v6  ;;  %v14196_v30 = vpop.f32.mrb[47].mxu1  ;;  %v7837_v10 = vmax.f32 %v7833_v41, %v7835_v14  ;;  %v7460_v17 = vpack.c.bf16 %v7448_v54, %v7447_v60  ;;  %v7451_v36 = vld [vmem:[%s15885_s28 + $0x266] sm:$0xff]  ;;  %v7983_v14 = vld [vmem:[#allocation3 + $0x20] sm:$0xff]  ;;  %v7454_v60 = vld [vmem:[%s15885_s28 + $0x27e] sm:$0xff] }
 0x340   : > { %14430 = vmatmul.mubr.msk.bf16.gmra.mrb[152].mxu1 %vm1977_vm3, %v8048_v58  ;;  %14395 = vmatprep.mubr.msk.bf16.mxu0 %vm15769_vm5, %v15768_v13  ;;  %v7860_v19 = vmax.f32 %v7856_v26, %v7858_v50  ;;  %v7981_v57 = vld [vmem:[#allocation3 + $0x10] sm:$0xff]  ;;  %v7462_v40 = vpack.c.bf16 %v7452_v22, %v7451_v36  ;;  %v17778_v38 = vpack.c.bf16 %v7984_v39, %v7983_v14  ;;  %v17785_v26 = vld [vmem:[%s18951_s3 + $0x8] sm:$0xff]   ;;  %v7457_v39 = vld [vmem:[%s15885_s28 + $0x296] sm:$0xff] }
 0x341   : > { %14582 = vmatpush3.bf16.msra.mxu0 %v17437_v61  ;;  %7839 = vst.msk [vmem:[#allocation3 + $0x6b] sm:$0xf] %vm7671_vm4, %v7837_v10  ;;  %v7453_v10 = vld [vmem:[%s15885_s28 + $0x276] sm:$0xff]  ;;  %v7985_v54 = vld [vmem:[#allocation3 + $0x30] sm:$0xff] }
 0x342   : > { %v6475_v23 = vpop.f32.mrb[44].mxu0  ;;  %14595 = vmatprep.subr.bf16.mxu0 %v15768_v13  ;;  %7862 = vst.msk [vmem:[#allocation3 + $0x71] sm:$0xff] %vm1977_vm3, %v7860_v19  ;;  %v7986_v19 = vld [vmem:[#allocation3 + $0x38] sm:$0xff] }
 0x343   : > { %v17752_v15 = vadd.f32 %v17718_v27, %v6475_v23  ;;  %v14161_v29 = vpop.f32.mrb[45].mxu0  ;;  %v6601_v33 = vpop.f32.mrb[48].mxu1  ;;  %v7450_v27 = vld [vmem:[%s15885_s28 + $0x25e] sm:$0xff]  ;;  %v8039_v24 = vld [vmem:[#allocation3 + $0x62] sm:$0xff]  ;;  %v8306_v14 = vld [vmem:[#allocation3 + $0x16] sm:$0xff] }
 0x344   : > { %v6478_v62 = vpop.f32.mrb[46].mxu0  ;;  %v14199_v63 = vpop.f32.mrb[49].mxu1  ;;  %v8042_v37 = vld [vmem:[#allocation3 + $0x7a] sm:$0xff]  ;;  %v7461_v55 = vpack.c.bf16 %v7450_v27, %v7449_v11  ;;  %v7988_v29 = vld [vmem:[#allocation3 + $0x48] sm:$0xff] }
 0x345   : > { %v17755_v0 = vadd.f32 %v17724_v52, %v6478_v62  ;;  %v14162_v61 = vpop.f32.mrb[47].mxu0  ;;  %v6604_v32 = vpop.f32.mrb[50].mxu1  ;;  %v7463_v62 = vpack.c.bf16 %v7454_v60, %v7453_v10  ;;  %v8305_v10 = vld [vmem:[#allocation3 + $0xe] sm:$0xff] }
 0x346   : > { %v14200_v45 = vpop.f32.mrb[51].mxu1  ;;  %v17800_v61 = vpack.c.bf16 %v7986_v19, %v7985_v54  ;;  %v8321_v19 = vpack.c.bf16 %v8306_v14, %v8305_v10 }
 0x347   : > { %14396 = vmatmul.mubr.msk.bf16.gmra.mrb[152].mxu0 %vm578_vm2, %v7460_v17 }
 0x348   : > { %14399 = vmatprep.mubr.msk.bf16.mxu0 %vm15769_vm5, %v15768_v13 }
 0x349   : > { %v8040_v8 = vld [vmem:[#allocation3 + $0x6a] sm:$0xff]  ;;  %v8041_v25 = vld [vmem:[#allocation3 + $0x72] sm:$0xff] }
 0x34a   : > { %v6483_v21 = vpop.f32.mrb[48].mxu0  ;;  %v8049_v1 = vpack.c.bf16 %v8040_v8, %v8039_v24  ;;  %v8050_v52 = vpack.c.bf16 %v8042_v37, %v8041_v25  ;;  %v7455_v24 = vld [vmem:[%s15885_s28 + $0x286] sm:$0xff]  ;;  %v7456_v8 = vld [vmem:[%s15885_s28 + $0x28e] sm:$0xff] }
 0x34b   : > { %v17762_v48 = vadd.f32 %v6593_v20, %v6483_v21  ;;  %v14165_v9 = vpop.f32.mrb[49].mxu0  ;;  %v6609_v3 = vpop.f32.mrb[52].mxu1  ;;  %v7982_v20 = vld [vmem:[#allocation3 + $0x18] sm:$0xff]  ;;  %v7989_v25 = vld [vmem:[#allocation3 + $0x50] sm:$0xff] }
 0x34c   : > { %v6486_v56 = vpop.f32.mrb[50].mxu0  ;;  %v14203_v44 = vpop.f32.mrb[53].mxu1  ;;  %14433 = vmatprep.mubr.msk.bf16.mxu1 %vm1977_vm3, %v8049_v1  ;;  %v17776_v41 = vpack.c.bf16 %v7982_v20, %v7981_v57  ;;  %v7990_v21 = vld [vmem:[#allocation3 + $0x58] sm:$0xff]  ;;  %v7458_v57 = vld [vmem:[%s15885_s28 + $0x29e] sm:$0x3f] }
 0x34d   : > { %v17765_v28 = vadd.f32 %v6596_v4, %v6486_v56  ;;  %v14166_v59 = vpop.f32.mrb[51].mxu0  ;;  %v6612_v2 = vpop.f32.mrb[54].mxu1  ;;  %14434 = vmatmul.mubr.msk.bf16.gmra.mrb[156].mxu1 %vm1977_vm3, %v8050_v52  ;;  %v7992_v52 = vld [vmem:[#allocation3 + $0x68] sm:$0xff]  ;;  %v17817_v44 = vpack.c.bf16 %v7990_v21, %v7989_v25 }
 0x34e   : > { %v14204_v6 = vpop.f32.mrb[55].mxu1  ;;  %14439 = vmatprep.mubr.msk.bf16.mxu1 %vm1977_vm3, %v7995_v31  ;;  %v7991_v31 = vld [vmem:[#allocation3 + $0x60] sm:$0xff] }
 0x34f   : > { %14400 = vmatmul.mubr.msk.bf16.gmra.mrb[156].mxu0 %vm578_vm2, %v7461_v55  ;;  %v17819_v6 = vpack.c.bf16 %v7992_v52, %v7991_v31 }
 0x350   : > { %14403 = vmatprep.mubr.msk.bf16.mxu0 %vm15769_vm5, %v15768_v13 }
 0x352   : > { %v6491_v51 = vpop.f32.mrb[52].mxu0 }
 0x353   : > { %v17774_v42 = vadd.f32 %v6601_v33, %v6491_v51  ;;  %v14169_v34 = vpop.f32.mrb[53].mxu0  ;;  %v6617_v7 = vpop.f32.mrb[56].mxu1 }
 0x354   : > { %v6494_v35 = vpop.f32.mrb[54].mxu0  ;;  %v14207_v49 = vpop.f32.mrb[57].mxu1  ;;  %v7993_v34 = vld [vmem:[#allocation3 + $0x70] sm:$0xff] }
 0x355   : > { %v17780_v58 = vadd.f32 %v6604_v32, %v6494_v35  ;;  %v14170_v4 = vpop.f32.mrb[55].mxu0  ;;  %v6620_v50 = vpop.f32.mrb[58].mxu1  ;;  %14440 = vmatmul.mubr.msk.bf16.vlgmr.msra.gmra.mrb[144].mxu1 %vm1977_vm3, %v17776_v41  ;;  %v7987_v32 = vld [vmem:[#allocation3 + $0x40] sm:$0xff] }
 0x356   : > { %v14208_v30 = vpop.f32.mrb[59].mxu1  ;;  %14443 = vmatprep.mubr.msk.bf16.mxu1 %vm1977_vm3, %v17778_v38  ;;  %14456 = vmatpush3.bf16.msra.mxu1 %v17695_v47  ;;  %v17802_v11 = vpack.c.bf16 %v7988_v29, %v7987_v32  ;;  %v7465_v4 = vpack.c.bf16 %v7458_v57, %v7457_v39  ;;  %v8313_v39 = vld [vmem:[#allocation3 + $0x4e] sm:$0xff]  ;;  %v8314_v57 = vld [vmem:[#allocation3 + $0x56] sm:$0xff] }
 0x357   : > { %14404 = vmatmul.mubr.msk.bf16.gmra.mrb[160].mxu0 %vm578_vm2, %v7462_v40  ;;  %14473 = vmatprep.subr.bf16.mxu1 %v17785_v26  ;;  %v7994_v40 = vld [vmem:[#allocation3 + $0x78] sm:$0xff] }
 0x358   : > { %14407 = vmatprep.mubr.msk.bf16.mxu0 %vm15769_vm5, %v15768_v13  ;;  %v17834_v30 = vpack.c.bf16 %v7994_v40, %v7993_v34  ;;  %v8312_v34 = vld [vmem:[#allocation3 + $0x46] sm:$0xff] }
 0x35a   : > { %v6499_v23 = vpop.f32.mrb[56].mxu0 }
 0x35b   : > { %v17798_v17 = vadd.f32 %v6609_v3, %v6499_v23  ;;  %v14173_v33 = vpop.f32.mrb[57].mxu0  ;;  %v6810_v63 = vpop.f32.mrb[60].mxu1  ;;  %v7464_v3 = vpack.c.bf16 %v7456_v8, %v7455_v24 }
 0x35c   : > { %v6502_v45 = vpop.f32.mrb[58].mxu0  ;;  %v14243_v37 = vpop.f32.mrb[61].mxu1 }
 0x35d   : > { %v17804_v47 = vadd.f32 %v6612_v2, %v6502_v45  ;;  %v14174_v27 = vpop.f32.mrb[59].mxu0  ;;  %v6813_v12 = vpop.f32.mrb[62].mxu1  ;;  %14444 = vmatmul.mubr.msk.bf16.gmra.mrb[148].mxu1 %vm1977_vm3, %v17800_v61  ;;  %v8309_v45 = vld [vmem:[#allocation3 + $0x2e] sm:$0xff]  ;;  %v8310_v37 = vld [vmem:[#allocation3 + $0x36] sm:$0xff] }
 0x35e   : > { %v14244_v46 = vpop.f32.mrb[63].mxu1  ;;  %14447 = vmatprep.mubr.msk.bf16.mxu1 %vm1977_vm3, %v17802_v11  ;;  %v9506_v27 = vld [vmem:[#allocation3 + $0x8a] sm:$0xff] }
 0x35f   : > { %14408 = vmatmul.mubr.msk.bf16.gmra.mrb[164].mxu0 %vm578_vm2, %v7463_v62 }
 0x360   : > { %14411 = vmatprep.mubr.msk.bf16.mxu0 %vm15769_vm5, %v15768_v13 }
 0x362   : > { %v6507_v1 = vpop.f32.mrb[60].mxu0 }
 0x363   : > { %v17815_v9 = vadd.f32 %v6617_v7, %v6507_v1  ;;  %v14177_v55 = vpop.f32.mrb[61].mxu0  ;;  %v6818_v56 = vpop.f32.mrb[64].mxu1  ;;  %v9505_v1 = vld [vmem:[#allocation3 + $0x82] sm:$0xff] }
 0x364   : > { %v6510_v59 = vpop.f32.mrb[62].mxu0  ;;  %v14247_v2 = vpop.f32.mrb[65].mxu1  ;;  %v8323_v55 = vpack.c.bf16 %v8310_v37, %v8309_v45 }
 0x365   : > { %v17821_v36 = vadd.f32 %v6620_v50, %v6510_v59  ;;  %v14178_v22 = vpop.f32.mrb[63].mxu0  ;;  %v6821_v20 = vpop.f32.mrb[66].mxu1  ;;  %14448 = vmatmul.mubr.msk.bf16.gmra.mrb[152].mxu1 %vm1977_vm3, %v17817_v44  ;;  %v9510_v59 = vpack.c.bf16 %v9506_v27, %v9505_v1 }
 0x366   : > { %v14248_v51 = vpop.f32.mrb[67].mxu1  ;;  %14451 = vmatprep.mubr.msk.bf16.mxu1 %vm1977_vm3, %v17819_v6  ;;  %v17851_v22 = vld [vmem:[%s18951_s3 + $0x20] sm:$0xff]  }
 0x367   : > { %14412 = vmatmul.mubr.msk.bf16.gmra.mrb[168].mxu0 %vm578_vm2, %v7464_v3 }
 0x368   : > { %14415 = vmatprep.mubr.msk.bf16.mxu0 %vm15769_vm5, %v15768_v13 }
 0x36a   : > { %v6700_v7 = vpop.f32.mrb[64].mxu0 }
 0x36b   : > { %v17832_v35 = vadd.f32 %v6810_v63, %v6700_v7  ;;  %v14213_v49 = vpop.f32.mrb[65].mxu0  ;;  %v6826_v50 = vpop.f32.mrb[68].mxu1  ;;  %v8308_v63 = vld [vmem:[#allocation3 + $0x26] sm:$0xff] }
 0x36c   : > { %v6703_v60 = vpop.f32.mrb[66].mxu0  ;;  %v14251_v54 = vpop.f32.mrb[69].mxu1 }
 0x36d   : > { %v17836_v23 = vadd.f32 %v6813_v12, %v6703_v60  ;;  %v14214_v29 = vpop.f32.mrb[67].mxu0  ;;  %v6829_v33 = vpop.f32.mrb[70].mxu1  ;;  %14452 = vmatmul.mubr.msk.bf16.gmra.mrb[156].mxu1 %vm1977_vm3, %v17834_v30  ;;  %v8307_v12 = vld [vmem:[#allocation3 + $0x1e] sm:$0xff] }
 0x36e   : > { %v14252_v62 = vpop.f32.mrb[71].mxu1  ;;  %14457 = vmatprep.mubr.msk.bf16.mxu1 %vm1977_vm3, %v8321_v19  ;;  %v8322_v25 = vpack.c.bf16 %v8308_v63, %v8307_v12  ;;  %v8316_v29 = vld [vmem:[#allocation3 + $0x66] sm:$0xff]  ;;  %v8317_v63 = vld [vmem:[#allocation3 + $0x6e] sm:$0xff] }
 0x36f   : > { %14416 = vmatmul.mubr.msk.bf16.gmra.mrb[172].mxu0 %vm578_vm2, %v7465_v4 }
 0x370   : > { %14583 = vmatprep.mubr.msk.bf16.mxu0 %vm15769_vm5, %v15768_v13 }
 0x372   : > { %v6708_v32 = vpop.f32.mrb[68].mxu0 }
 0x373   : > { %v17844_v46 = vadd.f32 %v6818_v56, %v6708_v32  ;;  %v14217_v24 = vpop.f32.mrb[69].mxu0  ;;  %v6834_v8 = vpop.f32.mrb[72].mxu1  ;;  %v8315_v32 = vld [vmem:[#allocation3 + $0x5e] sm:$0xff] }
 0x374   : > { %v6711_v21 = vpop.f32.mrb[70].mxu0  ;;  %v14255_v52 = vpop.f32.mrb[73].mxu1  ;;  %v8326_v12 = vpack.c.bf16 %v8316_v29, %v8315_v32 }
 0x375   : > { %v17846_v3 = vadd.f32 %v6821_v20, %v6711_v21  ;;  %v14218_v31 = vpop.f32.mrb[71].mxu0  ;;  %v6837_v2 = vpop.f32.mrb[74].mxu1  ;;  %14458 = vmatmul.mubr.msk.bf16.vlgmr.msra.gmra.mrb[144].mxu1 %vm1977_vm3, %v8322_v25  ;;  %v8311_v20 = vld [vmem:[#allocation3 + $0x3e] sm:$0xff] }
 0x376   : > { %v14256_v56 = vpop.f32.mrb[75].mxu1  ;;  %14461 = vmatprep.mubr.msk.bf16.mxu1 %vm1977_vm3, %v8323_v55  ;;  %14474 = vmatpush3.bf16.msra.mxu1 %v17785_v26  ;;  %v8324_v49 = vpack.c.bf16 %v8312_v34, %v8311_v20  ;;  %v8320_v31 = vld [vmem:[#allocation3 + $0x86] sm:$0xff]  ;;  %v8319_v20 = vld [vmem:[#allocation3 + $0x7e] sm:$0xff] }
 0x377   : > { %14584 = vmatmul.mubr.msk.bf16.vlgmr.msra.gmra.mrb[176].mxu0 %vm1977_vm3, %v9510_v59  ;;  %14491 = vmatprep.subr.bf16.mxu1 %v17851_v22  ;;  %v8003_v56 = vld [vmem:[#allocation3 + $0x1] sm:$0xff]  ;;  %v8328_v34 = vpack.c.bf16 %v8320_v31, %v8319_v20 }
 0x378   : > { %14596 = vmatpush3.bf16.msra.mxu0 %v17546_v43  ;;  %14587 = vmatprep.mubr.msk.bf16.mxu0 %vm15769_vm5, %v15768_v13  ;;  %v8325_v43 = vpack.c.bf16 %v8314_v57, %v8313_v39 }
 0x379   : > { %14609 = vmatprep.subr.bf16.mxu0 %v15768_v13 }
 0x37a   : > { %v6716_v51 = vpop.f32.mrb[72].mxu0 }
 0x37b   : > { %v17862_v40 = vadd.f32 %v6826_v50, %v6716_v51  ;;  %v14221_v7 = vpop.f32.mrb[73].mxu0  ;;  %v6842_v14 = vpop.f32.mrb[76].mxu1  ;;  %v8318_v50 = vld [vmem:[#allocation3 + $0x76] sm:$0xff] }
 0x37c   : > { %v6719_v26 = vpop.f32.mrb[74].mxu0  ;;  %v14259_v4 = vpop.f32.mrb[77].mxu1  ;;  %v8327_v25 = vpack.c.bf16 %v8318_v50, %v8317_v63  ;;  %v8005_v63 = vld [vmem:[#allocation3 + $0x11] sm:$0xff] }
 0x37d   : > { %v17864_v10 = vadd.f32 %v6829_v33, %v6719_v26  ;;  %v14222_v60 = vpop.f32.mrb[75].mxu0  ;;  %v6845_v54 = vpop.f32.mrb[78].mxu1  ;;  %14462 = vmatmul.mubr.msk.bf16.gmra.mrb[148].mxu1 %vm1977_vm3, %v8324_v49 }
 0x37e   : > { %v14260_v19 = vpop.f32.mrb[79].mxu1  ;;  %14465 = vmatprep.mubr.msk.bf16.mxu1 %vm1977_vm3, %v8325_v43 }
 0x37f   : > { %v8006_v19 = vld [vmem:[#allocation3 + $0x19] sm:$0xff] }
 0x382   : > { %v6724_v62 = vpop.f32.mrb[76].mxu0 }
 0x383   : > { %v17868_v45 = vadd.f32 %v6834_v8, %v6724_v62  ;;  %v14225_v37 = vpop.f32.mrb[77].mxu0  ;;  %v6850_v27 = vpop.f32.mrb[80].mxu1  ;;  %v8004_v8 = vld [vmem:[#allocation3 + $0x9] sm:$0xff] }
 0x384   : > { %v6727_v24 = vpop.f32.mrb[78].mxu0  ;;  %v14263_v33 = vpop.f32.mrb[81].mxu1  ;;  %v8019_v49 = vpack.c.bf16 %v8004_v8, %v8003_v56  ;;  %v8008_v62 = vld [vmem:[#allocation3 + $0x29] sm:$0xff]  ;;  %v8020_v37 = vpack.c.bf16 %v8006_v19, %v8005_v63  ;;  %v8009_v56 = vld [vmem:[#allocation3 + $0x31] sm:$0xff]  ;;  %v8010_v8 = vld [vmem:[#allocation3 + $0x39] sm:$0xff] }
 0x385   : > { %v17870_v21 = vadd.f32 %v6837_v2, %v6727_v24  ;;  %v14226_v1 = vpop.f32.mrb[79].mxu0  ;;  %v6853_v52 = vpop.f32.mrb[82].mxu1  ;;  %14466 = vmatmul.mubr.msk.bf16.gmra.mrb[152].mxu1 %vm1977_vm3, %v8326_v12  ;;  %v8007_v24 = vld [vmem:[#allocation3 + $0x21] sm:$0xff] }
 0x386   : > { %v14264_v55 = vpop.f32.mrb[83].mxu1  ;;  %14469 = vmatprep.mubr.msk.bf16.mxu1 %vm1977_vm3, %v8327_v25  ;;  %v17888_v25 = vld [vmem:[%s18951_s3 + $0x28] sm:$0xff]   ;;  %v8021_v1 = vpack.c.bf16 %v8008_v62, %v8007_v24 }
 0x38a   : > { %v6732_v59 = vpop.f32.mrb[80].mxu0 }
 0x38b   : > { %v14229_v51 = vpop.f32.mrb[81].mxu0  ;;  %v6858_v39 = vpop.f32.mrb[84].mxu1  ;;  %v17874_v57 = vadd.f32 %v6842_v14, %v6732_v59 }
 0x38c   : > { %v6735_v7 = vpop.f32.mrb[82].mxu0  ;;  %v14267_v2 = vpop.f32.mrb[85].mxu1  ;;  %v8012_v51 = vld [vmem:[#allocation3 + $0x49] sm:$0xff] }
 0x38d   : > { %v14230_v26 = vpop.f32.mrb[83].mxu0  ;;  %v6861_v4 = vpop.f32.mrb[86].mxu1  ;;  %v17876_v43 = vadd.f32 %v6845_v54, %v6735_v7  ;;  %14470 = vmatmul.mubr.msk.bf16.gmra.mrb[156].mxu1 %vm1977_vm3, %v8328_v34  ;;  %v8022_v2 = vpack.c.bf16 %v8010_v8, %v8009_v56 }
 0x38e   : > { %v14268_v60 = vpop.f32.mrb[87].mxu1  ;;  %14475 = vmatprep.mubr.msk.bf16.mxu1 %vm1977_vm3, %v8019_v49 }
 0x392   : > { %v6740_v29 = vpop.f32.mrb[84].mxu0 }
 0x393   : > { %v7086_v50 = vpop.f32.mrb[88].mxu1  ;;  %v14233_v14 = vpop.f32.mrb[85].mxu0  ;;  %v17880_v32 = vadd.f32 %v6850_v27, %v6740_v29 }
 0x394   : > { %v17883_v12 = vadd.f32 %v7086_v50, %v17832_v35  ;;  %v14303_v54 = vpop.f32.mrb[89].mxu1  ;;  %v6743_v33 = vpop.f32.mrb[86].mxu0  ;;  %v8014_v14 = vld [vmem:[#allocation3 + $0x59] sm:$0xff] }
 0x395   : > { %v7089_v55 = vpop.f32.mrb[90].mxu1  ;;  %v14234_v31 = vpop.f32.mrb[87].mxu0  ;;  %v17890_v59 = vadd.f32 %v6853_v52, %v6743_v33  ;;  %14476 = vmatmul.mubr.msk.bf16.vlgmr.msra.gmra.mrb[144].mxu1 %vm1977_vm3, %v8020_v37  ;;  %v8016_v37 = vld [vmem:[#allocation3 + $0x69] sm:$0xff] }
 0x396   : > { %v17894_v27 = vadd.f32 %v7089_v55, %v17836_v23  ;;  %v14304_v35 = vpop.f32.mrb[91].mxu1  ;;  %14479 = vmatprep.mubr.msk.bf16.mxu1 %vm1977_vm3, %v8021_v1  ;;  %14492 = vmatpush3.bf16.msra.mxu1 %v17851_v22  ;;  %v8011_v23 = vld [vmem:[#allocation3 + $0x41] sm:$0xff] }
 0x397   : > { %14509 = vmatprep.subr.bf16.mxu1 %v17888_v25  ;;  %v8023_v19 = vpack.c.bf16 %v8012_v51, %v8011_v23  ;;  %v8015_v55 = vld [vmem:[#allocation3 + $0x61] sm:$0xff] }
 0x398   : > { %v8025_v35 = vpack.c.bf16 %v8016_v37, %v8015_v55  ;;  %v8585_v55 = vld [vmem:[#allocation3 + $0x1f] sm:$0xff] }
 0x39a   : > { %v6748_v20 = vpop.f32.mrb[88].mxu0 }
 0x39b   : > { %v7094_v34 = vpop.f32.mrb[92].mxu1  ;;  %v14237_v7 = vpop.f32.mrb[89].mxu0  ;;  %v17899_v52 = vadd.f32 %v6858_v39, %v6748_v20  ;;  %v8013_v39 = vld [vmem:[#allocation3 + $0x51] sm:$0xff] }
 0x39c   : > { %v17902_v49 = vadd.f32 %v7094_v34, %v17844_v46  ;;  %v14307_v26 = vpop.f32.mrb[93].mxu1  ;;  %v6751_v60 = vpop.f32.mrb[90].mxu0  ;;  %v8024_v1 = vpack.c.bf16 %v8014_v14, %v8013_v39  ;;  %v8017_v34 = vld [vmem:[#allocation3 + $0x71] sm:$0xff] }
 0x39d   : > { %v7097_v29 = vpop.f32.mrb[94].mxu1  ;;  %v14238_v22 = vpop.f32.mrb[91].mxu0  ;;  %v17904_v62 = vadd.f32 %v6861_v4, %v6751_v60  ;;  %14480 = vmatmul.mubr.msk.bf16.gmra.mrb[148].mxu1 %vm1977_vm3, %v8022_v2  ;;  %v8584_v2 = vld [vmem:[#allocation3 + $0x17] sm:$0xff] }
 0x39e   : > { %v17908_v63 = vadd.f32 %v7097_v29, %v17846_v3  ;;  %v14308_v50 = vpop.f32.mrb[95].mxu1  ;;  %14483 = vmatprep.mubr.msk.bf16.mxu1 %vm1977_vm3, %v8023_v19  ;;  %v8583_v29 = vld [vmem:[#allocation3 + $0xf] sm:$0xff] }
 0x39f   : > { %v8599_v50 = vpack.c.bf16 %v8584_v2, %v8583_v29  ;;  %v8592_v29 = vld [vmem:[#allocation3 + $0x57] sm:$0xff] }
 0x3a2   : > { %v6941_v46 = vpop.f32.mrb[92].mxu0 }
 0x3a3   : > { %v7102_v24 = vpop.f32.mrb[96].mxu1  ;;  %v14273_v54 = vpop.f32.mrb[93].mxu0  ;;  %v17912_v33 = vadd.f32 %v6941_v46, %v17715_v5 }
 0x3a4   : > { %v17915_v4 = vadd.f32 %v7102_v24, %v17862_v40  ;;  %v14311_v31 = vpop.f32.mrb[97].mxu1  ;;  %v6944_v3 = vpop.f32.mrb[94].mxu0  ;;  %v8018_v40 = vld [vmem:[#allocation3 + $0x79] sm:$0xff]  ;;  %v8586_v24 = vld [vmem:[#allocation3 + $0x27] sm:$0xff]  ;;  %v8587_v54 = vld [vmem:[#allocation3 + $0x2f] sm:$0xff] }
 0x3a5   : > { %v7105_v56 = vpop.f32.mrb[98].mxu1  ;;  %v14274_v8 = vpop.f32.mrb[95].mxu0  ;;  %v17918_v20 = vadd.f32 %v6944_v3, %v17722_v18  ;;  %14484 = vmatmul.mubr.msk.bf16.gmra.mrb[152].mxu1 %vm1977_vm3, %v8024_v1  ;;  %v8026_v19 = vpack.c.bf16 %v8018_v40, %v8017_v34  ;;  %v8588_v1 = vld [vmem:[#allocation3 + $0x37] sm:$0xff] }
 0x3a6   : > { %v17922_v51 = vadd.f32 %v7105_v56, %v17864_v10  ;;  %v14312_v5 = vpop.f32.mrb[99].mxu1  ;;  %14487 = vmatprep.mubr.msk.bf16.mxu1 %vm1977_vm3, %v8025_v35  ;;  %v8601_v34 = vpack.c.bf16 %v8588_v1, %v8587_v54 }
 0x3a7   : > { %v17948_v5 = vld [vmem:[%s18951_s3 + $0x30] sm:$0xff]  }
 0x3aa   : > { %v6949_v7 = vpop.f32.mrb[96].mxu0 }
 0x3ab   : > { %v7110_v23 = vpop.f32.mrb[100].mxu1  ;;  %v14277_v26 = vpop.f32.mrb[97].mxu0  ;;  %v17926_v60 = vadd.f32 %v6949_v7, %v17734_v53 }
 0x3ac   : > { %v17929_v18 = vadd.f32 %v7110_v23, %v17868_v45  ;;  %v14315_v22 = vpop.f32.mrb[101].mxu1  ;;  %v6952_v10 = vpop.f32.mrb[98].mxu0  ;;  %v8589_v23 = vld [vmem:[#allocation3 + $0x3f] sm:$0xff] }
 0x3ad   : > { %v7113_v39 = vpop.f32.mrb[102].mxu1  ;;  %v14278_v14 = vpop.f32.mrb[99].mxu0  ;;  %v17932_v46 = vadd.f32 %v6952_v10, %v17738_v16  ;;  %14488 = vmatmul.mubr.msk.bf16.gmra.mrb[156].mxu1 %vm1977_vm3, %v8026_v19  ;;  %v8600_v16 = vpack.c.bf16 %v8586_v24, %v8585_v55  ;;  %v8591_v19 = vld [vmem:[#allocation3 + $0x4f] sm:$0xff]  ;;  %v8590_v22 = vld [vmem:[#allocation3 + $0x47] sm:$0xff] }
 0x3ae   : > { %v17936_v37 = vadd.f32 %v7113_v39, %v17870_v21  ;;  %v14316_v53 = vpop.f32.mrb[103].mxu1  ;;  %14493 = vmatprep.mubr.msk.bf16.mxu1 %vm1977_vm3, %v8599_v50  ;;  %v8602_v39 = vpack.c.bf16 %v8590_v22, %v8589_v23  ;;  %v8603_v24 = vpack.c.bf16 %v8592_v29, %v8591_v19  ;;  %v8598_v22 = vld [vmem:[#allocation3 + $0x87] sm:$0xff] }
 0x3b2   : > { %v6957_v45 = vpop.f32.mrb[100].mxu0 }
 0x3b3   : > { %v7118_v31 = vpop.f32.mrb[104].mxu1  ;;  %v14281_v3 = vpop.f32.mrb[101].mxu0  ;;  %v17940_v35 = vadd.f32 %v6957_v45, %v17752_v15 }
 0x3b4   : > { %v17943_v56 = vadd.f32 %v7118_v31, %v17874_v57  ;;  %v14319_v8 = vpop.f32.mrb[105].mxu1  ;;  %v6960_v21 = vpop.f32.mrb[102].mxu0  ;;  %v8596_v3 = vld [vmem:[#allocation3 + $0x77] sm:$0xff] }
 0x3b5   : > { %v7121_v40 = vpop.f32.mrb[106].mxu1  ;;  %v14282_v7 = vpop.f32.mrb[103].mxu0  ;;  %v17951_v2 = vadd.f32 %v6960_v21, %v17755_v0  ;;  %14494 = vmatmul.mubr.msk.bf16.vlgmr.msra.gmra.mrb[144].mxu1 %vm1977_vm3, %v8600_v16  ;;  %v8593_v16 = vld [vmem:[#allocation3 + $0x5f] sm:$0xff] }
 0x3b6   : > { %v17955_v15 = vadd.f32 %v7121_v40, %v17876_v43  ;;  %v14320_v57 = vpop.f32.mrb[107].mxu1  ;;  %14497 = vmatprep.mubr.msk.bf16.mxu1 %vm1977_vm3, %v8601_v34  ;;  %14510 = vmatpush3.bf16.msra.mxu1 %v17888_v25 }
 0x3b7   : > { %14527 = vmatprep.subr.bf16.mxu1 %v17948_v5 }
 0x3ba   : > { %v6965_v26 = vpop.f32.mrb[104].mxu0 }
 0x3bb   : > { %v7126_v10 = vpop.f32.mrb[108].mxu1  ;;  %v14285_v0 = vpop.f32.mrb[105].mxu0  ;;  %v17961_v50 = vadd.f32 %v6965_v26, %v17762_v48  ;;  %v8594_v48 = vld [vmem:[#allocation3 + $0x67] sm:$0xff] }
 0x3bc   : > { %v17964_v43 = vadd.f32 %v7126_v10, %v17880_v32  ;;  %v14323_v14 = vpop.f32.mrb[109].mxu1  ;;  %v6968_v53 = vpop.f32.mrb[106].mxu0  ;;  %v8595_v32 = vld [vmem:[#allocation3 + $0x6f] sm:$0xff] }
 0x3bd   : > { %v7129_v25 = vpop.f32.mrb[110].mxu1  ;;  %v14286_v45 = vpop.f32.mrb[107].mxu0  ;;  %v17967_v54 = vadd.f32 %v6968_v53, %v17765_v28  ;;  %14498 = vmatmul.mubr.msk.bf16.gmra.mrb[148].mxu1 %vm1977_vm3, %v8602_v39  ;;  %v8604_v28 = vpack.c.bf16 %v8594_v48, %v8593_v16  ;;  %v8605_v57 = vpack.c.bf16 %v8596_v3, %v8595_v32 }
 0x3be   : > { %v17971_v1 = vadd.f32 %v7129_v25, %v17890_v59  ;;  %v14324_v55 = vpop.f32.mrb[111].mxu1  ;;  %14501 = vmatprep.mubr.msk.bf16.mxu1 %vm1977_vm3, %v8603_v24 }
 0x3c2   : > { %v6973_v31 = vpop.f32.mrb[108].mxu0 }
 0x3c3   : > { %v17975_v8 = vadd.f32 %v6973_v31, %v17774_v42  ;;  %v7134_v21 = vpop.f32.mrb[112].mxu1  ;;  %v14289_v34 = vpop.f32.mrb[109].mxu0 }
 0x3c4   : > { %v17978_v40 = vadd.f32 %v7134_v21, %v17899_v52  ;;  %v14327_v7 = vpop.f32.mrb[113].mxu1  ;;  %v6976_v59 = vpop.f32.mrb[110].mxu0  ;;  %v8597_v52 = vld [vmem:[#allocation3 + $0x7f] sm:$0xff] }
 0x3c5   : > { %v17981_v23 = vadd.f32 %v6976_v59, %v17780_v58  ;;  %v7137_v26 = vpop.f32.mrb[114].mxu1  ;;  %v14290_v19 = vpop.f32.mrb[111].mxu0  ;;  %14502 = vmatmul.mubr.msk.bf16.gmra.mrb[152].mxu1 %vm1977_vm3, %v8604_v28  ;;  %v8606_v58 = vpack.c.bf16 %v8598_v22, %v8597_v52 }
 0x3c6   : > { %v17985_v29 = vadd.f32 %v7137_v26, %v17904_v62  ;;  %v14328_v42 = vpop.f32.mrb[115].mxu1  ;;  %14505 = vmatprep.mubr.msk.bf16.mxu1 %vm1977_vm3, %v8605_v57 }
 0x3ca   : > { %v6981_v10 = vpop.f32.mrb[112].mxu0 }
 0x3cb   : > { %v17989_v0 = vadd.f32 %v6981_v10, %v17798_v17  ;;  %v7376_v39 = vpop.f32.mrb[116].mxu1  ;;  %v14293_v14 = vpop.f32.mrb[113].mxu0 }
 0x3cc   : > { %v17992_v53 = vadd.f32 %v7376_v39, %v17883_v12  ;;  %v14363_v24 = vpop.f32.mrb[117].mxu1  ;;  %v6984_v25 = vpop.f32.mrb[114].mxu0 }
 0x3cd   : > { %v17995_v62 = vadd.f32 %v6984_v25, %v17804_v47  ;;  %v7379_v45 = vpop.f32.mrb[118].mxu1  ;;  %v14294_v55 = vpop.f32.mrb[115].mxu0  ;;  %14506 = vmatmul.mubr.msk.bf16.gmra.mrb[156].mxu1 %vm1977_vm3, %v8606_v58  ;;  %v8765_v25 = vld [vmem:[#allocation3 + $0x88] sm:$0xff] }
 0x3ce   : > { %v17999_v48 = vadd.f32 %v7379_v45, %v17894_v27  ;;  %v14364_v17 = vpop.f32.mrb[119].mxu1  ;;  %14511 = vmatprep.mubr.msk.bf16.mxu1 %vm1977_vm3, %v17776_v41  ;;  %v8918_v45 = vld [vmem:[#allocation3 + $0x24] sm:$0xff] }
 0x3cf   : > { %v8764_v55 = vld [vmem:[#allocation3 + $0x80] sm:$0xff] }
 0x3d2   : > { %v6989_v31 = vpop.f32.mrb[116].mxu0 }
 0x3d3   : > { %v18004_v12 = vadd.f32 %v6989_v31, %v17815_v9  ;;  %v7384_v32 = vpop.f32.mrb[120].mxu1  ;;  %v14297_v3 = vpop.f32.mrb[117].mxu0 }
 0x3d4   : > { %v18007_v47 = vadd.f32 %v7384_v32, %v17902_v49  ;;  %v14367_v16 = vpop.f32.mrb[121].mxu1  ;;  %v6992_v21 = vpop.f32.mrb[118].mxu0  ;;  %v18023_v49 = vld [vmem:[%s18951_s3 + $0x38] sm:$0xff]   ;;  %v18061_v32 = vpack.c.bf16 %v8765_v25, %v8764_v55 }
 0x3d5   : > { %v18010_v34 = vadd.f32 %v6992_v21, %v17821_v36  ;;  %v7387_v27 = vpop.f32.mrb[122].mxu1  ;;  %v14298_v28 = vpop.f32.mrb[119].mxu0  ;;  %14512 = vmatmul.mubr.msk.bf16.vlgmr.msra.gmra.mrb[144].mxu1 %vm1977_vm3, %v17778_v38  ;;  %v8926_v25 = vld [vmem:[#allocation3 + $0x64] sm:$0xff] }
 0x3d6   : > { %v18015_v41 = vadd.f32 %v7387_v27, %v17908_v63  ;;  %v14368_v9 = vpop.f32.mrb[123].mxu1  ;;  %14515 = vmatprep.mubr.msk.bf16.mxu1 %vm1977_vm3, %v17800_v61  ;;  %14528 = vmatpush3.bf16.msra.mxu1 %v17948_v5 }
 0x3d7   : > { %14545 = vmatprep.subr.bf16.mxu1 %v18023_v49 }
 0x3da   : > { %v7231_v36 = vpop.f32.mrb[120].mxu0 }
 0x3db   : > { %v18027_v7 = vadd.f32 %v7231_v36, %v17912_v33  ;;  %v7392_v38 = vpop.f32.mrb[124].mxu1  ;;  %v14333_v63 = vpop.f32.mrb[121].mxu0  ;;  %v8920_v36 = vld [vmem:[#allocation3 + $0x34] sm:$0xff] }
 0x3dc   : > { %v18030_v59 = vadd.f32 %v7392_v38, %v17915_v4  ;;  %v14371_v57 = vpop.f32.mrb[125].mxu1  ;;  %v7234_v61 = vpop.f32.mrb[122].mxu0  ;;  %v8921_v63 = vld [vmem:[#allocation3 + $0x3c] sm:$0xff] }
 0x3dd   : > { %v18033_v26 = vadd.f32 %v7234_v61, %v17918_v20  ;;  %v7395_v19 = vpop.f32.mrb[126].mxu1  ;;  %v14334_v42 = vpop.f32.mrb[123].mxu0  ;;  %14516 = vmatmul.mubr.msk.bf16.gmra.mrb[148].mxu1 %vm1977_vm3, %v17802_v11 }
 0x3de   : > { %v18038_v22 = vadd.f32 %v7395_v19, %v17922_v51  ;;  %v14372_v33 = vpop.f32.mrb[127].mxu1  ;;  %14519 = vmatprep.mubr.msk.bf16.mxu1 %vm1977_vm3, %v17817_v44 }
 0x3df   : > { %v8922_v33 = vld [vmem:[#allocation3 + $0x44] sm:$0xff] }
 0x3e2   : > { %v7239_v10 = vpop.f32.mrb[124].mxu0 }
 0x3e3   : > { %v18043_v4 = vadd.f32 %v7239_v10, %v17926_v60  ;;  %v7400_v52 = vpop.f32.mrb[128].mxu1  ;;  %v14337_v39 = vpop.f32.mrb[125].mxu0 }
 0x3e4   : > { %v18046_v20 = vadd.f32 %v7400_v52, %v17929_v18  ;;  %v14375_v14 = vpop.f32.mrb[129].mxu1  ;;  %v7242_v58 = vpop.f32.mrb[126].mxu0  ;;  %v18084_v52 = vld [vmem:[%s18951_s3 + $0x40] sm:$0xff]   ;;  %v8935_v39 = vpack.c.bf16 %v8922_v33, %v8921_v63 }
 0x3e5   : > { %v18049_v11 = vadd.f32 %v7242_v58, %v17932_v46  ;;  %v7403_v51 = vpop.f32.mrb[130].mxu1  ;;  %v14338_v24 = vpop.f32.mrb[127].mxu0  ;;  %14520 = vmatmul.mubr.msk.bf16.gmra.mrb[152].mxu1 %vm1977_vm3, %v17819_v6 }
 0x3e6   : > { %v18054_v44 = vadd.f32 %v7403_v51, %v17936_v37  ;;  %v14376_v60 = vpop.f32.mrb[131].mxu1  ;;  %14523 = vmatprep.mubr.msk.bf16.mxu1 %vm1977_vm3, %v17834_v30  ;;  %v8917_v37 = vld [vmem:[#allocation3 + $0x1c] sm:$0xff]  ;;  %v8924_v24 = vld [vmem:[#allocation3 + $0x54] sm:$0xff] }
 0x3e7   : > { %v8933_v21 = vpack.c.bf16 %v8918_v45, %v8917_v37 }
 0x3ea   : > { %v7247_v18 = vpop.f32.mrb[128].mxu0 }
 0x3eb   : > { %v18059_v17 = vadd.f32 %v7247_v18, %v17940_v35  ;;  %v7408_v46 = vpop.f32.mrb[132].mxu1  ;;  %v14341_v31 = vpop.f32.mrb[129].mxu0  ;;  %v8923_v18 = vld [vmem:[#allocation3 + $0x4c] sm:$0xff] }
 0x3ec   : > { %v18064_v6 = vadd.f32 %v7408_v46, %v17943_v56  ;;  %v14379_v3 = vpop.f32.mrb[133].mxu1  ;;  %v7250_v16 = vpop.f32.mrb[130].mxu0  ;;  %v8919_v56 = vld [vmem:[#allocation3 + $0x2c] sm:$0xff]  ;;  %v8936_v46 = vpack.c.bf16 %v8924_v24, %v8923_v18  ;;  %v8925_v31 = vld [vmem:[#allocation3 + $0x5c] sm:$0xff] }
 0x3ed   : > { %v18067_v30 = vadd.f32 %v7250_v16, %v17951_v2  ;;  %v7411_v27 = vpop.f32.mrb[134].mxu1  ;;  %v14342_v28 = vpop.f32.mrb[131].mxu0  ;;  %14524 = vmatmul.mubr.msk.bf16.gmra.mrb[156].mxu1 %vm1977_vm3, %v18061_v32  ;;  %v8934_v19 = vpack.c.bf16 %v8920_v36, %v8919_v56  ;;  %v8937_v16 = vpack.c.bf16 %v8926_v25, %v8925_v31  ;;  %v8927_v56 = vld [vmem:[#allocation3 + $0x6c] sm:$0xff] }
 0x3ee   : > { %v18072_v35 = vadd.f32 %v7411_v27, %v17955_v15  ;;  %v14380_v9 = vpop.f32.mrb[135].mxu1  ;;  %14529 = vmatprep.mubr.msk.bf16.mxu1 %vm1977_vm3, %v8933_v21 }
 0x3f2   : > { %v7255_v38 = vpop.f32.mrb[132].mxu0 }
 0x3f3   : > { %v18076_v57 = vadd.f32 %v7255_v38, %v17961_v50  ;;  %v7416_v2 = vpop.f32.mrb[136].mxu1  ;;  %v14345_v61 = vpop.f32.mrb[133].mxu0  ;;  %v8929_v38 = vld [vmem:[#allocation3 + $0x7c] sm:$0xff] }
 0x3f4   : > { %v18079_v42 = vadd.f32 %v7416_v2, %v17964_v43  ;;  %v14383_v10 = vpop.f32.mrb[137].mxu1  ;;  %v7258_v15 = vpop.f32.mrb[134].mxu0  ;;  %v8930_v61 = vld [vmem:[#allocation3 + $0x84] sm:$0xff] }
 0x3f5   : > { %v18087_v14 = vadd.f32 %v7258_v15, %v17967_v54  ;;  %v7419_v50 = vpop.f32.mrb[138].mxu1  ;;  %v14346_v58 = vpop.f32.mrb[135].mxu0  ;;  %14530 = vmatmul.mubr.msk.bf16.vlgmr.msra.gmra.mrb[144].mxu1 %vm1977_vm3, %v8934_v19  ;;  %v8939_v33 = vpack.c.bf16 %v8930_v61, %v8929_v38 }
 0x3f6   : > { %v18091_v51 = vadd.f32 %v7419_v50, %v17971_v1  ;;  %v14384_v43 = vpop.f32.mrb[139].mxu1  ;;  %14533 = vmatprep.mubr.msk.bf16.mxu1 %vm1977_vm3, %v8935_v39  ;;  %14546 = vmatpush3.bf16.msra.mxu1 %v18023_v49 }
 0x3f7   : > { %14563 = vmatprep.subr.bf16.mxu1 %v18084_v52 }
 0x3fa   : > { %v7263_v60 = vpop.f32.mrb[136].mxu0 }
 0x3fb   : > { %v18097_v54 = vadd.f32 %v7263_v60, %v17975_v8  ;;  %v7424_v45 = vpop.f32.mrb[140].mxu1  ;;  %v14349_v55 = vpop.f32.mrb[137].mxu0 }
 0x3fc   : > { %v18100_v1 = vadd.f32 %v7424_v45, %v17978_v40  ;;  %v14387_v37 = vpop.f32.mrb[141].mxu1  ;;  %v7266_v3 = vpop.f32.mrb[138].mxu0  ;;  %v8928_v40 = vld [vmem:[#allocation3 + $0x74] sm:$0xff] }
 0x3fd   : > { %v18103_v21 = vadd.f32 %v7266_v3, %v17981_v23  ;;  %v7427_v27 = vpop.f32.mrb[142].mxu1  ;;  %v14350_v28 = vpop.f32.mrb[139].mxu0  ;;  %14534 = vmatmul.mubr.msk.bf16.gmra.mrb[148].mxu1 %vm1977_vm3, %v8936_v46  ;;  %v8938_v23 = vpack.c.bf16 %v8928_v40, %v8927_v56  ;;  %v7891_v40 = vld [vmem:[#allocation2 + $0x1e4] ss:$2 sm:$0xf] }
 0x3fe   : > { %v18107_v8 = vadd.f32 %v7427_v27, %v17985_v29  ;;  %v14388_v9 = vpop.f32.mrb[143].mxu1  ;;  %14537 = vmatprep.mubr.msk.bf16.mxu1 %vm1977_vm3, %v8937_v16 }
 0x402   : > { %v7271_v36 = vpop.f32.mrb[140].mxu0 }
 0x403   : > { %v18111_v63 = vadd.f32 %v7271_v36, %v17989_v0  ;;  %v14353_v2 = vpop.f32.mrb[141].mxu0  ;;  %v7895_v36 = vld [vmem:[#allocation2 + $0x1e5] ss:$2 sm:$0xf] }
 0x404   : > { %v7274_v19 = vpop.f32.mrb[142].mxu0  ;;  %v7905_v61 = vmax.f32 %v7891_v40, %v7895_v36 }
 0x405   : > { %v18114_v10 = vadd.f32 %v7274_v19, %v17995_v62  ;;  %v14354_v29 = vpop.f32.mrb[143].mxu0  ;;  %14538 = vmatmul.mubr.msk.bf16.gmra.mrb[152].mxu1 %vm1977_vm3, %v8938_v23 }
 0x406   : > { %14541 = vmatprep.mubr.msk.bf16.mxu1 %vm1977_vm3, %v8939_v33 }
 0x40a   : > { %v7279_v15 = vpop.f32.mrb[144].mxu0 }
 0x40b   : > { %v18119_v39 = vadd.f32 %v7279_v15, %v18004_v12  ;;  %v14357_v50 = vpop.f32.mrb[145].mxu0  ;;  %v18130_v12 = vld [vmem:[%s18950_s2] ss:$0 sm:$0xff] }
 0x40c   : > { %v7282_v0 = vpop.f32.mrb[146].mxu0 }
 0x40d   : > { %v18122_v58 = vadd.f32 %v7282_v0, %v18010_v34  ;;  %v14358_v43 = vpop.f32.mrb[147].mxu0 }
 0x412   : > { %v7521_v24 = vpop.f32.mrb[148].mxu0 }
 0x413   : > { %v7576_v60 = vadd.f32 %v7521_v24, %v18027_v7  ;;  %v14393_v62 = vpop.f32.mrb[149].mxu0 }
 0x414   : > { %v7524_v25 = vpop.f32.mrb[150].mxu0 }
 0x415   : > { %v7590_v18 = vadd.f32 %v7576_v60, %v17992_v53  ;;  %v7577_v45 = vadd.f32 %v7524_v25, %v18033_v26  ;;  %v14394_v55 = vpop.f32.mrb[151].mxu0 }
 0x417   : > { %v7604_v46 = vadd.f32 %v18130_v12, %v7590_v18  ;;  %v7591_v34 = vadd.f32 %v7577_v45, %v17999_v48 }
 0x419   : > { %v7618_v31 = vmax.f32 %v7604_v46, 0.0  ;;  %v7605_v37 = vadd.f32 %v18130_v12, %v7591_v34 }
 0x41a   : > { %v7529_v7 = vpop.f32.mrb[152].mxu0 }
 0x41b   : > { %7632 = vst.msk [vmem:[#allocation2 + $0x200] sm:$0xff] %vm1977_vm3, %v7618_v31  ;;  %v7619_v3 = vmax.f32 %v7605_v37, 0.0  ;;  %v7578_v53 = vadd.f32 %v7529_v7, %v18043_v4  ;;  %v14397_v26 = vpop.f32.mrb[153].mxu0 }
 0x41c   : > { %v7532_v16 = vpop.f32.mrb[154].mxu0 }
 0x41d   : > { %7633 = vst.msk [vmem:[#allocation2 + $0x208] sm:$0xff] %vm1977_vm3, %v7619_v3  ;;  %v7592_v27 = vadd.f32 %v7578_v53, %v18007_v47  ;;  %v7579_v28 = vadd.f32 %v7532_v16, %v18049_v11  ;;  %v14398_v9 = vpop.f32.mrb[155].mxu0 }
 0x41f   : > { %v7606_v48 = vadd.f32 %v18130_v12, %v7592_v27  ;;  %v7593_v56 = vadd.f32 %v7579_v28, %v18015_v41 }
 0x421   : > { %v7620_v38 = vmax.f32 %v7606_v48, 0.0  ;;  %v7607_v2 = vadd.f32 %v18130_v12, %v7593_v56 }
 0x422   : > { %v7899_v23 = vld [vmem:[#allocation2 + $0x1fe] ss:$2 sm:$0xf]  ;;  %v7903_v4 = vld [vmem:[#allocation2 + $0x1ff] ss:$2 sm:$0xf] }
 0x423   : > { %v7907_v19 = vmax.f32 %v7899_v23, %v7903_v4  ;;  %7634 = vst.msk [vmem:[#allocation2 + $0x210] sm:$0xff] %vm1977_vm3, %v7620_v38  ;;  %v7621_v33 = vmax.f32 %v7607_v2, 0.0  ;;  %v7537_v47 = vpop.f32.mrb[156].mxu0 }
 0x424   : > { %v7580_v11 = vadd.f32 %v7537_v47, %v18059_v17  ;;  %v14401_v29 = vpop.f32.mrb[157].mxu0 }
 0x425   : > { %v7909_v15 = vmax.f32 %v7905_v61, %v7907_v19  ;;  %7635 = vst.msk [vmem:[#allocation2 + $0x218] sm:$0xff] %vm1977_vm3, %v7621_v33  ;;  %v7540_v41 = vpop.f32.mrb[158].mxu0 }
 0x426   : > { %v7594_v50 = vadd.f32 %v7580_v11, %v18030_v59  ;;  %v7581_v0 = vadd.f32 %v7540_v41, %v18067_v30  ;;  %v14402_v43 = vpop.f32.mrb[159].mxu0 }
 0x427   : > { %7911 = vst.msk [vmem:[#allocation3 + $0x95] sm:$0xf] %vm7671_vm4, %v7909_v15 }
 0x428   : > { %v7608_v24 = vadd.f32 %v18130_v12, %v7594_v50  ;;  %v7595_v60 = vadd.f32 %v7581_v0, %v18038_v22 }
 0x42a   : > { %v7622_v62 = vmax.f32 %v7608_v24, 0.0  ;;  %v7609_v25 = vadd.f32 %v18130_v12, %v7595_v60  ;;  %v7545_v17 = vpop.f32.mrb[160].mxu0  ;;  %v7913_v9 = vld [vmem:[#allocation2 + $0x208] ss:$2 sm:$0xff]  ;;  %v7917_v48 = vld [vmem:[#allocation2 + $0x209] ss:$2 sm:$0xff] }
 0x42b   : > { %v7582_v18 = vadd.f32 %v7545_v17, %v18076_v57  ;;  %v14405_v45 = vpop.f32.mrb[161].mxu0  ;;  %v7928_v23 = vmax.f32 %v7913_v9, %v7917_v48  ;;  %v9089_v48 = vld [vmem:[#allocation3 + $0x45] sm:$0xff] }
 0x42c   : > { %7636 = vst.msk [vmem:[#allocation2 + $0x220] sm:$0xff] %vm1977_vm3, %v7622_v62  ;;  %v7623_v55 = vmax.f32 %v7609_v25, 0.0  ;;  %v7548_v30 = vpop.f32.mrb[162].mxu0  ;;  %v7915_v56 = vld [vmem:[#allocation2 + $0x218] ss:$2 sm:$0xf] }
 0x42d   : > { %v7596_v59 = vadd.f32 %v7582_v18, %v18046_v20  ;;  %v7583_v46 = vadd.f32 %v7548_v30, %v18087_v14  ;;  %v14406_v34 = vpop.f32.mrb[163].mxu0  ;;  %v9085_v30 = vld [vmem:[#allocation3 + $0x25] sm:$0xff] }
 0x42e   : > { %7637 = vst.msk [vmem:[#allocation2 + $0x228] sm:$0xff] %vm1977_vm3, %v7623_v55  ;;  %v9507_v34 = vld [vmem:[#allocation3 + $0x92] sm:$0xff] }
 0x42f   : > { %v7610_v22 = vadd.f32 %v18130_v12, %v7596_v59  ;;  %v7597_v31 = vadd.f32 %v7583_v46, %v18054_v44  ;;  %v8931_v59 = vld [vmem:[#allocation3 + $0x8c] sm:$0xff] }
 0x431   : > { %v7624_v37 = vmax.f32 %v7610_v22, 0.0  ;;  %v7611_v7 = vadd.f32 %v18130_v12, %v7597_v31 }
 0x432   : > { %v7553_v57 = vpop.f32.mrb[164].mxu0 }
 0x433   : > { %7638 = vst.msk [vmem:[#allocation2 + $0x230] sm:$0xff] %vm1977_vm3, %v7624_v37  ;;  %v7584_v3 = vadd.f32 %v7553_v57, %v18097_v54  ;;  %v14409_v53 = vpop.f32.mrb[165].mxu0  ;;  %v7625_v20 = vmax.f32 %v7611_v7, 0.0  ;;  %v9084_v57 = vld [vmem:[#allocation3 + $0x1d] sm:$0xff] }
 0x434   : > { %v7556_v26 = vpop.f32.mrb[166].mxu0 }
 0x435   : > { %v7598_v14 = vadd.f32 %v7584_v3, %v18064_v6  ;;  %v7585_v16 = vadd.f32 %v7556_v26, %v18103_v21  ;;  %v14410_v27 = vpop.f32.mrb[167].mxu0  ;;  %7639 = vst.msk [vmem:[#allocation2 + $0x238] sm:$0xff] %vm1977_vm3, %v7625_v20  ;;  %v7919_v6 = vld [vmem:[#allocation2 + $0x219] ss:$2 sm:$0xf]  ;;  %v9100_v3 = vpack.c.bf16 %v9085_v30, %v9084_v57 }
 0x436   : > { %v7929_v41 = vmax.f32 %v7915_v56, %v7919_v6  ;;  %v9086_v26 = vld [vmem:[#allocation3 + $0x2d] sm:$0xff]  ;;  %v9088_v27 = vld [vmem:[#allocation3 + $0x3d] sm:$0xff] }
 0x437   : > { %v7612_v44 = vadd.f32 %v18130_v12, %v7598_v14  ;;  %v7599_v28 = vadd.f32 %v7585_v16, %v18072_v35  ;;  %v9087_v14 = vld [vmem:[#allocation3 + $0x35] sm:$0xff] }
 0x439   : > { %v7626_v40 = vmax.f32 %v7612_v44, 0.0  ;;  %v7613_v54 = vadd.f32 %v18130_v12, %v7599_v28  ;;  %v9101_v28 = vpack.c.bf16 %v9087_v14, %v9086_v26  ;;  %v9258_v26 = vld [vmem:[#allocation3 + $0x56] sm:$0xff] }
 0x43a   : > { %v7921_v36 = vld [vmem:[#allocation2 + $0x222] ss:$2 sm:$0xff]  ;;  %v7925_v38 = vld [vmem:[#allocation2 + $0x223] ss:$2 sm:$0xff]  ;;  %v7561_v2 = vpop.f32.mrb[168].mxu0 }
 0x43b   : > { %v7930_v4 = vmax.f32 %v7921_v36, %v7925_v38  ;;  %7640 = vst.msk [vmem:[#allocation2 + $0x240] sm:$0xff] %vm1977_vm3, %v7626_v40  ;;  %v7627_v21 = vmax.f32 %v7613_v54, 0.0  ;;  %v7586_v61 = vadd.f32 %v7561_v2, %v18111_v63  ;;  %v14413_v19 = vpop.f32.mrb[169].mxu0  ;;  %v9102_v54 = vpack.c.bf16 %v9089_v48, %v9088_v27 }
 0x43c   : > { %v7564_v33 = vpop.f32.mrb[170].mxu0  ;;  %v7923_v47 = vld [vmem:[#allocation2 + $0x232] ss:$2 sm:$0xf] }
 0x43d   : > { %v7932_v35 = vmax.f32 %v7928_v23, %v7930_v4  ;;  %v7927_v11 = vld [vmem:[#allocation2 + $0x233] ss:$2 sm:$0xf]  ;;  %7641 = vst.msk [vmem:[#allocation2 + $0x248] sm:$0xff] %vm1977_vm3, %v7627_v21  ;;  %v7600_v29 = vadd.f32 %v7586_v61, %v18079_v42  ;;  %v7587_v15 = vadd.f32 %v7564_v33, %v18114_v10  ;;  %v14414_v0 = vpop.f32.mrb[171].mxu0  ;;  %v9091_v21 = vld [vmem:[#allocation3 + $0x55] sm:$0xff] }
 0x43e   : > { %v7931_v50 = vmax.f32 %v7923_v47, %v7927_v11  ;;  %v9093_v11 = vld [vmem:[#allocation3 + $0x65] sm:$0xff] }
 0x43f   : > { %7934 = vst.msk [vmem:[#allocation3 + $0x9b] sm:$0xff] %vm1977_vm3, %v7932_v35  ;;  %v7614_v43 = vadd.f32 %v18130_v12, %v7600_v29  ;;  %v7601_v63 = vadd.f32 %v7587_v15, %v18091_v51  ;;  %v9090_v29 = vld [vmem:[#allocation3 + $0x4d] sm:$0xff] }
 0x440   : > { %v7933_v24 = vmax.f32 %v7929_v41, %v7931_v50  ;;  %v9103_v41 = vpack.c.bf16 %v9091_v21, %v9090_v29  ;;  %v9092_v50 = vld [vmem:[#allocation3 + $0x5d] sm:$0xff] }
 0x441   : > { %v7628_v60 = vmax.f32 %v7614_v43, 0.0  ;;  %v7615_v62 = vadd.f32 %v18130_v12, %v7601_v63  ;;  %v9104_v0 = vpack.c.bf16 %v9093_v11, %v9092_v50  ;;  %v15755_v43 = vld [vmem:[%s18951_s3 + $0x18] sm:$0xff]  }
 0x442   : > { %7935 = vst.msk [vmem:[#allocation3 + $0xa3] sm:$0xf] %vm7671_vm4, %v7933_v24  ;;  %v7569_v25 = vpop.f32.mrb[172].mxu0  ;;  %v9094_v63 = vld [vmem:[#allocation3 + $0x6d] sm:$0xff]  ;;  %v9095_v24 = vld [vmem:[#allocation3 + $0x75] sm:$0xff]  ;;  %v9497_v21 = vld [vmem:[#allocation3 + $0x81] sm:$0xff] }
 0x443   : > { %7642 = vst.msk [vmem:[#allocation2 + $0x250] sm:$0xff] %vm1977_vm3, %v7628_v60  ;;  %v7629_v42 = vmax.f32 %v7615_v62, 0.0  ;;  %v7588_v10 = vadd.f32 %v7569_v25, %v18119_v39  ;;  %v14417_v17 = vpop.f32.mrb[173].mxu0  ;;  %v9096_v62 = vld [vmem:[#allocation3 + $0x7d] sm:$0xff]  ;;  %v9097_v25 = vld [vmem:[#allocation3 + $0x85] sm:$0xff] }
 0x444   : > { %v7572_v18 = vpop.f32.mrb[174].mxu0  ;;  %v7937_v56 = vld [vmem:[#allocation2 + $0x23c] ss:$2 sm:$0xff]  ;;  %v7941_v40 = vld [vmem:[#allocation2 + $0x23d] ss:$2 sm:$0xff]  ;;  %v9106_v17 = vpack.c.bf16 %v9097_v25, %v9096_v62 }
 0x445   : > { %7643 = vst.msk [vmem:[#allocation2 + $0x258] sm:$0xff] %vm1977_vm3, %v7629_v42  ;;  %v7602_v45 = vadd.f32 %v7588_v10, %v18100_v1  ;;  %v7589_v51 = vadd.f32 %v7572_v18, %v18122_v58  ;;  %v14418_v55 = vpop.f32.mrb[175].mxu0  ;;  %v7952_v6 = vmax.f32 %v7937_v56, %v7941_v40  ;;  %v9491_v42 = vld [vmem:[#allocation3 + $0x90] sm:$0xff]  ;;  %v9105_v10 = vpack.c.bf16 %v9095_v24, %v9094_v63 }
 0x446   : > { %v8932_v46 = vld [vmem:[#allocation3 + $0x94] sm:$0xff] }
 0x447   : > { %v9508_v22 = vld [vmem:[#allocation3 + $0x9a] sm:$0xff]  ;;  %v7616_v31 = vadd.f32 %v18130_v12, %v7602_v45  ;;  %v7603_v37 = vadd.f32 %v7589_v51, %v18107_v8  ;;  %v8940_v7 = vpack.c.bf16 %v8932_v46, %v8931_v59  ;;  %v9252_v51 = vld [vmem:[#allocation3 + $0x26] sm:$0xff]  ;;  %v9261_v56 = vld [vmem:[#allocation3 + $0x6e] sm:$0xff] }
 0x448   : > { %v9511_v39 = vpack.c.bf16 %v9508_v22, %v9507_v34  ;;  %v9492_v60 = vld [vmem:[#allocation3 + $0x98] sm:$0xff]  ;;  %v9098_v55 = vld [vmem:[#allocation3 + $0x8d] sm:$0xff] }
 0x449   : > { %v7630_v53 = vmax.f32 %v7616_v31, 0.0  ;;  %v7617_v20 = vadd.f32 %v18130_v12, %v7603_v37  ;;  %14542 = vmatmul.mubr.msk.bf16.gmra.mrb[156].mxu1 %vm1977_vm3, %v8940_v7  ;;  %v9509_v16 = vld [vmem:[#allocation3 + $0xa2] sm:$0x3f]  ;;  %v9099_v18 = vld [vmem:[#allocation3 + $0x95] sm:$0xff] }
 0x44a   : > { %14588 = vmatmul.mubr.msk.bf16.gmra.mrb[180].mxu0 %vm1977_vm3, %v9511_v39  ;;  %14547 = vmatprep.mubr.msk.bf16.mxu1 %vm1977_vm3, %v9100_v3  ;;  %v18192_v8 = vpop.f32.mrb[176].mxu0  ;;  %v9512_v9 = vpack.c.bf16 %v9509_v16, %v9509_v16  ;;  %v7939_v36 = vld [vmem:[#allocation2 + $0x24c] ss:$2 sm:$0xf]  ;;  %v9107_v59 = vpack.c.bf16 %v9099_v18, %v9098_v55  ;;  %v9253_v22 = vld [vmem:[#allocation3 + $0x2e] sm:$0xff]  ;;  %v9260_v16 = vld [vmem:[#allocation3 + $0x66] sm:$0xff] }
 0x44b   : > { %14591 = vmatprep.mubr.msk.bf16.mxu0 %vm15769_vm5, %v15768_v13  ;;  %7644 = vst.msk [vmem:[#allocation2 + $0x260] sm:$0xff] %vm1977_vm3, %v7630_v53  ;;  %v7631_v1 = vmax.f32 %v7617_v20, 0.0  ;;  %v14585_v58 = vpop.f32.mrb[177].mxu0  ;;  %v7943_v38 = vld [vmem:[#allocation2 + $0x24d] ss:$2 sm:$0xf] }
 0x44c   : > { %v18194_v12 = vpop.f32.mrb[178].mxu0  ;;  %v7953_v33 = vmax.f32 %v7939_v36, %v7943_v38  ;;  %v9493_v45 = vld [vmem:[#allocation3 + $0xa0] sm:$0x3f]  ;;  %v9254_v31 = vld [vmem:[#allocation3 + $0x36] sm:$0xff]  ;;  %v9643_v39 = vld [vmem:[#allocation3 + $0x8e] sm:$0xff] }
 0x44d   : > { %7646 = vst.msk [vmem:[#allocation2 + $0x268] sm:$0x3f] %vm7645_vm6, %v7631_v1  ;;  %v14586_v44 = vpop.f32.mrb[179].mxu0  ;;  %v9496_v30 = vpack.c.bf16 %v9493_v45, %v9493_v45  ;;  %v9251_v46 = vld [vmem:[#allocation3 + $0x1e] sm:$0xff]  ;;  %v9644_v37 = vld [vmem:[#allocation3 + $0x96] sm:$0xff]  ;;  %v9268_v57 = vpack.c.bf16 %v9254_v31, %v9253_v22  ;;  %v9256_v53 = vld [vmem:[#allocation3 + $0x46] sm:$0xff] }
 0x44e   : > { %v9267_v34 = vpack.c.bf16 %v9252_v51, %v9251_v46  ;;  %v9255_v7 = vld [vmem:[#allocation3 + $0x3e] sm:$0xff]  ;;  %v9648_v3 = vpack.c.bf16 %v9644_v37, %v9643_v39  ;;  %v9257_v58 = vld [vmem:[#allocation3 + $0x4e] sm:$0xff]  ;;  %v9262_v40 = vld [vmem:[#allocation3 + $0x76] sm:$0xff] }
 0x44f   : > { %v9269_v20 = vpack.c.bf16 %v9256_v53, %v9255_v7  ;;  %v15756_v1 = vld [vmem:[%s18951_s3 + $0x8] sm:$0xff]   ;;  %v9270_v44 = vpack.c.bf16 %v9258_v26, %v9257_v58  ;;  %v9264_v36 = vld [vmem:[#allocation3 + $0x86] sm:$0xff]  ;;  %v9272_v38 = vpack.c.bf16 %v9262_v40, %v9261_v56  ;;  %v15656_v31 = vld [vmem:[%s18953_s5] sm:$0xff]  }
 0x450   : > { %v9645_v27 = vld [vmem:[#allocation3 + $0x9e] sm:$0xff]  ;;  %v10018_v39 = vld [vmem:[#allocation3 + $0xb5] sm:$0xff] }
 0x451   : > { %14548 = vmatmul.mubr.msk.bf16.vlgmr.msra.gmra.mrb[144].mxu1 %vm1977_vm3, %v9101_v28  ;;  %v9501_v11 = vld [vmem:[#allocation3 + $0xa1] sm:$0x3f]  ;;  %v15657_v37 = vld [vmem:[%s18953_s5 + $0x8] sm:$0xff]   ;;  %v15658_v53 = vld [vmem:[%s18953_s5 + $0x20] sm:$0xff]  }
 0x452   : > { %14592 = vmatmul.mubr.msk.bf16.gmra.mrb[184].mxu0 %vm1977_vm3, %v9512_v9  ;;  %v7945_v2 = vld [vmem:[#allocation2 + $0x256] ss:$2 sm:$0xff]  ;;  %v7949_v23 = vld [vmem:[#allocation2 + $0x257] ss:$2 sm:$0xff]  ;;  %14551 = vmatprep.mubr.msk.bf16.mxu1 %vm1977_vm3, %v9102_v54  ;;  %v9259_v9 = vld [vmem:[#allocation3 + $0x5e] sm:$0xff]  ;;  %v9504_v29 = vpack.c.bf16 %v9501_v11, %v9501_v11 }
 0x453   : > { %14597 = vmatprep.mubr.msk.bf16.mxu0 %vm15769_vm5, %v15768_v13  ;;  %v7954_v4 = vmax.f32 %v7945_v2, %v7949_v23  ;;  %14564 = vmatpush3.bf16.msra.mxu1 %v18084_v52  ;;  %v9271_v48 = vpack.c.bf16 %v9260_v16, %v9259_v9  ;;  %v9263_v23 = vld [vmem:[#allocation3 + $0x7e] sm:$0xff]  ;;  %v10096_v58 = vld [vmem:[#allocation3 + $0xb6] sm:$0xff] }
 0x454   : > { %v7947_v61 = vld [vmem:[#allocation2 + $0x266] ss:$2 sm:$0xf]  ;;  %v7951_v19 = vld [vmem:[#allocation2 + $0x267] ss:$2 sm:$0xf]  ;;  %14723 = vmatprep.subr.bf16.mxu1 %v15768_v13 }
 0x455   : > { %v7956_v35 = vmax.f32 %v7952_v6, %v7954_v4  ;;  %v7955_v47 = vmax.f32 %v7947_v61, %v7951_v19  ;;  %v9273_v6 = vpack.c.bf16 %v9264_v36, %v9263_v23  ;;  %v9498_v4 = vld [vmem:[#allocation3 + $0x89] sm:$0xff]  ;;  %v9783_v63 = vld [vmem:[#allocation3 + $0x9f] sm:$0xff] }
 0x456   : > { %v9502_v61 = vpack.c.bf16 %v9498_v4, %v9497_v21  ;;  %v15757_v19 = vld [vmem:[%s18951_s3 + $0x20] sm:$0xff]  }
 0x457   : > { %7958 = vst.msk [vmem:[#allocation3 + $0xa9] sm:$0xff] %vm1977_vm3, %v7956_v35  ;;  %v7957_v15 = vmax.f32 %v7953_v33, %v7955_v47  ;;  %v9500_v33 = vld [vmem:[#allocation3 + $0x99] sm:$0xff]  ;;  %v9499_v35 = vld [vmem:[#allocation3 + $0x91] sm:$0xff] }
 0x458   : > { %v9503_v47 = vpack.c.bf16 %v9500_v33, %v9499_v35 }
 0x459   : > { %7959 = vst.msk [vmem:[#allocation3 + $0xb1] sm:$0xf] %vm7671_vm4, %v7957_v15  ;;  %14552 = vmatmul.mubr.msk.bf16.gmra.mrb[148].mxu1 %vm1977_vm3, %v9103_v41  ;;  %v9782_v15 = vld [vmem:[#allocation3 + $0x97] sm:$0xff]  ;;  %v9781_v41 = vld [vmem:[#allocation3 + $0x8f] sm:$0xff] }
 0x45a   : > { %14598 = vmatmul.mubr.msk.bf16.vlgmr.msra.gmra.mrb[188].mxu0 %vm1977_vm3, %v18061_v32  ;;  %14555 = vmatprep.mubr.msk.bf16.mxu1 %vm1977_vm3, %v9104_v0  ;;  %v18215_v32 = vpack.c.bf16 %v9492_v60, %v9491_v42  ;;  %v9786_v50 = vpack.c.bf16 %v9782_v15, %v9781_v41  ;;  %v15758_v0 = vld [vmem:[%s18951_s3 + $0x28] sm:$0xff]   ;;  %v9861_v42 = vld [vmem:[#allocation3 + $0xa0] sm:$0xff] }
 0x45b   : > { %14610 = vmatpush3.bf16.msra.mxu0 %v15755_v43  ;;  %14601 = vmatprep.mubr.msk.bf16.mxu0 %vm15769_vm5, %v15768_v13 }
 0x45c   : > { %14623 = vmatprep.subr.bf16.mxu0 %v15768_v13 }
 0x45e   : > { %v9646_v14 = vld [vmem:[#allocation3 + $0xa6] sm:$0xff] }
 0x45f   : > { %v18237_v28 = vpack.c.bf16 %v9646_v14, %v9645_v27  ;;  %v9784_v43 = vld [vmem:[#allocation3 + $0xa7] sm:$0xff]  ;;  %v10097_v14 = vld [vmem:[#allocation3 + $0xbe] sm:$0x3f] }
 0x460   : > { %v9647_v54 = vld [vmem:[#allocation3 + $0xae] sm:$0x3f]  ;;  %v9787_v24 = vpack.c.bf16 %v9784_v43, %v9783_v63  ;;  %v9940_v55 = vld [vmem:[#allocation3 + $0xb4] sm:$0xff]  ;;  %v10100_v16 = vpack.c.bf16 %v10097_v14, %v10097_v14 }
 0x461   : > { %14556 = vmatmul.mubr.msk.bf16.gmra.mrb[152].mxu1 %vm1977_vm3, %v9105_v10  ;;  %v9650_v2 = vpack.c.bf16 %v9647_v54, %v9647_v54  ;;  %v9785_v60 = vld [vmem:[#allocation3 + $0xaf] sm:$0x3f] }
 0x462   : > { %14602 = vmatmul.mubr.msk.bf16.gmra.mrb[192].mxu0 %vm1977_vm3, %v18215_v32  ;;  %14559 = vmatprep.mubr.msk.bf16.mxu1 %vm1977_vm3, %v9106_v17  ;;  %v9788_v62 = vpack.c.bf16 %v9785_v60, %v9785_v60  ;;  %v9862_v25 = vld [vmem:[#allocation3 + $0xa8] sm:$0xff]  ;;  %v9863_v17 = vld [vmem:[#allocation3 + $0xb0] sm:$0x3f] }
 0x463   : > { %14605 = vmatprep.mubr.msk.bf16.mxu0 %vm15769_vm5, %v15768_v13  ;;  %v9865_v10 = vpack.c.bf16 %v9862_v25, %v9861_v42  ;;  %v9866_v18 = vpack.c.bf16 %v9863_v17, %v9863_v17  ;;  %v9939_v51 = vld [vmem:[#allocation3 + $0xac] sm:$0xff] }
 0x464   : > { %v10017_v7 = vld [vmem:[#allocation3 + $0xad] sm:$0xff] }
 0x469   : > { %14560 = vmatmul.mubr.msk.bf16.gmra.mrb[156].mxu1 %vm1977_vm3, %v9107_v59  ;;  %v9943_v59 = vpack.c.bf16 %v9940_v55, %v9939_v51 }
 0x46a   : > { %14606 = vmatmul.mubr.msk.bf16.gmra.mrb[196].mxu0 %vm1977_vm3, %v9496_v30  ;;  %14565 = vmatprep.mubr.msk.bf16.mxu1 %vm1977_vm3, %v9267_v34  ;;  %v9941_v30 = vld [vmem:[#allocation3 + $0xbc] sm:$0x3f] }
 0x46b   : > { %14611 = vmatprep.mubr.msk.bf16.mxu0 %vm15769_vm5, %v15768_v13  ;;  %v9944_v46 = vpack.c.bf16 %v9941_v30, %v9941_v30  ;;  %v10015_v34 = vld [vmem:[#allocation3 + $0x9d] sm:$0xff] }
 0x471   : > { %14566 = vmatmul.mubr.msk.bf16.vlgmr.msra.gmra.mrb[144].mxu1 %vm1977_vm3, %v9268_v57  ;;  %v10021_v57 = vpack.c.bf16 %v10018_v39, %v10017_v7 }
 0x472   : > { %14612 = vmatmul.mubr.msk.bf16.vlgmr.msra.gmra.mrb[200].mxu0 %vm1977_vm3, %v9648_v3  ;;  %14569 = vmatprep.mubr.msk.bf16.mxu1 %vm1977_vm3, %v9269_v20  ;;  %v15659_v20 = vld [vmem:[%s18953_s5 + $0x28] sm:$0xff]  }
 0x473   : > { %14624 = vmatpush3.bf16.msra.mxu0 %v15756_v1  ;;  %14615 = vmatprep.mubr.msk.bf16.mxu0 %vm15769_vm5, %v15768_v13  ;;  %v10095_v1 = vld [vmem:[#allocation3 + $0xae] sm:$0xff] }
 0x474   : > { %14637 = vmatprep.subr.bf16.mxu0 %v15768_v13  ;;  %14724 = vmatpush3.bf16.msra.mxu1 %v15656_v31  ;;  %v10099_v26 = vpack.c.bf16 %v10096_v58, %v10095_v1 }
 0x475   : > { %14725 = vmatprep.subr.bf16.mxu1 %v15768_v13 }
 0x478   : > { %14726 = vmatpush3.bf16.msra.mxu1 %v15657_v37 }
 0x479   : > { %14570 = vmatmul.mubr.msk.bf16.gmra.mrb[148].mxu1 %vm1977_vm3, %v9270_v44  ;;  %14755 = vmatprep.subr.bf16.mxu1 %v15768_v13 }
 0x47a   : > { %14616 = vmatmul.mubr.msk.bf16.gmra.mrb[204].mxu0 %vm1977_vm3, %v18237_v28  ;;  %14573 = vmatprep.mubr.msk.bf16.mxu1 %vm1977_vm3, %v9271_v48 }
 0x47b   : > { %14619 = vmatprep.mubr.msk.bf16.mxu0 %vm15769_vm5, %v15768_v13 }
 0x481   : > { %14574 = vmatmul.mubr.msk.bf16.gmra.mrb[152].mxu1 %vm1977_vm3, %v9272_v38 }
 0x482   : > { %14620 = vmatmul.mubr.msk.bf16.gmra.mrb[208].mxu0 %vm1977_vm3, %v9650_v2  ;;  %14577 = vmatprep.mubr.msk.bf16.mxu1 %vm1977_vm3, %v9273_v6 }
 0x483   : > { %14625 = vmatprep.mubr.msk.bf16.mxu0 %vm15769_vm5, %v15768_v13 }
 0x489   : > { %14578 = vmatmul.mubr.msk.bf16.gmra.mrb[156].mxu1 %vm1977_vm3, %v9648_v3 }
 0x48a   : > { %14626 = vmatmul.mubr.msk.bf16.vlgmr.msra.gmra.mrb[212].mxu0 %vm1977_vm3, %v9502_v61  ;;  %14727 = vmatprep.mubr.msk.bf16.mxu1 %vm15769_vm5, %v15768_v13 }
 0x48b   : > { %14638 = vmatpush3.bf16.msra.mxu0 %v15757_v19  ;;  %14629 = vmatprep.mubr.msk.bf16.mxu0 %vm15769_vm5, %v15768_v13 }
 0x48c   : > { %14651 = vmatprep.subr.bf16.mxu0 %v15768_v13 }
 0x492   : > { %14630 = vmatmul.mubr.msk.bf16.gmra.mrb[216].mxu0 %vm1977_vm3, %v9503_v47 }
 0x493   : > { %14633 = vmatprep.mubr.msk.bf16.mxu0 %vm15769_vm5, %v15768_v13 }
 0x49a   : > { %14634 = vmatmul.mubr.msk.bf16.gmra.mrb[220].mxu0 %vm1977_vm3, %v9504_v29 }
 0x49b   : > { %14639 = vmatprep.mubr.msk.bf16.mxu0 %vm15769_vm5, %v15768_v13 }
 0x4a2   : > { %14640 = vmatmul.mubr.msk.bf16.vlgmr.msra.gmra.mrb[224].mxu0 %vm1977_vm3, %v9786_v50 }
 0x4a3   : > { %14652 = vmatpush3.bf16.msra.mxu0 %v15758_v0  ;;  %14643 = vmatprep.mubr.msk.bf16.mxu0 %vm15769_vm5, %v15768_v13 }
 0x4a4   : > { %14665 = vmatprep.subr.bf16.mxu0 %v15768_v13 }
 0x4aa   : > { %14644 = vmatmul.mubr.msk.bf16.gmra.mrb[228].mxu0 %vm1977_vm3, %v9787_v24 }
 0x4ab   : > { %14647 = vmatprep.mubr.msk.bf16.mxu0 %vm15769_vm5, %v15768_v13 }
 0x4b2   : > { %14648 = vmatmul.mubr.msk.bf16.gmra.mrb[232].mxu0 %vm1977_vm3, %v9788_v62 }
 0x4b3   : > { %14653 = vmatprep.mubr.msk.bf16.mxu0 %vm15769_vm5, %v15768_v13 }
 0x4ba   : > { %14654 = vmatmul.mubr.msk.bf16.vlgmr.msra.gmra.mrb[236].mxu0 %vm1977_vm3, %v18215_v32  ;;  %v9937_v32 = vld [vmem:[#allocation3 + $0x9c] sm:$0xff] }
 0x4bb   : > { %14666 = vmatpush3.bf16.msra.mxu0 %v17948_v5  ;;  %14657 = vmatprep.mubr.msk.bf16.mxu0 %vm15769_vm5, %v15768_v13  ;;  %v9938_v5 = vld [vmem:[#allocation3 + $0xa4] sm:$0xff] }
 0x4bc   : > { %14679 = vmatprep.subr.bf16.mxu0 %v15768_v13  ;;  %v9942_v45 = vpack.c.bf16 %v9938_v5, %v9937_v32 }
 0x4c2   : > { %14658 = vmatmul.mubr.msk.bf16.gmra.mrb[240].mxu0 %vm1977_vm3, %v9865_v10 }
 0x4c3   : > { %14661 = vmatprep.mubr.msk.bf16.mxu0 %vm15769_vm5, %v15768_v13 }
 0x4ca   : > { %14662 = vmatmul.mubr.msk.bf16.gmra.mrb[244].mxu0 %vm1977_vm3, %v9866_v18 }
 0x4cb   : > { %14667 = vmatprep.mubr.msk.bf16.mxu0 %vm15769_vm5, %v15768_v13 }
 0x4d2   : > { %14668 = vmatmul.mubr.msk.bf16.vlgmr.msra.gmra.mrb[248].mxu0 %vm1977_vm3, %v9942_v45 }
 0x4d3   : > { %14680 = vmatpush3.bf16.msra.mxu0 %v18023_v49  ;;  %14671 = vmatprep.mubr.msk.bf16.mxu0 %vm15769_vm5, %v15768_v13  ;;  %v10016_v49 = vld [vmem:[#allocation3 + $0xa5] sm:$0xff] }
 0x4d4   : > { %14693 = vmatprep.subr.bf16.mxu0 %v15768_v13  ;;  %v10020_v22 = vpack.c.bf16 %v10016_v49, %v10015_v34 }
 0x4da   : > { %14672 = vmatmul.mubr.msk.bf16.gmra.mrb[252].mxu0 %vm1977_vm3, %v9943_v59 }
 0x4db   : > { %14675 = vmatprep.mubr.msk.bf16.mxu0 %vm15769_vm5, %v15768_v13 }
 0x4e2   : > { %14676 = vmatmul.mubr.msk.bf16.gmra.mrb[0].mxu0 %vm1977_vm3, %v9944_v46 }
 0x4e3   : > { %14681 = vmatprep.mubr.msk.bf16.mxu0 %vm15769_vm5, %v15768_v13 }
 0x4ea   : > { %14682 = vmatmul.mubr.msk.bf16.vlgmr.msra.gmra.mrb[4].mxu0 %vm1977_vm3, %v10020_v22 }
 0x4eb   : > { %14694 = vmatpush3.bf16.msra.mxu0 %v18084_v52  ;;  %14685 = vmatprep.mubr.msk.bf16.mxu0 %vm15769_vm5, %v15768_v13  ;;  %v10019_v52 = vld [vmem:[#allocation3 + $0xbd] sm:$0x3f] }
 0x4ec   : > { %14707 = vmatprep.subr.bf16.mxu0 %v15768_v13  ;;  %v10022_v3 = vpack.c.bf16 %v10019_v52, %v10019_v52 }
 0x4f2   : > { %14686 = vmatmul.mubr.msk.bf16.gmra.mrb[8].mxu0 %vm1977_vm3, %v10021_v57 }
 0x4f3   : > { %14689 = vmatprep.mubr.msk.bf16.mxu0 %vm15769_vm5, %v15768_v13 }
 0x4fa   : > { %14690 = vmatmul.mubr.msk.bf16.gmra.mrb[12].mxu0 %vm1977_vm3, %v10022_v3 }
 0x4fb   : > { %14695 = vmatprep.mubr.msk.bf16.mxu0 %vm15769_vm5, %v15768_v13 }
 0x502   : > { %14696 = vmatmul.mubr.msk.bf16.vlgmr.msra.gmra.mrb[16].mxu0 %vm1977_vm3, %v18237_v28 }
 0x503   : > { %14699 = vmatprep.mubr.msk.bf16.mxu0 %vm15769_vm5, %v15768_v13  ;;  %14708 = vmatpush3.bf16.msra.mxu0 %v15658_v53 }
 0x504   : > { %14709 = vmatprep.subr.bf16.mxu0 %v15768_v13 }
 0x507   : > { %14710 = vmatpush3.bf16.msra.mxu0 %v15659_v20 }
 0x508   : > { %14739 = vmatprep.subr.bf16.mxu0 %v15768_v13 }
 0x50a   : > { %14700 = vmatmul.mubr.msk.bf16.gmra.mrb[20].mxu0 %vm1977_vm3, %v10099_v26 }
 0x50b   : > { %14703 = vmatprep.mubr.msk.bf16.mxu0 %vm15769_vm5, %v15768_v13 }
 0x512   : > { %14704 = vmatmul.mubr.msk.bf16.gmra.mrb[24].mxu0 %vm1977_vm3, %v10100_v16 }
 0x513   : > { %14711 = vmatprep.mubr.msk.bf16.mxu0 %vm15769_vm5, %v15768_v13 }
 0x51d   : > { %v9564_v27 = vpop.f32.mrb[180].mxu0 }
 0x51e   : > { %v14589_v44 = vpop.f32.mrb[181].mxu0 }
 0x51f   : > { %v9567_v28 = vpop.f32.mrb[182].mxu0 }
 0x520   : > { %v14590_v9 = vpop.f32.mrb[183].mxu0 }
 0x525   : > { %v9572_v48 = vpop.f32.mrb[184].mxu0 }
 0x526   : > { %v14593_v56 = vpop.f32.mrb[185].mxu0 }
 0x527   : > { %v9575_v40 = vpop.f32.mrb[186].mxu0 }
 0x528   : > { %v14594_v54 = vpop.f32.mrb[187].mxu0 }
 0x52d   : > { %v9621_v36 = vpop.f32.mrb[188].mxu0 }
 0x52e   : > { %v18356_v38 = vadd.f32 %v9621_v36, %v18192_v8  ;;  %v14599_v2 = vpop.f32.mrb[189].mxu0 }
 0x52f   : > { %v9624_v23 = vpop.f32.mrb[190].mxu0 }
 0x530   : > { %v18359_v6 = vadd.f32 %v9624_v23, %v18194_v12  ;;  %v14600_v4 = vpop.f32.mrb[191].mxu0  ;;  %v18370_v12 = vld [vmem:[%s18952_s4] ss:$0 sm:$0xff] }
 0x535   : > { %v9629_v21 = vpop.f32.mrb[192].mxu0 }
 0x536   : > { %v18361_v61 = vadd.f32 %v9629_v21, %v9564_v27  ;;  %v14603_v19 = vpop.f32.mrb[193].mxu0 }
 0x537   : > { %v9632_v33 = vpop.f32.mrb[194].mxu0 }
 0x538   : > { %v18363_v35 = vadd.f32 %v9632_v33, %v9567_v28  ;;  %v14604_v47 = vpop.f32.mrb[195].mxu0 }
 0x53d   : > { %v9637_v11 = vpop.f32.mrb[196].mxu0 }
 0x53e   : > { %v18365_v29 = vadd.f32 %v9637_v11, %v9572_v48  ;;  %v14607_v15 = vpop.f32.mrb[197].mxu0 }
 0x53f   : > { %v9640_v8 = vpop.f32.mrb[198].mxu0 }
 0x540   : > { %v14608_v41 = vpop.f32.mrb[199].mxu0 }
 0x544   : > { %v14567_v50 = vpop.f32.mrb[144].mxu1 }
 0x545   : > { %v18372_v0 = vpop.f32.mrb[200].mxu0  ;;  %v9442_v43 = vadd.f32 %v14567_v50, %v18370_v12  ;;  %v9339_v63 = vpop.f32.mrb[145].mxu1 }
 0x546   : > { %v14613_v24 = vpop.f32.mrb[201].mxu0  ;;  %v9440_v60 = vadd.f32 %v18370_v12, %v9339_v63  ;;  %v14568_v62 = vpop.f32.mrb[146].mxu1 }
 0x547   : > { %v18376_v25 = vpop.f32.mrb[202].mxu0  ;;  %v9458_v42 = vmax.f32 %v9442_v43, 0.0  ;;  %v9443_v10 = vadd.f32 %v14568_v62, %v18370_v12  ;;  %v9342_v17 = vpop.f32.mrb[147].mxu1 }
 0x548   : > { %v14614_v18 = vpop.f32.mrb[203].mxu0  ;;  %v9456_v5 = vmax.f32 %v9440_v60, 0.0  ;;  %v9441_v32 = vadd.f32 %v18370_v12, %v9342_v17 }
 0x549   : > { %9475 = vst.msk [vmem:[#allocation4 + $0x10] sm:$0xff] %vm9472_vm7, %v9458_v42  ;;  %v9459_v45 = vmax.f32 %v9443_v10, 0.0 }
 0x54a   : > { %9473 = vst.msk [vmem:[#allocation4] sm:$0xff] %vm9472_vm7, %v9456_v5  ;;  %v9457_v51 = vmax.f32 %v9441_v32, 0.0 }
 0x54b   : > { %9476 = vst.msk [vmem:[#allocation4 + $0x18] sm:$0xff] %vm9472_vm7, %v9459_v45 }
 0x54c   : > { %9474 = vst.msk [vmem:[#allocation4 + $0x8] sm:$0xff] %vm9472_vm7, %v9457_v51  ;;  %v14571_v55 = vpop.f32.mrb[148].mxu1 }
 0x54d   : > { %v18384_v59 = vpop.f32.mrb[204].mxu0  ;;  %v9446_v30 = vadd.f32 %v14571_v55, %v18370_v12  ;;  %v9355_v46 = vpop.f32.mrb[149].mxu1  ;;  %v10308_v55 = vld [vmem:[#allocation5] sm:$0xff] }
 0x54e   : > { %v14617_v49 = vpop.f32.mrb[205].mxu0  ;;  %v9444_v34 = vadd.f32 %v18370_v12, %v9355_v46  ;;  %v14572_v22 = vpop.f32.mrb[150].mxu1 }
 0x54f   : > { %v18388_v31 = vpop.f32.mrb[206].mxu0  ;;  %v9462_v37 = vmax.f32 %v9446_v30, 0.0  ;;  %v9447_v7 = vadd.f32 %v14572_v22, %v18370_v12  ;;  %v9358_v39 = vpop.f32.mrb[151].mxu1 }
 0x550   : > { %v14618_v57 = vpop.f32.mrb[207].mxu0  ;;  %v9460_v52 = vmax.f32 %v9444_v34, 0.0  ;;  %v9445_v3 = vadd.f32 %v18370_v12, %v9358_v39 }
 0x551   : > { %9479 = vst.msk [vmem:[#allocation4 + $0x30] sm:$0xff] %vm9472_vm7, %v9462_v37  ;;  %v9463_v53 = vmax.f32 %v9447_v7, 0.0 }
 0x552   : > { %9477 = vst.msk [vmem:[#allocation4 + $0x20] sm:$0xff] %vm9472_vm7, %v9460_v52  ;;  %v9461_v20 = vmax.f32 %v9445_v3, 0.0 }
 0x553   : > { %v10200_v1 = vld [vmem:[#allocation4] ss:$2 sm:$0x3f]  ;;  %v10202_v58 = vld [vmem:[#allocation4 + $0x1] ss:$2 sm:$0x3f] }
 0x554   : > { %9480 = vst.msk [vmem:[#allocation4 + $0x38] sm:$0xff] %vm9472_vm7, %v9463_v53  ;;  %v10204_v26 = vld [vmem:[#allocation4 + $0xe] ss:$2 sm:$0x3f]  ;;  %v10207_v16 = vmax.f32 %v10200_v1, %v10202_v58  ;;  %9478 = vst.msk [vmem:[#allocation4 + $0x28] sm:$0xff] %vm9472_vm7, %v9461_v20  ;;  %v14575_v44 = vpop.f32.mrb[152].mxu1 }
 0x555   : > { %v10206_v14 = vld [vmem:[#allocation4 + $0xf] ss:$2 sm:$0x3f]  ;;  %v18396_v28 = vpop.f32.mrb[208].mxu0  ;;  %v9450_v9 = vadd.f32 %v14575_v44, %v18370_v12  ;;  %v9371_v48 = vpop.f32.mrb[153].mxu1 }
 0x556   : > { %v10208_v27 = vmax.f32 %v10204_v26, %v10206_v14  ;;  %v14621_v56 = vpop.f32.mrb[209].mxu0  ;;  %v9448_v54 = vadd.f32 %v18370_v12, %v9371_v48  ;;  %v14576_v36 = vpop.f32.mrb[154].mxu1 }
 0x557   : > { %v9713_v2 = vpop.f32.mrb[210].mxu0  ;;  %v9466_v23 = vmax.f32 %v9450_v9, 0.0  ;;  %v9451_v4 = vadd.f32 %v14576_v36, %v18370_v12  ;;  %v9374_v21 = vpop.f32.mrb[155].mxu1 }
 0x558   : > { %v10209_v40 = vmax.f32 %v10207_v16, %v10208_v27  ;;  %v14622_v19 = vpop.f32.mrb[211].mxu0  ;;  %v9449_v11 = vadd.f32 %v18370_v12, %v9374_v21  ;;  %v9464_v15 = vmax.f32 %v9448_v54, 0.0 }
 0x559   : > { %v10212_v33 = vld [vmem:[#allocation4 + $0x1c] ss:$2 sm:$0x3f]  ;;  %v10214_v47 = vld [vmem:[#allocation4 + $0x1d] ss:$2 sm:$0x3f] }
 0x55a   : > { %10210 = vst.msk [vmem:[#allocation5 + $0x9] sm:$0x3f] %vm10190_vm8, %v10209_v40  ;;  %v9467_v8 = vmax.f32 %v9451_v4, 0.0  ;;  %v10219_v43 = vmax.f32 %v10212_v33, %v10214_v47  ;;  %v9465_v24 = vmax.f32 %v9449_v11, 0.0 }
 0x55b   : > { %9483 = vst.msk [vmem:[#allocation4 + $0x50] sm:$0xff] %vm9472_vm7, %v9466_v23  ;;  %v10216_v41 = vld [vmem:[#allocation4 + $0x2a] ss:$2 sm:$0x3f]  ;;  %9481 = vst.msk [vmem:[#allocation4 + $0x40] sm:$0xff] %vm9472_vm7, %v9464_v15 }
 0x55c   : > { %v10218_v50 = vld [vmem:[#allocation4 + $0x2b] ss:$2 sm:$0x3f]  ;;  %9484 = vst.msk [vmem:[#allocation4 + $0x58] sm:$0xff] %vm9472_vm7, %v9467_v8  ;;  %v14579_v60 = vpop.f32.mrb[156].mxu1  ;;  %9482 = vst.msk [vmem:[#allocation4 + $0x48] sm:$0xff] %vm9472_vm7, %v9465_v24 }
 0x55d   : > { %v10220_v63 = vmax.f32 %v10216_v41, %v10218_v50  ;;  %v9759_v62 = vpop.f32.mrb[212].mxu0  ;;  %v9454_v42 = vadd.f32 %v14579_v60, %v18370_v12  ;;  %v9387_v17 = vpop.f32.mrb[157].mxu1 }
 0x55e   : > { %v18408_v10 = vadd.f32 %v9759_v62, %v18372_v0  ;;  %v14627_v18 = vpop.f32.mrb[213].mxu0  ;;  %v9452_v32 = vadd.f32 %v18370_v12, %v9387_v17  ;;  %v14580_v45 = vpop.f32.mrb[158].mxu1 }
 0x55f   : > { %v10221_v5 = vmax.f32 %v10219_v43, %v10220_v63  ;;  %v9762_v51 = vpop.f32.mrb[214].mxu0  ;;  %v9470_v30 = vmax.f32 %v9454_v42, 0.0  ;;  %v9455_v46 = vadd.f32 %v14580_v45, %v18370_v12  ;;  %v9390_v34 = vpop.f32.mrb[159].mxu1  ;;  %v15660_v45 = vld [vmem:[%s18953_s5 + $0x30] sm:$0xff]  }
 0x560   : > { %v18414_v49 = vadd.f32 %v9762_v51, %v18376_v25  ;;  %v14628_v22 = vpop.f32.mrb[215].mxu0  ;;  %v9468_v0 = vmax.f32 %v9452_v32, 0.0  ;;  %v9453_v37 = vadd.f32 %v18370_v12, %v9390_v34 }
 0x561   : > { %10222 = vst.msk [vmem:[#allocation5 + $0x11] sm:$0x3f] %vm10190_vm8, %v10221_v5  ;;  %v18418_v7 = vld [vmem:[#allocation5 + $0x8] sm:$0xff]  ;;  %v9471_v39 = vmax.f32 %v9455_v46, 0.0 }
 0x562   : > { %9487 = vst.msk [vmem:[#allocation4 + $0x70] sm:$0xff] %vm9472_vm7, %v9470_v30  ;;  %v10314_v57 = vpack.c.bf16 %v18418_v7, %v10308_v55  ;;  %9485 = vst.msk [vmem:[#allocation4 + $0x60] sm:$0xff] %vm9472_vm7, %v9468_v0  ;;  %v9469_v52 = vmax.f32 %v9453_v37, 0.0  ;;  %v10224_v3 = vld [vmem:[#allocation4 + $0x38] ss:$2 sm:$0x3f] }
 0x563   : > { %v10226_v25 = vld [vmem:[#allocation4 + $0x39] ss:$2 sm:$0x3f]  ;;  %9488 = vst.msk [vmem:[#allocation4 + $0x78] sm:$0xff] %vm9472_vm7, %v9471_v39  ;;  %v10326_v27 = vld [vmem:[#allocation5 + $0x2] sm:$0xff] }
 0x564   : > { %14728 = vmatmul.mubr.msk.bf16.vlgmr.msra.gmra.mrb[160].mxu1 %vm9472_vm7, %v10314_v57  ;;  %9486 = vst.msk [vmem:[#allocation4 + $0x68] sm:$0xff] %vm9472_vm7, %v9469_v52  ;;  %v10228_v53 = vld [vmem:[#allocation4 + $0x46] ss:$2 sm:$0x3f]  ;;  %v10231_v1 = vmax.f32 %v10224_v3, %v10226_v25 }
 0x565   : > { %14731 = vmatprep.mubr.msk.bf16.mxu1 %vm15769_vm5, %v15768_v13  ;;  %v10230_v20 = vld [vmem:[#allocation4 + $0x47] ss:$2 sm:$0x3f]  ;;  %v9767_v26 = vpop.f32.mrb[216].mxu0 }
 0x566   : > { %v10232_v58 = vmax.f32 %v10228_v53, %v10230_v20  ;;  %v18429_v14 = vadd.f32 %v9767_v26, %v18384_v59  ;;  %v14631_v16 = vpop.f32.mrb[217].mxu0  ;;  %v10236_v48 = vld [vmem:[#allocation4 + $0x54] ss:$2 sm:$0x3f]  ;;  %v15663_v55 = vld [vmem:[%s18953_s5 + $0x18] sm:$0xff]  }
 0x567   : > { %v9770_v40 = vpop.f32.mrb[218].mxu0  ;;  %v10238_v2 = vld [vmem:[#allocation4 + $0x55] ss:$2 sm:$0x3f] }
 0x568   : > { %v18431_v44 = vld [vmem:[#allocation5 + $0xa] sm:$0xff]  ;;  %v10233_v56 = vmax.f32 %v10231_v1, %v10232_v58  ;;  %v18439_v23 = vadd.f32 %v9770_v40, %v18388_v31  ;;  %v14632_v59 = vpop.f32.mrb[219].mxu0  ;;  %v10243_v19 = vmax.f32 %v10236_v48, %v10238_v2 }
 0x569   : > { %v18433_v9 = vld [vmem:[#allocation5 + $0x10] sm:$0xff]  ;;  %v10332_v54 = vpack.c.bf16 %v18431_v44, %v10326_v27 }
 0x56a   : > { %v10497_v36 = vpack.c.bf16 %v18433_v9, %v18418_v7  ;;  %10234 = vst.msk [vmem:[#allocation5 + $0x19] sm:$0x3f] %vm10190_vm8, %v10233_v56  ;;  %v15667_v7 = vld [vmem:[%s18953_s5 + $0x58] sm:$0xff]  }
 0x56b   : > { %14712 = vmatmul.mubr.msk.bf16.vlgmr.msra.gmra.mrb[28].mxu0 %vm9472_vm7, %v10332_v54  ;;  %v10240_v4 = vld [vmem:[#allocation4 + $0x62] ss:$2 sm:$0x3f]  ;;  %v10242_v21 = vld [vmem:[#allocation4 + $0x63] ss:$2 sm:$0x3f] }
 0x56c   : > { %14715 = vmatprep.mubr.msk.bf16.mxu0 %vm15769_vm5, %v15768_v13  ;;  %v10244_v33 = vmax.f32 %v10240_v4, %v10242_v21  ;;  %14740 = vmatpush3.bf16.msra.mxu0 %v15660_v45 }
 0x56d   : > { %v9775_v47 = vpop.f32.mrb[220].mxu0  ;;  %14741 = vmatprep.subr.bf16.mxu0 %v15768_v13 }
 0x56e   : > { %v9776_v11 = vadd.f32 %v9775_v47, %v18396_v28  ;;  %v14635_v15 = vpop.f32.mrb[221].mxu0  ;;  %v10245_v8 = vmax.f32 %v10243_v19, %v10244_v33 }
 0x56f   : > { %v9778_v41 = vpop.f32.mrb[222].mxu0 }
 0x570   : > { %v14636_v31 = vpop.f32.mrb[223].mxu0  ;;  %10246 = vst.msk [vmem:[#allocation5 + $0x21] sm:$0x3f] %vm10190_vm8, %v10245_v8 }
 0x571   : > { %v18447_v50 = vld [vmem:[#allocation5 + $0x18] sm:$0xff] }
 0x572   : > { %v18449_v43 = vld [vmem:[#allocation5 + $0x12] sm:$0xff]  ;;  %v18453_v63 = vpack.c.bf16 %v18447_v50, %v18433_v9 }
 0x573   : > { %v10755_v24 = vpack.c.bf16 %v18449_v43, %v18431_v44  ;;  %v10319_v9 = vld [vmem:[#allocation5 + $0x11] sm:$0xff] }
 0x574   : > { %14732 = vmatmul.mubr.msk.bf16.gmra.mrb[164].mxu1 %vm9472_vm7, %v18453_v63  ;;  %v15671_v44 = vld [vmem:[%s18953_s5 + $0x78] sm:$0xff]  }
 0x575   : > { %v9832_v28 = vpop.f32.mrb[224].mxu0  ;;  %14735 = vmatprep.mubr.msk.bf16.mxu1 %vm15769_vm5, %v15768_v13 }
 0x576   : > { %v9854_v60 = vadd.f32 %v9832_v28, %v18356_v38  ;;  %v14641_v62 = vpop.f32.mrb[225].mxu0  ;;  %v15662_v38 = vld [vmem:[%s18953_s5 + $0x10] sm:$0xff]  }
 0x577   : > { %v9835_v42 = vpop.f32.mrb[226].mxu0  ;;  %v18463_v5 = vld [vmem:[#allocation5 + $0x1a] sm:$0xff]  ;;  %14756 = vmatpush3.bf16.msra.mxu1 %v15662_v38 }
 0x578   : > { %v9855_v17 = vadd.f32 %v9835_v42, %v18359_v6  ;;  %v14642_v18 = vpop.f32.mrb[227].mxu0  ;;  %v18467_v32 = vpack.c.bf16 %v18463_v5, %v18449_v43  ;;  %v15661_v6 = vld [vmem:[%s18953_s5 + $0x38] sm:$0xff]   ;;  %14757 = vmatprep.subr.bf16.mxu1 %v15768_v13 }
 0x579   : > { %14742 = vmatpush3.bf16.msra.mxu0 %v15661_v6 }
 0x57a   : > { %14716 = vmatmul.mubr.msk.bf16.gmra.mrb[32].mxu0 %vm9472_vm7, %v18467_v32  ;;  %14771 = vmatprep.subr.bf16.mxu0 %v15768_v13 }
 0x57b   : > { %14719 = vmatprep.mubr.msk.bf16.mxu0 %vm15769_vm5, %v15768_v13  ;;  %14758 = vmatpush3.bf16.msra.mxu1 %v15663_v55 }
 0x57c   : > { %14787 = vmatprep.subr.bf16.mxu1 %v15768_v13 }
 0x57d   : > { %v9840_v51 = vpop.f32.mrb[228].mxu0 }
 0x57e   : > { %v9856_v30 = vadd.f32 %v9840_v51, %v18361_v61  ;;  %v14645_v46 = vpop.f32.mrb[229].mxu0 }
 0x57f   : > { %v9843_v34 = vpop.f32.mrb[230].mxu0 }
 0x580   : > { %v9857_v22 = vadd.f32 %v9843_v34, %v18363_v35  ;;  %v14646_v0 = vpop.f32.mrb[231].mxu0 }
 0x585   : > { %v9848_v37 = vpop.f32.mrb[232].mxu0 }
 0x586   : > { %v9858_v39 = vadd.f32 %v9848_v37, %v18365_v29  ;;  %v14649_v57 = vpop.f32.mrb[233].mxu0 }
 0x587   : > { %v9851_v52 = vpop.f32.mrb[234].mxu0 }
 0x588   : > { %v14650_v3 = vpop.f32.mrb[235].mxu0 }
 0x58d   : > { %v9910_v61 = vpop.f32.mrb[236].mxu0 }
 0x58e   : > { %v9932_v25 = vadd.f32 %v9910_v61, %v18408_v10  ;;  %v14655_v53 = vpop.f32.mrb[237].mxu0 }
 0x58f   : > { %v9913_v20 = vpop.f32.mrb[238].mxu0 }
 0x590   : > { %v9933_v35 = vadd.f32 %v9913_v20, %v18414_v49  ;;  %v14656_v1 = vpop.f32.mrb[239].mxu0 }
 0x595   : > { %v9918_v58 = vpop.f32.mrb[240].mxu0 }
 0x596   : > { %v9934_v26 = vadd.f32 %v9918_v58, %v18429_v14  ;;  %v14659_v16 = vpop.f32.mrb[241].mxu0 }
 0x597   : > { %v9921_v27 = vpop.f32.mrb[242].mxu0 }
 0x598   : > { %v9935_v48 = vadd.f32 %v9921_v27, %v18439_v23  ;;  %v14660_v56 = vpop.f32.mrb[243].mxu0 }
 0x59d   : > { %v9926_v29 = vpop.f32.mrb[244].mxu0 }
 0x59e   : > { %v9936_v40 = vadd.f32 %v9926_v29, %v9776_v11  ;;  %v14663_v54 = vpop.f32.mrb[245].mxu0 }
 0x59f   : > { %v9929_v2 = vpop.f32.mrb[246].mxu0 }
 0x5a0   : > { %v14664_v59 = vpop.f32.mrb[247].mxu0 }
 0x5a5   : > { %v9988_v4 = vpop.f32.mrb[248].mxu0 }
 0x5a6   : > { %v10010_v10 = vadd.f32 %v9988_v4, %v9854_v60  ;;  %v14669_v21 = vpop.f32.mrb[249].mxu0 }
 0x5a7   : > { %v9991_v19 = vpop.f32.mrb[250].mxu0 }
 0x5a8   : > { %v10011_v33 = vadd.f32 %v9991_v19, %v9855_v17  ;;  %v14670_v49 = vpop.f32.mrb[251].mxu0  ;;  %v10248_v19 = vld [vmem:[#allocation4 + $0x70] ss:$2 sm:$0x3f] }
 0x5ad   : > { %v9996_v47 = vpop.f32.mrb[252].mxu0 }
 0x5ae   : > { %v10012_v15 = vadd.f32 %v9996_v47, %v9856_v30  ;;  %v14673_v8 = vpop.f32.mrb[253].mxu0  ;;  %v10250_v47 = vld [vmem:[#allocation4 + $0x71] ss:$2 sm:$0x3f] }
 0x5af   : > { %v9999_v14 = vpop.f32.mrb[254].mxu0 }
 0x5b0   : > { %v10013_v41 = vadd.f32 %v9999_v14, %v9857_v22  ;;  %v14674_v31 = vpop.f32.mrb[255].mxu0 }
 0x5b5   : > { %v10004_v28 = vpop.f32.mrb[0].mxu0 }
 0x5b6   : > { %v10014_v23 = vadd.f32 %v10004_v28, %v9858_v39  ;;  %v14677_v62 = vpop.f32.mrb[1].mxu0 }
 0x5b7   : > { %v10007_v42 = vpop.f32.mrb[2].mxu0 }
 0x5b8   : > { %v14678_v11 = vpop.f32.mrb[3].mxu0  ;;  %v10255_v42 = vmax.f32 %v10248_v19, %v10250_v47  ;;  %v15672_v19 = vld [vmem:[%s18953_s5 + $0x80] sm:$0xff]  }
 0x5bd   : > { %v10066_v18 = vpop.f32.mrb[4].mxu0 }
 0x5be   : > { %v10088_v45 = vadd.f32 %v10066_v18, %v9932_v25  ;;  %v14683_v38 = vpop.f32.mrb[5].mxu0 }
 0x5bf   : > { %v10069_v6 = vpop.f32.mrb[6].mxu0 }
 0x5c0   : > { %v10089_v60 = vadd.f32 %v10069_v6, %v9933_v35  ;;  %v14684_v51 = vpop.f32.mrb[7].mxu0 }
 0x5c1   : > { %v18507_v51 = vld [vmem:[#allocation5 + $0x20] sm:$0xff] }
 0x5c5   : > { %v10074_v55 = vpop.f32.mrb[8].mxu0 }
 0x5c6   : > { %v10090_v17 = vadd.f32 %v10074_v55, %v9934_v26  ;;  %v14687_v46 = vpop.f32.mrb[9].mxu0 }
 0x5c7   : > { %v10077_v34 = vpop.f32.mrb[10].mxu0 }
 0x5c8   : > { %v10091_v30 = vadd.f32 %v10077_v34, %v9935_v48  ;;  %v14688_v0 = vpop.f32.mrb[11].mxu0 }
 0x5cd   : > { %v10082_v37 = vpop.f32.mrb[12].mxu0 }
 0x5ce   : > { %v10092_v22 = vadd.f32 %v10082_v37, %v9936_v40  ;;  %v14691_v57 = vpop.f32.mrb[13].mxu0 }
 0x5cf   : > { %v10085_v52 = vpop.f32.mrb[14].mxu0 }
 0x5d0   : > { %v14692_v39 = vpop.f32.mrb[15].mxu0 }
 0x5d1   : > { %v10317_v39 = vld [vmem:[#allocation5 + $0x1] sm:$0xff] }
 0x5d5   : > { %v10144_v3 = vpop.f32.mrb[16].mxu0 }
 0x5d6   : > { %v10166_v61 = vadd.f32 %v10144_v3, %v10010_v10  ;;  %v14697_v53 = vpop.f32.mrb[17].mxu0  ;;  %v10318_v3 = vld [vmem:[#allocation5 + $0x9] sm:$0xff] }
 0x5d7   : > { %v10147_v20 = vpop.f32.mrb[18].mxu0  ;;  %v10323_v53 = vpack.c.bf16 %v10318_v3, %v10317_v39  ;;  %v11033_v39 = vld [vmem:[#allocation5 + $0x3a] sm:$0x3f] }
 0x5d8   : > { %v10171_v25 = vadd.f32 %v10166_v61, %v10088_v45  ;;  %v10167_v1 = vadd.f32 %v10147_v20, %v10011_v33  ;;  %v14698_v58 = vpop.f32.mrb[19].mxu0  ;;  %v15664_v61 = vld [vmem:[%s18953_s5 + $0x40] sm:$0xff]   ;;  %v15666_v20 = vld [vmem:[%s18953_s5 + $0x50] sm:$0xff]  }
 0x5da   : > { %v10176_v35 = vadd.f32 %v18370_v12, %v10171_v25  ;;  %v10172_v16 = vadd.f32 %v10167_v1, %v10089_v60  ;;  %v15665_v25 = vld [vmem:[%s18953_s5 + $0x48] sm:$0xff]   ;;  %v10320_v1 = vld [vmem:[#allocation5 + $0x19] sm:$0xff] }
 0x5db   : > { %v10324_v58 = vpack.c.bf16 %v10320_v1, %v10319_v9 }
 0x5dc   : > { %v10181_v26 = vmax.f32 %v10176_v35, 0.0  ;;  %v10177_v27 = vadd.f32 %v18370_v12, %v10172_v16 }
 0x5dd   : > { %v10152_v48 = vpop.f32.mrb[20].mxu0 }
 0x5de   : > { %10186 = vst.msk [vmem:[#allocation4 + $0x80] sm:$0xff] %vm9472_vm7, %v10181_v26  ;;  %v10182_v56 = vmax.f32 %v10177_v27, 0.0  ;;  %v10168_v29 = vadd.f32 %v10152_v48, %v10012_v15  ;;  %v14701_v40 = vpop.f32.mrb[21].mxu0 }
 0x5df   : > { %v10155_v54 = vpop.f32.mrb[22].mxu0  ;;  %v15670_v40 = vld [vmem:[%s18953_s5 + $0x70] sm:$0xff]  }
 0x5e0   : > { %10187 = vst.msk [vmem:[#allocation4 + $0x88] sm:$0xff] %vm9472_vm7, %v10182_v56  ;;  %v10173_v2 = vadd.f32 %v10168_v29, %v10090_v17  ;;  %v10169_v59 = vadd.f32 %v10155_v54, %v10013_v41  ;;  %v14702_v4 = vpop.f32.mrb[23].mxu0  ;;  %v15668_v56 = vld [vmem:[%s18953_s5 + $0x60] sm:$0xff]   ;;  %v10662_v29 = vpack.c.bf16 %v10319_v9, %v10318_v3  ;;  %v15669_v54 = vld [vmem:[%s18953_s5 + $0x68] sm:$0xff]  }
 0x5e2   : > { %v10178_v10 = vadd.f32 %v18370_v12, %v10173_v2  ;;  %v10174_v21 = vadd.f32 %v10169_v59, %v10091_v30 }
 0x5e4   : > { %v10183_v33 = vmax.f32 %v10178_v10, 0.0  ;;  %v10179_v49 = vadd.f32 %v18370_v12, %v10174_v21 }
 0x5e5   : > { %v10160_v8 = vpop.f32.mrb[24].mxu0 }
 0x5e6   : > { %10188 = vst.msk [vmem:[#allocation4 + $0x90] sm:$0xff] %vm9472_vm7, %v10183_v33  ;;  %v10184_v14 = vmax.f32 %v10179_v49, 0.0  ;;  %v10170_v15 = vadd.f32 %v10160_v8, %v10014_v23  ;;  %v14705_v31 = vpop.f32.mrb[25].mxu0  ;;  %v15673_v33 = vld [vmem:[%s18953_s5 + $0x88] sm:$0xff]  }
 0x5e7   : > { %v10252_v28 = vld [vmem:[#allocation4 + $0x7e] ss:$2 sm:$0x3f]  ;;  %v10254_v62 = vld [vmem:[#allocation4 + $0x7f] ss:$2 sm:$0x3f] }
 0x5e8   : > { %v10256_v11 = vmax.f32 %v10252_v28, %v10254_v62  ;;  %10189 = vst.msk [vmem:[#allocation4 + $0x98] sm:$0xff] %vm9472_vm7, %v10184_v14  ;;  %v10175_v41 = vadd.f32 %v10170_v15, %v10092_v22  ;;  %v10163_v18 = vpop.f32.mrb[26].mxu0  ;;  %v10847_v14 = vld [vmem:[#allocation5 + $0x38] sm:$0x3f] }
 0x5e9   : > { %v14706_v45 = vpop.f32.mrb[27].mxu0  ;;  %v10940_v62 = vld [vmem:[#allocation5 + $0x39] sm:$0x3f] }
 0x5ea   : > { %v10257_v38 = vmax.f32 %v10255_v42, %v10256_v11  ;;  %v10180_v6 = vadd.f32 %v18370_v12, %v10175_v41 }
 0x5ec   : > { %10258 = vst.msk [vmem:[#allocation5 + $0x29] sm:$0x3f] %vm10190_vm8, %v10257_v38  ;;  %v10185_v60 = vmax.f32 %v10180_v6, 0.0 }
 0x5ed   : > { %v10260_v23 = vld [vmem:[#allocation4 + $0x8c] ss:$2 sm:$0x3f]  ;;  %v10262_v55 = vld [vmem:[#allocation4 + $0x8d] ss:$2 sm:$0x3f] }
 0x5ee   : > { %10191 = vst.msk [vmem:[#allocation4 + $0xa0] sm:$0x3f] %vm10190_vm8, %v10185_v60  ;;  %v10267_v12 = vmax.f32 %v10260_v23, %v10262_v55 }
 0x5f3   : > { %v18509_v17 = vld [vmem:[#allocation5 + $0x22] sm:$0xff]  ;;  %v10331_v46 = vld [vmem:[#allocation5 + $0x2a] sm:$0x3f] }
 0x5f4   : > { %v10313_v34 = vld [vmem:[#allocation5 + $0x28] sm:$0x3f]  ;;  %v10334_v30 = vpack.c.bf16 %v10331_v46, %v18509_v17 }
 0x5f5   : > { %v10316_v0 = vpack.c.bf16 %v10313_v34, %v18507_v51  ;;  %v10264_v37 = vld [vmem:[#allocation4 + $0x9a] ss:$2 sm:$0x3f]  ;;  %v10266_v22 = vld [vmem:[#allocation4 + $0x9b] ss:$2 sm:$0x3f] }
 0x5f6   : > { %v10268_v57 = vmax.f32 %v10264_v37, %v10266_v22  ;;  %14720 = vmatmul.mubr.msk.bf16.gmra.mrb[36].mxu0 %vm9472_vm7, %v10334_v30  ;;  %v10322_v16 = vld [vmem:[#allocation5 + $0x29] sm:$0x3f] }
 0x5f7   : > { %14736 = vmatmul.mubr.msk.bf16.gmra.mrb[168].mxu1 %vm9472_vm7, %v10316_v0  ;;  %14743 = vmatprep.mubr.msk.bf16.mxu0 %vm15769_vm5, %v15768_v13  ;;  %v10495_v26 = vld [vmem:[#allocation5 + $0x28] sm:$0xff] }
 0x5f8   : > { %14759 = vmatprep.mubr.msk.bf16.mxu1 %vm15769_vm5, %v15768_v13  ;;  %v10269_v52 = vmax.f32 %v10267_v12, %v10268_v57  ;;  %v10660_v10 = vld [vmem:[#allocation5 + $0x29] sm:$0xff]  ;;  %v10849_v49 = vpack.c.bf16 %v10495_v26, %v18507_v51 }
 0x5fa   : > { %10270 = vst.msk [vmem:[#allocation5 + $0x31] sm:$0x3f] %vm10190_vm8, %v10269_v52 }
 0x5fe   : > { %14744 = vmatmul.mubr.msk.bf16.vlgmr.msra.gmra.mrb[40].mxu0 %vm9472_vm7, %v10497_v36  ;;  %v10498_v36 = vpack.c.bf16 %v18507_v51, %v18447_v50  ;;  %v10321_v50 = vld [vmem:[#allocation5 + $0x21] sm:$0xff] }
 0x5ff   : > { %14760 = vmatmul.mubr.msk.bf16.vlgmr.msra.gmra.mrb[172].mxu1 %vm9472_vm7, %v10323_v53  ;;  %14772 = vmatpush3.bf16.msra.mxu0 %v15664_v61  ;;  %v10325_v48 = vpack.c.bf16 %v10322_v16, %v10321_v50  ;;  %v10663_v43 = vpack.c.bf16 %v10321_v50, %v10320_v1  ;;  %v10942_v47 = vpack.c.bf16 %v10660_v10, %v10321_v50  ;;  %v15675_v61 = vld [vmem:[%s18955_s7 + $0x8] sm:$0xff]   ;;  %v15676_v53 = vld [vmem:[%s18955_s7 + $0x10] sm:$0xff]   ;;  %v15677_v50 = vld [vmem:[%s18955_s7 + $0x18] sm:$0xff]  }
 0x600   : > { %14747 = vmatprep.mubr.msk.bf16.mxu0 %vm15769_vm5, %v15768_v13  ;;  %14763 = vmatprep.mubr.msk.bf16.mxu1 %vm15769_vm5, %v15768_v13 }
 0x601   : > { %14773 = vmatprep.subr.bf16.mxu0 %v15768_v13  ;;  %14788 = vmatpush3.bf16.msra.mxu1 %v15666_v20  ;;  %v10496_v35 = vld [vmem:[#allocation5 + $0x30] sm:$0x3f] }
 0x602   : > { %14789 = vmatprep.subr.bf16.mxu1 %v15768_v13  ;;  %v10499_v27 = vpack.c.bf16 %v10496_v35, %v10495_v26  ;;  %v10661_v2 = vld [vmem:[#allocation5 + $0x31] sm:$0x3f] }
 0x603   : > { %14774 = vmatpush3.bf16.msra.mxu0 %v15665_v25  ;;  %v10753_v59 = vld [vmem:[#allocation5 + $0x2a] sm:$0xff]  ;;  %v10754_v4 = vld [vmem:[#allocation5 + $0x32] sm:$0x3f] }
 0x604   : > { %14803 = vmatprep.subr.bf16.mxu0 %v15768_v13  ;;  %v10757_v21 = vpack.c.bf16 %v10754_v4, %v10753_v59  ;;  %v10846_v31 = vld [vmem:[#allocation5 + $0x30] sm:$0xff]  ;;  %v11035_v30 = vpack.c.bf16 %v10753_v59, %v18509_v17 }
 0x605   : > { %14790 = vmatpush3.bf16.msra.mxu1 %v15667_v7  ;;  %v10939_v28 = vld [vmem:[#allocation5 + $0x31] sm:$0xff]  ;;  %v10850_v11 = vpack.c.bf16 %v10847_v14, %v10846_v31 }
 0x606   : > { %14748 = vmatmul.mubr.msk.bf16.gmra.mrb[44].mxu0 %vm9472_vm7, %v10498_v36  ;;  %14819 = vmatprep.subr.bf16.mxu1 %v15768_v13  ;;  %v10943_v41 = vpack.c.bf16 %v10940_v62, %v10939_v28  ;;  %v11032_v52 = vld [vmem:[#allocation5 + $0x32] sm:$0xff] }
 0x607   : > { %14764 = vmatmul.mubr.msk.bf16.gmra.mrb[176].mxu1 %vm9472_vm7, %v10324_v58  ;;  %14751 = vmatprep.mubr.msk.bf16.mxu0 %vm15769_vm5, %v15768_v13  ;;  %v11036_v3 = vpack.c.bf16 %v11033_v39, %v11032_v52 }
 0x608   : > { %14767 = vmatprep.mubr.msk.bf16.mxu1 %vm15769_vm5, %v15768_v13 }
 0x60e   : > { %14752 = vmatmul.mubr.msk.bf16.gmra.mrb[48].mxu0 %vm9472_vm7, %v10499_v27 }
 0x60f   : > { %14768 = vmatmul.mubr.msk.bf16.gmra.mrb[180].mxu1 %vm9472_vm7, %v10325_v48  ;;  %14775 = vmatprep.mubr.msk.bf16.mxu0 %vm15769_vm5, %v15768_v13 }
 0x610   : > { %14791 = vmatprep.mubr.msk.bf16.mxu1 %vm15769_vm5, %v15768_v13 }
 0x616   : > { %14776 = vmatmul.mubr.msk.bf16.vlgmr.msra.gmra.mrb[52].mxu0 %vm9472_vm7, %v10662_v29 }
 0x617   : > { %14792 = vmatmul.mubr.msk.bf16.vlgmr.msra.gmra.mrb[184].mxu1 %vm9472_vm7, %v10755_v24  ;;  %14804 = vmatpush3.bf16.msra.mxu0 %v15668_v56  ;;  %v10756_v24 = vpack.c.bf16 %v18509_v17, %v18463_v5  ;;  %v10664_v5 = vpack.c.bf16 %v10661_v2, %v10660_v10  ;;  %v15674_v17 = vld [vmem:[%s18955_s7] sm:$0xff]  }
 0x618   : > { %14779 = vmatprep.mubr.msk.bf16.mxu0 %vm15769_vm5, %v15768_v13  ;;  %14795 = vmatprep.mubr.msk.bf16.mxu1 %vm15769_vm5, %v15768_v13 }
 0x619   : > { %14805 = vmatprep.subr.bf16.mxu0 %v15768_v13  ;;  %14820 = vmatpush3.bf16.msra.mxu1 %v15670_v40 }
 0x61a   : > { %14821 = vmatprep.subr.bf16.mxu1 %v15768_v13 }
 0x61b   : > { %14806 = vmatpush3.bf16.msra.mxu0 %v15669_v54 }
 0x61c   : > { %14835 = vmatprep.subr.bf16.mxu0 %v15768_v13 }
 0x61d   : > { %14822 = vmatpush3.bf16.msra.mxu1 %v15671_v44 }
 0x61e   : > { %14780 = vmatmul.mubr.msk.bf16.gmra.mrb[56].mxu0 %vm9472_vm7, %v10663_v43  ;;  %14851 = vmatprep.subr.bf16.mxu1 %v15768_v13 }
 0x61f   : > { %14796 = vmatmul.mubr.msk.bf16.gmra.mrb[188].mxu1 %vm9472_vm7, %v10756_v24  ;;  %14783 = vmatprep.mubr.msk.bf16.mxu0 %vm15769_vm5, %v15768_v13 }
 0x620   : > { %14799 = vmatprep.mubr.msk.bf16.mxu1 %vm15769_vm5, %v15768_v13 }
 0x626   : > { %14784 = vmatmul.mubr.msk.bf16.gmra.mrb[60].mxu0 %vm9472_vm7, %v10664_v5 }
 0x627   : > { %14800 = vmatmul.mubr.msk.bf16.gmra.mrb[192].mxu1 %vm9472_vm7, %v10757_v21  ;;  %14807 = vmatprep.mubr.msk.bf16.mxu0 %vm15769_vm5, %v15768_v13 }
 0x628   : > { %14823 = vmatprep.mubr.msk.bf16.mxu1 %vm15769_vm5, %v15768_v13 }
 0x62e   : > { %14808 = vmatmul.mubr.msk.bf16.vlgmr.msra.gmra.mrb[64].mxu0 %vm9472_vm7, %v18453_v63 }
 0x62f   : > { %14824 = vmatmul.mubr.msk.bf16.vlgmr.msra.gmra.mrb[196].mxu1 %vm9472_vm7, %v10324_v58  ;;  %14836 = vmatpush3.bf16.msra.mxu0 %v15672_v19 }
 0x630   : > { %14811 = vmatprep.mubr.msk.bf16.mxu0 %vm15769_vm5, %v15768_v13  ;;  %14827 = vmatprep.mubr.msk.bf16.mxu1 %vm15769_vm5, %v15768_v13 }
 0x631   : > { %14837 = vmatprep.subr.bf16.mxu0 %v15768_v13  ;;  %14852 = vmatpush3.bf16.msra.mxu1 %v15674_v17 }
 0x632   : > { %14853 = vmatprep.subr.bf16.mxu1 %v15768_v13 }
 0x633   : > { %14838 = vmatpush3.bf16.msra.mxu0 %v15673_v33 }
 0x634   : > { %14863 = vmatprep.subr.bf16.mxu0 %v15768_v13 }
 0x635   : > { %14854 = vmatpush3.bf16.msra.mxu1 %v15675_v61 }
 0x636   : > { %14812 = vmatmul.mubr.msk.bf16.gmra.mrb[68].mxu0 %vm9472_vm7, %v10849_v49  ;;  %14855 = vmatprep.subr.bf16.mxu1 %v15768_v13 }
 0x637   : > { %14828 = vmatmul.mubr.msk.bf16.gmra.mrb[200].mxu1 %vm9472_vm7, %v10942_v47  ;;  %v10468_v63 = vpop.f32.mrb[160].mxu1  ;;  %14815 = vmatprep.mubr.msk.bf16.mxu0 %vm15769_vm5, %v15768_v13 }
 0x638   : > { %14831 = vmatprep.mubr.msk.bf16.mxu1 %vm15769_vm5, %v15768_v13  ;;  %v14729_v8 = vpop.f32.mrb[161].mxu1 }
 0x639   : > { %v10471_v15 = vpop.f32.mrb[162].mxu1  ;;  %14856 = vmatpush3.bf16.msra.mxu1 %v15676_v53 }
 0x63a   : > { %v14730_v42 = vpop.f32.mrb[163].mxu1  ;;  %14857 = vmatprep.subr.bf16.mxu1 %v15768_v13 }
 0x63d   : > { %14858 = vmatpush3.bf16.msra.mxu1 %v15677_v50 }
 0x63e   : > { %v10390_v18 = vpop.f32.mrb[28].mxu0  ;;  %14816 = vmatmul.mubr.msk.bf16.gmra.mrb[72].mxu0 %vm9472_vm7, %v10850_v11  ;;  %14875 = vmatprep.subr.bf16.mxu1 %v15768_v13 }
 0x63f   : > { %14832 = vmatmul.mubr.msk.bf16.gmra.mrb[204].mxu1 %vm9472_vm7, %v10943_v41  ;;  %v18622_v45 = vadd.f32 %v10468_v63, %v10390_v18  ;;  %v14713_v38 = vpop.f32.mrb[29].mxu0  ;;  %14839 = vmatprep.mubr.msk.bf16.mxu0 %vm15769_vm5, %v15768_v13 }
 0x640   : > { %14859 = vmatprep.mubr.msk.bf16.mxu1 %vm15769_vm5, %v15768_v13  ;;  %v10393_v6 = vpop.f32.mrb[30].mxu0 }
 0x641   : > { %v18628_v60 = vadd.f32 %v10471_v15, %v10393_v6  ;;  %v14714_v51 = vpop.f32.mrb[31].mxu0 }
 0x646   : > { %14840 = vmatmul.mubr.msk.bf16.vlgmr.msra.gmra.mrb[76].mxu0 %vm9472_vm7, %v18467_v32 }
 0x647   : > { %14843 = vmatprep.mubr.msk.bf16.mxu0 %vm15769_vm5, %v15768_v13  ;;  %v10476_v23 = vpop.f32.mrb[164].mxu1 }
 0x648   : > { %v14733_v55 = vpop.f32.mrb[165].mxu1 }
 0x649   : > { %v10479_v46 = vpop.f32.mrb[166].mxu1 }
 0x64a   : > { %v14734_v34 = vpop.f32.mrb[167].mxu1 }
 0x64d   : > { %v10398_v0 = vpop.f32.mrb[32].mxu0 }
 0x64e   : > { %14844 = vmatmul.mubr.msk.bf16.gmra.mrb[80].mxu0 %vm9472_vm7, %v11035_v30  ;;  %v18636_v37 = vadd.f32 %v10476_v23, %v10398_v0  ;;  %v14717_v22 = vpop.f32.mrb[33].mxu0 }
 0x64f   : > { %14847 = vmatprep.mubr.msk.bf16.mxu0 %vm15769_vm5, %v15768_v13  ;;  %v10401_v12 = vpop.f32.mrb[34].mxu0 }
 0x650   : > { %v18640_v32 = vadd.f32 %v10479_v46, %v10401_v12  ;;  %v14718_v57 = vpop.f32.mrb[35].mxu0 }
 0x656   : > { %14848 = vmatmul.mubr.msk.bf16.gmra.mrb[84].mxu0 %vm9472_vm7, %v11036_v3 }
 0x657   : > { %14871 = vmatprep.mubr.msk.bf16.mxu0 %vm15769_vm5, %v15768_v13 }
 0x6c9   : > { %v10406_v20 = vpop.f32.mrb[36].mxu0 }
 0x6ca   : > { %v10484_v25 = vpop.f32.mrb[168].mxu1  ;;  %v14721_v7 = vpop.f32.mrb[37].mxu0 }
 0x6cb   : > { %v18656_v1 = vadd.f32 %v10484_v25, %v10406_v20  ;;  %v14737_v9 = vpop.f32.mrb[169].mxu1  ;;  %v10409_v36 = vpop.f32.mrb[38].mxu0 }
 0x6cc   : > { %v10487_v58 = vpop.f32.mrb[170].mxu1  ;;  %v14722_v16 = vpop.f32.mrb[39].mxu0 }
 0x6cd   : > { %v18658_v35 = vadd.f32 %v10487_v58, %v10409_v36  ;;  %v14738_v26 = vpop.f32.mrb[171].mxu1 }
 0x6d1   : > { %v10555_v27 = vpop.f32.mrb[40].mxu0 }
 0x6d2   : > { %v10633_v48 = vpop.f32.mrb[172].mxu1  ;;  %v14745_v29 = vpop.f32.mrb[41].mxu0 }
 0x6d3   : > { %v10634_v56 = vadd.f32 %v10633_v48, %v10555_v27  ;;  %v14761_v40 = vpop.f32.mrb[173].mxu1  ;;  %v10558_v54 = vpop.f32.mrb[42].mxu0 }
 0x6d4   : > { %v10636_v44 = vpop.f32.mrb[174].mxu1  ;;  %v14746_v24 = vpop.f32.mrb[43].mxu0 }
 0x6d5   : > { %v10637_v43 = vadd.f32 %v10636_v44, %v10558_v54  ;;  %v14762_v2 = vpop.f32.mrb[175].mxu1 }
 0x6d9   : > { %v10563_v59 = vpop.f32.mrb[44].mxu0 }
 0x6da   : > { %v10641_v4 = vpop.f32.mrb[176].mxu1  ;;  %v14749_v5 = vpop.f32.mrb[45].mxu0 }
 0x6db   : > { %v10642_v10 = vadd.f32 %v10641_v4, %v10563_v59  ;;  %v14765_v21 = vpop.f32.mrb[177].mxu1  ;;  %v10566_v19 = vpop.f32.mrb[46].mxu0 }
 0x6dc   : > { %v10644_v33 = vpop.f32.mrb[178].mxu1  ;;  %v14750_v47 = vpop.f32.mrb[47].mxu0 }
 0x6dd   : > { %v10645_v49 = vadd.f32 %v10644_v33, %v10566_v19  ;;  %v14766_v63 = vpop.f32.mrb[179].mxu1 }
 0x6e1   : > { %v10571_v8 = vpop.f32.mrb[48].mxu0 }
 0x6e2   : > { %v10649_v14 = vpop.f32.mrb[180].mxu1  ;;  %v14753_v31 = vpop.f32.mrb[49].mxu0 }
 0x6e3   : > { %v10650_v15 = vadd.f32 %v10649_v14, %v10571_v8  ;;  %v14769_v28 = vpop.f32.mrb[181].mxu1  ;;  %v10574_v62 = vpop.f32.mrb[50].mxu0 }
 0x6e4   : > { %v10652_v42 = vpop.f32.mrb[182].mxu1  ;;  %v14754_v41 = vpop.f32.mrb[51].mxu0 }
 0x6e5   : > { %v10653_v11 = vadd.f32 %v10652_v42, %v10574_v62  ;;  %v14770_v18 = vpop.f32.mrb[183].mxu1 }
 0x6e9   : > { %v10720_v38 = vpop.f32.mrb[52].mxu0 }
 0x6ea   : > { %v10813_v6 = vpop.f32.mrb[184].mxu1  ;;  %v10743_v51 = vadd.f32 %v10720_v38, %v18622_v45  ;;  %v14777_v55 = vpop.f32.mrb[53].mxu0 }
 0x6eb   : > { %v10836_v23 = vadd.f32 %v10813_v6, %v10634_v56  ;;  %v14793_v46 = vpop.f32.mrb[185].mxu1  ;;  %v10723_v34 = vpop.f32.mrb[54].mxu0 }
 0x6ec   : > { %v10816_v30 = vpop.f32.mrb[186].mxu1  ;;  %v10744_v0 = vadd.f32 %v10723_v34, %v18628_v60  ;;  %v14778_v12 = vpop.f32.mrb[55].mxu0 }
 0x6ed   : > { %v10837_v22 = vadd.f32 %v10816_v30, %v10637_v43  ;;  %v14794_v57 = vpop.f32.mrb[187].mxu1 }
 0x6f1   : > { %v10728_v52 = vpop.f32.mrb[56].mxu0 }
 0x6f2   : > { %v10821_v39 = vpop.f32.mrb[188].mxu1  ;;  %v10745_v3 = vadd.f32 %v10728_v52, %v18636_v37  ;;  %v14781_v61 = vpop.f32.mrb[57].mxu0  ;;  %v12755_v52 = vld [vmem:[%s18954_s6] ss:$0 sm:$0xff] }
 0x6f3   : > { %v10838_v17 = vadd.f32 %v10821_v39, %v10642_v10  ;;  %v14797_v53 = vpop.f32.mrb[189].mxu1  ;;  %v10731_v20 = vpop.f32.mrb[58].mxu0 }
 0x6f4   : > { %v10824_v25 = vpop.f32.mrb[190].mxu1  ;;  %v10746_v45 = vadd.f32 %v10731_v20, %v18640_v32  ;;  %v14782_v9 = vpop.f32.mrb[59].mxu0 }
 0x6f5   : > { %v10839_v7 = vadd.f32 %v10824_v25, %v10645_v49  ;;  %v14798_v36 = vpop.f32.mrb[191].mxu1 }
 0x6f9   : > { %v10736_v58 = vpop.f32.mrb[60].mxu0 }
 0x6fa   : > { %v10829_v16 = vpop.f32.mrb[192].mxu1  ;;  %v10747_v60 = vadd.f32 %v10736_v58, %v18656_v1  ;;  %v14785_v50 = vpop.f32.mrb[61].mxu0 }
 0x6fb   : > { %v10840_v26 = vadd.f32 %v10829_v16, %v10650_v15  ;;  %v14801_v27 = vpop.f32.mrb[193].mxu1  ;;  %v10739_v48 = vpop.f32.mrb[62].mxu0 }
 0x6fc   : > { %v10832_v56 = vpop.f32.mrb[194].mxu1  ;;  %v10748_v37 = vadd.f32 %v10739_v48, %v18658_v35  ;;  %v14786_v40 = vpop.f32.mrb[63].mxu0 }
 0x6fd   : > { %v10841_v29 = vadd.f32 %v10832_v56, %v10653_v11  ;;  %v14802_v54 = vpop.f32.mrb[195].mxu1 }
 0x701   : > { %v10906_v44 = vpop.f32.mrb[64].mxu0 }
 0x702   : > { %v10999_v43 = vpop.f32.mrb[196].mxu1  ;;  %v10929_v32 = vadd.f32 %v10906_v44, %v10743_v51  ;;  %v14809_v2 = vpop.f32.mrb[65].mxu0 }
 0x703   : > { %v11022_v24 = vadd.f32 %v10999_v43, %v10836_v23  ;;  %v14825_v59 = vpop.f32.mrb[197].mxu1  ;;  %v10909_v4 = vpop.f32.mrb[66].mxu0 }
 0x704   : > { %v11002_v10 = vpop.f32.mrb[198].mxu1  ;;  %v10930_v5 = vadd.f32 %v10909_v4, %v10744_v0  ;;  %v14810_v21 = vpop.f32.mrb[67].mxu0 }
 0x705   : > { %v11023_v1 = vadd.f32 %v11002_v10, %v10837_v22  ;;  %v14826_v19 = vpop.f32.mrb[199].mxu1 }
 0x709   : > { %v10914_v33 = vpop.f32.mrb[68].mxu0 }
 0x70a   : > { %v11007_v49 = vpop.f32.mrb[200].mxu1  ;;  %v10931_v47 = vadd.f32 %v10914_v33, %v10745_v3  ;;  %v14813_v35 = vpop.f32.mrb[69].mxu0 }
 0x70b   : > { %v11024_v63 = vadd.f32 %v11007_v49, %v10838_v17  ;;  %v14829_v8 = vpop.f32.mrb[201].mxu1  ;;  %v10917_v14 = vpop.f32.mrb[70].mxu0 }
 0x70c   : > { %v11010_v15 = vpop.f32.mrb[202].mxu1  ;;  %v10932_v31 = vadd.f32 %v10917_v14, %v10746_v45  ;;  %v14814_v62 = vpop.f32.mrb[71].mxu0 }
 0x70d   : > { %v11025_v28 = vadd.f32 %v11010_v15, %v10839_v7  ;;  %v14830_v42 = vpop.f32.mrb[203].mxu1 }
 0x711   : > { %v10922_v11 = vpop.f32.mrb[72].mxu0 }
 0x712   : > { %v11015_v41 = vpop.f32.mrb[204].mxu1  ;;  %v10933_v18 = vadd.f32 %v10922_v11, %v10747_v60  ;;  %v14817_v6 = vpop.f32.mrb[73].mxu0 }
 0x713   : > { %v11026_v38 = vadd.f32 %v11015_v41, %v10840_v26  ;;  %v14833_v51 = vpop.f32.mrb[205].mxu1  ;;  %v10925_v23 = vpop.f32.mrb[74].mxu0 }
 0x714   : > { %v11018_v55 = vpop.f32.mrb[206].mxu1  ;;  %v10934_v46 = vadd.f32 %v10925_v23, %v10748_v37  ;;  %v14818_v30 = vpop.f32.mrb[75].mxu0 }
 0x715   : > { %v11027_v34 = vadd.f32 %v11018_v55, %v10841_v29  ;;  %v14834_v0 = vpop.f32.mrb[207].mxu1 }
 0x719   : > { %v11092_v22 = vpop.f32.mrb[76].mxu0 }
 0x71a   : > { %v11115_v12 = vadd.f32 %v11092_v22, %v10929_v32  ;;  %v14841_v57 = vpop.f32.mrb[77].mxu0 }
 0x71b   : > { %v11095_v39 = vpop.f32.mrb[78].mxu0  ;;  %v12756_v57 = vld [vmem:[%s18956_s8] ss:$0 sm:$0xff] }
 0x71c   : > { %v11121_v3 = vadd.f32 %v11115_v12, %v11022_v24  ;;  %v11116_v17 = vadd.f32 %v11095_v39, %v10930_v5  ;;  %v14842_v61 = vpop.f32.mrb[79].mxu0 }
 0x71e   : > { %v11133_v53 = vadd.f32 %v12755_v52, %v11121_v3  ;;  %v11122_v20 = vadd.f32 %v11116_v17, %v11023_v1 }
 0x720   : > { %v11139_v25 = vmax.f32 %v11133_v53, 0.0  ;;  %v11134_v45 = vadd.f32 %v12755_v52, %v11122_v20 }
 0x721   : > { %v11100_v7 = vpop.f32.mrb[80].mxu0 }
 0x722   : > { %11146 = vst.msk [vmem:[#allocation6] sm:$0xff] %vm11145_vm9, %v11139_v25  ;;  %v11140_v9 = vmax.f32 %v11134_v45, 0.0  ;;  %v11117_v36 = vadd.f32 %v11100_v7, %v10931_v47  ;;  %v14845_v58 = vpop.f32.mrb[81].mxu0 }
 0x723   : > { %v11103_v16 = vpop.f32.mrb[82].mxu0 }
 0x724   : > { %11147 = vst.msk [vmem:[#allocation6 + $0x8] sm:$0xff] %vm11145_vm9, %v11140_v9  ;;  %v11123_v60 = vadd.f32 %v11117_v36, %v11024_v63  ;;  %v11118_v26 = vadd.f32 %v11103_v16, %v10932_v31  ;;  %v14846_v50 = vpop.f32.mrb[83].mxu0 }
 0x726   : > { %v11135_v27 = vadd.f32 %v12755_v52, %v11123_v60  ;;  %v11124_v48 = vadd.f32 %v11118_v26, %v11025_v28 }
 0x728   : > { %v11141_v56 = vmax.f32 %v11135_v27, 0.0  ;;  %v11136_v37 = vadd.f32 %v12755_v52, %v11124_v48 }
 0x729   : > { %v11153_v29 = vld [vmem:[#allocation6] ss:$2 sm:$0x7]  ;;  %v11155_v40 = vld [vmem:[#allocation6 + $0x1] ss:$2 sm:$0x7] }
 0x72a   : > { %11148 = vst.msk [vmem:[#allocation6 + $0x10] sm:$0xff] %vm11145_vm9, %v11141_v56  ;;  %v11142_v54 = vmax.f32 %v11136_v37, 0.0  ;;  %v11108_v44 = vpop.f32.mrb[84].mxu0  ;;  %v11160_v2 = vmax.f32 %v11153_v29, %v11155_v40 }
 0x72b   : > { %v11157_v43 = vld [vmem:[#allocation6 + $0x8] ss:$2 sm:$0x7]  ;;  %v11159_v32 = vld [vmem:[#allocation6 + $0x9] ss:$2 sm:$0x7]  ;;  %v11119_v24 = vadd.f32 %v11108_v44, %v10933_v18 }
 0x72c   : > { %v11161_v59 = vmax.f32 %v11157_v43, %v11159_v32  ;;  %11149 = vst.msk [vmem:[#allocation6 + $0x18] sm:$0xff] %vm11145_vm9, %v11142_v54  ;;  %v14849_v4 = vpop.f32.mrb[85].mxu0 }
 0x72d   : > { %v11125_v10 = vadd.f32 %v11119_v24, %v11026_v38  ;;  %v11111_v5 = vpop.f32.mrb[86].mxu0 }
 0x72e   : > { %v11162_v1 = vmax.f32 %v11160_v2, %v11161_v59  ;;  %v11120_v21 = vadd.f32 %v11111_v5, %v10934_v46  ;;  %v14850_v19 = vpop.f32.mrb[87].mxu0 }
 0x72f   : > { %v11137_v33 = vadd.f32 %v12755_v52, %v11125_v10 }
 0x730   : > { %11164 = vst.msk [vmem:[#allocation7] sm:$0x7] %vm11163_vm10, %v11162_v1  ;;  %v11126_v49 = vadd.f32 %v11120_v21, %v11027_v34 }
 0x731   : > { %v11166_v47 = vld [vmem:[#allocation6 + $0x10] ss:$2 sm:$0x7]  ;;  %v11168_v63 = vld [vmem:[#allocation6 + $0x11] ss:$2 sm:$0x7] }
 0x732   : > { %v11143_v35 = vmax.f32 %v11137_v33, 0.0  ;;  %v11138_v8 = vadd.f32 %v12755_v52, %v11126_v49  ;;  %v11173_v31 = vmax.f32 %v11166_v47, %v11168_v63 }
 0x733   : > { %v11170_v14 = vld [vmem:[#allocation6 + $0x18] ss:$2 sm:$0x7]  ;;  %v11172_v15 = vld [vmem:[#allocation6 + $0x19] ss:$2 sm:$0x7] }
 0x734   : > { %v11174_v28 = vmax.f32 %v11170_v14, %v11172_v15  ;;  %11150 = vst.msk [vmem:[#allocation6 + $0x20] sm:$0xff] %vm11145_vm9, %v11143_v35  ;;  %v11144_v62 = vmax.f32 %v11138_v8, 0.0 }
 0x736   : > { %v11175_v42 = vmax.f32 %v11173_v31, %v11174_v28  ;;  %11152 = vst.msk [vmem:[#allocation6 + $0x28] sm:$0x3f] %vm11151_vm11, %v11144_v62 }
 0x738   : > { %11176 = vst.msk [vmem:[#allocation7 + $0x3] sm:$0x7] %vm11163_vm10, %v11175_v42 }
 0x73b   : > { %v11178_v11 = vld [vmem:[#allocation6 + $0x20] ss:$2 sm:$0x7]  ;;  %v11180_v41 = vld [vmem:[#allocation6 + $0x21] ss:$2 sm:$0x7] }
 0x73c   : > { %v11185_v6 = vmax.f32 %v11178_v11, %v11180_v41 }
 0x73d   : > { %v11182_v18 = vld [vmem:[#allocation6 + $0x28] ss:$2 sm:$0x7]  ;;  %v11184_v38 = vld [vmem:[#allocation6 + $0x29] ss:$2 sm:$0x7] }
 0x73e   : > { %v11186_v51 = vmax.f32 %v11182_v18, %v11184_v38  ;;  %v15680_v18 = vld [vmem:[%s18957_s9] sm:$0xff]  }
 0x73f   : > { %v15678_v38 = vld [vmem:[%s18957_s9 + $0x40] sm:$0xff]  }
 0x740   : > { %v11187_v23 = vmax.f32 %v11185_v6, %v11186_v51  ;;  %14864 = vmatpush3.bf16.msra.mxu0 %v15678_v38  ;;  %v15681_v6 = vld [vmem:[%s18957_s9 + $0x8] sm:$0xff]  }
 0x741   : > { %14865 = vmatprep.subr.bf16.mxu0 %v15768_v13  ;;  %v15679_v51 = vld [vmem:[%s18957_s9 + $0x48] sm:$0xff]  }
 0x742   : > { %11188 = vst.msk [vmem:[#allocation7 + $0x6] sm:$0x7] %vm11163_vm10, %v11187_v23  ;;  %v15683_v23 = vld [vmem:[%s18957_s9 + $0x10] sm:$0xff]  }
 0x744   : > { %14866 = vmatpush3.bf16.msra.mxu0 %v15679_v51  ;;  %v15717_v51 = vld [vmem:[%s18959_s11 + $0x18] sm:$0xff]  }
 0x745   : > { %14867 = vmatprep.subr.bf16.mxu0 %v15768_v13 }
 0x749   : > { %v18682_v55 = vld [vmem:[#allocation7] sm:$0xff]  ;;  %v18684_v46 = vld [vmem:[#allocation7 + $0x8] sm:$0x1] }
 0x74a   : > { %v11191_v34 = vpack.c.bf16 %v18684_v46, %v18682_v55  ;;  %v11276_v30 = vmul.f32 %v18684_v46, %v18684_v46  ;;  %v11275_v0 = vmul.f32 %v18682_v55, %v18682_v55 }
 0x74c   : > { %14860 = vmatmul.mubr.msk.bf16.vlgmr.msra.gmra.mrb[208].mxu1 %vm11145_vm9, %v11191_v34  ;;  %v11281_v22 = vsel %vm11280_vm12, %v11276_v30, 0.0  ;;  %v11277_v12 = vsel %vm11145_vm9, %v11275_v0, 0.0  ;;  %v15682_v34 = vld [vmem:[%s18957_s9 + $0x50] sm:$0xff]   ;;  %v15685_v30 = vld [vmem:[%s18957_s9 + $0x18] sm:$0xff]  }
 0x74d   : > { %11282 = vadd.xlane.f32.xlu1 %v11281_v22  ;;  %11278 = vadd.xlane.f32.xlu0 %v11277_v12  ;;  %v15684_v0 = vld [vmem:[%s18957_s9 + $0x58] sm:$0xff]  }
 0x74e   : > { %14883 = vmatprep.mubr.msk.bf16.mxu1 %vm15769_vm5, %v15768_v13  ;;  %14876 = vmatpush3.bf16.msra.mxu1 %v15680_v18 }
 0x74f   : > { %14877 = vmatprep.subr.bf16.mxu1 %v15768_v13  ;;  %14868 = vmatpush3.bf16.msra.mxu0 %v15682_v34  ;;  %v15719_v34 = vld [vmem:[%s18959_s11 + $0x28] sm:$0xff]  }
 0x750   : > { %14869 = vmatprep.subr.bf16.mxu0 %v15768_v13 }
 0x752   : > { %14878 = vmatpush3.bf16.msra.mxu1 %v15681_v6  ;;  %v15716_v6 = vld [vmem:[%s18959_s11 + $0x10] sm:$0xff]  }
 0x753   : > { %14879 = vmatprep.subr.bf16.mxu1 %v15768_v13  ;;  %14870 = vmatpush3.bf16.msra.mxu0 %v15684_v0  ;;  %v15721_v0 = vld [vmem:[%s18959_s11 + $0x38] sm:$0xff]  }
 0x754   : > { %14887 = vmatprep.subr.bf16.mxu0 %v15768_v13 }
 0x756   : > { %14880 = vmatpush3.bf16.msra.mxu1 %v15683_v23  ;;  %v15718_v23 = vld [vmem:[%s18959_s11 + $0x20] sm:$0xff]  }
 0x757   : > { %14881 = vmatprep.subr.bf16.mxu1 %v15768_v13 }
 0x75a   : > { %14882 = vmatpush3.bf16.msra.mxu1 %v15685_v30  ;;  %v15720_v30 = vld [vmem:[%s18959_s11 + $0x30] sm:$0xff]  }
 0x75b   : > { %14899 = vmatprep.subr.bf16.mxu1 %v15768_v13 }
 0x7da   : > { %v11279_v9 = vpop.xlane.xlu0 %11278  ;;  %v11283_v36 = vpop.xlane.xlu1 %11282 }
 0x7db   : > { %15722 = vrsqrt.f32 %v11279_v9  ;;  %vm11286_vm13 = vcmp.eq.f32.partialorder %v11279_v9, inf  ;;  %vm11293_vm14 = vcmp.eq.f32.partialorder %v11283_v36, inf  ;;  %v11289_v37 = vand.u32 2147483648, %v11279_v9 }
 0x7dc   : > { %15724 = vrsqrt.f32 %v11283_v36  ;;  %v11296_v29 = vand.u32 2147483648, %v11283_v36  ;;  %vm11288_vm15 = vcmp.eq.f32.partialorder %v11279_v9, 0.0  ;;  %vm11295_vm0 = vcmp.eq.f32.partialorder %v11283_v36, 0.0 }
 0x7e5   : > { %v15723_v58 = vpop.eup %15722 }
 0x7e6   : > { %v15725_v16 = vpop.eup %15724  ;;  %v11285_v26 = vmul.f32 %v15723_v58, %v11279_v9  ;;  %v15690_v58 = vld [vmem:[%s18957_s9 + $0x30] sm:$0xff]  }
 0x7e7   : > { %v11292_v27 = vmul.f32 %v15725_v16, %v11283_v36  ;;  %v15691_v16 = vld [vmem:[%s18957_s9 + $0x70] sm:$0xff]  }
 0x7e8   : > { %v11287_v48 = vsel %vm11286_vm13, %v11279_v9, %v11285_v26  ;;  %v15687_v9 = vld [vmem:[%s18957_s9 + $0x60] sm:$0xff]   ;;  %v15693_v26 = vld [vmem:[%s18957_s9 + $0x78] sm:$0xff]  }
 0x7e9   : > { %v11294_v56 = vsel %vm11293_vm14, %v11283_v36, %v11292_v27  ;;  %v11290_v40 = vsel %vm11288_vm15, %v11289_v37, %v11287_v48  ;;  %v15694_v27 = vld [vmem:[%s18957_s9 + $0xa0] sm:$0xff]  }
 0x7ea   : > { %v11297_v54 = vsel %vm11295_vm0, %v11296_v29, %v11294_v56  ;;  %v11298_v43 = vmax.f32 %v11290_v40, 1e-12  ;;  %v15695_v56 = vld [vmem:[%s18957_s9 + $0x80] sm:$0xff]   ;;  %v15696_v29 = vld [vmem:[%s18957_s9 + $0xa8] sm:$0xff]  }
 0x7eb   : > { %v11299_v2 = vmax.f32 %v11297_v54, 1e-12  ;;  %v15697_v54 = vld [vmem:[%s18957_s9 + $0x88] sm:$0xff]  }
 0x81f   : > { %v11268_v52 = vpop.f32.mrb[208].mxu1 }
 0x820   : > { %v18700_v39 = vadd.f32 %v12756_v57, %v11268_v52  ;;  %v14861_v3 = vpop.f32.mrb[209].mxu1 }
 0x821   : > { %v11271_v17 = vpop.f32.mrb[210].mxu1 }
 0x822   : > { %v18702_v61 = vadd.f32 %v12756_v57, %v11271_v17  ;;  %v14862_v53 = vpop.f32.mrb[211].mxu1  ;;  %v11304_v20 = vmul.f32 %v18700_v39, %v18700_v39 }
 0x824   : > { %v11306_v25 = vsel %vm11145_vm9, %v11304_v20, 0.0  ;;  %v11305_v45 = vmul.f32 %v18702_v61, %v18702_v61 }
 0x825   : > { %11307 = vadd.xlane.f32.xlu0 %v11306_v25 }
 0x826   : > { %v11309_v7 = vsel %vm11280_vm12, %v11305_v45, 0.0  ;;  %v15686_v45 = vld [vmem:[%s18957_s9 + $0x20] sm:$0xff]  }
 0x827   : > { %11310 = vadd.xlane.f32.xlu1 %v11309_v7 }
 0x8b2   : > { %v11308_v60 = vpop.xlane.xlu0 %11307 }
 0x8b3   : > { %15726 = vrsqrt.f32 %v11308_v60  ;;  %vm11314_vm1 = vcmp.eq.f32.partialorder %v11308_v60, inf  ;;  %v11317_v59 = vand.u32 2147483648, %v11308_v60  ;;  %vm11316_vm2 = vcmp.eq.f32.partialorder %v11308_v60, 0.0 }
 0x8b4   : > { %v11311_v50 = vpop.xlane.xlu1 %11310 }
 0x8b5   : > { %15728 = vrsqrt.f32 %v11311_v50  ;;  %vm11321_vm3 = vcmp.eq.f32.partialorder %v11311_v50, inf  ;;  %v11324_v1 = vand.u32 2147483648, %v11311_v50  ;;  %vm11323_vm4 = vcmp.eq.f32.partialorder %v11311_v50, 0.0 }
 0x8b6   : > { %15730 = vrcp.f32 %v11298_v43  ;;  %v15699_v43 = vld [vmem:[%s18957_s9 + $0x90] sm:$0xff]  }
 0x8b7   : > { %15732 = vrcp.f32 %v11299_v2  ;;  %v15702_v2 = vld [vmem:[%s18957_s9 + $0xe0] sm:$0xff]  }
 0x8bd   : > { %v15727_v44 = vpop.eup %15726 }
 0x8be   : > { %v11313_v32 = vmul.f32 %v15727_v44, %v11308_v60  ;;  %v15698_v44 = vld [vmem:[%s18957_s9 + $0xb0] sm:$0xff]  }
 0x8bf   : > { %v15729_v24 = vpop.eup %15728 }
 0x8c0   : > { %v11315_v4 = vsel %vm11314_vm1, %v11308_v60, %v11313_v32  ;;  %v11320_v10 = vmul.f32 %v15729_v24, %v11311_v50  ;;  %v15731_v47 = vpop.eup %15730  ;;  %v15692_v60 = vld [vmem:[%s18957_s9 + $0x38] sm:$0xff]  }
 0x8c1   : > { %v11318_v5 = vsel %vm11316_vm2, %v11317_v59, %v11315_v4  ;;  %v15733_v63 = vpop.eup %15732  ;;  %v11301_v8 = vmul.f32 %v15731_v47, %v18682_v55  ;;  %v15700_v32 = vld [vmem:[%s18957_s9 + $0xb8] sm:$0xff]   ;;  %v15703_v4 = vld [vmem:[%s18957_s9 + $0xc0] sm:$0xff]  }
 0x8c2   : > { %v11326_v21 = vmax.f32 %v11318_v5, 1e-12  ;;  %v11322_v19 = vsel %vm11321_vm3, %v11311_v50, %v11320_v10  ;;  %v11303_v28 = vmul.f32 %v15733_v63, %v18684_v46  ;;  %v15701_v24 = vld [vmem:[%s18957_s9 + $0x98] sm:$0xff]  }
 0x8c3   : > { %v11325_v33 = vsel %vm11323_vm4, %v11324_v1, %v11322_v19  ;;  %v15704_v1 = vld [vmem:[%s18957_s9 + $0xe8] sm:$0xff]   ;;  %v15708_v47 = vld [vmem:[%s18957_s9 + $0xf8] sm:$0xff]  }
 0x8c4   : > { %15734 = vrcp.f32 %v11326_v21  ;;  %v11327_v49 = vmax.f32 %v11325_v33, 1e-12  ;;  %v15705_v19 = vld [vmem:[%s18957_s9 + $0xc8] sm:$0xff]   ;;  %v15706_v33 = vld [vmem:[%s18957_s9 + $0xf0] sm:$0xff]   ;;  %v15709_v63 = vld [vmem:[%s18957_s9 + $0xd8] sm:$0xff]  }
 0x8c6   : > { %15736 = vrcp.f32 %v11327_v49  ;;  %v15707_v49 = vld [vmem:[%s18957_s9 + $0xd0] sm:$0xff]  }
 0x8ce   : > { %v15735_v35 = vpop.eup %15734 }
 0x8cf   : > { %v11329_v14 = vmul.f32 %v15735_v35, %v18700_v39 }
 0x8d0   : > { %v15737_v15 = vpop.eup %15736 }
 0x8d1   : > { %v11332_v31 = vmul.f32 %v11329_v14, %v11301_v8  ;;  %v11331_v62 = vmul.f32 %v15737_v15, %v18702_v61  ;;  %v15710_v8 = vld [vmem:[%s18957_s9 + $0x100] sm:$0xff]  }
 0x8d3   : > { %v11334_v42 = vsel %vm11145_vm9, %v11332_v31, 0.0  ;;  %v11333_v11 = vmul.f32 %v11331_v62, %v11303_v28  ;;  %v15711_v31 = vld [vmem:[%s18957_s9 + $0x108] sm:$0xff]   ;;  %v15712_v62 = vld [vmem:[%s18957_s9 + $0x110] sm:$0xff]  }
 0x8d4   : > { %11335 = vadd.xlane.f32.xlu0 %v11334_v42 }
 0x8d5   : > { %v11337_v41 = vsel %vm11280_vm12, %v11333_v11, 0.0 }
 0x8d6   : > { %11338 = vadd.xlane.f32.xlu1 %v11337_v41  ;;  %v15713_v41 = vld [vmem:[%s18957_s9 + $0x118] sm:$0xff]  }
 0x961   : > { %v11336_v22 = vpop.xlane.xlu0 %11335 }
 0x962   : > { %v12762_v12 = vmul.f32 -1.442695, %v11336_v22 }
 0x963   : > { %v11339_v48 = vpop.xlane.xlu1 %11338 }
 0x964   : > { %15738 = vpow2.f32 %v12762_v12  ;;  %v12763_v40 = vmul.f32 -1.442695, %v11339_v48 }
 0x96e   : > { %v15739_v57 = vpop.eup %15738 }
 0x96f   : > { %v11346_v52 = vadd.f32 1.0, %v15739_v57 }
 0x971   : > { %15740 = vrcp.f32 %v11346_v52 }
 0x972   : > { %15742 = vpow2.f32 %v12763_v40 }
 0x97b   : > { %v15741_v3 = vpop.eup %15740 }
 0x97c   : > { %v11354_v17 = vsub.f32 1.0, %v15741_v3  ;;  %v11352_v53 = vmul.f32 %v15741_v3, %v18700_v39  ;;  %v15689_v39 = vld [vmem:[%s18957_s9 + $0x68] sm:$0xff]   ;;  %v15743_v10 = vpop.eup %15742 }
 0x97d   : > { %v11347_v21 = vadd.f32 1.0, %v15743_v10 }
 0x97e   : > { %v11356_v20 = vmul.f32 %v11354_v17, %v18682_v55  ;;  %v15688_v55 = vld [vmem:[%s18957_s9 + $0x28] sm:$0xff]  }
 0x97f   : > { %15744 = vrcp.f32 %v11347_v21 }
 0x980   : > { %v11358_v25 = vadd.f32 %v11356_v20, %v11352_v53 }
 0x982   : > { %v18753_v7 = vpack.c.bf16 %v11358_v25, %v11358_v25 }
 0x984   : > { %v11388_v36 = vrot.slane %v18753_v7, 1  ;;  %14884 = vmatmul.mubr.msk.bf16.vlgmr.msra.gmra.mrb[212].mxu1 %vm11145_vm9, %v18753_v7  ;;  %v18791_v50 = vshrl.u32 %v18753_v7, 16  ;;  %v11678_v5 = vrot.slane %v18753_v7, 2  ;;  %v11834_v14 = vrot.slane %v18753_v7, 3 }
 0x985   : > { %14900 = vmatpush3.bf16.msra.mxu1 %v15686_v45  ;;  %14907 = vmatprep.mubr.msk.bf16.mxu1 %vm15769_vm5, %v15768_v13 }
 0x986   : > { %14872 = vmatmul.mubr.msk.bf16.vlgmr.msra.gmra.mrb[88].mxu0 %vm11145_vm9, %v11388_v36  ;;  %14901 = vmatprep.subr.bf16.mxu1 %v15768_v13  ;;  %v11534_v37 = vrot.slane %v18791_v50, 1  ;;  %v11756_v59 = vrot.slane %v18791_v50, 2  ;;  %v11912_v35 = vrot.slane %v18791_v50, 3 }
 0x987   : > { %14888 = vmatpush3.bf16.msra.mxu0 %v15687_v9  ;;  %14895 = vmatprep.mubr.msk.bf16.mxu0 %vm15769_vm5, %v15768_v13 }
 0x988   : > { %14889 = vmatprep.subr.bf16.mxu0 %v15768_v13 }
 0x989   : > { %14902 = vmatpush3.bf16.msra.mxu1 %v15688_v55  ;;  %v15745_v15 = vpop.eup %15744 }
 0x98a   : > { %14903 = vmatprep.subr.bf16.mxu1 %v15768_v13  ;;  %v11355_v28 = vsub.f32 1.0, %v15745_v15  ;;  %v11353_v11 = vmul.f32 %v15745_v15, %v18702_v61  ;;  %v15715_v61 = vld [vmem:[%s18959_s11 + $0x8] sm:$0xff]  }
 0x98b   : > { %14890 = vmatpush3.bf16.msra.mxu0 %v15689_v39 }
 0x98c   : > { %14891 = vmatprep.subr.bf16.mxu0 %v15768_v13  ;;  %v11357_v42 = vmul.f32 %v11355_v28, %v18684_v46  ;;  %v15714_v46 = vld [vmem:[%s18959_s11] sm:$0xff]  }
 0x98d   : > { %14904 = vmatpush3.bf16.msra.mxu1 %v15690_v58 }
 0x98e   : > { %14905 = vmatprep.subr.bf16.mxu1 %v15768_v13  ;;  %v11359_v18 = vadd.f32 %v11357_v42, %v11353_v11 }
 0x98f   : > { %14892 = vmatpush3.bf16.msra.mxu0 %v15691_v16 }
 0x990   : > { %14893 = vmatprep.subr.bf16.mxu0 %v15768_v13  ;;  %v11981_v38 = vpack.c.bf16 %v11359_v18, %v11359_v18 }
 0x991   : > { %14906 = vmatpush3.bf16.msra.mxu1 %v15692_v60 }
 0x992   : > { %14923 = vmatprep.subr.bf16.mxu1 %v15768_v13 }
 0x993   : > { %14894 = vmatpush3.bf16.msra.mxu0 %v15693_v26 }
 0x994   : > { %14908 = vmatmul.mubr.msk.bf16.vlgmr.msra.gmra.mrb[216].mxu1 %vm11145_vm9, %v18791_v50  ;;  %14911 = vmatprep.subr.bf16.mxu0 %v15768_v13 }
 0x995   : > { %14924 = vmatpush3.bf16.msra.mxu1 %v15694_v27  ;;  %14931 = vmatprep.mubr.msk.bf16.mxu1 %vm15769_vm5, %v15768_v13 }
 0x996   : > { %14896 = vmatmul.mubr.msk.bf16.vlgmr.msra.gmra.mrb[92].mxu0 %vm11145_vm9, %v11534_v37  ;;  %14925 = vmatprep.subr.bf16.mxu1 %v15768_v13 }
 0x997   : > { %14912 = vmatpush3.bf16.msra.mxu0 %v15695_v56  ;;  %14919 = vmatprep.mubr.msk.bf16.mxu0 %vm15769_vm5, %v15768_v13 }
 0x998   : > { %14913 = vmatprep.subr.bf16.mxu0 %v15768_v13 }
 0x999   : > { %14926 = vmatpush3.bf16.msra.mxu1 %v15696_v29 }
 0x99a   : > { %14927 = vmatprep.subr.bf16.mxu1 %v15768_v13 }
 0x99b   : > { %14914 = vmatpush3.bf16.msra.mxu0 %v15697_v54 }
 0x99c   : > { %14915 = vmatprep.subr.bf16.mxu0 %v15768_v13 }
 0x99d   : > { %14928 = vmatpush3.bf16.msra.mxu1 %v15698_v44 }
 0x99e   : > { %14929 = vmatprep.subr.bf16.mxu1 %v15768_v13 }
 0x99f   : > { %14916 = vmatpush3.bf16.msra.mxu0 %v15699_v43 }
 0x9a0   : > { %14917 = vmatprep.subr.bf16.mxu0 %v15768_v13 }
 0x9a1   : > { %14930 = vmatpush3.bf16.msra.mxu1 %v15700_v32 }
 0x9a2   : > { %14947 = vmatprep.subr.bf16.mxu1 %v15768_v13 }
 0x9a3   : > { %14918 = vmatpush3.bf16.msra.mxu0 %v15701_v24 }
 0x9a4   : > { %14932 = vmatmul.mubr.msk.bf16.vlgmr.msra.gmra.mrb[220].mxu1 %vm11145_vm9, %v11756_v59  ;;  %14935 = vmatprep.subr.bf16.mxu0 %v15768_v13 }
 0x9a5   : > { %14948 = vmatpush3.bf16.msra.mxu1 %v15702_v2  ;;  %14955 = vmatprep.mubr.msk.bf16.mxu1 %vm15769_vm5, %v15768_v13 }
 0x9a6   : > { %14920 = vmatmul.mubr.msk.bf16.vlgmr.msra.gmra.mrb[96].mxu0 %vm11145_vm9, %v11678_v5  ;;  %14949 = vmatprep.subr.bf16.mxu1 %v15768_v13 }
 0x9a7   : > { %14936 = vmatpush3.bf16.msra.mxu0 %v15703_v4  ;;  %14943 = vmatprep.mubr.msk.bf16.mxu0 %vm15769_vm5, %v15768_v13 }
 0x9a8   : > { %14937 = vmatprep.subr.bf16.mxu0 %v15768_v13 }
 0x9a9   : > { %14950 = vmatpush3.bf16.msra.mxu1 %v15704_v1 }
 0x9aa   : > { %14951 = vmatprep.subr.bf16.mxu1 %v15768_v13 }
 0x9ab   : > { %14938 = vmatpush3.bf16.msra.mxu0 %v15705_v19 }
 0x9ac   : > { %14939 = vmatprep.subr.bf16.mxu0 %v15768_v13 }
 0x9ad   : > { %14952 = vmatpush3.bf16.msra.mxu1 %v15706_v33 }
 0x9ae   : > { %14953 = vmatprep.subr.bf16.mxu1 %v15768_v13 }
 0x9af   : > { %14940 = vmatpush3.bf16.msra.mxu0 %v15707_v49  ;;  %v12060_v49 = vld [vmem:[%s18958_s10] sm:$0x1] }
 0x9b0   : > { %14941 = vmatprep.subr.bf16.mxu0 %v15768_v13 }
 0x9b1   : > { %14954 = vmatpush3.bf16.msra.mxu1 %v15708_v47 }
 0x9b2   : > { %14971 = vmatprep.subr.bf16.mxu1 %v15768_v13 }
 0x9b3   : > { %14942 = vmatpush3.bf16.msra.mxu0 %v15709_v63 }
 0x9b4   : > { %14956 = vmatmul.mubr.msk.bf16.vlgmr.msra.gmra.mrb[224].mxu1 %vm11145_vm9, %v11912_v35  ;;  %14959 = vmatprep.subr.bf16.mxu0 %v15768_v13 }
 0x9b5   : > { %14987 = vmatprep.mubr.msk.bf16.mxu1 %vm15769_vm5, %v15768_v13  ;;  %14972 = vmatpush3.bf16.msra.mxu1 %v15714_v46 }
 0x9b6   : > { %14944 = vmatmul.mubr.msk.bf16.vlgmr.msra.gmra.mrb[100].mxu0 %vm11145_vm9, %v11834_v14  ;;  %14973 = vmatprep.subr.bf16.mxu1 %v15768_v13 }
 0x9b7   : > { %14960 = vmatpush3.bf16.msra.mxu0 %v15710_v8  ;;  %14967 = vmatprep.mubr.msk.bf16.mxu0 %vm15769_vm5, %v15768_v13  ;;  %vm12172_vm5 = vcmask 57344  }
 0x9b8   : > { %14961 = vmatprep.subr.bf16.mxu0 %v15768_v13 }
 0x9b9   : > { %14974 = vmatpush3.bf16.msra.mxu1 %v15715_v61 }
 0x9ba   : > { %14975 = vmatprep.subr.bf16.mxu1 %v15768_v13 }
 0x9bb   : > { %14962 = vmatpush3.bf16.msra.mxu0 %v15711_v31  ;;  %v12080_v31 = vld [vmem:[%s18960_s12] sm:$0x1] }
 0x9bc   : > { %14963 = vmatprep.subr.bf16.mxu0 %v15768_v13 }
 0x9bd   : > { %14976 = vmatpush3.bf16.msra.mxu1 %v15716_v6  ;;  %v12176_v6 = vld [vmem:[#allocation8] sm:$0x1] }
 0x9be   : > { %14977 = vmatprep.subr.bf16.mxu1 %v15768_v13 }
 0x9bf   : > { %14964 = vmatpush3.bf16.msra.mxu0 %v15712_v62 }
 0x9c0   : > { %14965 = vmatprep.subr.bf16.mxu0 %v15768_v13 }
 0x9c1   : > { %14978 = vmatpush3.bf16.msra.mxu1 %v15717_v51 }
 0x9c2   : > { %14979 = vmatprep.subr.bf16.mxu1 %v15768_v13 }
 0x9c3   : > { %14966 = vmatpush3.bf16.msra.mxu0 %v15713_v41  ;;  %v12170_v41 = vld [vmem:[%s18961_s13] sm:$0x1] }
 0x9c5   : > { %14980 = vmatpush3.bf16.msra.mxu1 %v15718_v23 }
 0x9c6   : > { %14968 = vmatmul.mubr.msk.bf16.vlgmr.msra.gmra.mrb[104].mxu0 %vm11145_vm9, %v11981_v38  ;;  %14981 = vmatprep.subr.bf16.mxu1 %v15768_v13 }
 0x9c9   : > { %14982 = vmatpush3.bf16.msra.mxu1 %v15719_v34 }
 0x9ca   : > { %14983 = vmatprep.subr.bf16.mxu1 %v15768_v13 }
 0x9cd   : > { %14984 = vmatpush3.bf16.msra.mxu1 %v15720_v30 }
 0x9ce   : > { %14985 = vmatprep.subr.bf16.mxu1 %v15768_v13 }
 0x9d1   : > { %14986 = vmatpush3.bf16.msra.mxu1 %v15721_v0 }
 0xa57   : > { %v11517_v22 = vpop.f32.mrb[212].mxu1 }
 0xa58   : > { %v14885_v12 = vpop.f32.mrb[213].mxu1 }
 0xa59   : > { %v11450_v57 = vpop.f32.mrb[88].mxu0  ;;  %v11520_v52 = vpop.f32.mrb[214].mxu1 }
 0xa5a   : > { %v11518_v3 = vadd.f32 %v11517_v22, %v11450_v57  ;;  %v14873_v17 = vpop.f32.mrb[89].mxu0  ;;  %v14886_v53 = vpop.f32.mrb[215].mxu1 }
 0xa5b   : > { %v11453_v20 = vpop.f32.mrb[90].mxu0 }
 0xa5c   : > { %v14874_v25 = vpop.f32.mrb[91].mxu0 }
 0xa67   : > { %v11663_v45 = vpop.f32.mrb[216].mxu1 }
 0xa68   : > { %v14909_v7 = vpop.f32.mrb[217].mxu1 }
 0xa69   : > { %v11596_v9 = vpop.f32.mrb[92].mxu0  ;;  %v11666_v36 = vpop.f32.mrb[218].mxu1 }
 0xa6a   : > { %v11664_v55 = vadd.f32 %v11663_v45, %v11596_v9  ;;  %v14897_v39 = vpop.f32.mrb[93].mxu0  ;;  %v14910_v58 = vpop.f32.mrb[219].mxu1 }
 0xa6b   : > { %v11599_v16 = vpop.f32.mrb[94].mxu0 }
 0xa6c   : > { %v14898_v60 = vpop.f32.mrb[95].mxu0 }
 0xa77   : > { %v11818_v13 = vpop.f32.mrb[220].mxu1 }
 0xa78   : > { %v11824_v26 = vadd.f32 %v11818_v13, %v11664_v55  ;;  %v14933_v50 = vpop.f32.mrb[221].mxu1 }
 0xa79   : > { %v11740_v27 = vpop.f32.mrb[96].mxu0  ;;  %v11821_v48 = vpop.f32.mrb[222].mxu1 }
 0xa7a   : > { %v11746_v56 = vadd.f32 %v11740_v27, %v11518_v3  ;;  %v14921_v37 = vpop.f32.mrb[97].mxu0  ;;  %v14934_v29 = vpop.f32.mrb[223].mxu1 }
 0xa7b   : > { %v11743_v40 = vpop.f32.mrb[98].mxu0 }
 0xa7c   : > { %v14922_v54 = vpop.f32.mrb[99].mxu0 }
 0xa87   : > { %v11974_v44 = vpop.f32.mrb[224].mxu1 }
 0xa88   : > { %v11980_v43 = vadd.f32 %v11974_v44, %v11824_v26  ;;  %v14957_v32 = vpop.f32.mrb[225].mxu1 }
 0xa89   : > { %v11896_v24 = vpop.f32.mrb[100].mxu0  ;;  %v11977_v2 = vpop.f32.mrb[226].mxu1 }
 0xa8a   : > { %v11902_v59 = vadd.f32 %v11896_v24, %v11746_v56  ;;  %v14945_v4 = vpop.f32.mrb[101].mxu0  ;;  %v14958_v10 = vpop.f32.mrb[227].mxu1 }
 0xa8b   : > { %v11899_v5 = vpop.f32.mrb[102].mxu0 }
 0xa8c   : > { %v14946_v1 = vpop.f32.mrb[103].mxu0 }
 0xa99   : > { %v12052_v21 = vpop.f32.mrb[104].mxu0 }
 0xa9a   : > { %v12058_v19 = vadd.f32 %v12052_v21, %v11902_v59  ;;  %v14969_v33 = vpop.f32.mrb[105].mxu0 }
 0xa9b   : > { %v12055_v47 = vpop.f32.mrb[106].mxu0 }
 0xa9c   : > { %v12059_v63 = vadd.f32 %v12058_v19, %v11980_v43  ;;  %v14970_v35 = vpop.f32.mrb[107].mxu0 }
 0xa9e   : > { %v12061_v8 = vadd.f32 %v12060_v49, %v12059_v63 }
 0xaa0   : > { %v12062_v14 = vmax.f32 %v12061_v8, 0.0 }
 0xaa2   : > { %v12063_v15 = vpack.c.bf16 %v12062_v14, %v12062_v14 }
 0xaa4   : > { %14988 = vmatmul.mubr.bf16.vlgmr.msra.gmra.mrb[228].mxu1 %v12063_v15 }
 0xb77   : > { %v12163_v28 = vpop.f32.mrb[228].mxu1 }
 0xb78   : > { %v12164_v62 = vadd.f32 %v12163_v28, %v12080_v31  ;;  %v14989_v42 = vpop.f32.mrb[229].mxu1 }
 0xb79   : > { %v12166_v11 = vpop.f32.mrb[230].mxu1 }
 0xb7a   : > { %v12169_v18 = vmax.f32 %v12164_v62, 0.0  ;;  %v14990_v38 = vpop.f32.mrb[231].mxu1 }
 0xb7c   : > { %v12171_v46 = vmul.f32 %v12170_v41, %v12169_v18 }
 0xb7e   : > { %v12173_v61 = vsel %vm12172_vm5, %v12171_v46, 0.0 }
 0xb7f   : > { %12174 = vadd.xlane.f32.xlu0 %v12173_v61 }
 0xc0c   : > { %v12175_v51 = vpop.xlane.xlu0 %12174 }
 0xc0d   : > { %v12177_v23 = vadd.f32 %v12176_v6, %v12175_v51 }
 0xc0f   : > { %v12881_v34 = vmul.f32 -1.442695, %v12177_v23 }
 0xc11   : > { %15746 = vpow2.f32 %v12881_v34 }
 0xc1b   : > { %v15747_v30 = vpop.eup %15746 }
 0xc1c   : > { %v12181_v0 = vadd.f32 1.0, %v15747_v30 }
 0xc1e   : > { %15748 = vrcp.f32 %v12181_v0 }
 0xc28   : > { %v15749_v22 = vpop.eup %15748 }
 0xc29   : > { %15634 = vpush %v15749_v22 }
 0xc5a   : > { %s15635_s28 = spop %15634 }
 0xc5b   : > { %v12186_v12 = vstv %s15635_s28 }
 0xc5c   : > { %12188 = vst [vmem:[%s494_s27] sm:$0xff] %v12186_v12 }
 0xc5d PF: > { %s27_s20 = sadd.s32 1, %s15765_s20  }
 0xc5e   : > { %p24_p4 = scmp.ge.s32.totalorder %s27_s20, 4  }
 0xc60   :  { %26 = sbr.rel (!%p24_p4) target bundleno = 3 (0x3), region = 247 }

</bundles_post_ra>
